<compile_context>
chip_gen: v6e
topology: v6e:2x2x1
jax: 0.10.0
libtpu: 0.0.40
codegen_flags: <defaults>
</compile_context>

<pallas_src>
import functools

import numpy as np
import jax
import jax.numpy as jnp
from jax import lax
from jax.experimental import pallas as pl
from jax.experimental.pallas import tpu as pltpu


# 1-D binomial factor of the 5x5 gaussian: G/256 = g (outer) g, g=[1,4,6,4,1]/16.
_G1D = np.array([1.0, 4.0, 6.0, 4.0, 1.0], dtype=np.float64) / 16.0
_G2D = np.outer(_G1D, _G1D)  # == gauss_kernel() of the PyTorch code (exactly)


# ---------------------------------------------------------------------------
# Compile-time construction of per-level 1-D operator (banded) matrices.
# Every entry is a small multiple of 1/16 (down) or 1/8 (up) -> exact in f32.
# ---------------------------------------------------------------------------
def _reflect_pad_mat(n):
    """(n+4, n) selector implementing F.pad(..., (2,2), mode='reflect')."""
    assert n >= 3, "reflect pad of 2 requires length >= 3 (same as PyTorch)"
    P = np.zeros((n + 4, n), dtype=np.float64)
    src = [2, 1] + list(range(n)) + [n - 2, n - 3]
    for i, j in enumerate(src):
        P[i, j] = 1.0
    return P


def _conv5_mat(n_out, taps):
    """(n_out, n_out+4): 'valid' 5-tap correlation with `taps`."""
    C = np.zeros((n_out, n_out + 4), dtype=np.float64)
    for o in range(n_out):
        C[o, o:o + 5] = taps
    return C


def _decimate_mat(n):
    """(ceil(n/2), n): x -> x[::2]."""
    m = (n + 1) // 2
    S = np.zeros((m, n), dtype=np.float64)
    for j in range(m):
        S[j, 2 * j] = 1.0
    return S


def _zero_stuff_mat(m):
    """(2m, m): x -> zero-stuffed x (data at even positions)."""
    Z = np.zeros((2 * m, m), dtype=np.float64)
    for i in range(m):
        Z[2 * i, i] = 1.0
    return Z


def _down_mat(n):
    """(ceil(n/2), n): x -> decimate(conv5_g(reflect_pad2(x)))  [one axis]."""
    return _decimate_mat(n) @ _conv5_mat(n, _G1D) @ _reflect_pad_mat(n)


def _up_mat(m, n_out):
    """(n_out, m): x -> crop(conv5_{2g}(reflect_pad2(zero_stuff(x))))."""
    U = _conv5_mat(2 * m, 2.0 * _G1D) @ _reflect_pad_mat(2 * m) @ _zero_stuff_mat(m)
    return U[:n_out, :]


def _block_diag(M, C):
    """Block-diagonal repetition of M over C channels."""
    r, c = M.shape
    out = np.zeros((C * r, C * c), dtype=np.float64)
    for i in range(C):
        out[i * r:(i + 1) * r, i * c:(i + 1) * c] = M
    return out


def _round_up(x, m):
    return ((x + m - 1) // m) * m


# ---------------------------------------------------------------------------
# The fused kernel: whole 5-level Laplacian pyramid + L1, for one batch elem.
# ---------------------------------------------------------------------------
def _laploss_kernel(x_ref, t_ref, mats_ref, out_ref, *, levels, inv_counts,
                    mat_offs):
    """x_ref/t_ref : (1, H, C*W) blocks (channels packed along lanes)
    mats_ref      : packed per-level operator matrices (single constant input)
    out_ref       : (1, 1, 1) per-batch partial loss block
    """
    dot = functools.partial(jnp.dot, precision=lax.Precision.HIGHEST,
                            preferred_element_type=jnp.float32)

    def mat(i):
        r, nr, nc = mat_offs[i]           # static slice, loaded at point of use
        return mats_ref[r:r + nr, 0:nc]

    # Linearity: only the difference image is ever needed.  Cast in-kernel.
    cur = x_ref[0].astype(jnp.float32) - t_ref[0].astype(jnp.float32)  # (H, C*W)

    total = jnp.zeros((1, 1), jnp.float32)
    for lvl in range(levels):
        LD = mat(4 * lvl + 0)             # (hd, h)
        RDb = mat(4 * lvl + 1)            # (C*w, C*wd)  block-diag over channels
        LU = mat(4 * lvl + 2)             # (h, hd)
        RUb = mat(4 * lvl + 3)            # (C*wd, C*w)  block-diag over channels
        # gauss filter + stride-2 decimation for ALL channels (rows then cols)
        down = dot(dot(LD, cur), RDb)     # (hd, C*wd)
        # zero-stuff + reflect-pad + 4*gauss conv + crop (polyphase form);
        # right operator first so both dots run at the wide C*w lane count.
        up = dot(LU, dot(down, RUb))      # (h, C*w)
        diff = cur - up                   # laplacian level of (input - target)
        total = total + jnp.sum(jnp.abs(diff)) * inv_counts[lvl]
        cur = down

    out_ref[0] = total


# ---------------------------------------------------------------------------
# Module wrapper
# ---------------------------------------------------------------------------
class LapLoss:
    """Pallas-TPU port of the PyTorch LapLoss module (forward pass only)."""

    def __init__(self, max_levels=5, channels=1):
        self.max_levels = max_levels
        self.channels = channels

    def __call__(self, input, target):
        assert input.shape == target.shape
        B, C, H, W = input.shape
        assert C == self.channels

        # Per-level banded operators (exact binary fractions); width operators
        # are block-diagonal over channels for the lane-packed layout.
        entries, inv_counts = [], []
        h, w = H, W
        for _ in range(self.max_levels):
            hd, wd = (h + 1) // 2, (w + 1) // 2
            entries.append(_down_mat(h))                      # LD  (hd, h)
            entries.append(_block_diag(_down_mat(w).T, C))    # RDb (C*w, C*wd)
            entries.append(_up_mat(hd, h))                    # LU  (h, hd)
            entries.append(_block_diag(_up_mat(wd, w).T, C))  # RUb (C*wd, C*w)
            inv_counts.append(1.0 / float(B * C * h * w))     # folded mean
            h, w = hd, wd

        # Pack ALL operators into one lane-aligned constant array (1 BlockSpec
        # instead of 20); record static (row, nrows, ncols) offsets.
        cols = _round_up(max(e.shape[1] for e in entries), 128)
        rows = sum(_round_up(e.shape[0], 8) for e in entries)
        packed = np.zeros((_round_up(rows, 8), cols), dtype=np.float32)
        mat_offs, r = [], 0
        for e in entries:
            packed[r:r + e.shape[0], :e.shape[1]] = e
            mat_offs.append((r, e.shape[0], e.shape[1]))
            r += _round_up(e.shape[0], 8)
        packed = jnp.asarray(packed)

        # Layout plumbing only (native dtype, no upcast): NCHW -> (B, H, C*W)
        # so the kernel's dots are lane-dense (C*W lanes at level 0).
        xp = jnp.reshape(jnp.swapaxes(input, 1, 2), (B, H, C * W))
        tp = jnp.reshape(jnp.swapaxes(target, 1, 2), (B, H, C * W))

        kern = functools.partial(_laploss_kernel, levels=self.max_levels,
                                 inv_counts=tuple(inv_counts),
                                 mat_offs=tuple(mat_offs))

        img_spec = pl.BlockSpec((1, H, C * W), lambda n: (n, 0, 0))
        mat_spec = pl.BlockSpec(packed.shape, lambda n: (0, 0))
        partial_losses = pl.pallas_call(
            kern,
            out_shape=jax.ShapeDtypeStruct((B, 1, 1), jnp.float32),
            grid=(B,),
            in_specs=[img_spec, img_spec, mat_spec],
            out_specs=pl.BlockSpec((1, 1, 1), lambda n: (n, 0, 0)),
            # Per-batch output blocks are independent -> batch axis can be
            # sharded across v7x's two TensorCores.
            compiler_params=pltpu.CompilerParams(
                dimension_semantics=("parallel",)),
        )(xp, tp, packed)
        return jnp.sum(partial_losses)


# ---------------------------------------------------------------------------
# Pure-JAX reference (mirrors the PyTorch code exactly; self-check only)
# ---------------------------------------------------------------------------
def _ref_conv_gauss(img, scale):
    C = img.shape[1]
    pad = jnp.pad(img, ((0, 0), (0, 0), (2, 2), (2, 2)), mode="reflect")
    k = jnp.asarray(_G2D, jnp.float32) * scale
    kern = jnp.tile(k[None, None], (C, 1, 1, 1))  # (C,1,5,5) OIHW, depthwise
    return jax.lax.conv_general_dilated(
        pad, kern, window_strides=(1, 1), padding="VALID",
        feature_group_count=C, dimension_numbers=("NCHW", "OIHW", "NCHW"),
        precision=lax.Precision.HIGHEST)


def _zero_stuff(x):
    N, C, h, w = x.shape
    z = jnp.zeros_like(x)
    r = jnp.stack([x, z], axis=-1).reshape(N, C, h, 2 * w)
    rz = jnp.zeros_like(r)
    return jnp.stack([r, rz], axis=3).reshape(N, C, 2 * h, 2 * w)


def _ref_laploss(inp, tgt, max_levels):
    def pyramid(img):
        cur, pyr = img, []
        for _ in range(max_levels):
            filt = _ref_conv_gauss(cur, 1.0)
            down = filt[:, :, ::2, ::2]
            up = _ref_conv_gauss(_zero_stuff(down), 4.0)
            hc = min(cur.shape[2], up.shape[2])
            wc = min(cur.shape[3], up.shape[3])
            pyr.append(cur[:, :, :hc, :wc] - up[:, :, :hc, :wc])
            cur = down
        return pyr
    pa, pb = pyramid(inp), pyramid(tgt)
    return sum(jnp.mean(jnp.abs(a - b)) for a, b in zip(pa, pb))


if __name__ == "__main__":
    key = jax.random.PRNGKey(0)
    k1, k2 = jax.random.split(key)
    # 5 pyramid levels need >= 3 px at the deepest level -> use 64x64 spatial.
    B, C, H, W = 2, 4, 64, 64
    inp = jax.random.normal(k1, (B, C, H, W), jnp.float32)
    tgt = jax.random.normal(k2, (B, C, H, W), jnp.float32)

    loss_fn = LapLoss(max_levels=5, channels=C)
    out = jax.block_until_ready(loss_fn(inp, tgt))

    ref = jax.block_until_ready(_ref_laploss(inp, tgt, 5))
    o, r = float(out), float(ref)
    if not (abs(o - r) <= 1e-3 * max(1.0, abs(r))):
        raise AssertionError(f"mismatch: pallas={o} ref={r}")
    print("KERNEL_OK")
</pallas_src>

<mosaic_0001>
module attributes {stable_mosaic.version = 11 : i64} {
  func.func @_laploss_kernel(%arg0: i32, %arg1: memref<1x64x256xf32, #tpu.memory_space<vmem>>, %arg2: memref<1x64x256xf32, #tpu.memory_space<vmem>>, %arg3: memref<944x256xf32, #tpu.memory_space<vmem>>, %arg4: memref<1x1x1xf32, #tpu.memory_space<vmem>>) attributes {dimension_semantics = [#tpu.dimension_semantics<parallel>], iteration_bounds = array<i64: 2>, scalar_prefetch = 0 : i64, scratch_operands = 0 : i64, tpu.core_type = #tpu.core_type<tc>, window_params = [{transform_indices = @transform_0, window_bounds = array<i64: 1, 64, 256>}, {transform_indices = @transform_1, window_bounds = array<i64: 1, 64, 256>}, {pipeline_mode = #tpu.pipeline_mode<synchronous>, transform_indices = @transform_2, window_bounds = array<i64: 944, 256>}, {transform_indices = @transform_3, window_bounds = array<i64: 1, 1, 1>}]} {
    %c0 = arith.constant 0 : index
    %c0_0 = arith.constant 0 : index
    %c0_1 = arith.constant 0 : index
    %0 = vector.load %arg1[%c0, %c0_0, %c0_1] : memref<1x64x256xf32, #tpu.memory_space<vmem>>, vector<1x64x256xf32>
    %1 = vector.shape_cast %0 : vector<1x64x256xf32> to vector<64x256xf32>
    %c0_2 = arith.constant 0 : index
    %c0_3 = arith.constant 0 : index
    %c0_4 = arith.constant 0 : index
    %2 = vector.load %arg2[%c0_2, %c0_3, %c0_4] : memref<1x64x256xf32, #tpu.memory_space<vmem>>, vector<1x64x256xf32>
    %3 = vector.shape_cast %2 : vector<1x64x256xf32> to vector<64x256xf32>
    %4 = arith.subf %1, %3 : vector<64x256xf32>
    %cst = arith.constant 0.000000e+00 : f32
    %5 = vector.broadcast %cst : f32 to vector<1x1xf32>
    %c0_5 = arith.constant 0 : index
    %c0_6 = arith.constant 0 : index
    %6 = vector.load %arg3[%c0_5, %c0_6] : memref<944x256xf32, #tpu.memory_space<vmem>>, vector<32x64xf32>
    %c32 = arith.constant 32 : index
    %c0_7 = arith.constant 0 : index
    %7 = vector.load %arg3[%c32, %c0_7] : memref<944x256xf32, #tpu.memory_space<vmem>>, vector<256x128xf32>
    %c288 = arith.constant 288 : index
    %c0_8 = arith.constant 0 : index
    %8 = vector.load %arg3[%c288, %c0_8] : memref<944x256xf32, #tpu.memory_space<vmem>>, vector<64x32xf32>
    %c352 = arith.constant 352 : index
    %c0_9 = arith.constant 0 : index
    %9 = vector.load %arg3[%c352, %c0_9] : memref<944x256xf32, #tpu.memory_space<vmem>>, vector<128x256xf32>
    %cst_10 = arith.constant dense<0.000000e+00> : vector<32x256xf32>
    %10 = tpu.matmul %6, %4, %cst_10 {dimension_numbers = #tpu.dot_dimension_numbers<[1], [0], [0], [1], [0, 0, 1, 1], [], []>, precision = #tpu.contract_precision<fp32>} : vector<32x64xf32>, vector<64x256xf32>, vector<32x256xf32> -> vector<32x256xf32>
    %cst_11 = arith.constant dense<0.000000e+00> : vector<32x128xf32>
    %11 = tpu.matmul %10, %7, %cst_11 {dimension_numbers = #tpu.dot_dimension_numbers<[1], [0], [0], [1], [0, 0, 1, 1], [], []>, precision = #tpu.contract_precision<fp32>} : vector<32x256xf32>, vector<256x128xf32>, vector<32x128xf32> -> vector<32x128xf32>
    %cst_12 = arith.constant dense<0.000000e+00> : vector<32x256xf32>
    %12 = tpu.matmul %11, %9, %cst_12 {dimension_numbers = #tpu.dot_dimension_numbers<[1], [0], [0], [1], [0, 0, 1, 1], [], []>, precision = #tpu.contract_precision<fp32>} : vector<32x128xf32>, vector<128x256xf32>, vector<32x256xf32> -> vector<32x256xf32>
    %cst_13 = arith.constant dense<0.000000e+00> : vector<64x256xf32>
    %13 = tpu.matmul %8, %12, %cst_13 {dimension_numbers = #tpu.dot_dimension_numbers<[1], [0], [0], [1], [0, 0, 1, 1], [], []>, precision = #tpu.contract_precision<fp32>} : vector<64x32xf32>, vector<32x256xf32>, vector<64x256xf32> -> vector<64x256xf32>
    %14 = arith.subf %4, %13 : vector<64x256xf32>
    %15 = math.absf %14 : vector<64x256xf32>
    %16 = vector.shape_cast %15 : vector<64x256xf32> to vector<1x64x256xf32>
    %cst_14 = arith.constant dense<0.000000e+00> : vector<1xf32>
    %17 = vector.multi_reduction <add>, %16, %cst_14 [1, 2] : vector<1x64x256xf32> to vector<1xf32>
    %18 = vector.shape_cast %17 : vector<1xf32> to vector<1x1x1xf32>
    %19 = vector.extract %18[0, 0, 0] : f32 from vector<1x1x1xf32>
    %cst_15 = arith.constant 3.05175781E-5 : f32
    %20 = arith.mulf %19, %cst_15 : f32
    %21 = vector.broadcast %20 : f32 to vector<1x1xf32>
    %22 = arith.addf %5, %21 : vector<1x1xf32>
    %c480 = arith.constant 480 : index
    %c0_16 = arith.constant 0 : index
    %23 = vector.load %arg3[%c480, %c0_16] : memref<944x256xf32, #tpu.memory_space<vmem>>, vector<16x32xf32>
    %c496 = arith.constant 496 : index
    %c0_17 = arith.constant 0 : index
    %24 = vector.load %arg3[%c496, %c0_17] : memref<944x256xf32, #tpu.memory_space<vmem>>, vector<128x64xf32>
    %c624 = arith.constant 624 : index
    %c0_18 = arith.constant 0 : index
    %25 = vector.load %arg3[%c624, %c0_18] : memref<944x256xf32, #tpu.memory_space<vmem>>, vector<32x16xf32>
    %c656 = arith.constant 656 : index
    %c0_19 = arith.constant 0 : index
    %26 = vector.load %arg3[%c656, %c0_19] : memref<944x256xf32, #tpu.memory_space<vmem>>, vector<64x128xf32>
    %cst_20 = arith.constant dense<0.000000e+00> : vector<16x128xf32>
    %27 = tpu.matmul %23, %11, %cst_20 {dimension_numbers = #tpu.dot_dimension_numbers<[1], [0], [0], [1], [0, 0, 1, 1], [], []>, precision = #tpu.contract_precision<fp32>} : vector<16x32xf32>, vector<32x128xf32>, vector<16x128xf32> -> vector<16x128xf32>
    %cst_21 = arith.constant dense<0.000000e+00> : vector<16x64xf32>
    %28 = tpu.matmul %27, %24, %cst_21 {dimension_numbers = #tpu.dot_dimension_numbers<[1], [0], [0], [1], [0, 0, 1, 1], [], []>, precision = #tpu.contract_precision<fp32>} : vector<16x128xf32>, vector<128x64xf32>, vector<16x64xf32> -> vector<16x64xf32>
    %cst_22 = arith.constant dense<0.000000e+00> : vector<16x128xf32>
    %29 = tpu.matmul %28, %26, %cst_22 {dimension_numbers = #tpu.dot_dimension_numbers<[1], [0], [0], [1], [0, 0, 1, 1], [], []>, precision = #tpu.contract_precision<fp32>} : vector<16x64xf32>, vector<64x128xf32>, vector<16x128xf32> -> vector<16x128xf32>
    %cst_23 = arith.constant dense<0.000000e+00> : vector<32x128xf32>
    %30 = tpu.matmul %25, %29, %cst_23 {dimension_numbers = #tpu.dot_dimension_numbers<[1], [0], [0], [1], [0, 0, 1, 1], [], []>, precision = #tpu.contract_precision<fp32>} : vector<32x16xf32>, vector<16x128xf32>, vector<32x128xf32> -> vector<32x128xf32>
    %31 = arith.subf %11, %30 : vector<32x128xf32>
    %32 = math.absf %31 : vector<32x128xf32>
    %33 = vector.shape_cast %32 : vector<32x128xf32> to vector<1x32x128xf32>
    %cst_24 = arith.constant dense<0.000000e+00> : vector<1xf32>
    %34 = vector.multi_reduction <add>, %33, %cst_24 [1, 2] : vector<1x32x128xf32> to vector<1xf32>
    %35 = vector.shape_cast %34 : vector<1xf32> to vector<1x1x1xf32>
    %36 = vector.extract %35[0, 0, 0] : f32 from vector<1x1x1xf32>
    %cst_25 = arith.constant 1.22070313E-4 : f32
    %37 = arith.mulf %36, %cst_25 : f32
    %38 = vector.broadcast %37 : f32 to vector<1x1xf32>
    %39 = arith.addf %22, %38 : vector<1x1xf32>
    %c720 = arith.constant 720 : index
    %c0_26 = arith.constant 0 : index
    %40 = vector.load %arg3[%c720, %c0_26] : memref<944x256xf32, #tpu.memory_space<vmem>>, vector<8x16xf32>
    %c728 = arith.constant 728 : index
    %c0_27 = arith.constant 0 : index
    %41 = vector.load %arg3[%c728, %c0_27] : memref<944x256xf32, #tpu.memory_space<vmem>>, vector<64x32xf32>
    %c792 = arith.constant 792 : index
    %c0_28 = arith.constant 0 : index
    %42 = vector.load %arg3[%c792, %c0_28] : memref<944x256xf32, #tpu.memory_space<vmem>>, vector<16x8xf32>
    %c808 = arith.constant 808 : index
    %c0_29 = arith.constant 0 : index
    %43 = vector.load %arg3[%c808, %c0_29] : memref<944x256xf32, #tpu.memory_space<vmem>>, vector<32x64xf32>
    %cst_30 = arith.constant dense<0.000000e+00> : vector<8x64xf32>
    %44 = tpu.matmul %40, %28, %cst_30 {dimension_numbers = #tpu.dot_dimension_numbers<[1], [0], [0], [1], [0, 0, 1, 1], [], []>, precision = #tpu.contract_precision<fp32>} : vector<8x16xf32>, vector<16x64xf32>, vector<8x64xf32> -> vector<8x64xf32>
    %cst_31 = arith.constant dense<0.000000e+00> : vector<8x32xf32>
    %45 = tpu.matmul %44, %41, %cst_31 {dimension_numbers = #tpu.dot_dimension_numbers<[1], [0], [0], [1], [0, 0, 1, 1], [], []>, precision = #tpu.contract_precision<fp32>} : vector<8x64xf32>, vector<64x32xf32>, vector<8x32xf32> -> vector<8x32xf32>
    %cst_32 = arith.constant dense<0.000000e+00> : vector<8x64xf32>
    %46 = tpu.matmul %45, %43, %cst_32 {dimension_numbers = #tpu.dot_dimension_numbers<[1], [0], [0], [1], [0, 0, 1, 1], [], []>, precision = #tpu.contract_precision<fp32>} : vector<8x32xf32>, vector<32x64xf32>, vector<8x64xf32> -> vector<8x64xf32>
    %cst_33 = arith.constant dense<0.000000e+00> : vector<16x64xf32>
    %47 = tpu.matmul %42, %46, %cst_33 {dimension_numbers = #tpu.dot_dimension_numbers<[1], [0], [0], [1], [0, 0, 1, 1], [], []>, precision = #tpu.contract_precision<fp32>} : vector<16x8xf32>, vector<8x64xf32>, vector<16x64xf32> -> vector<16x64xf32>
    %48 = arith.subf %28, %47 : vector<16x64xf32>
    %49 = math.absf %48 : vector<16x64xf32>
    %50 = vector.shape_cast %49 : vector<16x64xf32> to vector<1x16x64xf32>
    %cst_34 = arith.constant dense<0.000000e+00> : vector<1xf32>
    %51 = vector.multi_reduction <add>, %50, %cst_34 [1, 2] : vector<1x16x64xf32> to vector<1xf32>
    %52 = vector.shape_cast %51 : vector<1xf32> to vector<1x1x1xf32>
    %53 = vector.extract %52[0, 0, 0] : f32 from vector<1x1x1xf32>
    %cst_35 = arith.constant 4.8828125E-4 : f32
    %54 = arith.mulf %53, %cst_35 : f32
    %55 = vector.broadcast %54 : f32 to vector<1x1xf32>
    %56 = arith.addf %39, %55 : vector<1x1xf32>
    %c840 = arith.constant 840 : index
    %c0_36 = arith.constant 0 : index
    %57 = vector.load %arg3[%c840, %c0_36] : memref<944x256xf32, #tpu.memory_space<vmem>>, vector<4x8xf32>
    %c848 = arith.constant 848 : index
    %c0_37 = arith.constant 0 : index
    %58 = vector.load %arg3[%c848, %c0_37] : memref<944x256xf32, #tpu.memory_space<vmem>>, vector<32x16xf32>
    %c880 = arith.constant 880 : index
    %c0_38 = arith.constant 0 : index
    %59 = vector.load %arg3[%c880, %c0_38] : memref<944x256xf32, #tpu.memory_space<vmem>>, vector<8x4xf32>
    %c888 = arith.constant 888 : index
    %c0_39 = arith.constant 0 : index
    %60 = vector.load %arg3[%c888, %c0_39] : memref<944x256xf32, #tpu.memory_space<vmem>>, vector<16x32xf32>
    %cst_40 = arith.constant dense<0.000000e+00> : vector<4x32xf32>
    %61 = tpu.matmul %57, %45, %cst_40 {dimension_numbers = #tpu.dot_dimension_numbers<[1], [0], [0], [1], [0, 0, 1, 1], [], []>, precision = #tpu.contract_precision<fp32>} : vector<4x8xf32>, vector<8x32xf32>, vector<4x32xf32> -> vector<4x32xf32>
    %cst_41 = arith.constant dense<0.000000e+00> : vector<4x16xf32>
    %62 = tpu.matmul %61, %58, %cst_41 {dimension_numbers = #tpu.dot_dimension_numbers<[1], [0], [0], [1], [0, 0, 1, 1], [], []>, precision = #tpu.contract_precision<fp32>} : vector<4x32xf32>, vector<32x16xf32>, vector<4x16xf32> -> vector<4x16xf32>
    %cst_42 = arith.constant dense<0.000000e+00> : vector<4x32xf32>
    %63 = tpu.matmul %62, %60, %cst_42 {dimension_numbers = #tpu.dot_dimension_numbers<[1], [0], [0], [1], [0, 0, 1, 1], [], []>, precision = #tpu.contract_precision<fp32>} : vector<4x16xf32>, vector<16x32xf32>, vector<4x32xf32> -> vector<4x32xf32>
    %cst_43 = arith.constant dense<0.000000e+00> : vector<8x32xf32>
    %64 = tpu.matmul %59, %63, %cst_43 {dimension_numbers = #tpu.dot_dimension_numbers<[1], [0], [0], [1], [0, 0, 1, 1], [], []>, precision = #tpu.contract_precision<fp32>} : vector<8x4xf32>, vector<4x32xf32>, vector<8x32xf32> -> vector<8x32xf32>
    %65 = arith.subf %45, %64 : vector<8x32xf32>
    %66 = math.absf %65 : vector<8x32xf32>
    %67 = vector.shape_cast %66 : vector<8x32xf32> to vector<1x8x32xf32>
    %cst_44 = arith.constant dense<0.000000e+00> : vector<1xf32>
    %68 = vector.multi_reduction <add>, %67, %cst_44 [1, 2] : vector<1x8x32xf32> to vector<1xf32>
    %69 = vector.shape_cast %68 : vector<1xf32> to vector<1x1x1xf32>
    %70 = vector.extract %69[0, 0, 0] : f32 from vector<1x1x1xf32>
    %cst_45 = arith.constant 0.001953125 : f32
    %71 = arith.mulf %70, %cst_45 : f32
    %72 = vector.broadcast %71 : f32 to vector<1x1xf32>
    %73 = arith.addf %56, %72 : vector<1x1xf32>
    %c904 = arith.constant 904 : index
    %c0_46 = arith.constant 0 : index
    %74 = vector.load %arg3[%c904, %c0_46] : memref<944x256xf32, #tpu.memory_space<vmem>>, vector<2x4xf32>
    %c912 = arith.constant 912 : index
    %c0_47 = arith.constant 0 : index
    %75 = vector.load %arg3[%c912, %c0_47] : memref<944x256xf32, #tpu.memory_space<vmem>>, vector<16x8xf32>
    %c928 = arith.constant 928 : index
    %c0_48 = arith.constant 0 : index
    %76 = vector.load %arg3[%c928, %c0_48] : memref<944x256xf32, #tpu.memory_space<vmem>>, vector<4x2xf32>
    %c936 = arith.constant 936 : index
    %c0_49 = arith.constant 0 : index
    %77 = vector.load %arg3[%c936, %c0_49] : memref<944x256xf32, #tpu.memory_space<vmem>>, vector<8x16xf32>
    %cst_50 = arith.constant dense<0.000000e+00> : vector<2x16xf32>
    %78 = tpu.matmul %74, %62, %cst_50 {dimension_numbers = #tpu.dot_dimension_numbers<[1], [0], [0], [1], [0, 0, 1, 1], [], []>, precision = #tpu.contract_precision<fp32>} : vector<2x4xf32>, vector<4x16xf32>, vector<2x16xf32> -> vector<2x16xf32>
    %cst_51 = arith.constant dense<0.000000e+00> : vector<2x8xf32>
    %79 = tpu.matmul %78, %75, %cst_51 {dimension_numbers = #tpu.dot_dimension_numbers<[1], [0], [0], [1], [0, 0, 1, 1], [], []>, precision = #tpu.contract_precision<fp32>} : vector<2x16xf32>, vector<16x8xf32>, vector<2x8xf32> -> vector<2x8xf32>
    %cst_52 = arith.constant dense<0.000000e+00> : vector<2x16xf32>
    %80 = tpu.matmul %79, %77, %cst_52 {dimension_numbers = #tpu.dot_dimension_numbers<[1], [0], [0], [1], [0, 0, 1, 1], [], []>, precision = #tpu.contract_precision<fp32>} : vector<2x8xf32>, vector<8x16xf32>, vector<2x16xf32> -> vector<2x16xf32>
    %cst_53 = arith.constant dense<0.000000e+00> : vector<4x16xf32>
    %81 = tpu.matmul %76, %80, %cst_53 {dimension_numbers = #tpu.dot_dimension_numbers<[1], [0], [0], [1], [0, 0, 1, 1], [], []>, precision = #tpu.contract_precision<fp32>} : vector<4x2xf32>, vector<2x16xf32>, vector<4x16xf32> -> vector<4x16xf32>
    %82 = arith.subf %62, %81 : vector<4x16xf32>
    %83 = math.absf %82 : vector<4x16xf32>
    %84 = vector.shape_cast %83 : vector<4x16xf32> to vector<1x4x16xf32>
    %cst_54 = arith.constant dense<0.000000e+00> : vector<1xf32>
    %85 = vector.multi_reduction <add>, %84, %cst_54 [1, 2] : vector<1x4x16xf32> to vector<1xf32>
    %86 = vector.shape_cast %85 : vector<1xf32> to vector<1x1x1xf32>
    %87 = vector.extract %86[0, 0, 0] : f32 from vector<1x1x1xf32>
    %cst_55 = arith.constant 7.812500e-03 : f32
    %88 = arith.mulf %87, %cst_55 : f32
    %89 = vector.broadcast %88 : f32 to vector<1x1xf32>
    %90 = arith.addf %73, %89 : vector<1x1xf32>
    %c0_56 = arith.constant 0 : index
    %c0_57 = arith.constant 0 : index
    %c0_58 = arith.constant 0 : index
    %91 = vector.load %arg4[%c0_56, %c0_57, %c0_58] : memref<1x1x1xf32, #tpu.memory_space<vmem>>, vector<1x1x1xf32>
    %92 = vector.shape_cast %91 : vector<1x1x1xf32> to vector<1x1xf32>
    %93 = vector.shape_cast %90 : vector<1x1xf32> to vector<1x1x1xf32>
    tpu.vector_store %arg4[%c0_56, %c0_57, %c0_58], %93 {strides = array<i32>} : memref<1x1x1xf32, #tpu.memory_space<vmem>>, vector<1x1x1xf32>,
    return
  }
  func.func @transform_0(%arg0: i32) -> (i32, i32, i32) {
    %c0_i32 = arith.constant 0 : i32
    %c0_i32_0 = arith.constant 0 : i32
    %c0_i32_1 = arith.constant 0 : i32
    return %arg0, %c0_i32, %c0_i32_0 : i32, i32, i32
  }
  func.func @transform_1(%arg0: i32) -> (i32, i32, i32) {
    %c0_i32 = arith.constant 0 : i32
    %c0_i32_0 = arith.constant 0 : i32
    %c0_i32_1 = arith.constant 0 : i32
    return %arg0, %c0_i32, %c0_i32_0 : i32, i32, i32
  }
  func.func @transform_2(%arg0: i32) -> (i32, i32) {
    %c0_i32 = arith.constant 0 : i32
    %c0_i32_0 = arith.constant 0 : i32
    %c0_i32_1 = arith.constant 0 : i32
    return %c0_i32, %c0_i32_0 : i32, i32
  }
  func.func @transform_3(%arg0: i32) -> (i32, i32, i32) {
    %c0_i32 = arith.constant 0 : i32
    %c0_i32_0 = arith.constant 0 : i32
    %c0_i32_1 = arith.constant 0 : i32
    return %arg0, %c0_i32, %c0_i32_0 : i32, i32, i32
  }
}

</mosaic_0001>

<bundles_post_ra>
// kernel: tpu_custom_call.1
= control target key start
LH: loop header
LB: loop body
LE: loop exit
PB: predicated region body
PF: predicated region fallthrough
CT: control target
= control target key end

     0   :  { %8 = vsyncpa [#allocation3], 0  ;;  %s18029_s0 = inlined_call_operand.hbm [shape: f32[2,64,256], index: 0, kind: input, shape index: {}]   ;;  %s18030_s1 = inlined_call_operand.hbm [shape: f32[2,64,256], index: 1, kind: input, shape index: {}]   ;;  %s18031_s2 = inlined_call_operand.hbm [shape: f32[944,256], index: 2, kind: input, shape index: {}]   ;;  %s18032_s3 = inlined_call_operand.vmem [shape: f32[2,1,1], index: 3, kind: output, shape index: {}]  }
   0x1   :  { %10 = vsyncpa [#allocation3 + $0x1], 0 }
   0x2   :  { %11 = vsyncpa [#allocation5], 0 }
   0x3   :  { %13 = vsyncpa [#allocation5 + $0x1], 0  ;;  %s14450_s12 = smov 0   ;;  %s14452_s13 = smov 0  }
   0x4   :  { %s14454_s14 = smov 0   ;;  %s14456_s15 = smov 0  }
   0x5 LB: > { %s14469_s16 = sadd.s32 4294967295, %s14421_s15   ;;  %p39_p0 = scmp.ne.s32.totalorder %s14413_s13, %s14409_s12  ;;  %s14421_s15 = sphi %s14456_s15, %s19004_s15   ;;  %s14417_s14 = sphi %s14454_s14, %s19003_s14   ;;  %s14413_s13 = sphi %s14452_s13, %s19002_s13   ;;  %s14409_s12 = sphi %s14450_s12, %s19001_s12  }
   0x6   : > { %p18033_p1 = scmp.eq.s32.totalorder %s14469_s16, 0  ;;  %p12459_p2 = scmp.ge.s32.totalorder %s14421_s15, 1 }
   0x7   : > { %p123_p3 = scmp.lt.s32.totalorder %s14421_s15, 3  ;;  %s14423_s19 = smov [#allocation6]  }
   0x8   : > { %p14477_p4 = por %p18033_p1, %p39_p0  ;;  %s135_s20 = sshll.u32 %s14423_s19, 4  ;;  %s136_s20 = int_to_ptr.vmem [resolvable:$true] %s135_s20 }
   0x9   : > { %p14481_p5 = pnand %p12459_p2, %p123_p3  ;;  %s14494_s22 = sadd.s32 1, %s14421_s15  }
   0xa   : > { %s18482_s17 = scalar_select %p14477_p4, 1, 0 }
   0xb   : > { %p14246_p6 = pneg %p14481_p5  ;;  %s26_s23 = sadd.s32 1, %s14417_s14 }
   0xc   : > { %s23_s24 = ssub.s32 %s14421_s15, %s14494_s22  ;;  %s14308_s25 = scalar_lea.vmem %s136_s20, 30208 }
   0xd   : > { %p14489_p7 = pnand %p14246_p6, %p18033_p1  ;;  %p14309_p9 = scmp.ne.s32.totalorder %s136_s20, %s14308_s25 }
   0xe   : > { %p14316_p12 = scmp.lt.s32.totalorder %s136_s20, %s136_s20  ;;  %p14317_p13 = scmp.lt.s32.totalorder %s14308_s25, %s14308_s25 }
   0xf   : > { %p14299_p8 = pneg %p14489_p7 }
  0x10   : > { %p14318_p0 = por %p14317_p13, %p14316_p12 }
  0x11   : > { %p14311_p10 = pnand %p14309_p9, %p14299_p8 }
  0x13   : > { %p14312_p11 = pneg %p14311_p10 }
  0x15   : > { %p14319_p2 = pnand %p14318_p0, %p14312_p11 }
  0x17   : > { %14322 = shalt.err (!%p14319_p2)
}
  0x18   : > { %s14424_s26 = smov 256   ;;  %s14425_s27 = smov 16  }
  0x19   : > { %14249 = dma.hbm_to_vmem [thread:$0]  (!%p14489_p7), %s18031_s2, 30208, %s136_s20, [#allocation5], %s14424_s26, %s14424_s26, %s14425_s27  }
  0x1a   : > { %p24_p3 = scmp.eq.s32.totalorder %s23_s24, 0  ;;  %p33_p6 = scmp.ne.s32.totalorder %s14417_s14, %s14413_s13 }
  0x1b   : > { %p34_p8 = scmp.eq.s32.totalorder %s14421_s15, 0  ;;  %p14258_p9 = scmp.lt.s32.totalorder %s14421_s15, 2 }
  0x1c   : > { %s14514_s30 = scalar_select %p24_p3, %s14417_s14, %s26_s23  }
  0x1d   : > { %p35_p10 = por %p34_p8, %p33_p6  ;;  %s149_s4 = sand.u32 1, %s14417_s14  }
  0x1e   : > { %s12462_s5 = sshll.u32 %s149_s4, 7  ;;  %s12474_s6 = sshll.u32 %s14421_s15, 11 }
  0x1f   : > { %s14521_s9 = scalar_lea.hbm %s18029_s0, %s12474_s6  ;;  %s153_s10 = scalar_lea.vmem [#allocation2], %s12462_s5 }
  0x20   : > { %s160_s11 = sshll.u32 %s153_s10, 4  ;;  %p14525_p7 = pnand %p14258_p9, %p35_p10  ;;  %s14523_s11 = int_to_ptr.vmem [resolvable:$true] %s160_s11 }
  0x21   : > { %s14532_s21 = scalar_lea.hbm %s18030_s1, %s12474_s6  ;;  %s174_s23 = scalar_lea.vmem [#allocation4], %s12462_s5 }
  0x22   : > { %s14534_s24 = sshll.u32 %s174_s23, 4  ;;  %s14536_s25 = scalar_lea.sflag [#allocation3], %s149_s4  ;;  %s14567_s24 = int_to_ptr.vmem [resolvable:$true] %s14534_s24 }
  0x23   : > { %s14323_s28 = scalar_lea.hbm %s14521_s9, 2048  ;;  %p14325_p12 = pneg %p14525_p7 }
  0x24   : > { %p14324_p11 = scmp.ne.s32.totalorder %s14521_s9, %s14323_s28  ;;  %s14328_s8 = scalar_lea.hbm %s18029_s0, 4096 }
  0x25   : > { %p14329_p2 = scmp.lt.s32.totalorder %s14521_s9, %s18029_s0  ;;  %p14330_p3 = scmp.lt.s32.totalorder %s14328_s8, %s14323_s28 }
  0x26   : > { %p14326_p13 = pnand %p14325_p12, %p14324_p11 }
  0x27   : > { %p14331_p6 = por %p14330_p3, %p14329_p2 }
  0x28   : > { %p14327_p0 = pneg %p14326_p13 }
  0x2a   : > { %p14332_p8 = pnand %p14331_p6, %p14327_p0 }
  0x2c   : > { %14335 = shalt.err (!%p14332_p8)
}
  0x2d   : > { %s14336_s4 = scalar_lea.vmem %s14523_s11, 2048  ;;  %s14426_s5 = smov [#allocation2]  }
  0x2e   : > { %p14337_p9 = scmp.ne.s32.totalorder %s14523_s11, %s14336_s4  ;;  %s14341_s19 = sshll.u32 %s14426_s5, 4  ;;  %s14342_s19 = int_to_ptr.vmem [resolvable:$false] %s14341_s19 }
  0x2f   : > { %s14343_s20 = scalar_lea.vmem %s14342_s19, 4096  ;;  %p14344_p13 = scmp.lt.s32.totalorder %s14523_s11, %s14342_s19 }
  0x30   : > { %p14339_p10 = pnand %p14337_p9, %p14325_p12  ;;  %p14345_p1 = scmp.lt.s32.totalorder %s14343_s20, %s14336_s4 }
  0x32   : > { %p14340_p11 = pneg %p14339_p10  ;;  %p14346_p4 = por %p14345_p1, %p14344_p13 }
  0x34   : > { %p14347_p2 = pnand %p14346_p4, %p14340_p11 }
  0x36   : > { %14350 = shalt.err (!%p14347_p2)
}
  0x37   : > { %14253 = dma.hbm_to_vmem [thread:$0]  (!%p14525_p7), %s14521_s9, 2048, %s14523_s11, %s14536_s25, %s14424_s26, %s14424_s26, %s14425_s27  }
  0x38   : > { %s170_s23 = sand.u32 1, %s14421_s15   ;;  %s14351_s29 = scalar_lea.hbm %s14532_s21, 2048 }
  0x39   : > { %s171_s28 = scalar_lea.sflag [#allocation5], %s170_s23  ;;  %p14352_p1 = scmp.ne.s32.totalorder %s14532_s21, %s14351_s29 }
  0x3a   : > { %s14356_s10 = scalar_lea.hbm %s18030_s1, 4096  ;;  %p14357_p3 = scmp.lt.s32.totalorder %s14532_s21, %s18030_s1 }
  0x3b   : > { %p14354_p4 = pnand %p14352_p1, %p14325_p12  ;;  %p14358_p6 = scmp.lt.s32.totalorder %s14356_s10, %s14351_s29 }
  0x3d   : > { %p14355_p0 = pneg %p14354_p4  ;;  %p14359_p8 = por %p14358_p6, %p14357_p3 }
  0x3f   : > { %p14360_p9 = pnand %p14359_p8, %p14355_p0 }
  0x41   : > { %14363 = shalt.err (!%p14360_p9)
}
  0x42   : > { %s14364_s15 = scalar_lea.vmem %s14567_s24, 2048  ;;  %s14427_s9 = smov [#allocation4]  }
  0x43   : > { %p14365_p10 = scmp.ne.s32.totalorder %s14567_s24, %s14364_s15  ;;  %s14369_s11 = sshll.u32 %s14427_s9, 4  ;;  %s14370_s11 = int_to_ptr.vmem [resolvable:$false] %s14369_s11 }
  0x44   : > { %s14371_s25 = scalar_lea.vmem %s14370_s11, 4096  ;;  %p14372_p2 = scmp.lt.s32.totalorder %s14567_s24, %s14370_s11 }
  0x45   : > { %p14367_p11 = pnand %p14365_p10, %p14325_p12  ;;  %p14373_p1 = scmp.lt.s32.totalorder %s14371_s25, %s14364_s15 }
  0x47   : > { %p14368_p13 = pneg %p14367_p11  ;;  %p14374_p4 = por %p14373_p1, %p14372_p2 }
  0x49   : > { %p14375_p3 = pnand %p14374_p4, %p14368_p13 }
  0x4b   : > { %14378 = shalt.err (!%p14375_p3)
}
  0x4c   : > { %14256 = dma.hbm_to_vmem [thread:$0]  (!%p14525_p7), %s14532_s21, 2048, %s14567_s24, %s171_s28, %s14424_s26, %s14424_s26, %s14425_s27  }
  0x4d   : > { %193 = sbr.rel (%p14481_p5) target bundleno = 4276 (0x10b4), region = 32 }
  0x52   : > { %s195_s5 = sand.u32 1, %s14413_s13   ;;  %p18486_p12 = scmp.ne.s32.totalorder %s18482_s17, 0 }
  0x53   : > { %s12469_s19 = sshll.u32 %s195_s5, 7  ;;  %s196_s20 = scalar_lea.sflag [#allocation3], %s195_s5 }
  0x54   : > { %s14598_s23 = scalar_lea.vmem [#allocation2], %s12469_s19 }
  0x55   : > { %14396 = dma.done.wait (%p18486_p12), %s196_s20, 2048  }
  0x56   : > { %14398 = vsyncadd (%p18486_p12), %s196_s20, 4294965248  ;;  %s204_s12 = sand.u32 1, %s14469_s16   ;;  %s14605_s26 = scalar_lea.vmem [#allocation4], %s12469_s19 }
  0x57   : > { %s205_s29 = scalar_lea.sflag [#allocation5], %s204_s12 }
  0x58   : > { %14400 = dma.done.wait (%p18486_p12), %s205_s29, 2048  }
  0x59   : > { %14402 = vsyncadd (%p18486_p12), %s205_s29, 4294965248  ;;  %p18487_p5 = scmp.eq.s32.totalorder %s14469_s16, 0 }
  0x5b   : > { %14404 = dma.done.wait (%p18487_p5), [#allocation5], 30208   ;;  %p18488_p7 = pmov %p18487_p5 }
  0x5c   : > { %v18047_v0 = vmov 0.0   ;;  %v256_v1 = vld [vmem:[%s14598_s23 + $0x78] sm:$0xff]  ;;  %v255_v3 = vld [vmem:[%s14598_s23 + $0x70] sm:$0xff]  ;;  %v254_v6 = vld [vmem:[%s14598_s23 + $0x68] sm:$0xff]  ;;  %vm365_vm0 = vcmask 523264   ;;  %vm3204_vm1 = vcmask 261120  }
  0x5d   : > { %14406 = vsyncadd (%p18488_p7), [#allocation5], 4294937088  ;;  %458 = vmatprep.mubr.f32.mxu0 %v18047_v0  ;;  %647 = vmatprep.mubr.f32.mxu1 %v18047_v0  ;;  %v272_v2 = vld [vmem:[%s14605_s26 + $0x78] sm:$0xff]  ;;  %v271_v5 = vld [vmem:[%s14605_s26 + $0x70] sm:$0xff]  ;;  %vm6008_vm2 = vcmask 130048   ;;  %vm14429_vm3 = vmmov 0  }
  0x5e   : > { %v14620_v4 = vsub.f32 %v256_v1, %v272_v2  ;;  %v270_v7 = vld [vmem:[%s14605_s26 + $0x68] sm:$0xff]  ;;  %v14625_v8 = vsub.f32 %v255_v3, %v271_v5  ;;  %v253_v10 = vld [vmem:[%s14598_s23 + $0x60] sm:$0xff]  ;;  %v252_v12 = vld [vmem:[%s14598_s23 + $0x58] sm:$0xff]  ;;  %vm8137_vm4 = vcmask 64512   ;;  %vm10059_vm5 = vcmask 31744   ;;  %p238_p0 = scmp.lt.s32.totalorder %s14469_s16, 1 }
  0x5f   : > { %v14627_v9 = vsub.f32 %v254_v6, %v270_v7  ;;  %v269_v11 = vld [vmem:[%s14605_s26 + $0x60] sm:$0xff]  ;;  %v268_v15 = vld [vmem:[%s14605_s26 + $0x58] sm:$0xff]  ;;  %v251_v16 = vld [vmem:[%s14598_s23 + $0x50] sm:$0xff]  ;;  %vm10063_vm6 = vcmask 1043456   ;;  %vm11895_vm7 = vcmask 15360   ;;  %vm11899_vm8 = vcmask 1041408  }
  0x60   : > { %18489 = vst [vmem:[#allocation10_spill] sm:$0xff] %v14620_v4  ;;  %18490 = vst [vmem:[#allocation11_spill] sm:$0xff] %v14625_v8  ;;  %v14633_v13 = vand.u32 4294901760, %v14620_v4  ;;  %v14635_v14 = vsub.f32 %v253_v10, %v269_v11  ;;  %v267_v17 = vld [vmem:[%s14605_s26 + $0x50] sm:$0xff]  ;;  %v14641_v18 = vand.u32 4294901760, %v14625_v8  ;;  %v14646_v20 = vsub.f32 %v252_v12, %v268_v15  ;;  %v250_v22 = vld [vmem:[%s14598_s23 + $0x48] sm:$0xff] }
  0x61   : > { %18491 = vst [vmem:[#allocation12_spill] sm:$0xff] %v14627_v9  ;;  %v14644_v19 = vand.u32 4294901760, %v14627_v9  ;;  %v14648_v21 = vsub.f32 %v251_v16, %v267_v17  ;;  %v266_v23 = vld [vmem:[%s14605_s26 + $0x48] sm:$0xff]  ;;  %v249_v24 = vld [vmem:[%s14598_s23 + $0x40] sm:$0xff]  ;;  %v248_v28 = vld [vmem:[%s14598_s23 + $0x38] sm:$0xff]  ;;  %vm12351_vm9 = vcmask 125952  }
  0x62   : > { %18492 = vst [vmem:[#allocation13_spill] sm:$0xff] %v14635_v14  ;;  %18493 = vst [vmem:[#allocation14_spill] sm:$0xff] %v14646_v20  ;;  %395 = vmatprep.subr.mxu0 %v14633_v13  ;;  %v14655_v25 = vand.u32 4294901760, %v14635_v14  ;;  %v14657_v26 = vsub.f32 %v250_v22, %v266_v23  ;;  %v265_v27 = vld [vmem:[%s14605_s26 + $0x40] sm:$0xff]  ;;  %v264_v29 = vld [vmem:[%s14605_s26 + $0x38] sm:$0xff]  ;;  %v14664_v30 = vsub.f32 %v14620_v4, %v14633_v13  ;;  %v14668_v31 = vand.u32 4294901760, %v14646_v20 }
  0x63   : > { %18494 = vst [vmem:[#allocation15_spill] sm:$0xff] %v14648_v21  ;;  %397 = vmatpush1.msra.mxu0 %v14641_v18  ;;  %v14671_v32 = vand.u32 4294901760, %v14648_v21  ;;  %v14673_v33 = vsub.f32 %v249_v24, %v265_v27  ;;  %v14675_v34 = vsub.f32 %v248_v28, %v264_v29  ;;  %v247_v35 = vld [vmem:[%s14598_s23 + $0x30] sm:$0xff]  ;;  %v246_v37 = vld [vmem:[%s14598_s23 + $0x28] sm:$0xff]  ;;  %v14689_v41 = vsub.f32 %v14625_v8, %v14641_v18  ;;  %v245_v43 = vld [vmem:[%s14598_s23 + $0x20] sm:$0xff]  ;;  %s19006_s16 = smov (!%p238_p0, %s14469_s16), 1 }
  0x64   : > { %18495 = vst [vmem:[#allocation16_spill] sm:$0xff] %v14657_v26  ;;  %v263_v36 = vld [vmem:[%s14605_s26 + $0x30] sm:$0xff]  ;;  %399 = vmatprep.subr.mxu0 %v14644_v19  ;;  %v14682_v38 = vand.u32 4294901760, %v14657_v26  ;;  %v18046_v39 = vand.u32 4294901760, %v14664_v30  ;;  %v262_v42 = vld [vmem:[%s14605_s26 + $0x28] sm:$0xff]  ;;  %v261_v44 = vld [vmem:[%s14605_s26 + $0x20] sm:$0xff]  ;;  %v14705_v48 = vsub.f32 %v14627_v9, %v14644_v19  ;;  %v14728_v59 = vsub.f32 %v14635_v14, %v14655_v25  ;;  %s240_s9 = scalar_lea.vmem %s18032_s3, %s19006_s16 }
  0x65   : > { %18496 = vst [vmem:[#allocation17_spill] sm:$0xff] %v14673_v33  ;;  %18497 = vst [vmem:[#allocation18_spill] sm:$0xff] %v14675_v34  ;;  %v14685_v40 = vsub.f32 %v247_v35, %v263_v36  ;;  %401 = vmatpush1.msra.mxu0 %v14655_v25  ;;  %v14696_v45 = vand.u32 4294901760, %v14673_v33  ;;  %v14699_v46 = vand.u32 4294901760, %v14675_v34  ;;  %v14701_v47 = vsub.f32 %v246_v37, %v262_v42  ;;  %v244_v49 = vld [vmem:[%s14598_s23 + $0x18] sm:$0xff]  ;;  %v243_v55 = vld [vmem:[%s14598_s23 + $0x10] sm:$0xff] }
  0x66   : > { %v260_v50 = vld [vmem:[%s14605_s26 + $0x18] sm:$0xff]  ;;  %403 = vmatprep.subr.mxu0 %v14668_v31  ;;  %v522_v51 = vsub.f32 %v14664_v30, %v18046_v39  ;;  %v18044_v53 = vand.u32 4294901760, %v14689_v41  ;;  %v14717_v54 = vsub.f32 %v245_v43, %v261_v44  ;;  %v259_v56 = vld [vmem:[%s14605_s26 + $0x10] sm:$0xff]  ;;  %v18042_v58 = vand.u32 4294901760, %v14705_v48  ;;  %v242_v61 = vld [vmem:[%s14598_s23 + $0x8] sm:$0xff] }
  0x67   : > { %18498 = vst [vmem:[#allocation19_spill] sm:$0xff] %v14685_v40  ;;  %18499 = vst [vmem:[#allocation20_spill] sm:$0xff] %v14701_v47  ;;  %v14714_v52 = vand.u32 4294901760, %v14685_v40  ;;  %405 = vmatpush1.msra.mxu0 %v14671_v32  ;;  %v14723_v57 = vand.u32 4294901760, %v14701_v47  ;;  %v14730_v60 = vsub.f32 %v244_v49, %v260_v50  ;;  %v258_v62 = vld [vmem:[%s14605_s26 + $0x8] sm:$0xff]  ;;  %v14743_v3 = vsub.f32 %v14646_v20, %v14668_v31  ;;  %v241_v11 = vld [vmem:[%s14598_s23] sm:$0xff] }
  0x68   : > { %18500 = vst [vmem:[#allocation21_spill] sm:$0xff] %v14717_v54  ;;  %407 = vmatprep.subr.mxu0 %v14682_v38  ;;  %v523_v63 = vand.u32 4294901760, %v522_v51  ;;  %v528_v1 = vsub.f32 %v14689_v41, %v18044_v53  ;;  %v14739_v2 = vand.u32 4294901760, %v14717_v54  ;;  %v534_v5 = vsub.f32 %v14705_v48, %v18042_v58  ;;  %v257_v12 = vld [vmem:[%s14605_s26] sm:$0xff] }
  0x69   : > { %18501 = vst [vmem:[#allocation22_spill] sm:$0xff] %v14730_v60  ;;  %409 = vmatpush1.msra.mxu0 %v14696_v45  ;;  %v18039_v6 = vand.u32 4294901760, %v14728_v59  ;;  %v14751_v7 = vand.u32 4294901760, %v14730_v60  ;;  %v14753_v10 = vsub.f32 %v243_v55, %v259_v56  ;;  %v18038_v16 = vand.u32 4294901760, %v14743_v3  ;;  %v289_v23 = vld [vmem:[#allocation6] sm:$0xff] }
  0x6a   : > { %411 = vmatprep.subr.mxu0 %v14699_v46  ;;  %524 = vmatprep.subr.mxu1 %v523_v63  ;;  %v529_v15 = vand.u32 4294901760, %v528_v1  ;;  %v14761_v17 = vsub.f32 %v14648_v21, %v14671_v32  ;;  %v14763_v22 = vsub.f32 %v242_v61, %v258_v62  ;;  %v535_v24 = vand.u32 4294901760, %v534_v5  ;;  %v291_v53 = vld [vmem:[#allocation6 + $0x20] sm:$0xff] }
  0x6b   : > { %18502 = vst [vmem:[#allocation23_spill] sm:$0xff] %v14753_v10  ;;  %413 = vmatpush1.msra.mxu0 %v14714_v52  ;;  %v540_v27 = vsub.f32 %v14728_v59, %v18039_v6  ;;  %v14770_v28 = vand.u32 4294901760, %v14753_v10  ;;  %v14774_v29 = vsub.f32 %v14657_v26, %v14682_v38  ;;  %v546_v35 = vsub.f32 %v14743_v3, %v18038_v16 }
  0x6c   : > { %18503 = vst [vmem:[#allocation24_spill] sm:$0xff] %v14763_v22  ;;  %530 = vmatpush1.msra.mxu1 %v529_v15  ;;  %415 = vmatprep.subr.mxu0 %v14723_v57  ;;  %v18036_v36 = vand.u32 4294901760, %v14761_v17  ;;  %v14782_v37 = vand.u32 4294901760, %v14763_v22  ;;  %v14784_v42 = vsub.f32 %v241_v11, %v257_v12  ;;  %v14790_v49 = vsub.f32 %v14673_v33, %v14696_v45  ;;  %v290_v11 = vld [vmem:[#allocation6 + $0x10] sm:$0xff] }
  0x6d   : > { %536 = vmatprep.subr.mxu1 %v535_v24  ;;  %417 = vmatpush1.msra.mxu0 %v14739_v2  ;;  %v541_v43 = vand.u32 4294901760, %v540_v27  ;;  %v18035_v44 = vand.u32 4294901760, %v14774_v29  ;;  %v367_v50 = vsel %vm365_vm0, %v289_v23, 0  ;;  %v547_v51 = vand.u32 4294901760, %v546_v35 }
  0x6e   : > { %18504 = vst [vmem:[#allocation25_spill] sm:$0xff] %v14784_v42  ;;  %419 = vmatprep.subr.mxu0 %v14751_v7  ;;  %v552_v55 = vsub.f32 %v14761_v17, %v18036_v36  ;;  %v14798_v56 = vand.u32 4294901760, %v14784_v42  ;;  %v14800_v61 = vand.u32 4294901760, %v367_v50  ;;  %v18037_v63 = vand.u32 4294901760, %v14790_v49 }
  0x6f   : > { %542 = vmatpush1.msra.mxu1 %v541_v43  ;;  %421 = vmatpush1.msra.mxu0 %v14770_v28  ;;  %v558_v62 = vsub.f32 %v14774_v29, %v18035_v44  ;;  %v14809_v1 = vsub.f32 %v14675_v34, %v14699_v46  ;;  %v14813_v5 = vsub.f32 %v14685_v40, %v14714_v52  ;;  %vm12365_vm10 = vcmask 0  }
  0x70   : > { %548 = vmatprep.subr.mxu1 %v547_v51  ;;  %v553_v12 = vand.u32 4294901760, %v552_v55  ;;  %423 = vmatprep.subr.mxu0 %v14782_v37  ;;  %v14817_v15 = vsub.f32 %v367_v50, %v14800_v61  ;;  %v14821_v23 = vsub.f32 %v14701_v47, %v14723_v57  ;;  %v14825_v24 = vsub.f32 %v14717_v54, %v14739_v2 }
  0x71   : > { %v559_v27 = vand.u32 4294901760, %v558_v62  ;;  %425 = vmatpush1.msra.mxu0 %v14798_v56  ;;  %v564_v35 = vsub.f32 %v14790_v49, %v18037_v63  ;;  %v18041_v43 = vand.u32 4294901760, %v14809_v1  ;;  %v18040_v50 = vand.u32 4294901760, %v14813_v5 }
  0x72   : > { %554 = vmatpush1.msra.mxu1 %v553_v12  ;;  %v18043_v51 = vand.u32 4294901760, %v14817_v15  ;;  %694 = vmatprep.subr.mxu0 %v14664_v30  ;;  %v18045_v55 = vand.u32 4294901760, %v14821_v23  ;;  %v18050_v44 = vand.u32 4294901760, %v14825_v24  ;;  %v370_v62 = vsel %vm365_vm0, %v290_v11, 0 }
  0x73   : > { %560 = vmatprep.subr.mxu1 %v559_v27  ;;  %v565_v36 = vand.u32 4294901760, %v564_v35  ;;  %v570_v63 = vsub.f32 %v14809_v1, %v18041_v43  ;;  %v576_v12 = vsub.f32 %v14813_v5, %v18040_v50  ;;  %v14844_v16 = vand.u32 4294901760, %v370_v62 }
  0x74   : > { %v462_v6 = vsub.f32 %v14817_v15, %v18043_v51  ;;  %v582_v11 = vsub.f32 %v14821_v23, %v18045_v55  ;;  %v588_v27 = vsub.f32 %v14825_v24, %v18050_v44  ;;  %v14857_v35 = vsub.f32 %v14730_v60, %v14751_v7  ;;  %v292_v55 = vld [vmem:[#allocation6 + $0x30] sm:$0xff] }
  0x75   : > { %566 = vmatpush1.msra.mxu1 %v565_v36  ;;  %v571_v50 = vand.u32 4294901760, %v570_v63  ;;  %v577_v43 = vand.u32 4294901760, %v576_v12  ;;  %v14860_v58 = vsub.f32 %v370_v62, %v14844_v16  ;;  %v14864_v51 = vsub.f32 %v14753_v10, %v14770_v28 }
  0x76   : > { %v463_v39 = vand.u32 4294901760, %v462_v6  ;;  %v583_v0 = vand.u32 4294901760, %v582_v11  ;;  %v589_v4 = vand.u32 4294901760, %v588_v27  ;;  %v18052_v44 = vand.u32 4294901760, %v14857_v35 }
  0x77   : > { %572 = vmatprep.subr.mxu1 %v571_v50  ;;  %v18053_v8 = vand.u32 4294901760, %v14860_v58  ;;  %v18055_v36 = vand.u32 4294901760, %v14864_v51  ;;  %v14871_v63 = vsub.f32 %v14763_v22, %v14782_v37  ;;  %v14875_v62 = vsub.f32 %v14784_v42, %v14798_v56  ;;  %v311_v22 = vld [vmem:[#allocation6 + $0x160] sm:$0xff] }
  0x78   : > { %464 = vmatmul.mubr.f32.vlgmr.msra.gmra.mxu0 %v463_v39  ;;  %578 = vmatpush1.msra.mxu1 %v577_v43  ;;  %v594_v6 = vsub.f32 %v14857_v35, %v18052_v44  ;;  %v373_v50 = vsel %vm365_vm0, %v291_v53, 0  ;;  %v376_v12 = vsel %vm365_vm0, %v292_v55, 0  ;;  %v18505_v53 = vmov 0.0  }
  0x79   : > { %697 = vmatpush1.msra.mxu0 %v14689_v41  ;;  %584 = vmatprep.subr.mxu1 %v583_v0  ;;  %v473_v11 = vsub.f32 %v14860_v58, %v18053_v8  ;;  %v600_v39 = vsub.f32 %v14864_v51, %v18055_v36  ;;  %v18057_v43 = vand.u32 4294901760, %v14871_v63  ;;  %v611_v27 = vand.u32 4294901760, %v14875_v62 }
  0x7a   : > { %700 = vmatprep.subr.mxu0 %v14705_v48  ;;  %469 = vmatprep.mubr.f32.mxu0 %v18505_v53  ;;  %v595_v55 = vand.u32 4294901760, %v594_v6  ;;  %v14893_v44 = vand.u32 4294901760, %v373_v50  ;;  %v14895_v0 = vand.u32 4294901760, %v376_v12 }
  0x7b   : > { %590 = vmatpush1.msra.mxu1 %v589_v4  ;;  %703 = vmatpush1.msra.mxu0 %v14728_v59  ;;  %v474_v8 = vand.u32 4294901760, %v473_v11  ;;  %v601_v9 = vand.u32 4294901760, %v600_v39  ;;  %v606_v36 = vsub.f32 %v14871_v63, %v18057_v43  ;;  %v612_v14 = vsub.f32 %v14875_v62, %v611_v27 }
  0x7c   : > { %596 = vmatprep.subr.mxu1 %v595_v55  ;;  %706 = vmatprep.subr.mxu0 %v14743_v3  ;;  %v14906_v6 = vsub.f32 %v373_v50, %v14893_v44  ;;  %v14909_v4 = vsub.f32 %v376_v12, %v14895_v0  ;;  %v18506_v50 = vand.u32 4294901760, %v14664_v30  ;;  %v18507_v12 = vand.u32 4294901760, %v14689_v41 }
  0x7d   : > { %475 = vmatmul.mubr.f32.gmra.mxu0 %v474_v8  ;;  %602 = vmatpush1.msra.mxu1 %v601_v9  ;;  %v607_v11 = vand.u32 4294901760, %v606_v36  ;;  %v613_v39 = vand.u32 4294901760, %v612_v14  ;;  %v18510_v30 = vand.u32 4294901760, %v14743_v3  ;;  %v18511_v41 = vand.u32 4294901760, %v14761_v17 }
  0x7e   : > { %709 = vmatpush1.msra.mxu0 %v14761_v17  ;;  %480 = vmatprep.mubr.f32.mxu0 %v18505_v53  ;;  %v483_v43 = vand.u32 4294901760, %v14906_v6  ;;  %v494_v55 = vand.u32 4294901760, %v14909_v4  ;;  %v18514_v3 = vand.u32 4294901760, %v14817_v15  ;;  %v18515_v17 = vand.u32 4294901760, %v14809_v1 }
  0x7f   : > { %608 = vmatprep.subr.mxu1 %v607_v11  ;;  %712 = vmatprep.subr.mxu0 %v14774_v29  ;;  %v18508_v11 = vand.u32 4294901760, %v14705_v48  ;;  %v18512_v48 = vand.u32 4294901760, %v14774_v29  ;;  %v18516_v29 = vand.u32 4294901760, %v14813_v5 }
  0x80   : > { %614 = vmatpush1.msra.mxu1 %v613_v39  ;;  %715 = vmatpush1.msra.mxu0 %v14790_v49  ;;  %v484_v8 = vsub.f32 %v14906_v6, %v483_v43  ;;  %v495_v9 = vsub.f32 %v14909_v4, %v494_v55  ;;  %v18509_v39 = vand.u32 4294901760, %v14728_v59  ;;  %v18513_v59 = vand.u32 4294901760, %v14790_v49 }
  0x81   : > { %649 = vmatmul.mubr.f32.vlgmr.msra.gmra.mxu1 %v14800_v61  ;;  %718 = vmatprep.subr.mxu0 %v14809_v1  ;;  %v18518_v49 = vand.u32 4294901760, %v14825_v24  ;;  %v18522_v1 = vand.u32 4294901760, %v14871_v63 }
  0x82   : > { %v485_v14 = vand.u32 4294901760, %v484_v8  ;;  %822 = vmatprep.subr.mxu1 %v14633_v13  ;;  %721 = vmatpush1.msra.mxu0 %v14813_v5  ;;  %v496_v36 = vand.u32 4294901760, %v495_v9  ;;  %v18517_v8 = vand.u32 4294901760, %v14821_v23 }
  0x83   : > { %824 = vmatpush1.msra.mxu1 %v14641_v18  ;;  %724 = vmatprep.subr.mxu0 %v14821_v23 }
  0x84   : > { %486 = vmatmul.mubr.f32.gmra.mxu0 %v485_v14  ;;  %826 = vmatprep.subr.mxu1 %v14644_v19 }
  0x85   : > { %491 = vmatprep.mubr.f32.mxu0 %v18505_v53  ;;  %654 = vmatprep.mubr.f32.mxu1 %v18505_v53 }
  0x86   : > { %727 = vmatpush1.msra.mxu0 %v14825_v24  ;;  %828 = vmatpush1.msra.mxu1 %v14655_v25 }
  0x87   : > { %656 = vmatmul.mubr.f32.gmra.mxu1 %v14844_v16  ;;  %730 = vmatprep.subr.mxu0 %v14857_v35 }
  0x88   : > { %497 = vmatmul.mubr.f32.gmra.mxu0 %v496_v36  ;;  %830 = vmatprep.subr.mxu1 %v14668_v31  ;;  %v304_v36 = vld [vmem:[#allocation6 + $0xf0] sm:$0xff] }
  0x89   : > { %733 = vmatpush1.msra.mxu0 %v14864_v51  ;;  %832 = vmatpush1.msra.mxu1 %v14671_v32 }
  0x8a   : > { %736 = vmatprep.subr.mxu0 %v14871_v63  ;;  %834 = vmatprep.subr.mxu1 %v14682_v38  ;;  %v305_v63 = vld [vmem:[#allocation6 + $0x100] sm:$0xff] }
  0x8b   : > { %661 = vmatprep.mubr.f32.mxu1 %v18505_v53  ;;  %739 = vmatpush1.msra.mxu0 %v14875_v62 }
  0x8c   : > { %772 = vmatprep.mubr.f32.mxu0 %v18505_v53  ;;  %836 = vmatpush1.msra.mxu1 %v14696_v45 }
  0x8d   : > { %663 = vmatmul.mubr.f32.gmra.mxu1 %v14893_v44  ;;  %775 = vmatmul.mubr.f32.vlgmr.msra.gmra.mxu0 %v14817_v15  ;;  %v321_v15 = vld [vmem:[#allocation6 + $0x200] sm:$0xff] }
  0x8e   : > { %838 = vmatprep.subr.mxu1 %v14699_v46  ;;  %941 = vmatprep.subr.mxu0 %v18506_v50 }
  0x8f   : > { %840 = vmatpush1.msra.mxu1 %v14714_v52  ;;  %945 = vmatpush1.msra.mxu0 %v18507_v12 }
  0x90   : > { %842 = vmatprep.subr.mxu1 %v14723_v57  ;;  %949 = vmatprep.subr.mxu0 %v18508_v11 }
  0x91   : > { %668 = vmatprep.mubr.f32.mxu1 %v18505_v53  ;;  %780 = vmatprep.mubr.f32.mxu0 %v18505_v53 }
  0x92   : > { %844 = vmatpush1.msra.mxu1 %v14739_v2  ;;  %953 = vmatpush1.msra.mxu0 %v18509_v39 }
  0x93   : > { %670 = vmatmul.mubr.f32.gmra.mxu1 %v14895_v0  ;;  %783 = vmatmul.mubr.f32.gmra.mxu0 %v14860_v58 }
  0x94   : > { %846 = vmatprep.subr.mxu1 %v14751_v7  ;;  %957 = vmatprep.subr.mxu0 %v18510_v30  ;;  %v319_v30 = vld [vmem:[#allocation6 + $0x1e0] sm:$0xff] }
  0x95   : > { %848 = vmatpush1.msra.mxu1 %v14770_v28  ;;  %961 = vmatpush1.msra.mxu0 %v18511_v41 }
  0x96   : > { %850 = vmatprep.subr.mxu1 %v14782_v37  ;;  %965 = vmatprep.subr.mxu0 %v18512_v48 }
  0x97   : > { %788 = vmatprep.mubr.f32.mxu0 %v18505_v53  ;;  %852 = vmatpush1.msra.mxu1 %v14798_v56 }
  0x98   : > { %885 = vmatprep.mubr.f32.mxu1 %v18505_v53  ;;  %969 = vmatpush1.msra.mxu0 %v18513_v59 }
  0x99   : > { %791 = vmatmul.mubr.f32.gmra.mxu0 %v14906_v6  ;;  %889 = vmatmul.mubr.f32.vlgmr.msra.gmra.mxu1 %v18514_v3  ;;  %v320_v6 = vld [vmem:[#allocation6 + $0x1f0] sm:$0xff] }
  0x9a   : > { %973 = vmatprep.subr.mxu0 %v18515_v17  ;;  %1080 = vmatprep.subr.mxu1 %v14633_v13  ;;  %v18519_v13 = vand.u32 4294901760, %v14860_v58  ;;  %v15109_v3 = vand.u32 4294901760, %v320_v6  ;;  %v303_v17 = vld [vmem:[#allocation6 + $0xe0] sm:$0xff] }
  0x9b   : > { %977 = vmatpush1.msra.mxu0 %v18516_v29  ;;  %1082 = vmatpush1.msra.mxu1 %v14641_v18  ;;  %v18520_v18 = vand.u32 4294901760, %v14857_v35  ;;  %v15076_v35 = vand.u32 4294901760, %v321_v15 }
  0x9c   : > { %981 = vmatprep.subr.mxu0 %v18517_v8  ;;  %1084 = vmatprep.subr.mxu1 %v14644_v19  ;;  %v18521_v19 = vand.u32 4294901760, %v14864_v51 }
  0x9d   : > { %796 = vmatprep.mubr.f32.mxu0 %v18505_v53  ;;  %894 = vmatprep.mubr.f32.mxu1 %v18505_v53  ;;  %v15094_v14 = vsub.f32 %v321_v15, %v15076_v35  ;;  %v15132_v15 = vand.u32 4294901760, %v303_v17 }
  0x9e   : > { %985 = vmatpush1.msra.mxu0 %v18518_v49  ;;  %1086 = vmatpush1.msra.mxu1 %v14655_v25  ;;  %v324_v25 = vld [vmem:[#allocation6 + $0x230] sm:$0xff] }
  0x9f   : > { %799 = vmatmul.mubr.f32.gmra.mxu0 %v14909_v4  ;;  %898 = vmatmul.mubr.f32.gmra.mxu1 %v18519_v13  ;;  %18527 = vst [vmem:[#allocation30_spill] sm:$0xff] %v15094_v14  ;;  %v18061_v59 = vand.u32 4294901760, %v15094_v14  ;;  %v15115_v13 = vand.u32 4294901760, %v304_v36  ;;  %18531 = vst [vmem:[#allocation34_spill] sm:$0xff] %v15132_v15 }
  0xa0   : > { %989 = vmatprep.subr.mxu0 %v18520_v18  ;;  %1088 = vmatprep.subr.mxu1 %v14668_v31  ;;  %v15039_v31 = vand.u32 4294901760, %v324_v25  ;;  %v318_v18 = vld [vmem:[#allocation6 + $0x1d0] sm:$0xff] }
  0xa1   : > { %993 = vmatpush1.msra.mxu0 %v18521_v19  ;;  %1090 = vmatpush1.msra.mxu1 %v14671_v32  ;;  %v308_v32 = vld [vmem:[#allocation6 + $0x130] sm:$0xff] }
  0xa2   : > { %997 = vmatprep.subr.mxu0 %v18522_v1  ;;  %1092 = vmatprep.subr.mxu1 %v14682_v38  ;;  %18523 = vst [vmem:[#allocation26_spill] sm:$0xff] %v15039_v31  ;;  %v15041_v38 = vand.u32 4294901760, %v308_v32  ;;  %v1466_v1 = vsub.f32 %v15094_v14, %v18061_v59 }
  0xa3   : > { %903 = vmatprep.mubr.f32.mxu1 %v18505_v53  ;;  %1001 = vmatpush1.msra.mxu0 %v611_v27 }
  0xa4   : > { %1034 = vmatprep.mubr.f32.mxu0 %v18505_v53  ;;  %1094 = vmatpush1.msra.mxu1 %v14696_v45  ;;  %v323_v45 = vld [vmem:[#allocation6 + $0x220] sm:$0xff]  ;;  %v15050_v58 = vsub.f32 %v308_v32, %v15041_v38  ;;  %v15123_v32 = vand.u32 4294901760, %v319_v30 }
  0xa5   : > { %907 = vmatmul.mubr.f32.gmra.mxu1 %v483_v43  ;;  %1036 = vmatmul.mubr.f32.vlgmr.msra.gmra.mxu0 %v14800_v61 }
  0xa6   : > { %1096 = vmatprep.subr.mxu1 %v14699_v46  ;;  %912 = vmatprep.mubr.f32.mxu1 %v18505_v53  ;;  %v15044_v46 = vsub.f32 %v324_v25, %v15039_v31  ;;  %v15121_v25 = vsub.f32 %v320_v6, %v15109_v3  ;;  %v15137_v6 = vsub.f32 %v319_v30, %v15123_v32 }
  0xa7   : > { %1098 = vmatpush1.msra.mxu1 %v14714_v52  ;;  %1041 = vmatprep.mubr.f32.mxu0 %v18505_v53  ;;  %v15046_v52 = vand.u32 4294901760, %v323_v45 }
  0xa8   : > { %1100 = vmatprep.subr.mxu1 %v14723_v57  ;;  %18524 = vst [vmem:[#allocation27_spill] sm:$0xff] %v15044_v46  ;;  %v307_v57 = vld [vmem:[#allocation6 + $0x120] sm:$0xff]  ;;  %12476 = vmatprep.subr.mxu0 %v15039_v31  ;;  %18529 = vst [vmem:[#allocation32_spill] sm:$0xff] %v15121_v25 }
  0xa9   : > { %1102 = vmatpush1.msra.mxu1 %v14739_v2  ;;  %1043 = vmatmul.mubr.f32.gmra.mxu0 %v14844_v16  ;;  %v15052_v2 = vand.u32 4294901760, %v307_v57  ;;  %18532 = vst [vmem:[#allocation35_spill] sm:$0xff] %v15137_v6 }
  0xaa   : > { %916 = vmatmul.mubr.f32.gmra.mxu1 %v494_v55  ;;  %1104 = vmatprep.subr.mxu1 %v14751_v7  ;;  %v322_v7 = vld [vmem:[#allocation6 + $0x210] sm:$0xff] }
  0xab   : > { %1106 = vmatpush1.msra.mxu1 %v14770_v28  ;;  %1048 = vmatprep.mubr.f32.mxu0 %v18505_v53  ;;  %v15057_v28 = vsub.f32 %v323_v45, %v15046_v52  ;;  %v302_v45 = vld [vmem:[#allocation6 + $0xd0] sm:$0xff] }
  0xac   : > { %1108 = vmatprep.subr.mxu1 %v14782_v37  ;;  %1143 = vmatprep.mubr.f32.mxu1 %v18505_v53  ;;  %v15059_v37 = vand.u32 4294901760, %v322_v7 }
  0xad   : > { %1110 = vmatpush1.msra.mxu1 %v14798_v56  ;;  %1050 = vmatmul.mubr.f32.gmra.mxu0 %v14893_v44  ;;  %v18068_v56 = vand.u32 4294901760, %v15050_v58  ;;  %v18067_v24 = vand.u32 4294901760, %v15057_v28 }
  0xae   : > { %1145 = vmatmul.mubr.f32.vlgmr.msra.gmra.mxu1 %v14800_v61  ;;  %1055 = vmatprep.mubr.f32.mxu0 %v18505_v53  ;;  %v15064_v61 = vsub.f32 %v307_v57, %v15052_v2  ;;  %v15074_v51 = vsub.f32 %v322_v7, %v15059_v37 }
  0xaf   : > { %1150 = vmatprep.mubr.f32.mxu1 %v18505_v53  ;;  %12477 = vmatpush3.msra.mxu0 %v15041_v38  ;;  %v1333_v62 = vsub.f32 %v15050_v58, %v18068_v56  ;;  %v1452_v55 = vsub.f32 %v15057_v28, %v18067_v24 }
  0xb0   : > { %12478 = vmatprep.subr.mxu0 %v15046_v52  ;;  %18525 = vst [vmem:[#allocation28_spill] sm:$0xff] %v15074_v51  ;;  %v18065_v43 = vand.u32 4294901760, %v15064_v61  ;;  %v18064_v9 = vand.u32 4294901760, %v15074_v51 }
  0xb1   : > { %1057 = vmatmul.mubr.f32.gmra.mxu0 %v14895_v0  ;;  %v1334_v50 = vand.u32 4294901760, %v1333_v62  ;;  %v1453_v41 = vand.u32 4294901760, %v1452_v55  ;;  %v18058_v62 = vand.u32 4294901760, %v15121_v25  ;;  %v301_v55 = vld [vmem:[#allocation6 + $0xc0] sm:$0xff] }
  0xb2   : > { %1152 = vmatmul.mubr.f32.gmra.mxu1 %v14844_v16  ;;  %v18070_v16 = vand.u32 4294901760, %v15044_v46  ;;  %12479 = vmatpush3.msra.mxu0 %v15052_v2  ;;  %v1340_v12 = vsub.f32 %v15064_v61, %v18065_v43  ;;  %v1459_v48 = vsub.f32 %v15074_v51, %v18064_v9  ;;  %v299_v43 = vld [vmem:[#allocation6 + $0xa0] sm:$0xff] }
  0xb3   : > { %1157 = vmatprep.mubr.f32.mxu1 %v18505_v53  ;;  %12480 = vmatprep.subr.mxu0 %v15059_v37  ;;  %v1473_v30 = vsub.f32 %v15121_v25, %v18058_v62 }
  0xb4   : > { %v1445_v23 = vsub.f32 %v15044_v46, %v18070_v16  ;;  %v1341_v29 = vand.u32 4294901760, %v1340_v12  ;;  %v1460_v19 = vand.u32 4294901760, %v1459_v48  ;;  %v15144_v12 = vsub.f32 %v303_v17, %v15132_v15 }
  0xb5   : > { %v18063_v48 = vand.u32 4294901760, %v15137_v6 }
  0xb6   : > { %1159 = vmatmul.mubr.f32.gmra.mxu1 %v14893_v44  ;;  %v306_v44 = vld [vmem:[#allocation6 + $0x110] sm:$0xff]  ;;  %v1446_v4 = vand.u32 4294901760, %v1445_v23  ;;  %v317_v23 = vld [vmem:[#allocation6 + $0x1c0] sm:$0xff]  ;;  %18534 = vst [vmem:[#allocation37_spill] sm:$0xff] %v15144_v12 }
  0xb7   : > { %1164 = vmatprep.mubr.f32.mxu1 %v18505_v53  ;;  %v15066_v5 = vand.u32 4294901760, %v306_v44  ;;  %v295_v53 = vld [vmem:[#allocation6 + $0x60] sm:$0xff] }
  0xb8   : > { %12520 = vmatprep.subr.mxu1 %v1446_v4  ;;  %v15139_v4 = vand.u32 4294901760, %v318_v18 }
  0xb9   : > { %v15084_v27 = vsub.f32 %v306_v44, %v15066_v5  ;;  %12481 = vmatpush3.msra.mxu0 %v15066_v5  ;;  %12521 = vmatpush3.msra.mxu1 %v1334_v50  ;;  %v15130_v44 = vsub.f32 %v304_v36, %v15115_v13 }
  0xba   : > { %1166 = vmatmul.mubr.f32.gmra.mxu1 %v14895_v0  ;;  %v15086_v0 = vand.u32 4294901760, %v305_v63  ;;  %12482 = vmatprep.subr.mxu0 %v15076_v35  ;;  %18533 = vst [vmem:[#allocation36_spill] sm:$0xff] %v15139_v4 }
  0xbb   : > { %18526 = vst [vmem:[#allocation29_spill] sm:$0xff] %v15084_v27  ;;  %v18062_v11 = vand.u32 4294901760, %v15084_v27  ;;  %12522 = vmatprep.subr.mxu1 %v1453_v41  ;;  %18530 = vst [vmem:[#allocation33_spill] sm:$0xff] %v15130_v44  ;;  %v18059_v50 = vand.u32 4294901760, %v15130_v44  ;;  %v15146_v41 = vand.u32 4294901760, %v302_v45 }
  0xbc   : > { %v15102_v39 = vsub.f32 %v305_v63, %v15086_v0  ;;  %12483 = vmatpush3.msra.mxu0 %v15086_v0  ;;  %12523 = vmatpush3.msra.mxu1 %v1341_v29  ;;  %v1467_v63 = vand.u32 4294901760, %v1466_v1  ;;  %v15154_v29 = vsub.f32 %v318_v18, %v15139_v4  ;;  %v1474_v18 = vand.u32 4294901760, %v1473_v30 }
  0xbd   : > { %v1347_v8 = vsub.f32 %v15084_v27, %v18062_v11  ;;  %12484 = vmatprep.subr.mxu0 %v15109_v3  ;;  %12524 = vmatprep.subr.mxu1 %v1460_v19  ;;  %18535 = vst [vmem:[#allocation38_spill] sm:$0xff] %v15146_v41  ;;  %v1361_v17 = vsub.f32 %v15130_v44, %v18059_v50  ;;  %v18066_v19 = vand.u32 4294901760, %v15144_v12  ;;  %v300_v50 = vld [vmem:[#allocation6 + $0xb0] sm:$0xff]  ;;  %v315_v11 = vld [vmem:[#allocation6 + $0x1a0] sm:$0xff] }
  0xbe   : > { %18528 = vst [vmem:[#allocation31_spill] sm:$0xff] %v15102_v39  ;;  %v18060_v49 = vand.u32 4294901760, %v15102_v39  ;;  %12485 = vmatpush3.msra.mxu0 %v15115_v13  ;;  %18536 = vst [vmem:[#allocation39_spill] sm:$0xff] %v15154_v29  ;;  %v15164_v1 = vsub.f32 %v302_v45, %v15146_v41  ;;  %v15195_v56 = vand.u32 4294901760, %v300_v50 }
  0xbf   : > { %v1348_v57 = vand.u32 4294901760, %v1347_v8  ;;  %12486 = vmatprep.subr.mxu0 %v15123_v32  ;;  %v15156_v8 = vand.u32 4294901760, %v317_v23  ;;  %v1362_v45 = vand.u32 4294901760, %v1361_v17 }
  0xc0   : > { %v1354_v7 = vsub.f32 %v15102_v39, %v18060_v49  ;;  %12487 = vmatpush3.msra.mxu0 %v15132_v15  ;;  %18538 = vst [vmem:[#allocation41_spill] sm:$0xff] %v15164_v1  ;;  %v1368_v49 = vsub.f32 %v15144_v12, %v18066_v19  ;;  %v18071_v59 = vand.u32 4294901760, %v15164_v1  ;;  %18543 = vst [vmem:[#allocation46_spill] sm:$0xff] %v15195_v56 }
  0xc1   : > { %12525 = vmatpush3.msra.mxu1 %v1348_v57  ;;  %18537 = vst [vmem:[#allocation40_spill] sm:$0xff] %v15156_v8  ;;  %12488 = vmatprep.subr.mxu0 %v15139_v4  ;;  %v15166_v57 = vand.u32 4294901760, %v301_v55  ;;  %v15174_v62 = vsub.f32 %v317_v23, %v15156_v8 }
  0xc2   : > { %v1355_v36 = vand.u32 4294901760, %v1354_v7  ;;  %12526 = vmatprep.subr.mxu1 %v1467_v63  ;;  %v316_v7 = vld [vmem:[#allocation6 + $0x1b0] sm:$0xff]  ;;  %12489 = vmatpush3.msra.mxu0 %v15146_v41  ;;  %v1480_v63 = vsub.f32 %v15137_v6, %v18063_v48  ;;  %v1369_v19 = vand.u32 4294901760, %v1368_v49 }
  0xc3   : > { %18539 = vst [vmem:[#allocation42_spill] sm:$0xff] %v15166_v57  ;;  %18540 = vst [vmem:[#allocation43_spill] sm:$0xff] %v15174_v62  ;;  %12490 = vmatprep.subr.mxu0 %v15156_v8  ;;  %v15182_v30 = vsub.f32 %v301_v55, %v15166_v57  ;;  %v18073_v17 = vand.u32 4294901760, %v15174_v62  ;;  %v15189_v9 = vand.u32 4294901760, %v316_v7  ;;  %v1375_v55 = vsub.f32 %v15164_v1, %v18071_v59  ;;  %v298_v49 = vld [vmem:[#allocation6 + $0x90] sm:$0xff] }
  0xc4   : > { %12527 = vmatpush3.msra.mxu1 %v1355_v36  ;;  %v18069_v36 = vand.u32 4294901760, %v15154_v29  ;;  %12491 = vmatpush3.msra.mxu0 %v15166_v57  ;;  %v1481_v48 = vand.u32 4294901760, %v1480_v63  ;;  %v15226_v34 = vand.u32 4294901760, %v298_v49 }
  0xc5   : > { %18541 = vst [vmem:[#allocation44_spill] sm:$0xff] %v15182_v30  ;;  %12528 = vmatprep.subr.mxu1 %v1474_v18  ;;  %18542 = vst [vmem:[#allocation45_spill] sm:$0xff] %v15189_v9  ;;  %v18076_v24 = vand.u32 4294901760, %v15182_v30  ;;  %v314_v18 = vld [vmem:[#allocation6 + $0x190] sm:$0xff]  ;;  %v15201_v16 = vsub.f32 %v316_v7, %v15189_v9  ;;  %12492 = vmatprep.subr.mxu0 %v15189_v9  ;;  %v1376_v59 = vand.u32 4294901760, %v1375_v55  ;;  %v297_v55 = vld [vmem:[#allocation6 + $0x80] sm:$0xff] }
  0xc6   : > { %v1487_v23 = vsub.f32 %v15154_v29, %v18069_v36  ;;  %12529 = vmatpush3.msra.mxu1 %v1362_v45  ;;  %v1494_v36 = vsub.f32 %v15174_v62, %v18073_v17  ;;  %v15203_v45 = vand.u32 4294901760, %v315_v11  ;;  %v313_v17 = vld [vmem:[#allocation6 + $0x180] sm:$0xff]  ;;  %12493 = vmatpush3.msra.mxu0 %v15195_v56  ;;  %18551 = vst [vmem:[#allocation54_spill] sm:$0xff] %v15226_v34 }
  0xc7   : > { %12530 = vmatprep.subr.mxu1 %v1481_v48  ;;  %18544 = vst [vmem:[#allocation47_spill] sm:$0xff] %v15201_v16  ;;  %v1382_v20 = vsub.f32 %v15182_v30, %v18076_v24  ;;  %v15210_v48 = vsub.f32 %v300_v50, %v15195_v56  ;;  %v18079_v21 = vand.u32 4294901760, %v15201_v16 }
  0xc8   : > { %v1488_v63 = vand.u32 4294901760, %v1487_v23  ;;  %18545 = vst [vmem:[#allocation48_spill] sm:$0xff] %v15203_v45  ;;  %12531 = vmatpush3.msra.mxu1 %v1369_v19  ;;  %v15212_v23 = vand.u32 4294901760, %v299_v43  ;;  %v1495_v7 = vand.u32 4294901760, %v1494_v36  ;;  %v15217_v26 = vsub.f32 %v315_v11, %v15203_v45  ;;  %12494 = vmatprep.subr.mxu0 %v15203_v45  ;;  %v312_v36 = vld [vmem:[#allocation6 + $0x170] sm:$0xff] }
  0xc9   : > { %18546 = vst [vmem:[#allocation49_spill] sm:$0xff] %v15210_v48  ;;  %v15219_v19 = vand.u32 4294901760, %v314_v18  ;;  %v1383_v50 = vand.u32 4294901760, %v1382_v20  ;;  %v18083_v24 = vand.u32 4294901760, %v15210_v48  ;;  %v1501_v11 = vsub.f32 %v15201_v16, %v18079_v21 }
  0xca   : > { %18547 = vst [vmem:[#allocation50_spill] sm:$0xff] %v15212_v23  ;;  %12532 = vmatprep.subr.mxu1 %v1488_v63  ;;  %18548 = vst [vmem:[#allocation51_spill] sm:$0xff] %v15217_v26  ;;  %v15224_v33 = vsub.f32 %v299_v43, %v15212_v23  ;;  %12495 = vmatpush3.msra.mxu0 %v15212_v23  ;;  %v15236_v20 = vand.u32 4294901760, %v313_v17  ;;  %v15246_v21 = vand.u32 4294901760, %v297_v55  ;;  %v18556_v40 = vand.u32 4294901760, %v15217_v26 }
  0xcb   : > { %18549 = vst [vmem:[#allocation52_spill] sm:$0xff] %v15219_v19  ;;  %12533 = vmatpush3.msra.mxu1 %v1376_v59  ;;  %v15234_v63 = vsub.f32 %v314_v18, %v15219_v19  ;;  %12496 = vmatprep.subr.mxu0 %v15219_v19  ;;  %v1389_v43 = vsub.f32 %v15210_v48, %v18083_v24  ;;  %v1502_v18 = vand.u32 4294901760, %v1501_v11  ;;  %v296_v24 = vld [vmem:[#allocation6 + $0x70] sm:$0xff]  ;;  %v15269_v42 = vand.u32 4294901760, %v312_v36 }
  0xcc   : > { %18550 = vst [vmem:[#allocation53_spill] sm:$0xff] %v15224_v33  ;;  %12534 = vmatprep.subr.mxu1 %v1495_v7  ;;  %18553 = vst [vmem:[#allocation56_spill] sm:$0xff] %v15236_v20  ;;  %v18089_v59 = vand.u32 4294901760, %v15224_v33  ;;  %v15244_v7 = vsub.f32 %v298_v49, %v15226_v34  ;;  %12497 = vmatpush3.msra.mxu0 %v15226_v34  ;;  %v1508_v47 = vsub.f32 %v15217_v26, %v18556_v40 }
  0xcd   : > { %18552 = vst [vmem:[#allocation55_spill] sm:$0xff] %v15234_v63  ;;  %12535 = vmatpush3.msra.mxu1 %v1383_v50  ;;  %18555 = vst [vmem:[#allocation58_spill] sm:$0xff] %v15246_v21  ;;  %v18094_v50 = vand.u32 4294901760, %v15234_v63  ;;  %v15254_v54 = vsub.f32 %v313_v17, %v15236_v20  ;;  %12498 = vmatprep.subr.mxu0 %v15236_v20  ;;  %v1390_v49 = vand.u32 4294901760, %v1389_v43  ;;  %v15275_v26 = vand.u32 4294901760, %v296_v24 }
  0xce   : > { %18554 = vst [vmem:[#allocation57_spill] sm:$0xff] %v15244_v7  ;;  %v1396_v60 = vsub.f32 %v15224_v33, %v18089_v59  ;;  %v18097_v10 = vand.u32 4294901760, %v15244_v7  ;;  %v15262_v11 = vsub.f32 %v297_v55, %v15246_v21  ;;  %12499 = vmatpush3.msra.mxu0 %v15246_v21  ;;  %12536 = vmatprep.subr.mxu1 %v1502_v18  ;;  %v1509_v40 = vand.u32 4294901760, %v1508_v47  ;;  %v310_v47 = vld [vmem:[#allocation6 + $0x150] sm:$0xff] }
  0xcf   : > { %18557 = vst [vmem:[#allocation59_spill] sm:$0xff] %v15254_v54  ;;  %v1515_v17 = vsub.f32 %v15234_v63, %v18094_v50  ;;  %v18100_v43 = vand.u32 4294901760, %v15254_v54  ;;  %18559 = vst [vmem:[#allocation61_spill] sm:$0xff] %v15269_v42  ;;  %12537 = vmatpush3.msra.mxu1 %v1390_v49  ;;  %v15281_v63 = vsub.f32 %v312_v36, %v15269_v42  ;;  %v15283_v49 = vand.u32 4294901760, %v311_v22 }
  0xd0   : > { %18558 = vst [vmem:[#allocation60_spill] sm:$0xff] %v15262_v11  ;;  %v1397_v59 = vand.u32 4294901760, %v1396_v60  ;;  %v1403_v55 = vsub.f32 %v15244_v7, %v18097_v10  ;;  %v18105_v33 = vand.u32 4294901760, %v15262_v11  ;;  %18560 = vst [vmem:[#allocation62_spill] sm:$0xff] %v15275_v26  ;;  %12538 = vmatprep.subr.mxu1 %v1509_v40  ;;  %v294_v60 = vld [vmem:[#allocation6 + $0x50] sm:$0xff]  ;;  %12500 = vmatprep.subr.mxu0 %v15269_v42 }
  0xd1   : > { %v1516_v18 = vand.u32 4294901760, %v1515_v17  ;;  %v1522_v50 = vsub.f32 %v15254_v54, %v18100_v43  ;;  %18561 = vst [vmem:[#allocation63_spill] sm:$0xff] %v15281_v63  ;;  %18562 = vst [vmem:[#allocation64_spill] sm:$0xff] %v15283_v49  ;;  %v15290_v40 = vsub.f32 %v296_v24, %v15275_v26  ;;  %v15292_v17 = vand.u32 4294901760, %v295_v53  ;;  %v309_v43 = vld [vmem:[#allocation6 + $0x140] sm:$0xff]  ;;  %12501 = vmatpush3.msra.mxu0 %v15275_v26 }
  0xd2   : > { %12539 = vmatpush3.msra.mxu1 %v1397_v59  ;;  %v1404_v10 = vand.u32 4294901760, %v1403_v55  ;;  %v1410_v7 = vsub.f32 %v15262_v11, %v18105_v33  ;;  %v18110_v54 = vand.u32 4294901760, %v15281_v63  ;;  %v15297_v48 = vsub.f32 %v311_v22, %v15283_v49  ;;  %v293_v55 = vld [vmem:[#allocation6 + $0x40] sm:$0xff]  ;;  %12502 = vmatprep.subr.mxu0 %v15283_v49 }
  0xd3   : > { %18563 = vst [vmem:[#allocation65_spill] sm:$0xff] %v15290_v40  ;;  %18564 = vst [vmem:[#allocation66_spill] sm:$0xff] %v15292_v17  ;;  %12540 = vmatprep.subr.mxu1 %v1516_v18  ;;  %v1523_v36 = vand.u32 4294901760, %v1522_v50  ;;  %v15299_v59 = vand.u32 4294901760, %v310_v47  ;;  %v18115_v33 = vand.u32 4294901760, %v15290_v40  ;;  %v15304_v11 = vsub.f32 %v295_v53, %v15292_v17  ;;  %12503 = vmatpush3.msra.mxu0 %v15292_v17 }
  0xd4   : > { %18565 = vst [vmem:[#allocation67_spill] sm:$0xff] %v15297_v48  ;;  %12541 = vmatpush3.msra.mxu1 %v1404_v10  ;;  %v1411_v24 = vand.u32 4294901760, %v1410_v7  ;;  %v15306_v26 = vand.u32 4294901760, %v294_v60  ;;  %v1529_v22 = vsub.f32 %v15281_v63, %v18110_v54  ;;  %v18118_v50 = vand.u32 4294901760, %v15297_v48 }
  0xd5   : > { %18566 = vst [vmem:[#allocation68_spill] sm:$0xff] %v15299_v59  ;;  %18567 = vst [vmem:[#allocation69_spill] sm:$0xff] %v15304_v11  ;;  %12542 = vmatprep.subr.mxu1 %v1523_v36  ;;  %v15314_v18 = vsub.f32 %v310_v47, %v15299_v59  ;;  %v15316_v10 = vand.u32 4294901760, %v309_v43  ;;  %12504 = vmatprep.subr.mxu0 %v15299_v59  ;;  %v1417_v53 = vsub.f32 %v15290_v40, %v18115_v33 }
  0xd6   : > { %18568 = vst [vmem:[#allocation70_spill] sm:$0xff] %v15306_v26  ;;  %12543 = vmatpush3.msra.mxu1 %v1411_v24  ;;  %v18121_v7 = vand.u32 4294901760, %v15304_v11  ;;  %v15324_v36 = vsub.f32 %v294_v60, %v15306_v26  ;;  %v15326_v54 = vand.u32 4294901760, %v293_v55  ;;  %12505 = vmatpush3.msra.mxu0 %v15306_v26  ;;  %v1530_v47 = vand.u32 4294901760, %v1529_v22 }
  0xd7   : > { %18569 = vst [vmem:[#allocation71_spill] sm:$0xff] %v15314_v18  ;;  %18570 = vst [vmem:[#allocation72_spill] sm:$0xff] %v15316_v10  ;;  %v1536_v63 = vsub.f32 %v15297_v48, %v18118_v50  ;;  %v18124_v24 = vand.u32 4294901760, %v15314_v18  ;;  %v15334_v59 = vsub.f32 %v309_v43, %v15316_v10  ;;  %12506 = vmatprep.subr.mxu0 %v15316_v10  ;;  %v1418_v33 = vand.u32 4294901760, %v1417_v53 }
  0xd8   : > { %18571 = vst [vmem:[#allocation73_spill] sm:$0xff] %v15324_v36  ;;  %18572 = vst [vmem:[#allocation74_spill] sm:$0xff] %v15326_v54  ;;  %v1424_v60 = vsub.f32 %v15304_v11, %v18121_v7  ;;  %v18125_v40 = vand.u32 4294901760, %v15324_v36  ;;  %v15342_v22 = vsub.f32 %v293_v55, %v15326_v54  ;;  %12507 = vmatpush3.msra.mxu0 %v15326_v54  ;;  %12544 = vmatprep.subr.mxu1 %v1530_v47 }
  0xd9   : > { %18573 = vst [vmem:[#allocation75_spill] sm:$0xff] %v15334_v59  ;;  %v1537_v50 = vand.u32 4294901760, %v1536_v63  ;;  %v1543_v43 = vsub.f32 %v15314_v18, %v18124_v24  ;;  %v18129_v48 = vand.u32 4294901760, %v15334_v59  ;;  %12564 = vmatprep.subr.mxu0 %v15044_v46  ;;  %12545 = vmatpush3.msra.mxu1 %v1418_v33 }
  0xda   : > { %18574 = vst [vmem:[#allocation76_spill] sm:$0xff] %v15342_v22  ;;  %v1425_v53 = vand.u32 4294901760, %v1424_v60  ;;  %v1431_v7 = vsub.f32 %v15324_v36, %v18125_v40  ;;  %v18136_v55 = vand.u32 4294901760, %v15342_v22 }
  0xdb   : > { %12546 = vmatprep.subr.mxu1 %v1537_v50  ;;  %v1544_v11 = vand.u32 4294901760, %v1543_v43  ;;  %v1550_v63 = vsub.f32 %v15334_v59, %v18129_v48 }
  0xdc   : > { %12547 = vmatpush3.msra.mxu1 %v1425_v53  ;;  %v1432_v47 = vand.u32 4294901760, %v1431_v7  ;;  %v1438_v24 = vsub.f32 %v15342_v22, %v18136_v55 }
  0xdd   : > { %12548 = vmatprep.subr.mxu1 %v1544_v11  ;;  %v1551_v33 = vand.u32 4294901760, %v1550_v63 }
  0xde   : > { %12549 = vmatpush3.msra.mxu1 %v1432_v47  ;;  %v1439_v60 = vand.u32 4294901760, %v1438_v24 }
  0xdf   : > { %12550 = vmatprep.subr.mxu1 %v1551_v33 }
  0xe0   : > { %12551 = vmatpush3.msra.mxu1 %v1439_v60 }
  0xe1   : > { %12608 = vmatprep.subr.mxu1 %v15039_v31 }
 0x138   : > { %v465_v50 = vpop.f32.mrf.mxu0 }
 0x13a   : > { %v467_v43 = vpop.f32.mrf.mxu0 }
 0x13d   : > { %v476_v40 = vpop.f32.mrf.mxu0 }
 0x13f   : > { %v478_v46 = vpop.f32.mrf.mxu0 }
 0x141   : > { %v650_v36 = vpop.f32.mrf.mxu1 }
 0x142   : > { %v651_v1 = vadd.f32 %v650_v36, %v465_v50 }
 0x143   : > { %v652_v48 = vpop.f32.mrf.mxu1 }
 0x144   : > { %v487_v53 = vpop.f32.mrf.mxu0  ;;  %v653_v29 = vadd.f32 %v652_v48, %v467_v43 }
 0x146   : > { %v489_v7 = vpop.f32.mrf.mxu0 }
 0x147   : > { %v657_v59 = vpop.f32.mrf.mxu1 }
 0x148   : > { %v498_v18 = vpop.f32.mrf.mxu0  ;;  %v658_v45 = vadd.f32 %v657_v59, %v476_v40 }
 0x149   : > { %v659_v54 = vpop.f32.mrf.mxu1 }
 0x14a   : > { %v500_v55 = vpop.f32.mrf.mxu0  ;;  %v660_v57 = vadd.f32 %v659_v54, %v478_v46 }
 0x14d   : > { %v664_v11 = vpop.f32.mrf.mxu1  ;;  %v776_v63 = vpop.f32.mrf.mxu0 }
 0x14e   : > { %v777_v12 = vadd.f32 %v776_v63, %v651_v1  ;;  %v665_v27 = vadd.f32 %v664_v11, %v487_v53 }
 0x14f   : > { %v666_v47 = vpop.f32.mrf.mxu1  ;;  %v778_v24 = vpop.f32.mrf.mxu0 }
 0x150   : > { %v779_v44 = vadd.f32 %v778_v24, %v653_v29  ;;  %v667_v1 = vadd.f32 %v666_v47, %v489_v7 }
 0x153   : > { %v671_v33 = vpop.f32.mrf.mxu1  ;;  %v784_v60 = vpop.f32.mrf.mxu0 }
 0x154   : > { %v785_v39 = vadd.f32 %v784_v60, %v658_v45  ;;  %v672_v54 = vadd.f32 %v671_v33, %v498_v18 }
 0x155   : > { %v673_v22 = vpop.f32.mrf.mxu1  ;;  %v786_v31 = vpop.f32.mrf.mxu0 }
 0x156   : > { %v787_v51 = vadd.f32 %v786_v31, %v660_v57 }
 0x159   : > { %v792_v10 = vpop.f32.mrf.mxu0  ;;  %v890_v26 = vpop.f32.mrf.mxu1 }
 0x15a   : > { %v891_v56 = vadd.f32 %v890_v26, %v777_v12  ;;  %v793_v43 = vadd.f32 %v792_v10, %v665_v27 }
 0x15b   : > { %v794_v17 = vpop.f32.mrf.mxu0  ;;  %v892_v49 = vpop.f32.mrf.mxu1 }
 0x15c   : > { %v893_v8 = vadd.f32 %v892_v49, %v779_v44  ;;  %v795_v46 = vadd.f32 %v794_v17, %v667_v1 }
 0x15f   : > { %v800_v42 = vpop.f32.mrf.mxu0  ;;  %v899_v16 = vpop.f32.mrf.mxu1 }
 0x160   : > { %v900_v36 = vadd.f32 %v899_v16, %v785_v39  ;;  %v674_v39 = vadd.f32 %v673_v22, %v500_v55  ;;  %v801_v27 = vadd.f32 %v800_v42, %v672_v54 }
 0x161   : > { %v802_v21 = vpop.f32.mrf.mxu0  ;;  %v901_v30 = vpop.f32.mrf.mxu1 }
 0x162   : > { %v902_v40 = vadd.f32 %v901_v30, %v787_v51 }
 0x165   : > { %v908_v20 = vpop.f32.mrf.mxu1  ;;  %v1037_v62 = vpop.f32.mrf.mxu0 }
 0x166   : > { %v1038_v14 = vadd.f32 %v1037_v62, %v891_v56  ;;  %v909_v44 = vadd.f32 %v908_v20, %v793_v43 }
 0x167   : > { %v910_v34 = vpop.f32.mrf.mxu1  ;;  %v1039_v19 = vpop.f32.mrf.mxu0 }
 0x168   : > { %v1040_v50 = vadd.f32 %v1039_v19, %v893_v8 }
 0x169   : > { %v1044_v23 = vpop.f32.mrf.mxu0 }
 0x16a   : > { %v917_v6 = vpop.f32.mrf.mxu1  ;;  %v1045_v29 = vadd.f32 %v1044_v23, %v900_v36 }
 0x16b   : > { %v1046_v9 = vpop.f32.mrf.mxu0  ;;  %v918_v19 = vadd.f32 %v917_v6, %v801_v27 }
 0x16c   : > { %v919_v25 = vpop.f32.mrf.mxu1  ;;  %v1047_v62 = vadd.f32 %v1046_v9, %v902_v40 }
 0x16d   : > { %v1051_v41 = vpop.f32.mrf.mxu0 }
 0x16e   : > { %v1146_v4 = vpop.f32.mrf.mxu1  ;;  %v1052_v51 = vadd.f32 %v1051_v41, %v909_v44 }
 0x16f   : > { %v1147_v15 = vadd.f32 %v1146_v4, %v1038_v14  ;;  %v1053_v48 = vpop.f32.mrf.mxu0  ;;  %v911_v4 = vadd.f32 %v910_v34, %v795_v46 }
 0x170   : > { %v1148_v63 = vpop.f32.mrf.mxu1 }
 0x171   : > { %v15361_v26 = vand.u32 4294901760, %v1147_v15  ;;  %v1149_v12 = vadd.f32 %v1148_v63, %v1040_v50  ;;  %v1058_v16 = vpop.f32.mrf.mxu0  ;;  %v1054_v49 = vadd.f32 %v1053_v48, %v911_v4 }
 0x172   : > { %v1153_v56 = vpop.f32.mrf.mxu1  ;;  %v1059_v18 = vadd.f32 %v1058_v16, %v918_v19  ;;  %v18585_v19 = vld [vmem:[#allocation29_spill] sm:$0xff] }
 0x173   : > { %18575 = vst [vmem:[#allocation77_spill] sm:$0xff] %v15361_v26  ;;  %v15364_v45 = vsub.f32 %v1147_v15, %v15361_v26  ;;  %v15366_v31 = vand.u32 4294901760, %v1149_v12  ;;  %v1154_v14 = vadd.f32 %v1153_v56, %v1045_v29  ;;  %v803_v15 = vadd.f32 %v802_v21, %v674_v39  ;;  %v1060_v42 = vpop.f32.mrf.mxu0  ;;  %v18582_v39 = vld [vmem:[#allocation34_spill] sm:$0xff] }
 0x174   : > { %v1155_v8 = vpop.f32.mrf.mxu1 }
 0x175   : > { %v18208_v57 = vand.u32 4294901760, %v15364_v45  ;;  %v15370_v30 = vsub.f32 %v1149_v12, %v15366_v31  ;;  %v15372_v23 = vand.u32 4294901760, %v1154_v14  ;;  %v1156_v9 = vadd.f32 %v1155_v8, %v1047_v62  ;;  %1554 = vmatprep.mubr.f32.mxu1 %v15366_v31  ;;  %v18584_v8 = vld [vmem:[#allocation36_spill] sm:$0xff] }
 0x176   : > { %v1160_v20 = vpop.f32.mrf.mxu1  ;;  %1556 = vmatmul.mubr.f32.vlgmr.msra.gmra.mxu1 %v15361_v26  ;;  %v920_v59 = vadd.f32 %v919_v25, %v803_v15  ;;  %v18624_v26 = vand.u32 4294901760, %v15364_v45 }
 0x177   : > { %18576 = vst [vmem:[#allocation78_spill] sm:$0xff] %v15372_v23  ;;  %v15377_v34 = vsub.f32 %v1154_v14, %v15372_v23  ;;  %v15379_v41 = vand.u32 4294901760, %v1156_v9  ;;  %v1161_v17 = vadd.f32 %v1160_v20, %v1052_v51  ;;  %12609 = vmatpush3.msra.mxu1 %v15041_v38  ;;  %v1270_v21 = vand.u32 4294901760, %v15370_v30  ;;  %v18583_v51 = vld [vmem:[#allocation28_spill] sm:$0xff]  ;;  %v18586_v20 = vld [vmem:[#allocation38_spill] sm:$0xff] }
 0x178   : > { %12610 = vmatprep.subr.mxu1 %v15046_v52  ;;  %v1162_v10 = vpop.f32.mrf.mxu1  ;;  %v1277_v6 = vsub.f32 %v15364_v45, %v18208_v57  ;;  %v1061_v25 = vadd.f32 %v1060_v42, %v920_v59  ;;  %v18588_v59 = vld [vmem:[#allocation40_spill] sm:$0xff]  ;;  %v18617_v57 = vld [vmem:[#allocation57_spill] sm:$0xff] }
 0x179   : > { %18577 = vst [vmem:[#allocation79_spill] sm:$0xff] %v15379_v41  ;;  %v15388_v22 = vsub.f32 %v1156_v9, %v15379_v41  ;;  %v15390_v55 = vand.u32 4294901760, %v1161_v17  ;;  %v1163_v53 = vadd.f32 %v1162_v10, %v1054_v49  ;;  %12611 = vmatpush3.msra.mxu1 %v15052_v2  ;;  %1561 = vmatprep.mubr.f32.mxu1 %v15379_v41  ;;  %v18206_v60 = vand.u32 4294901760, %v15377_v34  ;;  %v18590_v10 = vld [vmem:[#allocation42_spill] sm:$0xff]  ;;  %v18623_v41 = vld [vmem:[#allocation63_spill] sm:$0xff] }
 0x17a   : > { %12612 = vmatprep.subr.mxu1 %v15059_v37  ;;  %v1167_v7 = vpop.f32.mrf.mxu1  ;;  %1563 = vmatmul.mubr.f32.gmra.mxu1 %v15372_v23  ;;  %v1271_v11 = vsub.f32 %v15370_v30, %v1270_v21  ;;  %v1278_v1 = vand.u32 4294901760, %v1277_v6  ;;  %v18622_v23 = vld [vmem:[#allocation74_spill] sm:$0xff] }
 0x17b   : > { %18578 = vst [vmem:[#allocation80_spill] sm:$0xff] %v15390_v55  ;;  %v15397_v47 = vand.u32 4294901760, %v1163_v53  ;;  %v1168_v24 = vadd.f32 %v1167_v7, %v1059_v18  ;;  %12613 = vmatpush3.msra.mxu1 %v15066_v5  ;;  %v18207_v33 = vand.u32 4294901760, %v15388_v22  ;;  %v15403_v36 = vsub.f32 %v1161_v17, %v15390_v55  ;;  %v18587_v17 = vld [vmem:[#allocation30_spill] sm:$0xff]  ;;  %v18589_v18 = vld [vmem:[#allocation31_spill] sm:$0xff] }
 0x17c   : > { %12614 = vmatprep.subr.mxu1 %v15076_v35  ;;  %v1169_v50 = vpop.f32.mrf.mxu1  ;;  %v1272_v48 = vand.u32 4294901760, %v1271_v11  ;;  %v1292_v46 = vsub.f32 %v15377_v34, %v18206_v60  ;;  %v18615_v60 = vld [vmem:[#allocation55_spill] sm:$0xff] }
 0x17d   : > { %18579 = vst [vmem:[#allocation81_spill] sm:$0xff] %v15397_v47  ;;  %v15407_v43 = vsub.f32 %v1163_v53, %v15397_v47  ;;  %v1170_v63 = vadd.f32 %v1169_v50, %v1061_v25  ;;  %12615 = vmatpush3.msra.mxu1 %v15086_v0  ;;  %1568 = vmatprep.mubr.f32.mxu1 %v15397_v47  ;;  %v15414_v29 = vand.u32 4294901760, %v1168_v24  ;;  %v18204_v16 = vand.u32 4294901760, %v15403_v36  ;;  %v18591_v53 = vld [vmem:[#allocation32_spill] sm:$0xff]  ;;  %v18592_v25 = vld [vmem:[#allocation45_spill] sm:$0xff] }
 0x17e   : > { %v1286_v40 = vsub.f32 %v15388_v22, %v18207_v33  ;;  %1273 = vmatprep.mubr.f32.mxu0 %v1272_v48  ;;  %12616 = vmatprep.subr.mxu1 %v15109_v3  ;;  %v1293_v27 = vand.u32 4294901760, %v1292_v46  ;;  %v18594_v50 = vld [vmem:[#allocation33_spill] sm:$0xff]  ;;  %v18596_v48 = vld [vmem:[#allocation35_spill] sm:$0xff]  ;;  %v18600_v46 = vld [vmem:[#allocation52_spill] sm:$0xff] }
 0x17f   : > { %18580 = vst [vmem:[#allocation82_spill] sm:$0xff] %v15414_v29  ;;  %v15417_v12 = vand.u32 4294901760, %v1170_v63  ;;  %1279 = vmatmul.mubr.f32.vlgmr.msra.gmra.mxu0 %v1278_v1  ;;  %1570 = vmatmul.mubr.f32.gmra.mxu1 %v15390_v55  ;;  %v18205_v44 = vand.u32 4294901760, %v15407_v43  ;;  %v15436_v14 = vsub.f32 %v1168_v24, %v15414_v29  ;;  %v1307_v15 = vsub.f32 %v15403_v36, %v18204_v16  ;;  %v18593_v24 = vld [vmem:[#allocation46_spill] sm:$0xff]  ;;  %v18612_v16 = vld [vmem:[#allocation64_spill] sm:$0xff] }
 0x180   : > { %v1287_v54 = vand.u32 4294901760, %v1286_v40  ;;  %12565 = vmatpush3.msra.mxu0 %v15050_v58  ;;  %12617 = vmatpush3.msra.mxu1 %v15115_v13  ;;  %v18597_v1 = vld [vmem:[#allocation50_spill] sm:$0xff]  ;;  %v18616_v33 = vld [vmem:[#allocation68_spill] sm:$0xff] }
 0x181   : > { %18581 = vst [vmem:[#allocation83_spill] sm:$0xff] %v15417_v12  ;;  %v15427_v56 = vsub.f32 %v1170_v63, %v15417_v12  ;;  %12566 = vmatprep.subr.mxu0 %v15057_v28  ;;  %12618 = vmatprep.subr.mxu1 %v15123_v32  ;;  %v1301_v62 = vsub.f32 %v15407_v43, %v18205_v44  ;;  %v18202_v42 = vand.u32 4294901760, %v15436_v14  ;;  %v1308_v6 = vand.u32 4294901760, %v1307_v15  ;;  %v18598_v63 = vld [vmem:[#allocation37_spill] sm:$0xff]  ;;  %v18604_v15 = vld [vmem:[#allocation56_spill] sm:$0xff]  ;;  %v18614_v44 = vld [vmem:[#allocation66_spill] sm:$0xff] }
 0x182   : > { %12567 = vmatpush3.msra.mxu0 %v15064_v61  ;;  %12619 = vmatpush3.msra.mxu1 %v18582_v39  ;;  %v18620_v55 = vld [vmem:[#allocation72_spill] sm:$0xff] }
 0x183   : > { %1288 = vmatprep.mubr.f32.mxu0 %v1287_v54  ;;  %1575 = vmatprep.mubr.f32.mxu1 %v15417_v12  ;;  %v18203_v4 = vand.u32 4294901760, %v15427_v56  ;;  %v1302_v9 = vand.u32 4294901760, %v1301_v62  ;;  %v1322_v11 = vsub.f32 %v15436_v14, %v18202_v42  ;;  %v18599_v54 = vld [vmem:[#allocation39_spill] sm:$0xff]  ;;  %v18601_v62 = vld [vmem:[#allocation54_spill] sm:$0xff]  ;;  %v18609_v42 = vld [vmem:[#allocation49_spill] sm:$0xff] }
 0x184   : > { %12568 = vmatprep.subr.mxu0 %v18583_v51  ;;  %12620 = vmatprep.subr.mxu1 %v18584_v8  ;;  %v18619_v12 = vld [vmem:[#allocation59_spill] sm:$0xff]  ;;  %v18621_v47 = vld [vmem:[#allocation60_spill] sm:$0xff] }
 0x185   : > { %1294 = vmatmul.mubr.f32.gmra.mxu0 %v1293_v27  ;;  %1577 = vmatmul.mubr.f32.gmra.mxu1 %v15414_v29  ;;  %v1316_v49 = vsub.f32 %v15427_v56, %v18203_v4  ;;  %v1323_v40 = vand.u32 4294901760, %v1322_v11  ;;  %v18602_v27 = vld [vmem:[#allocation41_spill] sm:$0xff]  ;;  %v18611_v4 = vld [vmem:[#allocation51_spill] sm:$0xff]  ;;  %v18618_v29 = vld [vmem:[#allocation70_spill] sm:$0xff] }
 0x186   : > { %12569 = vmatpush3.msra.mxu0 %v18585_v19  ;;  %12621 = vmatpush3.msra.mxu1 %v18586_v20  ;;  %v18608_v11 = vld [vmem:[#allocation61_spill] sm:$0xff] }
 0x187   : > { %12570 = vmatprep.subr.mxu0 %v18587_v17  ;;  %12622 = vmatprep.subr.mxu1 %v18588_v59  ;;  %v1317_v7 = vand.u32 4294901760, %v1316_v49  ;;  %v18605_v49 = vld [vmem:[#allocation44_spill] sm:$0xff] }
 0x188   : > { %1846 = vmatprep.mubr.f32.mxu1 %v1270_v21  ;;  %12571 = vmatpush3.msra.mxu0 %v18589_v18  ;;  %v18595_v21 = vld [vmem:[#allocation48_spill] sm:$0xff] }
 0x189   : > { %12623 = vmatpush3.msra.mxu1 %v18590_v10  ;;  %1303 = vmatprep.mubr.f32.mxu0 %v1302_v9  ;;  %v18603_v9 = vld [vmem:[#allocation43_spill] sm:$0xff] }
 0x18a   : > { %12572 = vmatprep.subr.mxu0 %v18591_v53  ;;  %12624 = vmatprep.subr.mxu1 %v18592_v25 }
 0x18b   : > { %1309 = vmatmul.mubr.f32.gmra.mxu0 %v1308_v6  ;;  %12625 = vmatpush3.msra.mxu1 %v18593_v24  ;;  %v18606_v6 = vld [vmem:[#allocation58_spill] sm:$0xff] }
 0x18c   : > { %12573 = vmatpush3.msra.mxu0 %v18594_v50  ;;  %12626 = vmatprep.subr.mxu1 %v18595_v21 }
 0x18d   : > { %12574 = vmatprep.subr.mxu0 %v18596_v48  ;;  %12627 = vmatpush3.msra.mxu1 %v18597_v1 }
 0x18e   : > { %12575 = vmatpush3.msra.mxu0 %v18598_v63  ;;  %1318 = vmatprep.mubr.f32.mxu0 %v1317_v7  ;;  %v18607_v7 = vld [vmem:[#allocation47_spill] sm:$0xff] }
 0x18f   : > { %12576 = vmatprep.subr.mxu0 %v18599_v54  ;;  %12628 = vmatprep.subr.mxu1 %v18600_v46 }
 0x190   : > { %1324 = vmatmul.mubr.f32.gmra.mxu0 %v1323_v40  ;;  %12629 = vmatpush3.msra.mxu1 %v18601_v62  ;;  %v18610_v40 = vld [vmem:[#allocation62_spill] sm:$0xff] }
 0x191   : > { %12577 = vmatpush3.msra.mxu0 %v18602_v27  ;;  %1712 = vmatprep.mubr.f32.mxu0 %v15370_v30  ;;  %v18613_v30 = vld [vmem:[#allocation53_spill] sm:$0xff] }
 0x192   : > { %12578 = vmatprep.subr.mxu0 %v18603_v9  ;;  %12630 = vmatprep.subr.mxu1 %v18604_v15 }
 0x193   : > { %12579 = vmatpush3.msra.mxu0 %v18605_v49  ;;  %12631 = vmatpush3.msra.mxu1 %v18606_v6 }
 0x194   : > { %12580 = vmatprep.subr.mxu0 %v18607_v7  ;;  %12632 = vmatprep.subr.mxu1 %v18608_v11 }
 0x195   : > { %12581 = vmatpush3.msra.mxu0 %v18609_v42  ;;  %12633 = vmatpush3.msra.mxu1 %v18610_v40 }
 0x196   : > { %12582 = vmatprep.subr.mxu0 %v18611_v4  ;;  %12634 = vmatprep.subr.mxu1 %v18612_v16 }
 0x197   : > { %12583 = vmatpush3.msra.mxu0 %v18613_v30  ;;  %12635 = vmatpush3.msra.mxu1 %v18614_v44 }
 0x198   : > { %12584 = vmatprep.subr.mxu0 %v18615_v60  ;;  %12636 = vmatprep.subr.mxu1 %v18616_v33  ;;  %v18625_v60 = vld [vmem:[#allocation26_spill] sm:$0xff]  ;;  %v18626_v33 = vld [vmem:[#allocation65_spill] sm:$0xff] }
 0x199   : > { %12585 = vmatpush3.msra.mxu0 %v18617_v57  ;;  %12637 = vmatpush3.msra.mxu1 %v18618_v29  ;;  %v18627_v57 = vand.u32 4294901760, %v15388_v22 }
 0x19a   : > { %12586 = vmatprep.subr.mxu0 %v18619_v12  ;;  %12638 = vmatprep.subr.mxu1 %v18620_v55  ;;  %v18628_v12 = vld [vmem:[#allocation67_spill] sm:$0xff] }
 0x19b   : > { %12587 = vmatpush3.msra.mxu0 %v18621_v47  ;;  %12639 = vmatpush3.msra.mxu1 %v18622_v23  ;;  %v18629_v47 = vld [vmem:[#allocation69_spill] sm:$0xff] }
 0x19c   : > { %12588 = vmatprep.subr.mxu0 %v18623_v41  ;;  %1850 = vmatmul.mubr.f32.vlgmr.msra.gmra.mxu1 %v18624_v26  ;;  %v18630_v41 = vld [vmem:[#allocation71_spill] sm:$0xff]  ;;  %v18631_v26 = vand.u32 4294901760, %v15377_v34 }
 0x19d   : > { %12696 = vmatprep.subr.mxu1 %v18625_v60  ;;  %12589 = vmatpush3.msra.mxu0 %v18626_v33  ;;  %v18632_v60 = vld [vmem:[#allocation73_spill] sm:$0xff] }
 0x19e   : > { %1857 = vmatprep.mubr.f32.mxu1 %v18627_v57  ;;  %12697 = vmatpush3.msra.mxu1 %v15041_v38  ;;  %v18633_v57 = vand.u32 4294901760, %v15407_v43  ;;  %v18634_v38 = vld [vmem:[#allocation75_spill] sm:$0xff] }
 0x19f   : > { %12590 = vmatprep.subr.mxu0 %v18628_v12  ;;  %12698 = vmatprep.subr.mxu1 %v15046_v52  ;;  %v18635_v52 = vld [vmem:[#allocation76_spill] sm:$0xff] }
 0x1a0   : > { %12591 = vmatpush3.msra.mxu0 %v18629_v47  ;;  %12699 = vmatpush3.msra.mxu1 %v15052_v2  ;;  %v18636_v2 = vand.u32 4294901760, %v15403_v36 }
 0x1a1   : > { %12592 = vmatprep.subr.mxu0 %v18630_v41  ;;  %1861 = vmatmul.mubr.f32.gmra.mxu1 %v18631_v26 }
 0x1a2   : > { %12700 = vmatprep.subr.mxu1 %v15059_v37  ;;  %12593 = vmatpush3.msra.mxu0 %v18632_v60  ;;  %v18637_v37 = vld [vmem:[#allocation27_spill] sm:$0xff] }
 0x1a3   : > { %1868 = vmatprep.mubr.f32.mxu1 %v18633_v57  ;;  %12701 = vmatpush3.msra.mxu1 %v15066_v5  ;;  %v18638_v26 = vand.u32 4294901760, %v18637_v37  ;;  %v18639_v5 = vand.u32 4294901760, %v15427_v56 }
 0x1a4   : > { %12594 = vmatprep.subr.mxu0 %v18634_v38  ;;  %12702 = vmatprep.subr.mxu1 %v15076_v35  ;;  %v18640_v35 = vand.u32 4294901760, %v15050_v58  ;;  %v18644_v58 = vand.u32 4294901760, %v18583_v51  ;;  %v18655_v51 = vand.u32 4294901760, %v18605_v49  ;;  %v362_v49 = vld [vmem:[#allocation6 + $0x3a8] sm:$0xff] }
 0x1a5   : > { %12595 = vmatpush3.msra.mxu0 %v18635_v52  ;;  %12703 = vmatpush3.msra.mxu1 %v15086_v0  ;;  %v18641_v0 = vand.u32 4294901760, %v15057_v28  ;;  %v18645_v28 = vand.u32 4294901760, %v18585_v19  ;;  %v18659_v19 = vand.u32 4294901760, %v18613_v30 }
 0x1a6   : > { %1715 = vmatmul.mubr.f32.vlgmr.msra.gmra.mxu0 %v15364_v45  ;;  %1872 = vmatmul.mubr.f32.gmra.mxu1 %v18636_v2  ;;  %v18642_v45 = vand.u32 4294901760, %v15064_v61  ;;  %v18646_v61 = vand.u32 4294901760, %v18587_v17  ;;  %v359_v2 = vld [vmem:[#allocation6 + $0x390] sm:$0xff] }
 0x1a7   : > { %12652 = vmatprep.subr.mxu0 %v18638_v26  ;;  %12704 = vmatprep.subr.mxu1 %v15109_v3  ;;  %v18643_v3 = vand.u32 4294901760, %v15436_v14 }
 0x1a8   : > { %1721 = vmatprep.mubr.f32.mxu0 %v15388_v22  ;;  %1879 = vmatprep.mubr.f32.mxu1 %v18639_v5  ;;  %v18650_v22 = vand.u32 4294901760, %v18596_v48  ;;  %v18676_v48 = vand.u32 4294901760, %v18630_v41  ;;  %v18683_v41 = vld [vmem:[#allocation83_spill] sm:$0xff]  ;;  %v15664_v5 = vand.u32 4294901760, %v359_v2 }
 0x1a9   : > { %12653 = vmatpush3.msra.mxu0 %v18640_v35  ;;  %12705 = vmatpush3.msra.mxu1 %v15115_v13  ;;  %v18647_v13 = vand.u32 4294901760, %v18589_v18  ;;  %v18663_v18 = vld [vmem:[#allocation57_spill] sm:$0xff]  ;;  %v358_v35 = vld [vmem:[#allocation6 + $0x388] sm:$0xff] }
 0x1aa   : > { %12654 = vmatprep.subr.mxu0 %v18641_v0  ;;  %12706 = vmatprep.subr.mxu1 %v15123_v32  ;;  %v18648_v32 = vand.u32 4294901760, %v18591_v53 }
 0x1ab   : > { %12655 = vmatpush3.msra.mxu0 %v18642_v45  ;;  %12707 = vmatpush3.msra.mxu1 %v18582_v39  ;;  %v18654_v39 = vand.u32 4294901760, %v18603_v9  ;;  %v363_v9 = vld [vmem:[#allocation6 + $0x3b0] sm:$0xff] }
 0x1ac   : > { %1724 = vmatmul.mubr.f32.gmra.mxu0 %v15377_v34  ;;  %1883 = vmatmul.mubr.f32.gmra.mxu1 %v18643_v3  ;;  %v18649_v34 = vand.u32 4294901760, %v18594_v50  ;;  %v18672_v50 = vand.u32 4294901760, %v18626_v33  ;;  %v18680_v33 = vand.u32 4294901760, %v18634_v38 }
 0x1ad   : > { %12656 = vmatprep.subr.mxu0 %v18644_v58  ;;  %12708 = vmatprep.subr.mxu1 %v18584_v8  ;;  %v18657_v8 = vand.u32 4294901760, %v18609_v42  ;;  %v18664_v42 = vand.u32 4294901760, %v18663_v18  ;;  %v15674_v58 = vand.u32 4294901760, %v358_v35 }
 0x1ae   : > { %1730 = vmatprep.mubr.f32.mxu0 %v15407_v43  ;;  %12657 = vmatpush3.msra.mxu0 %v18645_v28  ;;  %v18651_v43 = vand.u32 4294901760, %v18598_v63  ;;  %v18679_v63 = vld [vmem:[#allocation81_spill] sm:$0xff]  ;;  %v357_v28 = vld [vmem:[#allocation6 + $0x380] sm:$0xff] }
 0x1af   : > { %12709 = vmatpush3.msra.mxu1 %v18586_v20  ;;  %2174 = vmatprep.mubr.f32.mxu1 %v15366_v31  ;;  %v18660_v20 = vld [vmem:[#allocation55_spill] sm:$0xff] }
 0x1b0   : > { %12658 = vmatprep.subr.mxu0 %v18646_v61  ;;  %12710 = vmatprep.subr.mxu1 %v18588_v59  ;;  %v18661_v17 = vand.u32 4294901760, %v18660_v20  ;;  %v18662_v59 = vld [vmem:[#allocation68_spill] sm:$0xff]  ;;  %v354_v20 = vld [vmem:[#allocation6 + $0x368] sm:$0xff] }
 0x1b1   : > { %12659 = vmatpush3.msra.mxu0 %v18647_v13  ;;  %12711 = vmatpush3.msra.mxu1 %v18590_v10  ;;  %v18665_v10 = vld [vmem:[#allocation59_spill] sm:$0xff] }
 0x1b2   : > { %1733 = vmatmul.mubr.f32.gmra.mxu0 %v15403_v36  ;;  %12660 = vmatprep.subr.mxu0 %v18648_v32  ;;  %v18652_v36 = vand.u32 4294901760, %v18599_v54  ;;  %v18681_v54 = vand.u32 4294901760, %v18635_v52  ;;  %v15682_v32 = vsub.f32 %v359_v2, %v15664_v5 }
 0x1b3   : > { %12712 = vmatprep.subr.mxu1 %v18592_v25  ;;  %1739 = vmatprep.mubr.f32.mxu0 %v15427_v56  ;;  %v18653_v56 = vand.u32 4294901760, %v18602_v27 }
 0x1b4   : > { %12661 = vmatpush3.msra.mxu0 %v18649_v34  ;;  %12713 = vmatpush3.msra.mxu1 %v18593_v24  ;;  %v18671_v24 = vld [vmem:[#allocation77_spill] sm:$0xff]  ;;  %18691 = vst [vmem:[#allocation30_spill] sm:$0xff] %v15682_v32  ;;  %v15684_v34 = vand.u32 4294901760, %v357_v28 }
 0x1b5   : > { %12662 = vmatprep.subr.mxu0 %v18650_v22  ;;  %12714 = vmatprep.subr.mxu1 %v18595_v21  ;;  %v18673_v21 = vld [vmem:[#allocation79_spill] sm:$0xff]  ;;  %v356_v22 = vld [vmem:[#allocation6 + $0x378] sm:$0xff] }
 0x1b6   : > { %12663 = vmatpush3.msra.mxu0 %v18651_v43  ;;  %12715 = vmatpush3.msra.mxu1 %v18597_v1  ;;  %v18678_v1 = vand.u32 4294901760, %v18632_v60  ;;  %v360_v60 = vld [vmem:[#allocation6 + $0x398] sm:$0xff] }
 0x1b7   : > { %1742 = vmatmul.mubr.f32.gmra.mxu0 %v15436_v14  ;;  %12664 = vmatprep.subr.mxu0 %v18652_v36  ;;  %v18656_v14 = vand.u32 4294901760, %v18607_v7  ;;  %v15644_v7 = vand.u32 4294901760, %v362_v49  ;;  %v15657_v52 = vand.u32 4294901760, %v360_v60 }
 0x1b8   : > { %12716 = vmatprep.subr.mxu1 %v18600_v46  ;;  %12665 = vmatpush3.msra.mxu0 %v18653_v56  ;;  %v18685_v46 = vmov 0.0  }
 0x1b9   : > { %2049 = vmatprep.mubr.f32.mxu0 %v15366_v31  ;;  %12717 = vmatpush3.msra.mxu1 %v18601_v62  ;;  %v18658_v31 = vand.u32 4294901760, %v18611_v4  ;;  %v18666_v4 = vand.u32 4294901760, %v18665_v10  ;;  %v364_v62 = vld [vmem:[#allocation6 + $0x3b8] sm:$0xff]  ;;  %v15655_v38 = vsub.f32 %v362_v49, %v15644_v7  ;;  %v15672_v3 = vsub.f32 %v360_v60, %v15657_v52  ;;  %v353_v10 = vld [vmem:[#allocation6 + $0x360] sm:$0xff] }
 0x1ba   : > { %12666 = vmatprep.subr.mxu0 %v18654_v39  ;;  %12718 = vmatprep.subr.mxu1 %v18604_v15  ;;  %v15637_v27 = vand.u32 4294901760, %v364_v62  ;;  %v15639_v15 = vand.u32 4294901760, %v363_v9  ;;  %v15692_v39 = vsub.f32 %v358_v35, %v15674_v58 }
 0x1bb   : > { %12667 = vmatpush3.msra.mxu0 %v18655_v51  ;;  %12719 = vmatpush3.msra.mxu1 %v18606_v6  ;;  %18688 = vst [vmem:[#allocation36_spill] sm:$0xff] %v15655_v38  ;;  %v18238_v45 = vand.u32 4294901760, %v15655_v38  ;;  %18690 = vst [vmem:[#allocation38_spill] sm:$0xff] %v15672_v3  ;;  %v18235_v56 = vand.u32 4294901760, %v15672_v3  ;;  %v355_v51 = vld [vmem:[#allocation6 + $0x370] sm:$0xff] }
 0x1bc   : > { %12668 = vmatprep.subr.mxu0 %v18656_v14  ;;  %12720 = vmatprep.subr.mxu1 %v18608_v11  ;;  %18686 = vst [vmem:[#allocation34_spill] sm:$0xff] %v15637_v27  ;;  %v15642_v6 = vsub.f32 %v364_v62, %v15637_v27  ;;  %v361_v11 = vld [vmem:[#allocation6 + $0x3a0] sm:$0xff]  ;;  %18692 = vst [vmem:[#allocation40_spill] sm:$0xff] %v15692_v39  ;;  %v18233_v18 = vand.u32 4294901760, %v15692_v39 }
 0x1bd   : > { %12669 = vmatpush3.msra.mxu0 %v18657_v8  ;;  %12721 = vmatpush3.msra.mxu1 %v18610_v40  ;;  %v15648_v40 = vsub.f32 %v363_v9, %v15639_v15  ;;  %v15650_v30 = vand.u32 4294901760, %v361_v11  ;;  %v2358_v36 = vsub.f32 %v15655_v38, %v18238_v45  ;;  %v349_v62 = vld [vmem:[#allocation6 + $0x340] sm:$0xff] }
 0x1be   : > { %12670 = vmatprep.subr.mxu0 %v18658_v31  ;;  %12722 = vmatprep.subr.mxu1 %v18612_v16  ;;  %v18667_v16 = vld [vmem:[#allocation60_spill] sm:$0xff]  ;;  %18687 = vst [vmem:[#allocation28_spill] sm:$0xff] %v15642_v6  ;;  %v18241_v57 = vand.u32 4294901760, %v15642_v6  ;;  %v18234_v31 = vand.u32 4294901760, %v15682_v32 }
 0x1bf   : > { %12671 = vmatpush3.msra.mxu0 %v18659_v19  ;;  %12723 = vmatpush3.msra.mxu1 %v18614_v44  ;;  %v18668_v53 = vand.u32 4294901760, %v18667_v16  ;;  %v18669_v44 = vld [vmem:[#allocation63_spill] sm:$0xff]  ;;  %v18239_v37 = vand.u32 4294901760, %v15648_v40  ;;  %v15662_v26 = vsub.f32 %v361_v11, %v15650_v30  ;;  %v15700_v19 = vsub.f32 %v357_v28, %v15684_v34 }
 0x1c0   : > { %12672 = vmatprep.subr.mxu0 %v18661_v17  ;;  %12724 = vmatprep.subr.mxu1 %v18662_v59  ;;  %v18670_v25 = vand.u32 4294901760, %v18669_v44  ;;  %v2346_v0 = vsub.f32 %v15642_v6, %v18241_v57  ;;  %v2359_v17 = vand.u32 4294901760, %v2358_v36  ;;  %v2370_v59 = vsub.f32 %v15672_v3, %v18235_v56 }
 0x1c1   : > { %12673 = vmatpush3.msra.mxu0 %v18664_v42  ;;  %12725 = vmatpush3.msra.mxu1 %v18618_v29  ;;  %v18674_v29 = vand.u32 4294901760, %v18628_v12  ;;  %v18684_v12 = vld [vmem:[#allocation82_spill] sm:$0xff]  ;;  %18689 = vst [vmem:[#allocation29_spill] sm:$0xff] %v15662_v26  ;;  %v2352_v61 = vsub.f32 %v15648_v40, %v18239_v37  ;;  %v18237_v13 = vand.u32 4294901760, %v15662_v26  ;;  %18693 = vst [vmem:[#allocation31_spill] sm:$0xff] %v15700_v19  ;;  %v15707_v42 = vand.u32 4294901760, %v356_v22 }
 0x1c2   : > { %12674 = vmatprep.subr.mxu0 %v18666_v4  ;;  %12726 = vmatprep.subr.mxu1 %v18620_v55  ;;  %v18675_v55 = vand.u32 4294901760, %v18629_v47  ;;  %v18682_v47 = vld [vmem:[#allocation80_spill] sm:$0xff]  ;;  %v2347_v43 = vand.u32 4294901760, %v2346_v0  ;;  %v2376_v16 = vsub.f32 %v15682_v32, %v18234_v31  ;;  %v15713_v44 = vand.u32 4294901760, %v355_v51  ;;  %v338_v37 = vld [vmem:[#allocation6 + $0x2e8] sm:$0xff] }
 0x1c3   : > { %12675 = vmatpush3.msra.mxu0 %v18668_v53  ;;  %12727 = vmatpush3.msra.mxu1 %v18622_v23  ;;  %v18677_v23 = vld [vmem:[#allocation78_spill] sm:$0xff]  ;;  %v2353_v14 = vand.u32 4294901760, %v2352_v61  ;;  %v2364_v8 = vsub.f32 %v15662_v26, %v18237_v13  ;;  %v18231_v53 = vand.u32 4294901760, %v15700_v19  ;;  %v15764_v36 = vand.u32 4294901760, %v349_v62 }
 0x1c4   : > { %12676 = vmatprep.subr.mxu0 %v18670_v25  ;;  %2176 = vmatmul.mubr.f32.vlgmr.msra.gmra.mxu1 %v18671_v24  ;;  %v352_v25 = vld [vmem:[#allocation6 + $0x358] sm:$0xff] }
 0x1c5   : > { %12677 = vmatpush3.msra.mxu0 %v18672_v50  ;;  %2181 = vmatprep.mubr.f32.mxu1 %v18673_v21  ;;  %v2365_v4 = vand.u32 4294901760, %v2364_v8  ;;  %v2382_v50 = vsub.f32 %v15692_v39, %v18233_v18  ;;  %18704 = vst [vmem:[#allocation52_spill] sm:$0xff] %v15764_v36  ;;  %v340_v18 = vld [vmem:[#allocation6 + $0x2f8] sm:$0xff] }
 0x1c6   : > { %12678 = vmatprep.subr.mxu0 %v18674_v29  ;;  %2348 = vmatprep.subr.mxu1 %v2347_v43  ;;  %v15721_v29 = vand.u32 4294901760, %v354_v20  ;;  %v15867_v57 = vand.u32 4294901760, %v340_v18 }
 0x1c7   : > { %12679 = vmatpush3.msra.mxu0 %v18675_v55  ;;  %2354 = vmatpush1.msra.mxu1 %v2353_v14  ;;  %v351_v55 = vld [vmem:[#allocation6 + $0x350] sm:$0xff] }
 0x1c8   : > { %12680 = vmatprep.subr.mxu0 %v18676_v48  ;;  %2183 = vmatmul.mubr.f32.gmra.mxu1 %v18677_v23  ;;  %v2377_v48 = vand.u32 4294901760, %v2376_v16  ;;  %v15744_v60 = vand.u32 4294901760, %v351_v55  ;;  %18723 = vst [vmem:[#allocation65_spill] sm:$0xff] %v15867_v57 }
 0x1c9   : > { %12681 = vmatpush3.msra.mxu0 %v18678_v1  ;;  %2188 = vmatprep.mubr.f32.mxu1 %v18679_v63  ;;  %v15728_v1 = vsub.f32 %v355_v51, %v15713_v44  ;;  %v348_v51 = vld [vmem:[#allocation6 + $0x338] sm:$0xff] }
 0x1ca   : > { %12682 = vmatprep.subr.mxu0 %v18680_v33  ;;  %2360 = vmatprep.subr.mxu1 %v2359_v17  ;;  %v350_v33 = vld [vmem:[#allocation6 + $0x348] sm:$0xff]  ;;  %18700 = vst [vmem:[#allocation35_spill] sm:$0xff] %v15744_v60  ;;  %v15762_v43 = vsub.f32 %v351_v55, %v15744_v60 }
 0x1cb   : > { %12683 = vmatpush3.msra.mxu0 %v18681_v54  ;;  %2366 = vmatpush1.msra.mxu1 %v2365_v4  ;;  %18695 = vst [vmem:[#allocation32_spill] sm:$0xff] %v15728_v1  ;;  %v2383_v54 = vand.u32 4294901760, %v2382_v50  ;;  %v18228_v49 = vand.u32 4294901760, %v15728_v1  ;;  %v15754_v28 = vand.u32 4294901760, %v350_v33 }
 0x1cc   : > { %2051 = vmatmul.mubr.f32.vlgmr.msra.gmra.mxu0 %v18671_v24  ;;  %2190 = vmatmul.mubr.f32.gmra.mxu1 %v18682_v47  ;;  %v2371_v24 = vand.u32 4294901760, %v2370_v59  ;;  %18703 = vst [vmem:[#allocation39_spill] sm:$0xff] %v15762_v43  ;;  %v347_v59 = vld [vmem:[#allocation6 + $0x330] sm:$0xff]  ;;  %v18224_v16 = vand.u32 4294901760, %v15762_v43 }
 0x1cd   : > { %2056 = vmatprep.mubr.f32.mxu0 %v18673_v21  ;;  %2195 = vmatprep.mubr.f32.mxu1 %v18683_v41  ;;  %v15719_v21 = vsub.f32 %v356_v22, %v15707_v42  ;;  %18702 = vst [vmem:[#allocation37_spill] sm:$0xff] %v15754_v28  ;;  %v2400_v61 = vsub.f32 %v15728_v1, %v18228_v49 }
 0x1ce   : > { %2203 = vmatprep.subr.mxu0 %v15637_v27  ;;  %2372 = vmatprep.subr.mxu1 %v2371_v24  ;;  %v15772_v17 = vsub.f32 %v350_v33, %v15754_v28  ;;  %v346_v24 = vld [vmem:[#allocation6 + $0x328] sm:$0xff]  ;;  %v345_v33 = vld [vmem:[#allocation6 + $0x320] sm:$0xff] }
 0x1cf   : > { %2205 = vmatpush1.msra.mxu0 %v15639_v15  ;;  %18694 = vst [vmem:[#allocation42_spill] sm:$0xff] %v15719_v21  ;;  %2378 = vmatpush1.msra.mxu1 %v2377_v48 }
 0x1d0   : > { %2058 = vmatmul.mubr.f32.gmra.mxu0 %v18677_v23  ;;  %2197 = vmatmul.mubr.f32.gmra.mxu1 %v18684_v12  ;;  %v2388_v23 = vsub.f32 %v15700_v19, %v18231_v53  ;;  %18705 = vst [vmem:[#allocation54_spill] sm:$0xff] %v15772_v17  ;;  %v18226_v48 = vand.u32 4294901760, %v15772_v17 }
 0x1d1   : > { %2063 = vmatprep.mubr.f32.mxu0 %v18679_v63  ;;  %2567 = vmatprep.mubr.f32.mxu1 %v18685_v46  ;;  %v15730_v63 = vand.u32 4294901760, %v353_v10 }
 0x1d2   : > { %2207 = vmatprep.subr.mxu0 %v15644_v7  ;;  %v2389_v9 = vand.u32 4294901760, %v2388_v23  ;;  %2384 = vmatprep.subr.mxu1 %v2383_v54  ;;  %v15787_v23 = vand.u32 4294901760, %v348_v51 }
 0x1d3   : > { %2209 = vmatpush1.msra.mxu0 %v15650_v30  ;;  %18696 = vst [vmem:[#allocation45_spill] sm:$0xff] %v15730_v63  ;;  %v15742_v11 = vsub.f32 %v353_v10, %v15730_v63  ;;  %v2401_v10 = vand.u32 4294901760, %v2400_v61  ;;  %v344_v61 = vld [vmem:[#allocation6 + $0x318] sm:$0xff] }
 0x1d4   : > { %2065 = vmatmul.mubr.f32.gmra.mxu0 %v18682_v47  ;;  %2211 = vmatprep.subr.mxu0 %v15657_v52  ;;  %v18230_v47 = vand.u32 4294901760, %v15719_v21  ;;  %18707 = vst [vmem:[#allocation43_spill] sm:$0xff] %v15787_v23 }
 0x1d5   : > { %2070 = vmatprep.mubr.f32.mxu0 %v18683_v41  ;;  %2213 = vmatpush1.msra.mxu0 %v15664_v5  ;;  %v15735_v41 = vsub.f32 %v354_v20, %v15721_v29  ;;  %18699 = vst [vmem:[#allocation48_spill] sm:$0xff] %v15742_v11  ;;  %v18225_v22 = vand.u32 4294901760, %v15742_v11 }
 0x1d6   : > { %2215 = vmatprep.subr.mxu0 %v15674_v58  ;;  %v2394_v2 = vsub.f32 %v15719_v21, %v18230_v47  ;;  %2390 = vmatpush1.msra.mxu1 %v2389_v9 }
 0x1d7   : > { %2217 = vmatpush1.msra.mxu0 %v15684_v34  ;;  %18697 = vst [vmem:[#allocation46_spill] sm:$0xff] %v15735_v41  ;;  %v18227_v35 = vand.u32 4294901760, %v15735_v41  ;;  %v2412_v4 = vsub.f32 %v15742_v11, %v18225_v22 }
 0x1d8   : > { %2072 = vmatmul.mubr.f32.gmra.mxu0 %v18684_v12  ;;  %2219 = vmatprep.subr.mxu0 %v15707_v42  ;;  %v15737_v12 = vand.u32 4294901760, %v352_v25  ;;  %v2395_v14 = vand.u32 4294901760, %v2394_v2  ;;  %v15793_v2 = vand.u32 4294901760, %v347_v59 }
 0x1d9   : > { %2298 = vmatprep.mubr.f32.mxu0 %v18685_v46  ;;  %2221 = vmatpush1.msra.mxu0 %v15713_v44  ;;  %v2406_v8 = vsub.f32 %v15735_v41, %v18227_v35  ;;  %v2413_v54 = vand.u32 4294901760, %v2412_v4  ;;  %v343_v4 = vld [vmem:[#allocation6 + $0x310] sm:$0xff] }
 0x1da   : > { %18698 = vst [vmem:[#allocation33_spill] sm:$0xff] %v15737_v12  ;;  %2223 = vmatprep.subr.mxu0 %v15721_v29  ;;  %v15752_v0 = vsub.f32 %v352_v25, %v15737_v12  ;;  %v15780_v25 = vsub.f32 %v349_v62, %v15764_v36  ;;  %2396 = vmatprep.subr.mxu1 %v2395_v14  ;;  %18708 = vst [vmem:[#allocation56_spill] sm:$0xff] %v15793_v2  ;;  %v15824_v53 = vand.u32 4294901760, %v343_v4 }
 0x1db   : > { %2225 = vmatpush1.msra.mxu0 %v15730_v63  ;;  %v2407_v50 = vand.u32 4294901760, %v2406_v8  ;;  %2402 = vmatpush1.msra.mxu1 %v2401_v10  ;;  %v2424_v62 = vsub.f32 %v15762_v43, %v18224_v16  ;;  %v2430_v8 = vsub.f32 %v15772_v17, %v18226_v48  ;;  %v15801_v10 = vand.u32 4294901760, %v346_v24  ;;  %v342_v48 = vld [vmem:[#allocation6 + $0x308] sm:$0xff] }
 0x1dc   : > { %18701 = vst [vmem:[#allocation50_spill] sm:$0xff] %v15752_v0  ;;  %2227 = vmatprep.subr.mxu0 %v15737_v12  ;;  %v18223_v20 = vand.u32 4294901760, %v15752_v0  ;;  %18706 = vst [vmem:[#allocation41_spill] sm:$0xff] %v15780_v25  ;;  %v18229_v9 = vand.u32 4294901760, %v15780_v25 }
 0x1dd   : > { %2229 = vmatpush1.msra.mxu0 %v15744_v60  ;;  %2408 = vmatprep.subr.mxu1 %v2407_v50  ;;  %18710 = vst [vmem:[#allocation58_spill] sm:$0xff] %v15801_v10  ;;  %v2425_v16 = vand.u32 4294901760, %v2424_v62  ;;  %v15808_v50 = vsub.f32 %v347_v59, %v15793_v2  ;;  %v15815_v49 = vsub.f32 %v346_v24, %v15801_v10  ;;  %v341_v62 = vld [vmem:[#allocation6 + $0x300] sm:$0xff]  ;;  %18716 = vst [vmem:[#allocation64_spill] sm:$0xff] %v15824_v53 }
 0x1de   : > { %2231 = vmatprep.subr.mxu0 %v15754_v28  ;;  %v2418_v55 = vsub.f32 %v15752_v0, %v18223_v20  ;;  %v15799_v20 = vsub.f32 %v348_v51, %v15787_v23  ;;  %2414 = vmatpush1.msra.mxu1 %v2413_v54  ;;  %v2436_v22 = vsub.f32 %v15780_v25, %v18229_v9  ;;  %v2431_v51 = vand.u32 4294901760, %v2430_v8 }
 0x1df   : > { %2233 = vmatpush1.msra.mxu0 %v15764_v36  ;;  %18711 = vst [vmem:[#allocation47_spill] sm:$0xff] %v15808_v50  ;;  %18713 = vst [vmem:[#allocation49_spill] sm:$0xff] %v15815_v49  ;;  %v15817_v54 = vand.u32 4294901760, %v344_v61  ;;  %v18236_v9 = vand.u32 4294901760, %v15808_v50 }
 0x1e0   : > { %v2419_v14 = vand.u32 4294901760, %v2418_v55  ;;  %18709 = vst [vmem:[#allocation44_spill] sm:$0xff] %v15799_v20  ;;  %2235 = vmatprep.subr.mxu0 %v15787_v23  ;;  %v15810_v55 = vand.u32 4294901760, %v345_v33  ;;  %v18232_v35 = vand.u32 4294901760, %v15799_v20  ;;  %v2437_v59 = vand.u32 4294901760, %v2436_v22 }
 0x1e1   : > { %2237 = vmatpush1.msra.mxu0 %v15793_v2  ;;  %18714 = vst [vmem:[#allocation62_spill] sm:$0xff] %v15817_v54  ;;  %v15832_v8 = vsub.f32 %v344_v61, %v15817_v54  ;;  %v15834_v22 = vand.u32 4294901760, %v342_v48 }
 0x1e2   : > { %18712 = vst [vmem:[#allocation61_spill] sm:$0xff] %v15810_v55  ;;  %2420 = vmatprep.subr.mxu1 %v2419_v14  ;;  %2239 = vmatprep.subr.mxu0 %v15801_v10  ;;  %v15822_v47 = vsub.f32 %v345_v33, %v15810_v55  ;;  %v2442_v24 = vsub.f32 %v15799_v20, %v18232_v35  ;;  %v18240_v14 = vand.u32 4294901760, %v15815_v49  ;;  %v15844_v35 = vand.u32 4294901760, %v341_v62 }
 0x1e3   : > { %2426 = vmatpush1.msra.mxu1 %v2425_v16  ;;  %2241 = vmatpush1.msra.mxu0 %v15810_v55  ;;  %18717 = vst [vmem:[#allocation53_spill] sm:$0xff] %v15832_v8  ;;  %18718 = vst [vmem:[#allocation66_spill] sm:$0xff] %v15834_v22  ;;  %v2448_v16 = vsub.f32 %v15808_v50, %v18236_v9  ;;  %v15852_v56 = vsub.f32 %v342_v48, %v15834_v22  ;;  %v339_v9 = vld [vmem:[#allocation6 + $0x2f0] sm:$0xff] }
 0x1e4   : > { %18715 = vst [vmem:[#allocation51_spill] sm:$0xff] %v15822_v47  ;;  %2432 = vmatprep.subr.mxu1 %v2431_v51  ;;  %2243 = vmatprep.subr.mxu0 %v15817_v54  ;;  %v18244_v33 = vand.u32 4294901760, %v15822_v47  ;;  %v15842_v51 = vsub.f32 %v343_v4, %v15824_v53  ;;  %18720 = vst [vmem:[#allocation72_spill] sm:$0xff] %v15844_v35  ;;  %v2443_v61 = vand.u32 4294901760, %v2442_v24  ;;  %v15873_v50 = vand.u32 4294901760, %v339_v9 }
 0x1e5   : > { %2438 = vmatpush1.msra.mxu1 %v2437_v59  ;;  %2245 = vmatpush1.msra.mxu0 %v15824_v53  ;;  %v2454_v31 = vsub.f32 %v15815_v49, %v18240_v14  ;;  %v18249_v59 = vand.u32 4294901760, %v15832_v8  ;;  %18721 = vst [vmem:[#allocation74_spill] sm:$0xff] %v15852_v56  ;;  %v2449_v4 = vand.u32 4294901760, %v2448_v16  ;;  %v15860_v24 = vsub.f32 %v341_v62, %v15844_v35  ;;  %v337_v49 = vld [vmem:[#allocation6 + $0x2e0] sm:$0xff] }
 0x1e6   : > { %18719 = vst [vmem:[#allocation70_spill] sm:$0xff] %v15842_v51  ;;  %2247 = vmatprep.subr.mxu0 %v15834_v22  ;;  %v2460_v13 = vsub.f32 %v15822_v47, %v18244_v33  ;;  %v18252_v45 = vand.u32 4294901760, %v15842_v51  ;;  %2444 = vmatprep.subr.mxu1 %v2443_v61  ;;  %v18255_v16 = vand.u32 4294901760, %v15852_v56  ;;  %18724 = vst [vmem:[#allocation67_spill] sm:$0xff] %v15873_v50 }
 0x1e7   : > { %18722 = vst [vmem:[#allocation26_spill] sm:$0xff] %v15860_v24  ;;  %2249 = vmatpush1.msra.mxu0 %v15844_v35  ;;  %v2455_v14 = vand.u32 4294901760, %v2454_v31  ;;  %v2466_v48 = vsub.f32 %v15832_v8, %v18249_v59  ;;  %2450 = vmatpush1.msra.mxu1 %v2449_v4  ;;  %v18260_v47 = vand.u32 4294901760, %v15860_v24  ;;  %v336_v31 = vld [vmem:[#allocation6 + $0x2d8] sm:$0xff]  ;;  %v15879_v8 = vsub.f32 %v340_v18, %v15867_v57 }
 0x1e8   : > { %v2461_v33 = vand.u32 4294901760, %v2460_v13  ;;  %v2472_v62 = vsub.f32 %v15842_v51, %v18252_v45  ;;  %v2478_v59 = vsub.f32 %v15852_v56, %v18255_v16  ;;  %v15881_v4 = vand.u32 4294901760, %v338_v37  ;;  %v335_v13 = vld [vmem:[#allocation6 + $0x2d0] sm:$0xff]  ;;  %2251 = vmatprep.subr.mxu0 %v15867_v57  ;;  %v334_v16 = vld [vmem:[#allocation6 + $0x2c8] sm:$0xff] }
 0x1e9   : > { %2456 = vmatprep.subr.mxu1 %v2455_v14  ;;  %v2467_v61 = vand.u32 4294901760, %v2466_v48  ;;  %18725 = vst [vmem:[#allocation69_spill] sm:$0xff] %v15879_v8  ;;  %v2484_v51 = vsub.f32 %v15860_v24, %v18260_v47  ;;  %v15888_v14 = vsub.f32 %v339_v9, %v15873_v50  ;;  %v15890_v48 = vand.u32 4294901760, %v337_v49  ;;  %2253 = vmatpush1.msra.mxu0 %v15873_v50 }
 0x1ea   : > { %18726 = vst [vmem:[#allocation71_spill] sm:$0xff] %v15881_v4  ;;  %2462 = vmatpush1.msra.mxu1 %v2461_v33  ;;  %v2473_v45 = vand.u32 4294901760, %v2472_v62  ;;  %v2479_v18 = vand.u32 4294901760, %v2478_v59  ;;  %v18265_v56 = vand.u32 4294901760, %v15879_v8  ;;  %v15895_v20 = vsub.f32 %v338_v37, %v15881_v4  ;;  %v333_v62 = vld [vmem:[#allocation6 + $0x2c0] sm:$0xff]  ;;  %2255 = vmatprep.subr.mxu0 %v15881_v4 }
 0x1eb   : > { %18727 = vst [vmem:[#allocation73_spill] sm:$0xff] %v15888_v14  ;;  %18728 = vst [vmem:[#allocation75_spill] sm:$0xff] %v15890_v48  ;;  %2468 = vmatprep.subr.mxu1 %v2467_v61  ;;  %v15897_v33 = vand.u32 4294901760, %v336_v31  ;;  %v2485_v9 = vand.u32 4294901760, %v2484_v51  ;;  %v18270_v47 = vand.u32 4294901760, %v15888_v14  ;;  %v15902_v24 = vsub.f32 %v337_v49, %v15890_v48  ;;  %2257 = vmatpush1.msra.mxu0 %v15890_v48 }
 0x1ec   : > { %18729 = vst [vmem:[#allocation76_spill] sm:$0xff] %v15895_v20  ;;  %2474 = vmatpush1.msra.mxu1 %v2473_v45  ;;  %v15904_v50 = vand.u32 4294901760, %v335_v13  ;;  %v2490_v37 = vsub.f32 %v15879_v8, %v18265_v56  ;;  %v18273_v59 = vand.u32 4294901760, %v15895_v20  ;;  %v15914_v45 = vand.u32 4294901760, %v334_v16 }
 0x1ed   : > { %18730 = vst [vmem:[#allocation27_spill] sm:$0xff] %v15897_v33  ;;  %18731 = vst [vmem:[#allocation55_spill] sm:$0xff] %v15902_v24  ;;  %2480 = vmatprep.subr.mxu1 %v2479_v18  ;;  %v15912_v61 = vsub.f32 %v336_v31, %v15897_v33  ;;  %2259 = vmatprep.subr.mxu0 %v15897_v33  ;;  %v2496_v49 = vsub.f32 %v15888_v14, %v18270_v47  ;;  %v18276_v51 = vand.u32 4294901760, %v15902_v24 }
 0x1ee   : > { %18732 = vst [vmem:[#allocation68_spill] sm:$0xff] %v15904_v50  ;;  %18734 = vst [vmem:[#allocation59_spill] sm:$0xff] %v15914_v45  ;;  %2486 = vmatpush1.msra.mxu1 %v2485_v9  ;;  %v15922_v18 = vsub.f32 %v335_v13, %v15904_v50  ;;  %v15924_v56 = vand.u32 4294901760, %v333_v62  ;;  %2261 = vmatpush1.msra.mxu0 %v15904_v50  ;;  %v2491_v31 = vand.u32 4294901760, %v2490_v37 }
 0x1ef   : > { %18733 = vst [vmem:[#allocation57_spill] sm:$0xff] %v15912_v61  ;;  %v2502_v8 = vsub.f32 %v15895_v20, %v18273_v59  ;;  %v18279_v9 = vand.u32 4294901760, %v15912_v61  ;;  %v15932_v33 = vsub.f32 %v334_v16, %v15914_v45  ;;  %2263 = vmatprep.subr.mxu0 %v15914_v45  ;;  %v2497_v47 = vand.u32 4294901760, %v2496_v49 }
 0x1f0   : > { %18735 = vst [vmem:[#allocation60_spill] sm:$0xff] %v15922_v18  ;;  %18736 = vst [vmem:[#allocation63_spill] sm:$0xff] %v15924_v56  ;;  %v2508_v13 = vsub.f32 %v15902_v24, %v18276_v51  ;;  %v18280_v14 = vand.u32 4294901760, %v15922_v18  ;;  %v15940_v37 = vsub.f32 %v333_v62, %v15924_v56  ;;  %2265 = vmatpush1.msra.mxu0 %v15924_v56  ;;  %2492 = vmatprep.subr.mxu1 %v2491_v31 }
 0x1f1   : > { %18737 = vst [vmem:[#allocation77_spill] sm:$0xff] %v15932_v33  ;;  %v2503_v59 = vand.u32 4294901760, %v2502_v8  ;;  %v2514_v16 = vsub.f32 %v15912_v61, %v18279_v9  ;;  %v18284_v20 = vand.u32 4294901760, %v15932_v33  ;;  %2598 = vmatprep.subr.mxu0 %v15642_v6  ;;  %2498 = vmatpush1.msra.mxu1 %v2497_v47 }
 0x1f2   : > { %18738 = vst [vmem:[#allocation79_spill] sm:$0xff] %v15940_v37  ;;  %v2509_v49 = vand.u32 4294901760, %v2508_v13  ;;  %v2520_v51 = vsub.f32 %v15922_v18, %v18280_v14  ;;  %v18291_v62 = vand.u32 4294901760, %v15940_v37 }
 0x1f3   : > { %2504 = vmatprep.subr.mxu1 %v2503_v59  ;;  %v2515_v24 = vand.u32 4294901760, %v2514_v16  ;;  %v2526_v8 = vsub.f32 %v15932_v33, %v18284_v20 }
 0x1f4   : > { %2510 = vmatpush1.msra.mxu1 %v2509_v49  ;;  %v2521_v31 = vand.u32 4294901760, %v2520_v51  ;;  %v2532_v9 = vsub.f32 %v15940_v37, %v18291_v62 }
 0x1f5   : > { %2516 = vmatprep.subr.mxu1 %v2515_v24  ;;  %v2527_v47 = vand.u32 4294901760, %v2526_v8 }
 0x1f6   : > { %2522 = vmatpush1.msra.mxu1 %v2521_v31  ;;  %v2533_v13 = vand.u32 4294901760, %v2532_v9 }
 0x1f7   : > { %2528 = vmatprep.subr.mxu1 %v2527_v47 }
 0x1f8   : > { %2534 = vmatpush1.msra.mxu1 %v2533_v13 }
 0x1f9   : > { %2758 = vmatprep.subr.mxu1 %v15637_v27 }
 0x236   : > { %v12552_v59 = vpop.f32.mrf.mxu1 }
 0x238   : > { %v12553_v16 = vpop.f32.mrf.mxu1 }
 0x239   : > { %v12554_v55 = vadd.f32 %v12553_v16, %v12552_v59 }
 0x23a   : > { %v12555_v14 = vpop.f32.mrf.mxu1 }
 0x23c   : > { %v12556_v18 = vpop.f32.mrf.mxu1 }
 0x23d   : > { %v12557_v36 = vadd.f32 %v12556_v18, %v12555_v14 }
 0x23f   : > { %v12508_v6 = vpop.f32.mrf.mxu0  ;;  %v12558_v49 = vpop.f32.mrf.mxu1 }
 0x241   : > { %v12509_v20 = vpop.f32.mrf.mxu0  ;;  %v12559_v33 = vpop.f32.mrf.mxu1 }
 0x242   : > { %v12510_v54 = vadd.f32 %v12509_v20, %v12508_v6  ;;  %v12560_v3 = vadd.f32 %v12559_v33, %v12558_v49 }
 0x244   : > { %v1558_v1 = vadd.f32 %v12554_v55, %v12510_v54 }
 0x245   : > { %v12511_v51 = vpop.f32.mrf.mxu0  ;;  %v12561_v56 = vpop.f32.mrf.mxu1 }
 0x247   : > { %v12512_v61 = vpop.f32.mrf.mxu0  ;;  %v12562_v24 = vpop.f32.mrf.mxu1 }
 0x248   : > { %v12513_v2 = vadd.f32 %v12512_v61, %v12511_v51  ;;  %v12563_v14 = vadd.f32 %v12562_v24, %v12561_v56 }
 0x24a   : > { %v1565_v60 = vadd.f32 %v12557_v36, %v12513_v2 }
 0x24b   : > { %v12514_v62 = vpop.f32.mrf.mxu0 }
 0x24d   : > { %v12515_v8 = vpop.f32.mrf.mxu0 }
 0x24e   : > { %v12516_v32 = vadd.f32 %v12515_v8, %v12514_v62 }
 0x250   : > { %v12517_v9 = vpop.f32.mrf.mxu0  ;;  %v1572_v55 = vadd.f32 %v12560_v3, %v12516_v32 }
 0x252   : > { %v12518_v13 = vpop.f32.mrf.mxu0 }
 0x25c   : > { %v12640_v31 = vpop.f32.mrf.mxu1 }
 0x25e   : > { %v12641_v47 = vpop.f32.mrf.mxu1 }
 0x25f   : > { %v12642_v12 = vadd.f32 %v12641_v47, %v12640_v31 }
 0x261   : > { %v12643_v37 = vpop.f32.mrf.mxu1 }
 0x263   : > { %v12644_v45 = vpop.f32.mrf.mxu1 }
 0x264   : > { %v12645_v54 = vadd.f32 %v12644_v45, %v12643_v37 }
 0x266   : > { %v12596_v27 = vpop.f32.mrf.mxu0  ;;  %v12646_v48 = vpop.f32.mrf.mxu1 }
 0x268   : > { %v12597_v50 = vpop.f32.mrf.mxu0  ;;  %v12647_v57 = vpop.f32.mrf.mxu1 }
 0x269   : > { %v12598_v41 = vadd.f32 %v12597_v50, %v12596_v27  ;;  %v12519_v27 = vadd.f32 %v12518_v13, %v12517_v9 }
 0x26b   : > { %v1717_v19 = vadd.f32 %v12598_v41, %v1558_v1  ;;  %v1579_v18 = vadd.f32 %v12563_v14, %v12519_v27  ;;  %v18753_v27 = vld [vmem:[#allocation45_spill] sm:$0xff] }
 0x26c   : > { %v12599_v4 = vpop.f32.mrf.mxu0  ;;  %v12649_v35 = vpop.f32.mrf.mxu1 }
 0x26d   : > { %v1852_v38 = vadd.f32 %v12642_v12, %v1717_v19 }
 0x26e   : > { %v12600_v25 = vpop.f32.mrf.mxu0  ;;  %v12650_v22 = vpop.f32.mrf.mxu1 }
 0x26f   : > { %v12601_v28 = vadd.f32 %v12600_v25, %v12599_v4 }
 0x271   : > { %v1726_v6 = vadd.f32 %v12601_v28, %v1565_v60  ;;  %v12648_v28 = vadd.f32 %v12647_v57, %v12646_v48 }
 0x272   : > { %v12602_v17 = vpop.f32.mrf.mxu0 }
 0x273   : > { %v1863_v4 = vadd.f32 %v12645_v54, %v1726_v6 }
 0x274   : > { %v12603_v43 = vpop.f32.mrf.mxu0 }
 0x275   : > { %v12604_v20 = vadd.f32 %v12603_v43, %v12602_v17 }
 0x277   : > { %v12605_v0 = vpop.f32.mrf.mxu0  ;;  %v1735_v36 = vadd.f32 %v12604_v20, %v1572_v55  ;;  %v18754_v55 = vld [vmem:[#allocation29_spill] sm:$0xff] }
 0x279   : > { %v12606_v23 = vpop.f32.mrf.mxu0  ;;  %v1874_v12 = vadd.f32 %v12648_v28, %v1735_v36  ;;  %v18764_v28 = vld [vmem:[#allocation42_spill] sm:$0xff] }
 0x27a   : > { %v12607_v1 = vadd.f32 %v12606_v23, %v12605_v0  ;;  %v12651_v0 = vadd.f32 %v12650_v22, %v12649_v35 }
 0x27c   : > { %v1744_v32 = vadd.f32 %v12607_v1, %v1579_v18  ;;  %v18757_v1 = vld [vmem:[#allocation30_spill] sm:$0xff] }
 0x27e   : > { %v1885_v48 = vadd.f32 %v12651_v0, %v1744_v32  ;;  %v18767_v32 = vld [vmem:[#allocation32_spill] sm:$0xff] }
 0x27f   : > { %v18772_v0 = vld [vmem:[#allocation48_spill] sm:$0xff] }
 0x284   : > { %v12728_v53 = vpop.f32.mrf.mxu1 }
 0x286   : > { %v12729_v11 = vpop.f32.mrf.mxu1 }
 0x287   : > { %v12730_v61 = vadd.f32 %v12729_v11, %v12728_v53 }
 0x288   : > { %v12731_v10 = vpop.f32.mrf.mxu1 }
 0x28a   : > { %v12732_v21 = vpop.f32.mrf.mxu1 }
 0x28b   : > { %v12733_v19 = vadd.f32 %v12732_v21, %v12731_v10 }
 0x28c   : > { %v12684_v39 = vpop.f32.mrf.mxu0  ;;  %v12734_v26 = vpop.f32.mrf.mxu1 }
 0x28e   : > { %v12685_v63 = vpop.f32.mrf.mxu0  ;;  %v12735_v41 = vpop.f32.mrf.mxu1 }
 0x28f   : > { %v12686_v59 = vadd.f32 %v12685_v63, %v12684_v39  ;;  %v12736_v21 = vadd.f32 %v12735_v41, %v12734_v26  ;;  %v18758_v41 = vld [vmem:[#allocation35_spill] sm:$0xff] }
 0x290   : > { %v12687_v50 = vpop.f32.mrf.mxu0  ;;  %v12737_v53 = vpop.f32.mrf.mxu1 }
 0x291   : > { %v2053_v16 = vadd.f32 %v12686_v59, %v1852_v38  ;;  %v18752_v59 = vld [vmem:[#allocation36_spill] sm:$0xff] }
 0x292   : > { %v12688_v25 = vpop.f32.mrf.mxu0  ;;  %v12738_v10 = vpop.f32.mrf.mxu1 }
 0x293   : > { %v15959_v2 = vadd.f32 %v12730_v61, %v2053_v16  ;;  %v12689_v33 = vadd.f32 %v12688_v25, %v12687_v50  ;;  %v12739_v62 = vadd.f32 %v12738_v10, %v12737_v53  ;;  %v18755_v61 = vld [vmem:[#allocation38_spill] sm:$0xff]  ;;  %v18756_v16 = vld [vmem:[#allocation33_spill] sm:$0xff]  ;;  %v18759_v25 = vld [vmem:[#allocation40_spill] sm:$0xff] }
 0x294   : > { %v12690_v60 = vpop.f32.mrf.mxu0  ;;  %v18768_v53 = vld [vmem:[#allocation58_spill] sm:$0xff]  ;;  %v18776_v10 = vld [vmem:[#allocation39_spill] sm:$0xff] }
 0x295   : > { %18739 = vst [vmem:[#allocation78_spill] sm:$0xff] %v15959_v2  ;;  %v15962_v39 = vand.u32 4294901760, %v15959_v2  ;;  %v2060_v3 = vadd.f32 %v12689_v33, %v1863_v4  ;;  %v18761_v4 = vld [vmem:[#allocation37_spill] sm:$0xff]  ;;  %v18762_v33 = vld [vmem:[#allocation31_spill] sm:$0xff] }
 0x296   : > { %v12691_v38 = vpop.f32.mrf.mxu0 }
 0x297   : > { %18740 = vst [vmem:[#allocation81_spill] sm:$0xff] %v15962_v39  ;;  %v15966_v56 = vsub.f32 %v15959_v2, %v15962_v39  ;;  %v15968_v63 = vadd.f32 %v12733_v19, %v2060_v3  ;;  %v12692_v11 = vadd.f32 %v12691_v38, %v12690_v60  ;;  %2569 = vmatmul.mubr.f32.vlgmr.msra.gmra.mxu1 %v15962_v39  ;;  %v18763_v60 = vld [vmem:[#allocation52_spill] sm:$0xff]  ;;  %v18765_v19 = vld [vmem:[#allocation43_spill] sm:$0xff]  ;;  %v18797_v39 = vld [vmem:[#allocation69_spill] sm:$0xff] }
 0x298   : > { %2760 = vmatpush1.msra.mxu1 %v15639_v15  ;;  %v12693_v57 = vpop.f32.mrf.mxu0  ;;  %2574 = vmatprep.mubr.f32.mxu1 %v18685_v46  ;;  %v18766_v3 = vld [vmem:[#allocation56_spill] sm:$0xff]  ;;  %v18789_v2 = vld [vmem:[#allocation27_spill] sm:$0xff] }
 0x299   : > { %18741 = vst [vmem:[#allocation80_spill] sm:$0xff] %v15968_v63  ;;  %v15974_v43 = vand.u32 4294901760, %v15968_v63  ;;  %v2067_v17 = vadd.f32 %v12692_v11, %v1874_v12  ;;  %2762 = vmatprep.subr.mxu1 %v15644_v7  ;;  %v15978_v23 = vand.u32 4294901760, %v15966_v56  ;;  %v18770_v12 = vld [vmem:[#allocation46_spill] sm:$0xff]  ;;  %v18771_v11 = vld [vmem:[#allocation61_spill] sm:$0xff] }
 0x29a   : > { %2764 = vmatpush1.msra.mxu1 %v15650_v30  ;;  %v12694_v35 = vpop.f32.mrf.mxu0 }
 0x29b   : > { %18742 = vst [vmem:[#allocation83_spill] sm:$0xff] %v15974_v43  ;;  %18743 = vst [vmem:[#allocation82_spill] sm:$0xff] %v15978_v23  ;;  %v15983_v22 = vsub.f32 %v15968_v63, %v15974_v43  ;;  %v15985_v45 = vadd.f32 %v12736_v21, %v2067_v17  ;;  %v12695_v26 = vadd.f32 %v12694_v35, %v12693_v57  ;;  %2766 = vmatprep.subr.mxu1 %v15657_v52  ;;  %v18773_v57 = vld [vmem:[#allocation50_spill] sm:$0xff]  ;;  %v18775_v17 = vld [vmem:[#allocation64_spill] sm:$0xff] }
 0x29c   : > { %2576 = vmatmul.mubr.f32.gmra.mxu1 %v15974_v43  ;;  %v2302_v37 = vsub.f32 %v15966_v56, %v15978_v23  ;;  %v18774_v21 = vld [vmem:[#allocation62_spill] sm:$0xff]  ;;  %v18788_v63 = vld [vmem:[#allocation51_spill] sm:$0xff] }
 0x29d   : > { %18744 = vst [vmem:[#allocation84_spill] sm:$0xff] %v15985_v45  ;;  %2768 = vmatpush1.msra.mxu1 %v15664_v5  ;;  %2581 = vmatprep.mubr.f32.mxu1 %v18685_v46  ;;  %v15994_v49 = vand.u32 4294901760, %v15985_v45  ;;  %v2074_v51 = vadd.f32 %v12695_v26, %v1885_v48  ;;  %v15998_v24 = vand.u32 4294901760, %v15983_v22  ;;  %v18777_v48 = vld [vmem:[#allocation66_spill] sm:$0xff]  ;;  %v18779_v26 = vld [vmem:[#allocation72_spill] sm:$0xff] }
 0x29e   : > { %2770 = vmatprep.subr.mxu1 %v15674_v58  ;;  %v16001_v8 = vand.u32 4294901760, %v2302_v37  ;;  %v18778_v35 = vld [vmem:[#allocation54_spill] sm:$0xff]  ;;  %v18780_v37 = vld [vmem:[#allocation41_spill] sm:$0xff] }
 0x29f   : > { %18745 = vst [vmem:[#allocation85_spill] sm:$0xff] %v15994_v49  ;;  %18746 = vst [vmem:[#allocation86_spill] sm:$0xff] %v15998_v24  ;;  %2772 = vmatpush1.msra.mxu1 %v15684_v34  ;;  %v16005_v31 = vsub.f32 %v15985_v45, %v15994_v49  ;;  %v16007_v9 = vadd.f32 %v12739_v62, %v2074_v51  ;;  %v2313_v47 = vsub.f32 %v15983_v22, %v15998_v24  ;;  %v18781_v62 = vld [vmem:[#allocation65_spill] sm:$0xff]  ;;  %v18782_v51 = vld [vmem:[#allocation44_spill] sm:$0xff] }
 0x2a0   : > { %18747 = vst [vmem:[#allocation87_spill] sm:$0xff] %v16001_v8  ;;  %2774 = vmatprep.subr.mxu1 %v15707_v42  ;;  %2583 = vmatmul.mubr.f32.gmra.mxu1 %v15994_v49  ;;  %v18786_v45 = vld [vmem:[#allocation49_spill] sm:$0xff]  ;;  %v18795_v49 = vld [vmem:[#allocation63_spill] sm:$0xff]  ;;  %v18796_v43 = vld [vmem:[#allocation26_spill] sm:$0xff] }
 0x2a1   : > { %18748 = vst [vmem:[#allocation88_spill] sm:$0xff] %v16007_v9  ;;  %2304 = vmatmul.mubr.f32.vlgmr.msra.gmra.mxu0 %v16001_v8  ;;  %2776 = vmatpush1.msra.mxu1 %v15713_v44  ;;  %v16016_v13 = vand.u32 4294901760, %v16007_v9  ;;  %v16020_v6 = vand.u32 4294901760, %v2313_v47  ;;  %v16023_v20 = vand.u32 4294901760, %v16005_v31  ;;  %v18783_v47 = vld [vmem:[#allocation67_spill] sm:$0xff]  ;;  %v18790_v8 = vld [vmem:[#allocation53_spill] sm:$0xff] }
 0x2a2   : > { %2601 = vmatpush1.msra.mxu0 %v15648_v40  ;;  %2778 = vmatprep.subr.mxu1 %v15721_v29 }
 0x2a3   : > { %18749 = vst [vmem:[#allocation89_spill] sm:$0xff] %v16016_v13  ;;  %18750 = vst [vmem:[#allocation90_spill] sm:$0xff] %v16020_v6  ;;  %2604 = vmatprep.subr.mxu0 %v18752_v59  ;;  %2780 = vmatpush1.msra.mxu1 %v18753_v27  ;;  %v16029_v50 = vsub.f32 %v16007_v9, %v16016_v13  ;;  %v2324_v54 = vsub.f32 %v16005_v31, %v16023_v20  ;;  %v18787_v9 = vld [vmem:[#allocation75_spill] sm:$0xff] }
 0x2a4   : > { %18751 = vst [vmem:[#allocation91_spill] sm:$0xff] %v16023_v20  ;;  %2607 = vmatpush1.msra.mxu0 %v18754_v55  ;;  %2309 = vmatprep.mubr.f32.mxu0 %v18685_v46 }
 0x2a5   : > { %2588 = vmatprep.mubr.f32.mxu1 %v18685_v46  ;;  %2610 = vmatprep.subr.mxu0 %v18755_v61  ;;  %v16040_v14 = vand.u32 4294901760, %v16029_v50  ;;  %v16046_v36 = vand.u32 4294901760, %v2324_v54  ;;  %v18784_v54 = vld [vmem:[#allocation47_spill] sm:$0xff] }
 0x2a6   : > { %2782 = vmatprep.subr.mxu1 %v18756_v16  ;;  %2315 = vmatmul.mubr.f32.gmra.mxu0 %v16020_v6  ;;  %v18791_v6 = vld [vmem:[#allocation68_spill] sm:$0xff] }
 0x2a7   : > { %2590 = vmatmul.mubr.f32.gmra.mxu1 %v16016_v13  ;;  %2613 = vmatpush1.msra.mxu0 %v18757_v1  ;;  %18760 = vst [vmem:[#allocation36_spill] sm:$0xff] %v16046_v36  ;;  %v2335_v18 = vsub.f32 %v16029_v50, %v16040_v14  ;;  %v18794_v13 = vld [vmem:[#allocation74_spill] sm:$0xff] }
 0x2a8   : > { %2784 = vmatpush1.msra.mxu1 %v18758_v41  ;;  %2616 = vmatprep.subr.mxu0 %v18759_v25 }
 0x2a9   : > { %2786 = vmatprep.subr.mxu1 %v18761_v4  ;;  %2619 = vmatpush1.msra.mxu0 %v18762_v33  ;;  %v16060_v38 = vand.u32 4294901760, %v2335_v18  ;;  %v18785_v18 = vld [vmem:[#allocation71_spill] sm:$0xff] }
 0x2aa   : > { %2788 = vmatpush1.msra.mxu1 %v18763_v60  ;;  %2320 = vmatprep.mubr.f32.mxu0 %v18685_v46 }
 0x2ab   : > { %2622 = vmatprep.subr.mxu0 %v18764_v28  ;;  %2790 = vmatprep.subr.mxu1 %v18765_v19  ;;  %18769 = vst [vmem:[#allocation45_spill] sm:$0xff] %v16060_v38 }
 0x2ac   : > { %2326 = vmatmul.mubr.f32.gmra.mxu0 %v16046_v36  ;;  %2792 = vmatpush1.msra.mxu1 %v18766_v3  ;;  %v18792_v36 = vld [vmem:[#allocation70_spill] sm:$0xff] }
 0x2ad   : > { %2625 = vmatpush1.msra.mxu0 %v18767_v32  ;;  %2794 = vmatprep.subr.mxu1 %v18768_v53 }
 0x2ae   : > { %2628 = vmatprep.subr.mxu0 %v18770_v12  ;;  %2796 = vmatpush1.msra.mxu1 %v18771_v11 }
 0x2af   : > { %2631 = vmatpush1.msra.mxu0 %v18772_v0  ;;  %2331 = vmatprep.mubr.f32.mxu0 %v18685_v46 }
 0x2b0   : > { %2634 = vmatprep.subr.mxu0 %v18773_v57  ;;  %2798 = vmatprep.subr.mxu1 %v18774_v21 }
 0x2b1   : > { %2337 = vmatmul.mubr.f32.gmra.mxu0 %v16060_v38  ;;  %2800 = vmatpush1.msra.mxu1 %v18775_v17  ;;  %v18793_v38 = vld [vmem:[#allocation59_spill] sm:$0xff] }
 0x2b2   : > { %2637 = vmatpush1.msra.mxu0 %v18776_v10  ;;  %2802 = vmatprep.subr.mxu1 %v18777_v48 }
 0x2b3   : > { %2640 = vmatprep.subr.mxu0 %v18778_v35  ;;  %2804 = vmatpush1.msra.mxu1 %v18779_v26 }
 0x2b4   : > { %2643 = vmatpush1.msra.mxu0 %v18780_v37  ;;  %2806 = vmatprep.subr.mxu1 %v18781_v62 }
 0x2b5   : > { %2646 = vmatprep.subr.mxu0 %v18782_v51  ;;  %2808 = vmatpush1.msra.mxu1 %v18783_v47 }
 0x2b6   : > { %2649 = vmatpush1.msra.mxu0 %v18784_v54  ;;  %2810 = vmatprep.subr.mxu1 %v18785_v18 }
 0x2b7   : > { %2652 = vmatprep.subr.mxu0 %v18786_v45  ;;  %2812 = vmatpush1.msra.mxu1 %v18787_v9 }
 0x2b8   : > { %2655 = vmatpush1.msra.mxu0 %v18788_v63  ;;  %2814 = vmatprep.subr.mxu1 %v18789_v2  ;;  %v18798_v2 = vld [vmem:[#allocation34_spill] sm:$0xff] }
 0x2b9   : > { %2658 = vmatprep.subr.mxu0 %v18790_v8  ;;  %2816 = vmatpush1.msra.mxu1 %v18791_v6  ;;  %v18799_v8 = vld [vmem:[#allocation73_spill] sm:$0xff]  ;;  %v18800_v6 = vld [vmem:[#allocation76_spill] sm:$0xff] }
 0x2ba   : > { %2661 = vmatpush1.msra.mxu0 %v18792_v36  ;;  %2818 = vmatprep.subr.mxu1 %v18793_v38  ;;  %v18801_v38 = vld [vmem:[#allocation55_spill] sm:$0xff] }
 0x2bb   : > { %2664 = vmatprep.subr.mxu0 %v18794_v13  ;;  %2820 = vmatpush1.msra.mxu1 %v18795_v49  ;;  %v18802_v49 = vld [vmem:[#allocation57_spill] sm:$0xff] }
 0x2bc   : > { %2667 = vmatpush1.msra.mxu0 %v18796_v43  ;;  %2853 = vmatprep.mubr.f32.mxu1 %v18685_v46 }
 0x2bd   : > { %2670 = vmatprep.subr.mxu0 %v18797_v39  ;;  %2857 = vmatmul.mubr.f32.vlgmr.msra.gmra.mxu1 %v15978_v23 }
 0x2be   : > { %3080 = vmatprep.subr.mxu1 %v18798_v2  ;;  %2673 = vmatpush1.msra.mxu0 %v18799_v8  ;;  %v18803_v2 = vld [vmem:[#allocation60_spill] sm:$0xff] }
 0x2bf   : > { %3082 = vmatpush1.msra.mxu1 %v15639_v15  ;;  %2676 = vmatprep.subr.mxu0 %v18800_v6  ;;  %v18804_v15 = vld [vmem:[#allocation77_spill] sm:$0xff] }
 0x2c0   : > { %3084 = vmatprep.subr.mxu1 %v15644_v7  ;;  %2679 = vmatpush1.msra.mxu0 %v18801_v38  ;;  %v18805_v7 = vld [vmem:[#allocation79_spill] sm:$0xff] }
 0x2c1   : > { %2862 = vmatprep.mubr.f32.mxu1 %v18685_v46  ;;  %3086 = vmatpush1.msra.mxu1 %v15650_v30  ;;  %v18806_v30 = vld [vmem:[#allocation28_spill] sm:$0xff] }
 0x2c2   : > { %2682 = vmatprep.subr.mxu0 %v18802_v49  ;;  %2866 = vmatmul.mubr.f32.gmra.mxu1 %v15998_v24 }
 0x2c3   : > { %3088 = vmatprep.subr.mxu1 %v15657_v52  ;;  %2685 = vmatpush1.msra.mxu0 %v18803_v2  ;;  %v18807_v52 = vand.u32 4294901760, %v18806_v30 }
 0x2c4   : > { %3090 = vmatpush1.msra.mxu1 %v15664_v5  ;;  %2688 = vmatprep.subr.mxu0 %v18804_v15  ;;  %v18808_v5 = vand.u32 4294901760, %v15648_v40  ;;  %v18811_v40 = vand.u32 4294901760, %v18755_v61  ;;  %v18818_v61 = vand.u32 4294901760, %v18772_v0  ;;  %v18835_v0 = vld [vmem:[#allocation63_spill] sm:$0xff] }
 0x2c5   : > { %3092 = vmatprep.subr.mxu1 %v15674_v58  ;;  %2691 = vmatpush1.msra.mxu0 %v18805_v7  ;;  %v18809_v58 = vand.u32 4294901760, %v18752_v59  ;;  %v18815_v59 = vand.u32 4294901760, %v18764_v28  ;;  %v18826_v28 = vand.u32 4294901760, %v18788_v63  ;;  %v18834_v63 = vand.u32 4294901760, %v18796_v43 }
 0x2c6   : > { %2724 = vmatprep.mubr.f32.mxu0 %v18685_v46  ;;  %2871 = vmatprep.mubr.f32.mxu1 %v18685_v46  ;;  %v18840_v43 = vand.u32 4294901760, %v18801_v38  ;;  %v18846_v38 = vld [vmem:[#allocation85_spill] sm:$0xff] }
 0x2c7   : > { %3094 = vmatpush1.msra.mxu1 %v15684_v34  ;;  %2727 = vmatmul.mubr.f32.vlgmr.msra.gmra.mxu0 %v15966_v56  ;;  %v18810_v34 = vand.u32 4294901760, %v18754_v55  ;;  %v18817_v55 = vand.u32 4294901760, %v18770_v12  ;;  %v18831_v12 = vld [vmem:[#allocation68_spill] sm:$0xff] }
 0x2c8   : > { %2875 = vmatmul.mubr.f32.gmra.mxu1 %v16023_v20  ;;  %2893 = vmatprep.subr.mxu0 %v18807_v52 }
 0x2c9   : > { %3096 = vmatprep.subr.mxu1 %v15707_v42  ;;  %2897 = vmatpush1.msra.mxu0 %v18808_v5  ;;  %v18812_v42 = vand.u32 4294901760, %v18757_v1  ;;  %v18820_v1 = vand.u32 4294901760, %v18776_v10 }
 0x2ca   : > { %3098 = vmatpush1.msra.mxu1 %v15713_v44  ;;  %2901 = vmatprep.subr.mxu0 %v18809_v58  ;;  %v18813_v44 = vand.u32 4294901760, %v18759_v25  ;;  %v18822_v25 = vand.u32 4294901760, %v18780_v37 }
 0x2cb   : > { %3100 = vmatprep.subr.mxu1 %v15721_v29  ;;  %2732 = vmatprep.mubr.f32.mxu0 %v18685_v46  ;;  %v18814_v29 = vand.u32 4294901760, %v18762_v33  ;;  %v18824_v33 = vand.u32 4294901760, %v18784_v54 }
 0x2cc   : > { %2880 = vmatprep.mubr.f32.mxu1 %v18685_v46  ;;  %2905 = vmatpush1.msra.mxu0 %v18810_v34 }
 0x2cd   : > { %3102 = vmatpush1.msra.mxu1 %v18753_v27  ;;  %2735 = vmatmul.mubr.f32.gmra.mxu0 %v15983_v22  ;;  %v18816_v27 = vand.u32 4294901760, %v18767_v32  ;;  %v18829_v32 = vld [vmem:[#allocation27_spill] sm:$0xff] }
 0x2ce   : > { %2884 = vmatmul.mubr.f32.gmra.mxu1 %v16040_v14  ;;  %2909 = vmatprep.subr.mxu0 %v18811_v40 }
 0x2cf   : > { %3104 = vmatprep.subr.mxu1 %v18756_v16  ;;  %2913 = vmatpush1.msra.mxu0 %v18812_v42  ;;  %v18819_v16 = vand.u32 4294901760, %v18773_v57  ;;  %v18837_v57 = vld [vmem:[#allocation81_spill] sm:$0xff] }
 0x2d0   : > { %3106 = vmatpush1.msra.mxu1 %v18758_v41  ;;  %2917 = vmatprep.subr.mxu0 %v18813_v44  ;;  %v18821_v41 = vand.u32 4294901760, %v18778_v35 }
 0x2d1   : > { %3108 = vmatprep.subr.mxu1 %v18761_v4  ;;  %2740 = vmatprep.mubr.f32.mxu0 %v18685_v46  ;;  %v18823_v4 = vand.u32 4294901760, %v18782_v51 }
 0x2d2   : > { %2921 = vmatpush1.msra.mxu0 %v18814_v29  ;;  %3110 = vmatpush1.msra.mxu1 %v18763_v60  ;;  %v18825_v60 = vand.u32 4294901760, %v18786_v45  ;;  %v18832_v45 = vand.u32 4294901760, %v18794_v13  ;;  %v18839_v13 = vand.u32 4294901760, %v18800_v6  ;;  %v18845_v6 = vand.u32 4294901760, %v18805_v7 }
 0x2d3   : > { %2743 = vmatmul.mubr.f32.gmra.mxu0 %v16005_v31  ;;  %2925 = vmatprep.subr.mxu0 %v18815_v59 }
 0x2d4   : > { %3112 = vmatprep.subr.mxu1 %v18765_v19  ;;  %2929 = vmatpush1.msra.mxu0 %v18816_v27  ;;  %v18827_v19 = vld [vmem:[#allocation53_spill] sm:$0xff] }
 0x2d5   : > { %3114 = vmatpush1.msra.mxu1 %v18766_v3  ;;  %2933 = vmatprep.subr.mxu0 %v18817_v55  ;;  %v18828_v3 = vand.u32 4294901760, %v18827_v19 }
 0x2d6   : > { %3116 = vmatprep.subr.mxu1 %v18768_v53  ;;  %2748 = vmatprep.mubr.f32.mxu0 %v18685_v46  ;;  %v18830_v53 = vand.u32 4294901760, %v18792_v36  ;;  %v18838_v36 = vand.u32 4294901760, %v18799_v8  ;;  %v18844_v8 = vand.u32 4294901760, %v18804_v15 }
 0x2d7   : > { %2937 = vmatpush1.msra.mxu0 %v18818_v61  ;;  %3118 = vmatpush1.msra.mxu1 %v18771_v11  ;;  %v18833_v11 = vld [vmem:[#allocation59_spill] sm:$0xff] }
 0x2d8   : > { %2751 = vmatmul.mubr.f32.gmra.mxu0 %v16029_v50  ;;  %2941 = vmatprep.subr.mxu0 %v18819_v16 }
 0x2d9   : > { %3120 = vmatprep.subr.mxu1 %v18774_v21  ;;  %2945 = vmatpush1.msra.mxu0 %v18820_v1  ;;  %v18841_v21 = vand.u32 4294901760, %v18802_v49  ;;  %v18847_v49 = vld [vmem:[#allocation89_spill] sm:$0xff] }
 0x2da   : > { %3122 = vmatpush1.msra.mxu1 %v18775_v17  ;;  %2949 = vmatprep.subr.mxu0 %v18821_v41  ;;  %v18843_v17 = vand.u32 4294901760, %v18803_v2 }
 0x2db   : > { %3124 = vmatprep.subr.mxu1 %v18777_v48  ;;  %2953 = vmatpush1.msra.mxu0 %v18822_v25 }
 0x2dc   : > { %3126 = vmatpush1.msra.mxu1 %v18779_v26  ;;  %2957 = vmatprep.subr.mxu0 %v18823_v4 }
 0x2dd   : > { %3128 = vmatprep.subr.mxu1 %v18781_v62  ;;  %2961 = vmatpush1.msra.mxu0 %v18824_v33 }
 0x2de   : > { %3130 = vmatpush1.msra.mxu1 %v18783_v47  ;;  %2965 = vmatprep.subr.mxu0 %v18825_v60 }
 0x2df   : > { %3132 = vmatprep.subr.mxu1 %v18785_v18  ;;  %2969 = vmatpush1.msra.mxu0 %v18826_v28 }
 0x2e0   : > { %3134 = vmatpush1.msra.mxu1 %v18787_v9  ;;  %2973 = vmatprep.subr.mxu0 %v18828_v3  ;;  %v18836_v9 = vand.u32 4294901760, %v18797_v39  ;;  %v18842_v39 = vld [vmem:[#allocation83_spill] sm:$0xff] }
 0x2e1   : > { %3136 = vmatprep.subr.mxu1 %v18829_v32  ;;  %2977 = vmatpush1.msra.mxu0 %v18830_v53 }
 0x2e2   : > { %3138 = vmatpush1.msra.mxu1 %v18831_v12  ;;  %2981 = vmatprep.subr.mxu0 %v18832_v45 }
 0x2e3   : > { %3140 = vmatprep.subr.mxu1 %v18833_v11  ;;  %2985 = vmatpush1.msra.mxu0 %v18834_v63 }
 0x2e4   : > { %3142 = vmatpush1.msra.mxu1 %v18835_v0  ;;  %3175 = vmatprep.mubr.f32.mxu1 %v18685_v46 }
 0x2e5   : > { %2989 = vmatprep.subr.mxu0 %v18836_v9  ;;  %3177 = vmatmul.mubr.f32.vlgmr.msra.gmra.mxu1 %v18837_v57  ;;  %v325_v9 = vld [vmem:[#allocation6 + $0x240] sm:$0xff] }
 0x2e6   : > { %2993 = vmatpush1.msra.mxu0 %v18838_v36  ;;  %3182 = vmatprep.mubr.f32.mxu1 %v18685_v46 }
 0x2e7   : > { %2997 = vmatprep.subr.mxu0 %v18839_v13  ;;  %3050 = vmatprep.mubr.f32.mxu0 %v18685_v46 }
 0x2e8   : > { %3001 = vmatpush1.msra.mxu0 %v18840_v43 }
 0x2e9   : > { %3005 = vmatprep.subr.mxu0 %v18841_v21  ;;  %3184 = vmatmul.mubr.f32.gmra.mxu1 %v18842_v39 }
 0x2ea   : > { %3009 = vmatpush1.msra.mxu0 %v18843_v17  ;;  %3189 = vmatprep.mubr.f32.mxu1 %v18685_v46 }
 0x2eb   : > { %3013 = vmatprep.subr.mxu0 %v18844_v8 }
 0x2ec   : > { %3017 = vmatpush1.msra.mxu0 %v18845_v6 }
 0x2ed   : > { %3052 = vmatmul.mubr.f32.vlgmr.msra.gmra.mxu0 %v18837_v57  ;;  %3191 = vmatmul.mubr.f32.gmra.mxu1 %v18846_v38 }
 0x2ee   : > { %3057 = vmatprep.mubr.f32.mxu0 %v18685_v46  ;;  %3196 = vmatprep.mubr.f32.mxu1 %v18685_v46 }
 0x2f1   : > { %3059 = vmatmul.mubr.f32.gmra.mxu0 %v18842_v39  ;;  %3198 = vmatmul.mubr.f32.gmra.mxu1 %v18847_v49 }
 0x2f2   : > { %3064 = vmatprep.mubr.f32.mxu0 %v18685_v46  ;;  %3494 = vmatprep.mubr.f32.mxu1 %v18685_v46 }
 0x2f5   : > { %3066 = vmatmul.mubr.f32.gmra.mxu0 %v18846_v38 }
 0x2f6   : > { %3071 = vmatprep.mubr.f32.mxu0 %v18685_v46 }
 0x2f9   : > { %3073 = vmatmul.mubr.f32.gmra.mxu0 %v18847_v49 }
 0x2fa   : > { %3301 = vmatprep.mubr.f32.mxu0 %v18685_v46 }
 0x357   : > { %v2570_v10 = vpop.f32.mrf.mxu1 }
 0x359   : > { %v2572_v48 = vpop.f32.mrf.mxu1 }
 0x35c   : > { %v2577_v35 = vpop.f32.mrf.mxu1 }
 0x35e   : > { %v2579_v37 = vpop.f32.mrf.mxu1 }
 0x360   : > { %v2584_v51 = vpop.f32.mrf.mxu1 }
 0x361   : > { %v2305_v26 = vpop.f32.mrf.mxu0 }
 0x362   : > { %v2586_v54 = vpop.f32.mrf.mxu1  ;;  %v2571_v43 = vadd.f32 %v2570_v10, %v2305_v26  ;;  %v326_v26 = vld [vmem:[#allocation6 + $0x250] sm:$0xff] }
 0x363   : > { %v2307_v62 = vpop.f32.mrf.mxu0 }
 0x364   : > { %v2573_v45 = vadd.f32 %v2572_v48, %v2307_v62 }
 0x366   : > { %v2316_v47 = vpop.f32.mrf.mxu0 }
 0x367   : > { %v2591_v2 = vpop.f32.mrf.mxu1  ;;  %v2578_v12 = vadd.f32 %v2577_v35, %v2316_v47 }
 0x368   : > { %v2318_v18 = vpop.f32.mrf.mxu0 }
 0x369   : > { %v2593_v7 = vpop.f32.mrf.mxu1  ;;  %v2580_v3 = vadd.f32 %v2579_v37, %v2318_v18  ;;  %v3206_v37 = vsel %vm3204_vm1, %v325_v9, 0 }
 0x36a   : > { %v16232_v10 = vand.u32 4294901760, %v3206_v37 }
 0x36c   : > { %v2327_v15 = vpop.f32.mrf.mxu0 }
 0x36d   : > { %v2585_v11 = vadd.f32 %v2584_v51, %v2327_v15 }
 0x36e   : > { %v2329_v30 = vpop.f32.mrf.mxu0 }
 0x36f   : > { %v2587_v36 = vadd.f32 %v2586_v54, %v2329_v30 }
 0x371   : > { %v2338_v5 = vpop.f32.mrf.mxu0 }
 0x372   : > { %v2592_v23 = vadd.f32 %v2591_v2, %v2338_v5 }
 0x373   : > { %v2340_v34 = vpop.f32.mrf.mxu0 }
 0x374   : > { %v2594_v48 = vadd.f32 %v2593_v7, %v2340_v34  ;;  %v327_v7 = vld [vmem:[#allocation6 + $0x260] sm:$0xff] }
 0x37d   : > { %v2858_v52 = vpop.f32.mrf.mxu1 }
 0x37f   : > { %v2860_v58 = vpop.f32.mrf.mxu1 }
 0x382   : > { %v2867_v40 = vpop.f32.mrf.mxu1 }
 0x384   : > { %v2869_v44 = vpop.f32.mrf.mxu1 }
 0x387   : > { %v2728_v42 = vpop.f32.mrf.mxu0 }
 0x388   : > { %v2876_v59 = vpop.f32.mrf.mxu1  ;;  %v2729_v18 = vadd.f32 %v2728_v42, %v2571_v43 }
 0x389   : > { %v2730_v29 = vpop.f32.mrf.mxu0 }
 0x38a   : > { %v2878_v55 = vpop.f32.mrf.mxu1  ;;  %v2731_v21 = vadd.f32 %v2730_v29, %v2573_v45  ;;  %v2859_v5 = vadd.f32 %v2858_v52, %v2729_v18 }
 0x38c   : > { %v2861_v47 = vadd.f32 %v2860_v58, %v2731_v21 }
 0x38d   : > { %v2736_v27 = vpop.f32.mrf.mxu0 }
 0x38e   : > { %v2885_v16 = vpop.f32.mrf.mxu1  ;;  %v2737_v13 = vadd.f32 %v2736_v27, %v2578_v12 }
 0x38f   : > { %v2738_v61 = vpop.f32.mrf.mxu0 }
 0x390   : > { %v2887_v41 = vpop.f32.mrf.mxu1  ;;  %v2739_v63 = vadd.f32 %v2738_v61, %v2580_v3  ;;  %v2868_v51 = vadd.f32 %v2867_v40, %v2737_v13 }
 0x392   : > { %v2870_v20 = vadd.f32 %v2869_v44, %v2739_v63 }
 0x393   : > { %v2744_v1 = vpop.f32.mrf.mxu0 }
 0x394   : > { %v2745_v17 = vadd.f32 %v2744_v1, %v2585_v11 }
 0x395   : > { %v2746_v25 = vpop.f32.mrf.mxu0 }
 0x396   : > { %v2747_v24 = vadd.f32 %v2746_v25, %v2587_v36  ;;  %v2877_v54 = vadd.f32 %v2876_v59, %v2745_v17 }
 0x398   : > { %v2752_v33 = vpop.f32.mrf.mxu0  ;;  %v2879_v2 = vadd.f32 %v2878_v55, %v2747_v24 }
 0x399   : > { %v2753_v62 = vadd.f32 %v2752_v33, %v2592_v23  ;;  %v3209_v23 = vsel %vm3204_vm1, %v326_v26, 0  ;;  %v16236_v33 = vsub.f32 %v3206_v37, %v16232_v10  ;;  %v329_v26 = vld [vmem:[#allocation6 + $0x280] sm:$0xff] }
 0x39a   : > { %v2754_v19 = vpop.f32.mrf.mxu0  ;;  %v16238_v11 = vand.u32 4294901760, %v3209_v23 }
 0x39b   : > { %v2755_v29 = vadd.f32 %v2754_v19, %v2594_v48  ;;  %v2886_v3 = vadd.f32 %v2885_v16, %v2753_v62  ;;  %v3212_v16 = vsel %vm3204_vm1, %v327_v7, 0  ;;  %v3304_v13 = vand.u32 4294901760, %v16236_v33 }
 0x39d   : > { %v2888_v52 = vadd.f32 %v2887_v41, %v2755_v29  ;;  %v328_v41 = vld [vmem:[#allocation6 + $0x270] sm:$0xff] }
 0x39e   : > { %v3215_v48 = vsel %vm3204_vm1, %v328_v41, 0 }
 0x3a5   : > { %v16229_v4 = vpop.f32.mrf.mxu1 }
 0x3a7   : > { %v3180_v60 = vpop.f32.mrf.mxu1 }
 0x3a9   : > { %v3185_v28 = vpop.f32.mrf.mxu1 }
 0x3ab   : > { %v3187_v32 = vpop.f32.mrf.mxu1 }
 0x3ad   : > { %v3053_v53 = vpop.f32.mrf.mxu0  ;;  %v3192_v8 = vpop.f32.mrf.mxu1 }
 0x3ae   : > { %v3054_v58 = vadd.f32 %v3053_v53, %v2859_v5 }
 0x3af   : > { %v3055_v0 = vpop.f32.mrf.mxu0  ;;  %v3194_v15 = vpop.f32.mrf.mxu1 }
 0x3b0   : > { %v3056_v1 = vadd.f32 %v3055_v0, %v2861_v47  ;;  %v3179_v9 = vadd.f32 %v16229_v4, %v3054_v58  ;;  %v16261_v4 = vand.u32 4294901760, %v3212_v16  ;;  %v3305_v47 = vsub.f32 %v16236_v33, %v3304_v13 }
 0x3b1   : > { %v3060_v6 = vpop.f32.mrf.mxu0  ;;  %v3199_v34 = vpop.f32.mrf.mxu1 }
 0x3b2   : > { %v3061_v27 = vadd.f32 %v3060_v6, %v2868_v51  ;;  %v3181_v55 = vadd.f32 %v3180_v60, %v3056_v1  ;;  %v16259_v6 = vsub.f32 %v3209_v23, %v16238_v11  ;;  %v16272_v62 = vand.u32 4294901760, %v3179_v9 }
 0x3b3   : > { %v3062_v35 = vpop.f32.mrf.mxu0  ;;  %v3218_v23 = vsel %vm3204_vm1, %v329_v26, 0  ;;  %v3306_v58 = vand.u32 4294901760, %v3305_v47 }
 0x3b4   : > { %v3063_v61 = vadd.f32 %v3062_v35, %v2870_v20  ;;  %v3186_v19 = vadd.f32 %v3185_v28, %v3061_v27  ;;  %v3201_v28 = vpop.f32.mrf.mxu1  ;;  %v3315_v27 = vand.u32 4294901760, %v16259_v6 }
 0x3b5   : > { %v3067_v30 = vpop.f32.mrf.mxu0 }
 0x3b6   : > { %v3068_v25 = vadd.f32 %v3067_v30, %v2877_v54  ;;  %v3188_v20 = vadd.f32 %v3187_v32, %v3063_v61  ;;  %v16249_v60 = vand.u32 4294901760, %v3186_v19 }
 0x3b7   : > { %v3069_v42 = vpop.f32.mrf.mxu0 }
 0x3b8   : > { %v3070_v44 = vadd.f32 %v3069_v42, %v2879_v2  ;;  %v3193_v40 = vadd.f32 %v3192_v8, %v3068_v25  ;;  %v16246_v36 = vand.u32 4294901760, %v3188_v20  ;;  %v16256_v8 = vand.u32 4294901760, %v3181_v55 }
 0x3b9   : > { %v3074_v59 = vpop.f32.mrf.mxu0  ;;  %v16294_v2 = vand.u32 4294901760, %v3215_v48  ;;  %v16300_v25 = vsub.f32 %v3212_v16, %v16261_v4  ;;  %v16303_v42 = vsub.f32 %v3179_v9, %v16272_v62 }
 0x3ba   : > { %v3195_v12 = vadd.f32 %v3194_v15, %v3070_v44  ;;  %v3075_v24 = vadd.f32 %v3074_v59, %v2886_v3  ;;  %v16241_v63 = vand.u32 4294901760, %v3193_v40  ;;  %v16275_v51 = vsub.f32 %v3188_v20, %v16246_v36 }
 0x3bb   : > { %v3076_v45 = vpop.f32.mrf.mxu0  ;;  %v16281_v15 = vsub.f32 %v3186_v19, %v16249_v60  ;;  %v16290_v29 = vsub.f32 %v3181_v55, %v16256_v8  ;;  %v3316_v59 = vsub.f32 %v16259_v6, %v3315_v27  ;;  %v18385_v55 = vand.u32 4294901760, %v16300_v25 }
 0x3bc   : > { %v16243_v53 = vand.u32 4294901760, %v3195_v12  ;;  %v3200_v32 = vadd.f32 %v3199_v34, %v3075_v24  ;;  %v3077_v0 = vadd.f32 %v3076_v45, %v2888_v52  ;;  %v16264_v37 = vsub.f32 %v3193_v40, %v16241_v63  ;;  %v330_v40 = vld [vmem:[#allocation6 + $0x290] sm:$0xff] }
 0x3bd   : > { %v3440_v3 = vand.u32 4294901760, %v16275_v51  ;;  %v3446_v7 = vand.u32 4294901760, %v16281_v15  ;;  %v3452_v19 = vand.u32 4294901760, %v16290_v29  ;;  %v16332_v45 = vand.u32 4294901760, %v3218_v23 }
 0x3be   : > { %v16252_v43 = vsub.f32 %v3195_v12, %v16243_v53  ;;  %v16254_v21 = vand.u32 4294901760, %v3200_v32  ;;  %v3202_v17 = vadd.f32 %v3201_v28, %v3077_v0  ;;  %v3434_v5 = vand.u32 4294901760, %v16264_v37 }
 0x3bf   : > { %v16325_v12 = vsub.f32 %v3215_v48, %v16294_v2  ;;  %v3458_v16 = vand.u32 4294901760, %v16303_v42  ;;  %v3441_v0 = vsub.f32 %v16275_v51, %v3440_v3  ;;  %v3221_v9 = vsel %vm3204_vm1, %v330_v40, 0 }
 0x3c0   : > { %v16267_v18 = vsub.f32 %v3200_v32, %v16254_v21  ;;  %v16269_v35 = vand.u32 4294901760, %v3202_v17  ;;  %v3428_v30 = vand.u32 4294901760, %v16252_v43  ;;  %v3435_v52 = vsub.f32 %v16264_v37, %v3434_v5 }
 0x3c1   : > { %v3447_v41 = vsub.f32 %v16281_v15, %v3446_v7  ;;  %v3317_v48 = vand.u32 4294901760, %v3316_v59  ;;  %v3453_v47 = vsub.f32 %v16290_v29, %v3452_v19  ;;  %v3337_v26 = vand.u32 4294901760, %v16325_v12 }
 0x3c2   : > { %v3422_v61 = vand.u32 4294901760, %v16267_v18  ;;  %v16285_v54 = vsub.f32 %v3202_v17, %v16269_v35  ;;  %3254 = vmatprep.subr.mxu0 %v16269_v35  ;;  %v3429_v20 = vsub.f32 %v16252_v43, %v3428_v30  ;;  %v331_v17 = vld [vmem:[#allocation6 + $0x2a0] sm:$0xff]  ;;  %v3442_v40 = vand.u32 4294901760, %v3441_v0 }
 0x3c3   : > { %3256 = vmatpush1.msra.mxu0 %v16254_v21  ;;  %v3459_v59 = vsub.f32 %v16303_v42, %v3458_v16 }
 0x3c4   : > { %3258 = vmatprep.subr.mxu0 %v16243_v53  ;;  %v3416_v1 = vand.u32 4294901760, %v16285_v54  ;;  %v3423_v44 = vsub.f32 %v16267_v18, %v3422_v61  ;;  %v3430_v28 = vand.u32 4294901760, %v3429_v20  ;;  %v16355_v20 = vand.u32 4294901760, %v3221_v9 }
 0x3c5   : > { %3260 = vmatpush1.msra.mxu0 %v16241_v63 }
 0x3c6   : > { %3262 = vmatprep.subr.mxu0 %v16246_v36  ;;  %v3417_v34 = vsub.f32 %v16285_v54, %v3416_v1  ;;  %v3424_v32 = vand.u32 4294901760, %v3423_v44  ;;  %v3436_v44 = vand.u32 4294901760, %v3435_v52  ;;  %v3448_v52 = vand.u32 4294901760, %v3447_v41 }
 0x3c7   : > { %3264 = vmatpush1.msra.mxu0 %v16249_v60  ;;  %v3460_v41 = vand.u32 4294901760, %v3459_v59 }
 0x3c8   : > { %3266 = vmatprep.subr.mxu0 %v16256_v8  ;;  %v3418_v24 = vand.u32 4294901760, %v3417_v34  ;;  %v16353_v34 = vsub.f32 %v3218_v23, %v16332_v45  ;;  %v3454_v23 = vand.u32 4294901760, %v3453_v47 }
 0x3c9   : > { %3268 = vmatpush1.msra.mxu0 %v16272_v62 }
 0x3ca   : > { %3307 = vmatmul.mubr.f32.vlgmr.msra.gmra.mxu0 %v3306_v58  ;;  %3419 = vmatprep.subr.mxu1 %v3418_v24  ;;  %v3327_v58 = vsub.f32 %v16300_v25, %v18385_v55  ;;  %v3224_v24 = vsel %vm3204_vm1, %v331_v17, 0  ;;  %v3348_v55 = vand.u32 4294901760, %v16353_v34  ;;  %v16370_v17 = vsub.f32 %v3221_v9, %v16355_v20 }
 0x3cb   : > { %3577 = vmatprep.subr.mxu0 %v16285_v54  ;;  %3425 = vmatpush1.msra.mxu1 %v3424_v32  ;;  %v332_v32 = vld [vmem:[#allocation6 + $0x2b0] sm:$0xff] }
 0x3cc   : > { %3580 = vmatpush1.msra.mxu0 %v16267_v18  ;;  %3431 = vmatprep.subr.mxu1 %v3430_v28  ;;  %v3338_v28 = vsub.f32 %v16325_v12, %v3337_v26  ;;  %v3328_v0 = vand.u32 4294901760, %v3327_v58  ;;  %v3349_v9 = vsub.f32 %v16353_v34, %v3348_v55  ;;  %v3359_v58 = vand.u32 4294901760, %v16370_v17 }
 0x3cd   : > { %3583 = vmatprep.subr.mxu0 %v16252_v43  ;;  %3312 = vmatprep.mubr.f32.mxu0 %v18685_v46 }
 0x3ce   : > { %3437 = vmatpush1.msra.mxu1 %v3436_v44  ;;  %3586 = vmatpush1.msra.mxu0 %v16264_v37  ;;  %v16372_v44 = vand.u32 4294901760, %v3224_v24  ;;  %v3339_v47 = vand.u32 4294901760, %v3338_v28  ;;  %v18852_v37 = vld [vmem:[#allocation87_spill] sm:$0xff] }
 0x3cf   : > { %3318 = vmatmul.mubr.f32.gmra.mxu0 %v3317_v48  ;;  %3443 = vmatprep.subr.mxu1 %v3442_v40  ;;  %v3227_v48 = vsel %vm3204_vm1, %v332_v32, 0 }
 0x3d0   : > { %3589 = vmatprep.subr.mxu0 %v16275_v51  ;;  %3449 = vmatpush1.msra.mxu1 %v3448_v52  ;;  %v16385_v40 = vsub.f32 %v3224_v24, %v16372_v44  ;;  %v16387_v59 = vand.u32 4294901760, %v3227_v48  ;;  %v3350_v24 = vand.u32 4294901760, %v3349_v9  ;;  %v3360_v52 = vsub.f32 %v16370_v17, %v3359_v58 }
 0x3d1   : > { %3592 = vmatpush1.msra.mxu0 %v16281_v15  ;;  %3455 = vmatprep.subr.mxu1 %v3454_v23 }
 0x3d2   : > { %3595 = vmatprep.subr.mxu0 %v16290_v29  ;;  %3323 = vmatprep.mubr.f32.mxu0 %v18685_v46  ;;  %v3370_v32 = vand.u32 4294901760, %v16385_v40  ;;  %v16402_v54 = vsub.f32 %v3227_v48, %v16387_v59 }
 0x3d3   : > { %3461 = vmatpush1.msra.mxu1 %v3460_v41  ;;  %3598 = vmatpush1.msra.mxu0 %v16303_v42 }
 0x3d4   : > { %3329 = vmatmul.mubr.f32.gmra.mxu0 %v3328_v0  ;;  %3496 = vmatmul.mubr.f32.vlgmr.msra.gmra.mxu1 %v16232_v10  ;;  %v3371_v23 = vsub.f32 %v16385_v40, %v3370_v32  ;;  %v3381_v28 = vand.u32 4294901760, %v16402_v54 }
 0x3d5   : > { %3721 = vmatprep.subr.mxu1 %v16269_v35  ;;  %3868 = vmatprep.subr.mxu0 %v3416_v1  ;;  %v3361_v1 = vand.u32 4294901760, %v3360_v52  ;;  %v4184_v52 = vld [vmem:[#allocation6 + $0x460] sm:$0xff] }
 0x3d6   : > { %3723 = vmatpush1.msra.mxu1 %v16254_v21  ;;  %3334 = vmatprep.mubr.f32.mxu0 %v18685_v46  ;;  %v3372_v0 = vand.u32 4294901760, %v3371_v23  ;;  %v3382_v41 = vsub.f32 %v16402_v54, %v3381_v28  ;;  %v16660_v23 = vand.u32 4294901760, %v4184_v52 }
 0x3d7   : > { %3725 = vmatprep.subr.mxu1 %v16243_v53  ;;  %3501 = vmatprep.mubr.f32.mxu1 %v18685_v46 }
 0x3d8   : > { %3727 = vmatpush1.msra.mxu1 %v16241_v63  ;;  %3340 = vmatmul.mubr.f32.gmra.mxu0 %v3339_v47  ;;  %v3383_v48 = vand.u32 4294901760, %v3382_v41  ;;  %v4185_v47 = vld [vmem:[#allocation6 + $0x470] sm:$0xff]  ;;  %18876 = vst [vmem:[#allocation39_spill] sm:$0xff] %v16660_v23 }
 0x3d9   : > { %3503 = vmatmul.mubr.f32.gmra.mxu1 %v16238_v11  ;;  %3729 = vmatprep.subr.mxu1 %v16246_v36 }
 0x3da   : > { %3731 = vmatpush1.msra.mxu1 %v16249_v60  ;;  %3345 = vmatprep.mubr.f32.mxu0 %v18685_v46 }
 0x3db   : > { %3733 = vmatprep.subr.mxu1 %v16256_v8  ;;  %3508 = vmatprep.mubr.f32.mxu1 %v18685_v46 }
 0x3dc   : > { %3735 = vmatpush1.msra.mxu1 %v16272_v62  ;;  %3351 = vmatmul.mubr.f32.gmra.mxu0 %v3350_v24 }
 0x3dd   : > { %3510 = vmatmul.mubr.f32.gmra.mxu1 %v16261_v4  ;;  %4011 = vmatprep.subr.mxu1 %v16269_v35 }
 0x3de   : > { %3356 = vmatprep.mubr.f32.mxu0 %v18685_v46  ;;  %3515 = vmatprep.mubr.f32.mxu1 %v18685_v46 }
 0x3e0   : > { %3362 = vmatmul.mubr.f32.gmra.mxu0 %v3361_v1 }
 0x3e1   : > { %3517 = vmatmul.mubr.f32.gmra.mxu1 %v16294_v2  ;;  %3367 = vmatprep.mubr.f32.mxu0 %v18685_v46 }
 0x3e2   : > { %3522 = vmatprep.mubr.f32.mxu1 %v18685_v46 }
 0x3e4   : > { %3373 = vmatmul.mubr.f32.gmra.mxu0 %v3372_v0  ;;  %v4183_v0 = vld [vmem:[#allocation6 + $0x450] sm:$0xff] }
 0x3e5   : > { %3524 = vmatmul.mubr.f32.gmra.mxu1 %v16332_v45  ;;  %3378 = vmatprep.mubr.f32.mxu0 %v18685_v46 }
 0x3e6   : > { %3529 = vmatprep.mubr.f32.mxu1 %v18685_v46 }
 0x3e8   : > { %3384 = vmatmul.mubr.f32.gmra.mxu0 %v3383_v48 }
 0x3e9   : > { %3531 = vmatmul.mubr.f32.gmra.mxu1 %v16355_v20  ;;  %3631 = vmatprep.mubr.f32.mxu0 %v18685_v46 }
 0x3ea   : > { %3536 = vmatprep.mubr.f32.mxu1 %v18685_v46 }
 0x3ec   : > { %3634 = vmatmul.mubr.f32.vlgmr.msra.gmra.mxu0 %v16236_v33  ;;  %v18848_v33 = vld [vmem:[#allocation45_spill] sm:$0xff] }
 0x3ed   : > { %3538 = vmatmul.mubr.f32.gmra.mxu1 %v16372_v44  ;;  %3872 = vmatpush1.msra.mxu0 %v3422_v61 }
 0x3ee   : > { %3876 = vmatprep.subr.mxu0 %v3428_v30  ;;  %3543 = vmatprep.mubr.f32.mxu1 %v18685_v46  ;;  %v4189_v30 = vld [vmem:[#allocation6 + $0x4b0] sm:$0xff] }
 0x3ef   : > { %3880 = vmatpush1.msra.mxu0 %v3434_v5  ;;  %3639 = vmatprep.mubr.f32.mxu0 %v18685_v46  ;;  %v16603_v29 = vand.u32 4294901760, %v4189_v30 }
 0x3f0   : > { %3884 = vmatprep.subr.mxu0 %v3440_v3  ;;  %3642 = vmatmul.mubr.f32.gmra.mxu0 %v16259_v6  ;;  %v18851_v6 = vld [vmem:[#allocation90_spill] sm:$0xff]  ;;  %v4187_v3 = vld [vmem:[#allocation6 + $0x490] sm:$0xff] }
 0x3f1   : > { %3545 = vmatmul.mubr.f32.gmra.mxu1 %v16387_v59  ;;  %3888 = vmatpush1.msra.mxu0 %v3446_v7  ;;  %18861 = vst [vmem:[#allocation40_spill] sm:$0xff] %v16603_v29 }
 0x3f2   : > { %3892 = vmatprep.subr.mxu0 %v3452_v19  ;;  %3647 = vmatprep.mubr.f32.mxu0 %v18685_v46 }
 0x3f3   : > { %3896 = vmatpush1.msra.mxu0 %v3458_v16  ;;  %3768 = vmatprep.mubr.f32.mxu1 %v18685_v46  ;;  %v4186_v16 = vld [vmem:[#allocation6 + $0x480] sm:$0xff] }
 0x3f4   : > { %13226 = vmatprep.subr.mxu0 %v18847_v49  ;;  %3650 = vmatmul.mubr.f32.gmra.mxu0 %v16300_v25 }
 0x3f5   : > { %3772 = vmatmul.mubr.f32.vlgmr.msra.gmra.mxu1 %v3304_v13  ;;  %3655 = vmatprep.mubr.f32.mxu0 %v18685_v46  ;;  %v4175_v13 = vld [vmem:[#allocation6 + $0x3d0] sm:$0xff] }
 0x3f6   : > { %4013 = vmatpush1.msra.mxu1 %v16254_v21  ;;  %3777 = vmatprep.mubr.f32.mxu1 %v18685_v46  ;;  %v4208_v43 = vsel %vm3204_vm1, %v4175_v13, 0  ;;  %v18850_v21 = vld [vmem:[#allocation36_spill] sm:$0xff] }
 0x3f7   : > { %4015 = vmatprep.subr.mxu1 %v16243_v53  ;;  %v4174_v53 = vld [vmem:[#allocation6 + $0x3c0] sm:$0xff] }
 0x3f8   : > { %4017 = vmatpush1.msra.mxu1 %v16241_v63  ;;  %3658 = vmatmul.mubr.f32.gmra.mxu0 %v16325_v12  ;;  %v18849_v63 = vand.u32 4294901760, %v16300_v25  ;;  %v16613_v25 = vsub.f32 %v4189_v30, %v16603_v29 }
 0x3f9   : > { %4019 = vmatprep.subr.mxu1 %v16246_v36  ;;  %3781 = vmatmul.mubr.f32.gmra.mxu1 %v3315_v27  ;;  %v4205_v36 = vsel %vm3204_vm1, %v4174_v53, 0  ;;  %v4188_v27 = vld [vmem:[#allocation6 + $0x4a0] sm:$0xff] }
 0x3fa   : > { %4021 = vmatpush1.msra.mxu1 %v16249_v60  ;;  %3663 = vmatprep.mubr.f32.mxu0 %v18685_v46  ;;  %v16514_v60 = vand.u32 4294901760, %v4205_v36  ;;  %18863 = vst [vmem:[#allocation31_spill] sm:$0xff] %v16613_v25  ;;  %v16615_v42 = vand.u32 4294901760, %v4188_v27  ;;  %v16622_v12 = vand.u32 4294901760, %v16613_v25 }
 0x3fb   : > { %4023 = vmatprep.subr.mxu1 %v16256_v8  ;;  %3786 = vmatprep.mubr.f32.mxu1 %v18685_v46  ;;  %v16522_v8 = vand.u32 4294901760, %v4208_v43 }
 0x3fc   : > { %4025 = vmatpush1.msra.mxu1 %v16272_v62  ;;  %3666 = vmatmul.mubr.f32.gmra.mxu0 %v16353_v34  ;;  %18864 = vst [vmem:[#allocation52_spill] sm:$0xff] %v16615_v42  ;;  %18865 = vst [vmem:[#allocation42_spill] sm:$0xff] %v16622_v12  ;;  %v4857_v34 = vsub.f32 %v16613_v25, %v16622_v12 }
 0x3fd   : > { %13237 = vmatprep.subr.mxu1 %v18848_v33  ;;  %3790 = vmatmul.mubr.f32.gmra.mxu1 %v18849_v63  ;;  %v4290_v18 = vsub.f32 %v4208_v43, %v16522_v8  ;;  %v16674_v63 = vand.u32 4294901760, %v4183_v0 }
 0x3fe   : > { %3671 = vmatprep.mubr.f32.mxu0 %v18685_v46  ;;  %3795 = vmatprep.mubr.f32.mxu1 %v18685_v46  ;;  %v4858_v9 = vand.u32 4294901760, %v4857_v34 }
 0x3ff   : > { %v4291_v35 = vand.u32 4294901760, %v4290_v18  ;;  %18879 = vst [vmem:[#allocation72_spill] sm:$0xff] %v16674_v63 }
 0x400   : > { %3674 = vmatmul.mubr.f32.gmra.mxu0 %v16370_v17  ;;  %v16636_v17 = vand.u32 4294901760, %v4186_v16 }
 0x401   : > { %3799 = vmatmul.mubr.f32.gmra.mxu1 %v3337_v26  ;;  %3679 = vmatprep.mubr.f32.mxu0 %v18685_v46  ;;  %v4292_v51 = vsub.f32 %v4290_v18, %v4291_v35 }
 0x402   : > { %3804 = vmatprep.mubr.f32.mxu1 %v18685_v46  ;;  %18869 = vst [vmem:[#allocation58_spill] sm:$0xff] %v16636_v17 }
 0x403   : > { %v4293_v15 = vand.u32 4294901760, %v4292_v51 }
 0x404   : > { %3682 = vmatmul.mubr.f32.gmra.mxu0 %v16385_v40  ;;  %v16645_v40 = vsub.f32 %v4186_v16, %v16636_v17 }
 0x405   : > { %3808 = vmatmul.mubr.f32.gmra.mxu1 %v3348_v55  ;;  %3687 = vmatprep.mubr.f32.mxu0 %v18685_v46  ;;  %v16625_v55 = vsub.f32 %v4188_v27, %v16615_v42 }
 0x406   : > { %3813 = vmatprep.mubr.f32.mxu1 %v18685_v46  ;;  %18871 = vst [vmem:[#allocation61_spill] sm:$0xff] %v16645_v40 }
 0x407   : > { %18866 = vst [vmem:[#allocation43_spill] sm:$0xff] %v16625_v55 }
 0x408   : > { %3690 = vmatmul.mubr.f32.gmra.mxu0 %v16402_v54  ;;  %v16655_v54 = vand.u32 4294901760, %v16645_v40 }
 0x409   : > { %3817 = vmatmul.mubr.f32.gmra.mxu1 %v3359_v58  ;;  %3929 = vmatprep.mubr.f32.mxu0 %v18685_v46 }
 0x40a   : > { %3822 = vmatprep.mubr.f32.mxu1 %v18685_v46  ;;  %18874 = vst [vmem:[#allocation62_spill] sm:$0xff] %v16655_v54  ;;  %v4878_v41 = vsub.f32 %v16645_v40, %v16655_v54 }
 0x40c   : > { %3931 = vmatmul.mubr.f32.vlgmr.msra.gmra.mxu0 %v16232_v10  ;;  %v4879_v13 = vand.u32 4294901760, %v4878_v41 }
 0x40d   : > { %3826 = vmatmul.mubr.f32.gmra.mxu1 %v3370_v32  ;;  %13227 = vmatpush3.msra.mxu0 %v18847_v49 }
 0x40e   : > { %13228 = vmatprep.subr.mxu0 %v18846_v38  ;;  %3831 = vmatprep.mubr.f32.mxu1 %v18685_v46 }
 0x40f   : > { %13229 = vmatpush3.msra.mxu0 %v18846_v38  ;;  %3936 = vmatprep.mubr.f32.mxu0 %v18685_v46 }
 0x410   : > { %13230 = vmatprep.subr.mxu0 %v18842_v39  ;;  %3938 = vmatmul.mubr.f32.gmra.mxu0 %v16238_v11 }
 0x411   : > { %3835 = vmatmul.mubr.f32.gmra.mxu1 %v3381_v28  ;;  %13231 = vmatpush3.msra.mxu0 %v18842_v39 }
 0x412   : > { %13232 = vmatprep.subr.mxu0 %v18837_v57  ;;  %3943 = vmatprep.mubr.f32.mxu0 %v18685_v46 }
 0x413   : > { %13233 = vmatpush3.msra.mxu0 %v18837_v57  ;;  %4058 = vmatprep.mubr.f32.mxu1 %v18685_v46 }
 0x414   : > { %13248 = vmatprep.subr.mxu0 %v16029_v50  ;;  %3945 = vmatmul.mubr.f32.gmra.mxu0 %v16261_v4 }
 0x415   : > { %4060 = vmatmul.mubr.f32.vlgmr.msra.gmra.mxu1 %v16232_v10  ;;  %3950 = vmatprep.mubr.f32.mxu0 %v18685_v46  ;;  %v4280_v10 = vsub.f32 %v4205_v36, %v16514_v60  ;;  %v4182_v36 = vld [vmem:[#allocation6 + $0x440] sm:$0xff] }
 0x416   : > { %13238 = vmatpush3.msra.mxu1 %v18848_v33  ;;  %4065 = vmatprep.mubr.f32.mxu1 %v18685_v46  ;;  %v16672_v33 = vsub.f32 %v4184_v52, %v16660_v23 }
 0x417   : > { %13239 = vmatprep.subr.mxu1 %v18850_v21 }
 0x418   : > { %13240 = vmatpush3.msra.mxu1 %v18850_v21  ;;  %3952 = vmatmul.mubr.f32.gmra.mxu0 %v16294_v2  ;;  %18878 = vst [vmem:[#allocation54_spill] sm:$0xff] %v16672_v33  ;;  %v16681_v43 = vand.u32 4294901760, %v16672_v33  ;;  %v16684_v21 = vsub.f32 %v4183_v0, %v16674_v63  ;;  %v4176_v0 = vld [vmem:[#allocation6 + $0x3e0] sm:$0xff] }
 0x419   : > { %13241 = vmatprep.subr.mxu1 %v18851_v6  ;;  %4067 = vmatmul.mubr.f32.gmra.mxu1 %v16238_v11  ;;  %v4281_v11 = vand.u32 4294901760, %v4280_v10 }
 0x41a   : > { %13242 = vmatpush3.msra.mxu1 %v18851_v6  ;;  %3957 = vmatprep.mubr.f32.mxu0 %v18685_v46  ;;  %18880 = vst [vmem:[#allocation41_spill] sm:$0xff] %v16681_v43  ;;  %18881 = vst [vmem:[#allocation65_spill] sm:$0xff] %v16684_v21  ;;  %v4181_v6 = vld [vmem:[#allocation6 + $0x430] sm:$0xff] }
 0x41b   : > { %13243 = vmatprep.subr.mxu1 %v18852_v37  ;;  %4072 = vmatprep.mubr.f32.mxu1 %v18685_v46  ;;  %v4282_v62 = vsub.f32 %v4280_v10, %v4281_v11 }
 0x41c   : > { %13244 = vmatpush3.msra.mxu1 %v18852_v37  ;;  %3959 = vmatmul.mubr.f32.gmra.mxu0 %v16332_v45  ;;  %v4892_v37 = vsub.f32 %v16672_v33, %v16681_v43 }
 0x41d   : > { %13259 = vmatprep.subr.mxu1 %v18847_v49  ;;  %4074 = vmatmul.mubr.f32.gmra.mxu1 %v16261_v4  ;;  %v4283_v4 = vand.u32 4294901760, %v4282_v62  ;;  %v4180_v62 = vld [vmem:[#allocation6 + $0x420] sm:$0xff] }
 0x41e   : > { %3964 = vmatprep.mubr.f32.mxu0 %v18685_v46  ;;  %4079 = vmatprep.mubr.f32.mxu1 %v18685_v46  ;;  %v4893_v51 = vand.u32 4294901760, %v4892_v37 }
 0x420   : > { %3966 = vmatmul.mubr.f32.gmra.mxu0 %v16355_v20 }
 0x421   : > { %4081 = vmatmul.mubr.f32.gmra.mxu1 %v16294_v2  ;;  %3971 = vmatprep.mubr.f32.mxu0 %v18685_v46 }
 0x422   : > { %4086 = vmatprep.mubr.f32.mxu1 %v18685_v46 }
 0x424   : > { %3973 = vmatmul.mubr.f32.gmra.mxu0 %v16372_v44 }
 0x425   : > { %4088 = vmatmul.mubr.f32.gmra.mxu1 %v16332_v45  ;;  %3978 = vmatprep.mubr.f32.mxu0 %v18685_v46  ;;  %v16628_v45 = vand.u32 4294901760, %v4187_v3 }
 0x426   : > { %4093 = vmatprep.mubr.f32.mxu1 %v18685_v46 }
 0x427   : > { %18867 = vst [vmem:[#allocation56_spill] sm:$0xff] %v16628_v45 }
 0x428   : > { %3980 = vmatmul.mubr.f32.gmra.mxu0 %v16387_v59 }
 0x429   : > { %4095 = vmatmul.mubr.f32.gmra.mxu1 %v16355_v20  ;;  %13234 = vmatprep.mubr.f32.mxu0 %v4283_v4  ;;  %v16634_v20 = vand.u32 4294901760, %v16625_v55 }
 0x42a   : > { %4100 = vmatprep.mubr.f32.mxu1 %v18685_v46 }
 0x42b   : > { %18868 = vst [vmem:[#allocation32_spill] sm:$0xff] %v16634_v20  ;;  %v4864_v58 = vsub.f32 %v16625_v55, %v16634_v20 }
 0x42c   : > { %13235 = vmatmul.mubr.f32.vlgmr.msra.gmra.mxu0 %v4293_v15 }
 0x42d   : > { %4102 = vmatmul.mubr.f32.gmra.mxu1 %v16372_v44  ;;  %13249 = vmatpush3.msra.mxu0 %v16029_v50  ;;  %v4191_v50 = vld [vmem:[#allocation6 + $0x4d0] sm:$0xff]  ;;  %v16639_v44 = vsub.f32 %v4187_v3, %v16628_v45  ;;  %v4865_v32 = vand.u32 4294901760, %v4864_v58  ;;  %v4178_v3 = vld [vmem:[#allocation6 + $0x400] sm:$0xff] }
 0x42e   : > { %13250 = vmatprep.subr.mxu0 %v16005_v31  ;;  %4107 = vmatprep.mubr.f32.mxu1 %v18685_v46 }
 0x42f   : > { %13251 = vmatpush3.msra.mxu0 %v16005_v31  ;;  %13256 = vmatprep.mubr.f32.mxu0 %v4280_v10  ;;  %v18853_v31 = vld [vmem:[#allocation91_spill] sm:$0xff]  ;;  %18870 = vst [vmem:[#allocation46_spill] sm:$0xff] %v16639_v44  ;;  %v16651_v24 = vand.u32 4294901760, %v16639_v44 }
 0x430   : > { %13252 = vmatprep.subr.mxu0 %v15983_v22 }
 0x431   : > { %4109 = vmatmul.mubr.f32.gmra.mxu1 %v16387_v59  ;;  %13253 = vmatpush3.msra.mxu0 %v15983_v22  ;;  %v18854_v22 = vld [vmem:[#allocation86_spill] sm:$0xff]  ;;  %v16647_v59 = vand.u32 4294901760, %v4185_v47  ;;  %18873 = vst [vmem:[#allocation50_spill] sm:$0xff] %v16651_v24  ;;  %v4871_v28 = vsub.f32 %v16639_v44, %v16651_v24 }
 0x432   : > { %13254 = vmatprep.subr.mxu0 %v15966_v56  ;;  %13245 = vmatprep.mubr.f32.mxu1 %v16514_v60 }
 0x433   : > { %13255 = vmatpush3.msra.mxu0 %v15966_v56  ;;  %v18855_v56 = vld [vmem:[#allocation82_spill] sm:$0xff]  ;;  %18872 = vst [vmem:[#allocation48_spill] sm:$0xff] %v16647_v59  ;;  %v16658_v1 = vsub.f32 %v4185_v47, %v16647_v59  ;;  %v4872_v53 = vand.u32 4294901760, %v4871_v28  ;;  %v4177_v47 = vld [vmem:[#allocation6 + $0x3f0] sm:$0xff] }
 0x434   : > { %13270 = vmatprep.subr.mxu0 %v16040_v14  ;;  %13257 = vmatmul.mubr.f32.vlgmr.msra.gmra.mxu0 %v4290_v18  ;;  %v16693_v18 = vand.u32 4294901760, %v16684_v21  ;;  %v16747_v28 = vand.u32 4294901760, %v4177_v47 }
 0x435   : > { %13246 = vmatmul.mubr.f32.vlgmr.msra.gmra.mxu1 %v16522_v8  ;;  %13271 = vmatpush3.msra.mxu0 %v16040_v14  ;;  %v16588_v14 = vand.u32 4294901760, %v4191_v50  ;;  %18875 = vst [vmem:[#allocation64_spill] sm:$0xff] %v16658_v1  ;;  %v16669_v48 = vand.u32 4294901760, %v16658_v1 }
 0x436   : > { %13260 = vmatpush3.msra.mxu1 %v18847_v49  ;;  %13272 = vmatprep.subr.mxu0 %v18853_v31  ;;  %18883 = vst [vmem:[#allocation67_spill] sm:$0xff] %v16693_v18  ;;  %v4899_v4 = vsub.f32 %v16684_v21, %v16693_v18  ;;  %18897 = vst [vmem:[#allocation57_spill] sm:$0xff] %v16747_v28 }
 0x437   : > { %13261 = vmatprep.subr.mxu1 %v18846_v38  ;;  %13273 = vmatpush3.msra.mxu0 %v18853_v31  ;;  %18856 = vst [vmem:[#allocation29_spill] sm:$0xff] %v16588_v14  ;;  %v16591_v61 = vsub.f32 %v4191_v50, %v16588_v14  ;;  %18877 = vst [vmem:[#allocation66_spill] sm:$0xff] %v16669_v48  ;;  %v16707_v31 = vand.u32 4294901760, %v4180_v62 }
 0x438   : > { %13262 = vmatpush3.msra.mxu1 %v18846_v38  ;;  %13274 = vmatprep.subr.mxu0 %v18854_v22  ;;  %v4900_v50 = vand.u32 4294901760, %v4899_v4 }
 0x439   : > { %13263 = vmatprep.subr.mxu1 %v18842_v39  ;;  %13275 = vmatpush3.msra.mxu0 %v18854_v22  ;;  %18857 = vst [vmem:[#allocation38_spill] sm:$0xff] %v16591_v61  ;;  %18887 = vst [vmem:[#allocation75_spill] sm:$0xff] %v16707_v31  ;;  %v16718_v30 = vsub.f32 %v4180_v62, %v16707_v31 }
 0x43a   : > { %13264 = vmatpush3.msra.mxu1 %v18842_v39  ;;  %13276 = vmatprep.subr.mxu0 %v18855_v56 }
 0x43b   : > { %13265 = vmatprep.subr.mxu1 %v18837_v57  ;;  %13267 = vmatprep.mubr.f32.mxu1 %v4281_v11  ;;  %v16695_v11 = vand.u32 4294901760, %v4181_v6  ;;  %18890 = vst [vmem:[#allocation74_spill] sm:$0xff] %v16718_v30 }
 0x43c   : > { %13266 = vmatpush3.msra.mxu1 %v18837_v57  ;;  %13277 = vmatpush3.msra.mxu0 %v18855_v56  ;;  %v4179_v56 = vld [vmem:[#allocation6 + $0x410] sm:$0xff] }
 0x43d   : > { %13268 = vmatmul.mubr.f32.vlgmr.msra.gmra.mxu1 %v4291_v35  ;;  %13281 = vmatprep.subr.mxu1 %v18847_v49  ;;  %18884 = vst [vmem:[#allocation47_spill] sm:$0xff] %v16695_v11  ;;  %v16705_v15 = vsub.f32 %v4181_v6, %v16695_v11  ;;  %v16720_v27 = vand.u32 4294901760, %v4179_v56 }
 0x43e   : > { %13278 = vmatprep.mubr.f32.mxu0 %v16514_v60  ;;  %13282 = vmatpush3.msra.mxu1 %v18847_v49  ;;  %v4190_v49 = vld [vmem:[#allocation6 + $0x4c0] sm:$0xff] }
 0x43f   : > { %13279 = vmatmul.mubr.f32.vlgmr.msra.gmra.mxu0 %v16522_v8  ;;  %13283 = vmatprep.subr.mxu1 %v18846_v38  ;;  %18886 = vst [vmem:[#allocation49_spill] sm:$0xff] %v16705_v15  ;;  %18891 = vst [vmem:[#allocation26_spill] sm:$0xff] %v16720_v27  ;;  %v16732_v16 = vsub.f32 %v4179_v56, %v16720_v27 }
 0x440   : > { %13284 = vmatpush3.msra.mxu1 %v18846_v38  ;;  %13289 = vmatprep.mubr.f32.mxu1 %v16514_v60  ;;  %v16593_v38 = vand.u32 4294901760, %v4190_v49  ;;  %v4885_v60 = vsub.f32 %v16658_v1, %v16669_v48 }
 0x441   : > { %13285 = vmatprep.subr.mxu1 %v18842_v39  ;;  %13292 = vmatprep.subr.mxu0 %v16588_v14  ;;  %18893 = vst [vmem:[#allocation34_spill] sm:$0xff] %v16732_v16  ;;  %v16741_v52 = vand.u32 4294901760, %v16732_v16 }
 0x442   : > { %13286 = vmatpush3.msra.mxu1 %v18842_v39  ;;  %18858 = vst [vmem:[#allocation33_spill] sm:$0xff] %v16593_v38  ;;  %13293 = vmatpush3.msra.mxu0 %v16588_v14  ;;  %v16598_v39 = vand.u32 4294901760, %v16591_v61  ;;  %v4886_v10 = vand.u32 4294901760, %v4885_v60  ;;  %v16759_v60 = vsub.f32 %v4177_v47, %v16747_v28 }
 0x443   : > { %13287 = vmatprep.subr.mxu1 %v18837_v57  ;;  %13294 = vmatprep.subr.mxu0 %v16593_v38  ;;  %18895 = vst [vmem:[#allocation76_spill] sm:$0xff] %v16741_v52 }
 0x444   : > { %13288 = vmatpush3.msra.mxu1 %v18837_v57  ;;  %18859 = vst [vmem:[#allocation30_spill] sm:$0xff] %v16598_v39  ;;  %v16601_v57 = vsub.f32 %v4190_v49, %v16593_v38  ;;  %13295 = vmatpush3.msra.mxu0 %v16593_v38  ;;  %v4843_v2 = vsub.f32 %v16591_v61, %v16598_v39  ;;  %v16715_v49 = vand.u32 4294901760, %v16705_v15  ;;  %18900 = vst [vmem:[#allocation79_spill] sm:$0xff] %v16759_v60 }
 0x445   : > { %13290 = vmatmul.mubr.f32.vlgmr.msra.gmra.mxu1 %v16522_v8  ;;  %13296 = vmatprep.subr.mxu0 %v16603_v29  ;;  %v16687_v8 = vand.u32 4294901760, %v4182_v36  ;;  %v16769_v62 = vand.u32 4294901760, %v16759_v60 }
 0x446   : > { %18860 = vst [vmem:[#allocation35_spill] sm:$0xff] %v16601_v57  ;;  %v16610_v5 = vand.u32 4294901760, %v16601_v57  ;;  %13297 = vmatpush3.msra.mxu0 %v16603_v29  ;;  %v4844_v7 = vand.u32 4294901760, %v4843_v2  ;;  %18889 = vst [vmem:[#allocation70_spill] sm:$0xff] %v16715_v49 }
 0x447   : > { %13298 = vmatprep.subr.mxu0 %v16615_v42  ;;  %18882 = vst [vmem:[#allocation44_spill] sm:$0xff] %v16687_v8  ;;  %v16699_v35 = vsub.f32 %v4182_v36, %v16687_v8  ;;  %18902 = vst [vmem:[#allocation53_spill] sm:$0xff] %v16769_v62  ;;  %v4941_v56 = vsub.f32 %v16759_v60, %v16769_v62 }
 0x448   : > { %18862 = vst [vmem:[#allocation37_spill] sm:$0xff] %v16610_v5  ;;  %v4850_v19 = vsub.f32 %v16601_v57, %v16610_v5  ;;  %13299 = vmatpush3.msra.mxu0 %v16615_v42  ;;  %13327 = vmatprep.subr.mxu1 %v4844_v7 }
 0x449   : > { %13328 = vmatpush3.msra.mxu1 %v4844_v7  ;;  %13300 = vmatprep.subr.mxu0 %v16628_v45  ;;  %18885 = vst [vmem:[#allocation71_spill] sm:$0xff] %v16699_v35  ;;  %v16711_v22 = vand.u32 4294901760, %v16699_v35  ;;  %v4913_v7 = vsub.f32 %v16705_v15, %v16715_v49 }
 0x44a   : > { %v4851_v26 = vand.u32 4294901760, %v4850_v19  ;;  %13301 = vmatpush3.msra.mxu0 %v16628_v45  ;;  %v16729_v19 = vand.u32 4294901760, %v16718_v30 }
 0x44b   : > { %13302 = vmatprep.subr.mxu0 %v16636_v17  ;;  %18888 = vst [vmem:[#allocation51_spill] sm:$0xff] %v16711_v22  ;;  %v4906_v2 = vsub.f32 %v16699_v35, %v16711_v22 }
 0x44c   : > { %13329 = vmatprep.subr.mxu1 %v4851_v26  ;;  %13303 = vmatpush3.msra.mxu0 %v16636_v17  ;;  %18892 = vst [vmem:[#allocation69_spill] sm:$0xff] %v16729_v19  ;;  %v4920_v58 = vsub.f32 %v16718_v30, %v16729_v19 }
 0x44d   : > { %13330 = vmatpush3.msra.mxu1 %v4851_v26  ;;  %13304 = vmatprep.subr.mxu0 %v16647_v59  ;;  %v16734_v26 = vand.u32 4294901760, %v4178_v3  ;;  %v4907_v34 = vand.u32 4294901760, %v4906_v2  ;;  %v4942_v2 = vand.u32 4294901760, %v4941_v56 }
 0x44e   : > { %13331 = vmatprep.subr.mxu1 %v4858_v9  ;;  %13305 = vmatpush3.msra.mxu0 %v16647_v59  ;;  %v4921_v41 = vand.u32 4294901760, %v4920_v58 }
 0x44f   : > { %13332 = vmatpush3.msra.mxu1 %v4858_v9  ;;  %13306 = vmatprep.subr.mxu0 %v16660_v23  ;;  %18894 = vst [vmem:[#allocation73_spill] sm:$0xff] %v16734_v26  ;;  %v4914_v9 = vand.u32 4294901760, %v4913_v7 }
 0x450   : > { %13333 = vmatprep.subr.mxu1 %v4865_v32  ;;  %13307 = vmatpush3.msra.mxu0 %v16660_v23 }
 0x451   : > { %13334 = vmatpush3.msra.mxu1 %v4865_v32  ;;  %13308 = vmatprep.subr.mxu0 %v16674_v63  ;;  %v16744_v32 = vsub.f32 %v4178_v3, %v16734_v26 }
 0x452   : > { %13335 = vmatprep.subr.mxu1 %v4872_v53  ;;  %13309 = vmatpush3.msra.mxu0 %v16674_v63 }
 0x453   : > { %13336 = vmatpush3.msra.mxu1 %v4872_v53  ;;  %13310 = vmatprep.subr.mxu0 %v16687_v8  ;;  %18896 = vst [vmem:[#allocation55_spill] sm:$0xff] %v16744_v32  ;;  %v4927_v53 = vsub.f32 %v16732_v16, %v16741_v52  ;;  %v16753_v36 = vand.u32 4294901760, %v16744_v32 }
 0x454   : > { %13337 = vmatprep.subr.mxu1 %v4879_v13  ;;  %13311 = vmatpush3.msra.mxu0 %v16687_v8 }
 0x455   : > { %13338 = vmatpush3.msra.mxu1 %v4879_v13  ;;  %13312 = vmatprep.subr.mxu0 %v16695_v11  ;;  %18898 = vst [vmem:[#allocation60_spill] sm:$0xff] %v16753_v36  ;;  %v16755_v13 = vand.u32 4294901760, %v4176_v0  ;;  %v4928_v6 = vand.u32 4294901760, %v4927_v53 }
 0x456   : > { %13339 = vmatprep.subr.mxu1 %v4886_v10  ;;  %13313 = vmatpush3.msra.mxu0 %v16695_v11 }
 0x457   : > { %13340 = vmatpush3.msra.mxu1 %v4886_v10  ;;  %13314 = vmatprep.subr.mxu0 %v16707_v31  ;;  %18899 = vst [vmem:[#allocation77_spill] sm:$0xff] %v16755_v13  ;;  %v4934_v10 = vsub.f32 %v16744_v32, %v16753_v36  ;;  %v16765_v37 = vsub.f32 %v4176_v0, %v16755_v13 }
 0x458   : > { %13341 = vmatprep.subr.mxu1 %v4893_v51  ;;  %13315 = vmatpush3.msra.mxu0 %v16707_v31 }
 0x459   : > { %13342 = vmatpush3.msra.mxu1 %v4893_v51  ;;  %13316 = vmatprep.subr.mxu0 %v16720_v27  ;;  %18901 = vst [vmem:[#allocation28_spill] sm:$0xff] %v16765_v37  ;;  %v4935_v51 = vand.u32 4294901760, %v4934_v10  ;;  %v16773_v4 = vand.u32 4294901760, %v16765_v37 }
 0x45a   : > { %13343 = vmatprep.subr.mxu1 %v4900_v50  ;;  %13317 = vmatpush3.msra.mxu0 %v16720_v27 }
 0x45b   : > { %13344 = vmatpush3.msra.mxu1 %v4900_v50  ;;  %13318 = vmatprep.subr.mxu0 %v16734_v26  ;;  %18903 = vst [vmem:[#allocation27_spill] sm:$0xff] %v16773_v4  ;;  %v4948_v50 = vsub.f32 %v16765_v37, %v16773_v4 }
 0x45c   : > { %13345 = vmatprep.subr.mxu1 %v4907_v34  ;;  %13319 = vmatpush3.msra.mxu0 %v16734_v26 }
 0x45d   : > { %13346 = vmatpush3.msra.mxu1 %v4907_v34  ;;  %13320 = vmatprep.subr.mxu0 %v16747_v28  ;;  %v4949_v3 = vand.u32 4294901760, %v4948_v50 }
 0x45e   : > { %13347 = vmatprep.subr.mxu1 %v4914_v9  ;;  %13321 = vmatpush3.msra.mxu0 %v16747_v28 }
 0x45f   : > { %13348 = vmatpush3.msra.mxu1 %v4914_v9  ;;  %13322 = vmatprep.subr.mxu0 %v16755_v13 }
 0x460   : > { %13349 = vmatprep.subr.mxu1 %v4921_v41  ;;  %13323 = vmatpush3.msra.mxu0 %v16755_v13 }
 0x461   : > { %13350 = vmatpush3.msra.mxu1 %v4921_v41  ;;  %13362 = vmatprep.subr.mxu0 %v16591_v61 }
 0x462   : > { %13351 = vmatprep.subr.mxu1 %v4928_v6 }
 0x463   : > { %13352 = vmatpush3.msra.mxu1 %v4928_v6 }
 0x464   : > { %13353 = vmatprep.subr.mxu1 %v4935_v51 }
 0x465   : > { %13354 = vmatpush3.msra.mxu1 %v4935_v51 }
 0x466   : > { %13355 = vmatprep.subr.mxu1 %v4942_v2 }
 0x467   : > { %13356 = vmatpush3.msra.mxu1 %v4942_v2 }
 0x468   : > { %13357 = vmatprep.subr.mxu1 %v4949_v3 }
 0x469   : > { %13358 = vmatpush3.msra.mxu1 %v4949_v3 }
 0x46a   : > { %13397 = vmatprep.subr.mxu1 %v16588_v14 }
 0x48a   : > { %v16781_v7 = vpop.f32.mrf.mxu0 }
 0x48c   : > { %v16783_v34 = vpop.f32.mrf.mxu0 }
 0x48f   : > { %v16786_v47 = vpop.f32.mrf.mxu0 }
 0x491   : > { %v16788_v9 = vpop.f32.mrf.mxu0 }
 0x494   : > { %v16790_v58 = vpop.f32.mrf.mxu0  ;;  %v3497_v0 = vpop.f32.mrf.mxu1 }
 0x495   : > { %v3498_v38 = vadd.f32 %v3497_v0, %v16781_v7 }
 0x496   : > { %v16792_v41 = vpop.f32.mrf.mxu0  ;;  %v3499_v53 = vpop.f32.mrf.mxu1 }
 0x498   : > { %v16794_v6 = vpop.f32.mrf.mxu0 }
 0x499   : > { %v3504_v10 = vpop.f32.mrf.mxu1 }
 0x49a   : > { %v16796_v51 = vpop.f32.mrf.mxu0 }
 0x49b   : > { %v16798_v56 = vpop.f32.mrf.mxu1 }
 0x49c   : > { %v16800_v50 = vpop.f32.mrf.mxu0 }
 0x49d   : > { %v16802_v2 = vpop.f32.mrf.mxu1 }
 0x49e   : > { %v16804_v3 = vpop.f32.mrf.mxu0 }
 0x49f   : > { %v16806_v46 = vpop.f32.mrf.mxu1 }
 0x4a0   : > { %v16808_v4 = vpop.f32.mrf.mxu0 }
 0x4a1   : > { %v16810_v62 = vpop.f32.mrf.mxu1 }
 0x4a2   : > { %v16812_v36 = vpop.f32.mrf.mxu0 }
 0x4a3   : > { %v16814_v52 = vpop.f32.mrf.mxu1 }
 0x4a4   : > { %v16816_v19 = vpop.f32.mrf.mxu0 }
 0x4a5   : > { %v16818_v49 = vpop.f32.mrf.mxu1 }
 0x4a6   : > { %v16820_v22 = vpop.f32.mrf.mxu0 }
 0x4a7   : > { %18904 = vst [vmem:[#allocation68_spill] sm:$0xff] %v16820_v22  ;;  %v16822_v18 = vpop.f32.mrf.mxu1 }
 0x4a8   : > { %v16824_v43 = vpop.f32.mrf.mxu0 }
 0x4a9   : > { %18905 = vst [vmem:[#allocation59_spill] sm:$0xff] %v16824_v43  ;;  %v16826_v48 = vpop.f32.mrf.mxu1 }
 0x4aa   : > { %v16828_v54 = vpop.f32.mrf.mxu0 }
 0x4ab   : > { %18906 = vst [vmem:[#allocation63_spill] sm:$0xff] %v16828_v54  ;;  %v16830_v24 = vpop.f32.mrf.mxu1  ;;  %v3500_v54 = vadd.f32 %v3499_v53, %v16783_v34 }
 0x4ac   : > { %v3635_v20 = vpop.f32.mrf.mxu0 }
 0x4ad   : > { %v16832_v12 = vpop.f32.mrf.mxu1 }
 0x4ae   : > { %v3637_v5 = vpop.f32.mrf.mxu0 }
 0x4af   : > { %v16834_v39 = vpop.f32.mrf.mxu1 }
 0x4b0   : > { %18907 = vst [vmem:[#allocation81_spill] sm:$0xff] %v16834_v39  ;;  %v3643_v37 = vpop.f32.mrf.mxu0 }
 0x4b1   : > { %v16836_v60 = vpop.f32.mrf.mxu1 }
 0x4b2   : > { %18908 = vst [vmem:[#allocation83_spill] sm:$0xff] %v16836_v60  ;;  %v3645_v32 = vpop.f32.mrf.mxu0 }
 0x4b3   : > { %v16838_v16 = vpop.f32.mrf.mxu1 }
 0x4b4   : > { %18909 = vst [vmem:[#allocation85_spill] sm:$0xff] %v16838_v16  ;;  %v3651_v13 = vpop.f32.mrf.mxu0 }
 0x4b5   : > { %v3773_v30 = vpop.f32.mrf.mxu1 }
 0x4b6   : > { %v3653_v28 = vpop.f32.mrf.mxu0 }
 0x4b7   : > { %v3775_v15 = vpop.f32.mrf.mxu1 }
 0x4b8   : > { %v16840_v26 = vpop.f32.mrf.mxu0 }
 0x4b9   : > { %v3782_v35 = vpop.f32.mrf.mxu1 }
 0x4ba   : > { %v16842_v27 = vpop.f32.mrf.mxu0 }
 0x4bb   : > { %v3784_v21 = vpop.f32.mrf.mxu1 }
 0x4bc   : > { %v16844_v31 = vpop.f32.mrf.mxu0 }
 0x4bd   : > { %v3791_v33 = vpop.f32.mrf.mxu1 }
 0x4be   : > { %v16846_v11 = vpop.f32.mrf.mxu0 }
 0x4bf   : > { %v3793_v1 = vpop.f32.mrf.mxu1 }
 0x4c0   : > { %v16848_v8 = vpop.f32.mrf.mxu0 }
 0x4c1   : > { %v16850_v40 = vpop.f32.mrf.mxu1 }
 0x4c2   : > { %v16852_v63 = vpop.f32.mrf.mxu0 }
 0x4c3   : > { %v16854_v44 = vpop.f32.mrf.mxu1 }
 0x4c4   : > { %v16856_v23 = vpop.f32.mrf.mxu0 }
 0x4c5   : > { %18910 = vst [vmem:[#allocation89_spill] sm:$0xff] %v16856_v23  ;;  %v16858_v55 = vpop.f32.mrf.mxu1  ;;  %v3638_v23 = vadd.f32 %v3637_v5, %v3500_v54 }
 0x4c6   : > { %v16860_v59 = vpop.f32.mrf.mxu0 }
 0x4c7   : > { %18911 = vst [vmem:[#allocation45_spill] sm:$0xff] %v16860_v59  ;;  %v16862_v25 = vpop.f32.mrf.mxu1  ;;  %v3636_v59 = vadd.f32 %v3635_v20, %v3498_v38  ;;  %v3776_v0 = vadd.f32 %v3775_v15, %v3638_v23  ;;  %v3512_v38 = vadd.f32 %v16802_v2, %v16790_v58  ;;  %v3519_v15 = vadd.f32 %v16810_v62, %v16794_v6 }
 0x4c8   : > { %v16864_v17 = vpop.f32.mrf.mxu0 }
 0x4c9   : > { %18912 = vst [vmem:[#allocation36_spill] sm:$0xff] %v16864_v17  ;;  %v16866_v57 = vpop.f32.mrf.mxu1  ;;  %v3505_v17 = vadd.f32 %v3504_v10, %v16786_v47  ;;  %v3652_v54 = vadd.f32 %v3651_v13, %v3512_v38 }
 0x4ca   : > { %v16868_v61 = vpop.f32.mrf.mxu0 }
 0x4cb   : > { %18913 = vst [vmem:[#allocation90_spill] sm:$0xff] %v16868_v61  ;;  %v16870_v45 = vpop.f32.mrf.mxu1  ;;  %v3774_v61 = vadd.f32 %v3773_v30, %v3636_v59  ;;  %v3644_v7 = vadd.f32 %v3643_v37, %v3505_v17  ;;  %v3514_v59 = vadd.f32 %v16806_v46, %v16792_v41  ;;  %v18918_v17 = vld [vmem:[#allocation25_spill] sm:$0xff]  ;;  %v3521_v46 = vadd.f32 %v16814_v52, %v16796_v51 }
 0x4cc   : > { %18914 = vst [vmem:[#allocation87_spill] sm:$0xff] %v16870_v45  ;;  %v3932_v42 = vpop.f32.mrf.mxu0 }
 0x4cd   : > { %v16872_v29 = vpop.f32.mrf.mxu1  ;;  %v3933_v22 = vadd.f32 %v3932_v42, %v3774_v61  ;;  %v3783_v53 = vadd.f32 %v3782_v35, %v3644_v7  ;;  %v3654_v37 = vadd.f32 %v3653_v28, %v3514_v59  ;;  %v18920_v7 = vld [vmem:[#allocation23_spill] sm:$0xff]  ;;  %v3662_v6 = vadd.f32 %v16842_v27, %v3521_v46 }
 0x4ce   : > { %18915 = vst [vmem:[#allocation91_spill] sm:$0xff] %v16872_v29  ;;  %v3934_v14 = vpop.f32.mrf.mxu0  ;;  %v3507_v29 = vadd.f32 %v16798_v56, %v16788_v9  ;;  %v3540_v46 = vadd.f32 %v16832_v12, %v16816_v19 }
 0x4cf   : > { %v16875_v16 = vpop.f32.mrf.mxu1  ;;  %v3794_v13 = vadd.f32 %v3793_v1, %v3654_v37  ;;  %v18921_v1 = vld [vmem:[#allocation22_spill] sm:$0xff]  ;;  %v3803_v59 = vadd.f32 %v16854_v44, %v3662_v6  ;;  %v18923_v44 = vld [vmem:[#allocation20_spill] sm:$0xff] }
 0x4d0   : > { %18916 = vst [vmem:[#allocation86_spill] sm:$0xff] %v16875_v16  ;;  %v3939_v60 = vpop.f32.mrf.mxu0  ;;  %v3646_v34 = vadd.f32 %v3645_v32, %v3507_v29  ;;  %v3792_v29 = vadd.f32 %v3791_v33, %v3652_v54 }
 0x4d1   : > { %v16878_v43 = vpop.f32.mrf.mxu1  ;;  %v3940_v9 = vadd.f32 %v3939_v60, %v3783_v53  ;;  %v3528_v53 = vadd.f32 %v16822_v18, %v16804_v3 }
 0x4d2   : > { %18917 = vst [vmem:[#allocation82_spill] sm:$0xff] %v16878_v43  ;;  %v3941_v39 = vpop.f32.mrf.mxu0  ;;  %v3935_v43 = vadd.f32 %v3934_v14, %v3776_v0  ;;  %v3785_v10 = vadd.f32 %v3784_v21, %v3646_v34  ;;  %v3660_v21 = vadd.f32 %v16840_v26, %v3519_v15 }
 0x4d3   : > { %v16881_v45 = vpop.f32.mrf.mxu1  ;;  %v18929_v6 = vld [vmem:[#allocation87_spill] sm:$0xff] }
 0x4d4   : > { %v3946_v16 = vpop.f32.mrf.mxu0  ;;  %v3942_v14 = vadd.f32 %v3941_v39, %v3785_v10  ;;  %v3526_v39 = vadd.f32 %v16818_v49, %v16800_v50  ;;  %v3801_v0 = vadd.f32 %v16850_v40, %v3660_v21  ;;  %v18922_v40 = vld [vmem:[#allocation21_spill] sm:$0xff] }
 0x4d5   : > { %v4061_v20 = vpop.f32.mrf.mxu1  ;;  %v3947_v60 = vadd.f32 %v3946_v16, %v3792_v29  ;;  %v3535_v29 = vadd.f32 %v16830_v24, %v16812_v36 }
 0x4d6   : > { %v4062_v47 = vadd.f32 %v4061_v20, %v3933_v22  ;;  %v3948_v5 = vpop.f32.mrf.mxu0  ;;  %v18919_v22 = vld [vmem:[#allocation24_spill] sm:$0xff] }
 0x4d7   : > { %v4063_v30 = vpop.f32.mrf.mxu1  ;;  %v3949_v38 = vadd.f32 %v3948_v5, %v3794_v13  ;;  %v3678_v21 = vadd.f32 %v16852_v63, %v3535_v29  ;;  %v18940_v29 = vld [vmem:[#allocation15_spill] sm:$0xff] }
 0x4d8   : > { %v4115_v23 = vsub.f32 %v18918_v17, %v4062_v47  ;;  %v4064_v61 = vadd.f32 %v4063_v30, %v3935_v43  ;;  %v3953_v42 = vpop.f32.mrf.mxu0  ;;  %v3668_v47 = vadd.f32 %v16844_v31, %v3526_v39  ;;  %v3670_v17 = vadd.f32 %v16846_v11, %v3528_v53  ;;  %v18934_v53 = vld [vmem:[#allocation91_spill] sm:$0xff] }
 0x4d9   : > { %v4068_v35 = vpop.f32.mrf.mxu1  ;;  %v3954_v49 = vadd.f32 %v3953_v42, %v3801_v0  ;;  %v3821_v0 = vadd.f32 %v18929_v6, %v3678_v21  ;;  %v18943_v21 = vld [vmem:[#allocation14_spill] sm:$0xff] }
 0x4da   : > { %v4116_v32 = vsub.f32 %v18919_v22, %v4064_v61  ;;  %v4069_v58 = vadd.f32 %v4068_v35, %v3940_v9  ;;  %v3955_v56 = vpop.f32.mrf.mxu0  ;;  %v4131_v41 = vand.u32 2147483647, %v4115_v23  ;;  %v3533_v9 = vadd.f32 %v16826_v48, %v16808_v4 }
 0x4db   : > { %v4070_v43 = vpop.f32.mrf.mxu1  ;;  %v3810_v23 = vadd.f32 %v16858_v55, %v3668_v47  ;;  %v3956_v18 = vadd.f32 %v3955_v56, %v3803_v59  ;;  %v18924_v55 = vld [vmem:[#allocation19_spill] sm:$0xff] }
 0x4dc   : > { %v4132_v2 = vand.u32 2147483647, %v4116_v32  ;;  %v4117_v62 = vsub.f32 %v18920_v7, %v4069_v58  ;;  %v4071_v28 = vadd.f32 %v4070_v43, %v3942_v14  ;;  %v3960_v33 = vpop.f32.mrf.mxu0  ;;  %v3676_v35 = vadd.f32 %v16848_v8, %v3533_v9  ;;  %v18926_v7 = vld [vmem:[#allocation68_spill] sm:$0xff]  ;;  %v18937_v9 = vld [vmem:[#allocation85_spill] sm:$0xff] }
 0x4dd   : > { %v4075_v52 = vpop.f32.mrf.mxu1  ;;  %v3812_v14 = vadd.f32 %v16862_v25, %v3670_v17  ;;  %v3961_v48 = vadd.f32 %v3960_v33, %v3810_v23  ;;  %v18925_v25 = vld [vmem:[#allocation18_spill] sm:$0xff]  ;;  %v18928_v33 = vld [vmem:[#allocation89_spill] sm:$0xff]  ;;  %v18938_v23 = vld [vmem:[#allocation36_spill] sm:$0xff] }
 0x4de   : > { %v4147_v51 = vadd.f32 %v4132_v2, %v4131_v41  ;;  %v4133_v26 = vand.u32 2147483647, %v4117_v62  ;;  %v4118_v16 = vsub.f32 %v18921_v1, %v4071_v28  ;;  %v4076_v20 = vadd.f32 %v4075_v52, %v3947_v60  ;;  %v3962_v34 = vpop.f32.mrf.mxu0  ;;  %v18927_v62 = vld [vmem:[#allocation81_spill] sm:$0xff]  ;;  %v18932_v1 = vld [vmem:[#allocation83_spill] sm:$0xff] }
 0x4df   : > { %v4077_v50 = vpop.f32.mrf.mxu1  ;;  %v3819_v13 = vadd.f32 %v16866_v57, %v3676_v35  ;;  %v3963_v24 = vadd.f32 %v3962_v34, %v3812_v14  ;;  %v3542_v28 = vadd.f32 %v18927_v62, %v18926_v7  ;;  %v3684_v39 = vadd.f32 %v18928_v33, %v3540_v46  ;;  %v18930_v57 = vld [vmem:[#allocation17_spill] sm:$0xff]  ;;  %v18941_v14 = vld [vmem:[#allocation90_spill] sm:$0xff] }
 0x4e0   : > { %v4148_v27 = vadd.f32 %v4147_v51, %v4133_v26  ;;  %v4134_v54 = vand.u32 2147483647, %v4118_v16  ;;  %v4119_v5 = vsub.f32 %v18922_v40, %v4076_v20  ;;  %v4078_v30 = vadd.f32 %v4077_v50, %v3949_v38  ;;  %v3967_v10 = vpop.f32.mrf.mxu0  ;;  %v18931_v26 = vld [vmem:[#allocation59_spill] sm:$0xff]  ;;  %v18933_v20 = vld [vmem:[#allocation45_spill] sm:$0xff] }
 0x4e1   : > { %v4082_v3 = vpop.f32.mrf.mxu1  ;;  %v3968_v12 = vadd.f32 %v3967_v10, %v3819_v13  ;;  %v3547_v16 = vadd.f32 %v18932_v1, %v18931_v26  ;;  %v3686_v34 = vadd.f32 %v18933_v20, %v3542_v28  ;;  %v3828_v47 = vadd.f32 %v18934_v53, %v3684_v39  ;;  %v18936_v10 = vld [vmem:[#allocation63_spill] sm:$0xff]  ;;  %v18945_v39 = vld [vmem:[#allocation12_spill] sm:$0xff]  ;;  %v18947_v1 = vld [vmem:[#allocation10_spill] sm:$0xff] }
 0x4e2   : > { %v4149_v31 = vadd.f32 %v4148_v27, %v4134_v54  ;;  %v4135_v61 = vand.u32 2147483647, %v4119_v5  ;;  %v4120_v42 = vsub.f32 %v18923_v44, %v4078_v30  ;;  %v4083_v15 = vadd.f32 %v4082_v3, %v3954_v49  ;;  %v3969_v37 = vpop.f32.mrf.mxu0  ;;  %v18935_v54 = vld [vmem:[#allocation16_spill] sm:$0xff]  ;;  %v18939_v3 = vld [vmem:[#allocation86_spill] sm:$0xff] }
 0x4e3   : > { %v4084_v4 = vpop.f32.mrf.mxu1  ;;  %v3970_v59 = vadd.f32 %v3969_v37, %v3821_v0  ;;  %v3549_v17 = vadd.f32 %v18937_v9, %v18936_v10 }
 0x4e4   : > { %v4150_v11 = vadd.f32 %v4149_v31, %v4135_v61  ;;  %v4136_v22 = vand.u32 2147483647, %v4120_v42  ;;  %v4121_v32 = vsub.f32 %v18924_v55, %v4083_v15  ;;  %v4085_v58 = vadd.f32 %v4084_v4, %v3956_v18  ;;  %v3974_v56 = vpop.f32.mrf.mxu0  ;;  %v18942_v4 = vld [vmem:[#allocation82_spill] sm:$0xff] }
 0x4e5   : > { %v4089_v36 = vpop.f32.mrf.mxu1  ;;  %v3692_v18 = vadd.f32 %v18938_v23, %v3547_v16  ;;  %v3830_v31 = vadd.f32 %v18939_v3, %v3686_v34  ;;  %v3975_v61 = vadd.f32 %v3974_v56, %v3828_v47 }
 0x4e6   : > { %v4151_v8 = vadd.f32 %v4150_v11, %v4136_v22  ;;  %v4137_v60 = vand.u32 2147483647, %v4121_v32  ;;  %v4122_v43 = vsub.f32 %v18925_v25, %v4085_v58  ;;  %v4090_v41 = vadd.f32 %v4089_v36, %v3961_v48  ;;  %v3976_v2 = vpop.f32.mrf.mxu0 }
 0x4e7   : > { %v4091_v19 = vpop.f32.mrf.mxu1  ;;  %v3694_v48 = vadd.f32 %v18941_v14, %v3549_v17  ;;  %v3837_v11 = vadd.f32 %v18942_v4, %v3692_v18  ;;  %v3977_v22 = vadd.f32 %v3976_v2, %v3830_v31 }
 0x4e8   : > { %v4152_v63 = vadd.f32 %v4151_v8, %v4137_v60  ;;  %v4138_v38 = vand.u32 2147483647, %v4122_v43  ;;  %v4123_v52 = vsub.f32 %v18930_v57, %v4090_v41  ;;  %v4092_v51 = vadd.f32 %v4091_v19, %v3963_v24  ;;  %v3981_v5 = vpop.f32.mrf.mxu0  ;;  %v18944_v43 = vld [vmem:[#allocation13_spill] sm:$0xff]  ;;  %v18946_v57 = vld [vmem:[#allocation11_spill] sm:$0xff] }
 0x4e9   : > { %v4096_v49 = vpop.f32.mrf.mxu1  ;;  %v3839_v56 = vadd.f32 %v16881_v45, %v3694_v48  ;;  %v3982_v36 = vadd.f32 %v3981_v5, %v3837_v11  ;;  %v18948_v11 = vld [vmem:[#allocation29_spill] sm:$0xff] }
 0x4ea   : > { %v4153_v50 = vadd.f32 %v4152_v63, %v4138_v38  ;;  %v4139_v27 = vand.u32 2147483647, %v4123_v52  ;;  %v4124_v40 = vsub.f32 %v18935_v54, %v4092_v51  ;;  %v4097_v30 = vadd.f32 %v4096_v49, %v3968_v12  ;;  %v3983_v46 = vpop.f32.mrf.mxu0 }
 0x4eb   : > { %v4098_v44 = vpop.f32.mrf.mxu1  ;;  %v3984_v62 = vadd.f32 %v3983_v46, %v3839_v56  ;;  %v18950_v46 = vld [vmem:[#allocation40_spill] sm:$0xff] }
 0x4ec   : > { %v4154_v42 = vadd.f32 %v4153_v50, %v4139_v27  ;;  %v4140_v15 = vand.u32 2147483647, %v4124_v40  ;;  %v4125_v37 = vsub.f32 %v18940_v29, %v4097_v30  ;;  %v4099_v35 = vadd.f32 %v4098_v44, %v3970_v59  ;;  %v13236_v19 = vpop.f32.mrf.mxu0  ;;  %v18952_v56 = vld [vmem:[#allocation56_spill] sm:$0xff] }
 0x4ed   : > { %v4103_v55 = vpop.f32.mrf.mxu1 }
 0x4ee   : > { %v4155_v32 = vadd.f32 %v4154_v42, %v4140_v15  ;;  %v4141_v58 = vand.u32 2147483647, %v4125_v37  ;;  %v4126_v13 = vsub.f32 %v18943_v21, %v4099_v35  ;;  %v4104_v24 = vadd.f32 %v4103_v55, %v3975_v61  ;;  %v4285_v34 = vpop.f32.mrf.mxu0 }
 0x4ef   : > { %v4105_v8 = vpop.f32.mrf.mxu1 }
 0x4f0   : > { %v4156_v60 = vadd.f32 %v4155_v32, %v4141_v58  ;;  %v4142_v25 = vand.u32 2147483647, %v4126_v13  ;;  %v4127_v41 = vsub.f32 %v18944_v43, %v4104_v24  ;;  %v4106_v7 = vadd.f32 %v4105_v8, %v3977_v22  ;;  %v18949_v32 = vld [vmem:[#allocation33_spill] sm:$0xff]  ;;  %v18951_v24 = vld [vmem:[#allocation52_spill] sm:$0xff]  ;;  %v18954_v8 = vld [vmem:[#allocation35_spill] sm:$0xff] }
 0x4f1   : > { %v4110_v28 = vpop.f32.mrf.mxu1  ;;  %v18957_v43 = vld [vmem:[#allocation48_spill] sm:$0xff] }
 0x4f2   : > { %v4157_v33 = vadd.f32 %v4156_v60, %v4142_v25  ;;  %v4143_v2 = vand.u32 2147483647, %v4127_v41  ;;  %v4128_v6 = vsub.f32 %v18945_v39, %v4106_v7  ;;  %v4111_v0 = vadd.f32 %v4110_v28, %v3982_v36  ;;  %v18953_v36 = vld [vmem:[#allocation38_spill] sm:$0xff]  ;;  %v18956_v25 = vld [vmem:[#allocation31_spill] sm:$0xff]  ;;  %v18961_v28 = vld [vmem:[#allocation72_spill] sm:$0xff] }
 0x4f3   : > { %v4112_v12 = vpop.f32.mrf.mxu1  ;;  %v18955_v60 = vld [vmem:[#allocation58_spill] sm:$0xff]  ;;  %v18958_v41 = vld [vmem:[#allocation43_spill] sm:$0xff]  ;;  %v18964_v39 = vld [vmem:[#allocation64_spill] sm:$0xff] }
 0x4f4   : > { %v4158_v63 = vadd.f32 %v4157_v33, %v4143_v2  ;;  %v4144_v38 = vand.u32 2147483647, %v4128_v6  ;;  %v4129_v45 = vsub.f32 %v18946_v57, %v4111_v0  ;;  %v4113_v52 = vadd.f32 %v4112_v12, %v3984_v62  ;;  %v13258_v49 = vpop.f32.mrf.mxu0  ;;  %v18959_v7 = vld [vmem:[#allocation39_spill] sm:$0xff]  ;;  %v18960_v62 = vld [vmem:[#allocation46_spill] sm:$0xff]  ;;  %v18962_v33 = vld [vmem:[#allocation61_spill] sm:$0xff] }
 0x4f5   : > { %v13247_v51 = vpop.f32.mrf.mxu1  ;;  %v18963_v2 = vld [vmem:[#allocation44_spill] sm:$0xff]  ;;  %v18965_v6 = vld [vmem:[#allocation47_spill] sm:$0xff]  ;;  %v18966_v0 = vld [vmem:[#allocation54_spill] sm:$0xff] }
 0x4f6   : > { %v4145_v26 = vand.u32 2147483647, %v4129_v45  ;;  %v4130_v16 = vsub.f32 %v18947_v1, %v4113_v52  ;;  %v4159_v20 = vadd.f32 %v4158_v63, %v4144_v38  ;;  %v4393_v50 = vadd.f32 %v13247_v51, %v13236_v19  ;;  %v4472_v40 = vpop.f32.mrf.mxu0  ;;  %v18967_v12 = vld [vmem:[#allocation75_spill] sm:$0xff]  ;;  %v18968_v19 = vld [vmem:[#allocation65_spill] sm:$0xff]  ;;  %v18969_v63 = vld [vmem:[#allocation26_spill] sm:$0xff] }
 0x4f7   : > { %v4386_v59 = vpop.f32.mrf.mxu1  ;;  %v18970_v38 = vld [vmem:[#allocation71_spill] sm:$0xff]  ;;  %v18971_v57 = vld [vmem:[#allocation73_spill] sm:$0xff]  ;;  %v18974_v51 = vld [vmem:[#allocation74_spill] sm:$0xff] }
 0x4f8   : > { %v4146_v53 = vand.u32 2147483647, %v4130_v16  ;;  %v4160_v47 = vadd.f32 %v4159_v20, %v4145_v26  ;;  %v4387_v54 = vadd.f32 %v4386_v59, %v4285_v34  ;;  %v4480_v30 = vadd.f32 %v13258_v49, %v4393_v50  ;;  %v18972_v45 = vld [vmem:[#allocation49_spill] sm:$0xff]  ;;  %v18976_v1 = vld [vmem:[#allocation34_spill] sm:$0xff]  ;;  %v18977_v16 = vld [vmem:[#allocation55_spill] sm:$0xff] }
 0x4f9   : > { %v18973_v52 = vld [vmem:[#allocation57_spill] sm:$0xff]  ;;  %v18978_v20 = vld [vmem:[#allocation79_spill] sm:$0xff]  ;;  %v18979_v34 = vld [vmem:[#allocation28_spill] sm:$0xff] }
 0x4fa   : > { %v4161_v27 = vadd.f32 %v4160_v47, %v4146_v53  ;;  %v4473_v17 = vadd.f32 %v4472_v40, %v4387_v54  ;;  %v18975_v26 = vld [vmem:[#allocation77_spill] sm:$0xff]  ;;  %v18980_v53 = vld [vmem:[#allocation30_spill] sm:$0xff]  ;;  %v18983_v49 = vld [vmem:[#allocation32_spill] sm:$0xff] }
 0x4fb   : > { %v18981_v47 = vld [vmem:[#allocation37_spill] sm:$0xff]  ;;  %v18982_v59 = vld [vmem:[#allocation42_spill] sm:$0xff] }
 0x4fc   : > { %4162 = vadd.xlane.f32.xlu0 %v4161_v27  ;;  %v18984_v50 = vld [vmem:[#allocation50_spill] sm:$0xff]  ;;  %v18987_v40 = vld [vmem:[#allocation41_spill] sm:$0xff] }
 0x4fd   : > { %v13269_v5 = vpop.f32.mrf.mxu1  ;;  %v18985_v27 = vld [vmem:[#allocation62_spill] sm:$0xff] }
 0x4fe   : > { %v4565_v23 = vadd.f32 %v13269_v5, %v4480_v30  ;;  %v18986_v54 = vld [vmem:[#allocation66_spill] sm:$0xff]  ;;  %v18988_v5 = vld [vmem:[#allocation67_spill] sm:$0xff] }
 0x4ff   : > { %v4556_v10 = vpop.f32.mrf.mxu1  ;;  %v13280_v9 = vpop.f32.mrf.mxu0  ;;  %v18989_v30 = vld [vmem:[#allocation51_spill] sm:$0xff] }
 0x500   : > { %v4557_v18 = vadd.f32 %v4556_v10, %v4473_v17  ;;  %v4654_v31 = vadd.f32 %v13280_v9, %v4565_v23  ;;  %v18990_v10 = vld [vmem:[#allocation70_spill] sm:$0xff]  ;;  %v18991_v9 = vld [vmem:[#allocation69_spill] sm:$0xff]  ;;  %v18992_v17 = vld [vmem:[#allocation76_spill] sm:$0xff] }
 0x501   : > { %v4647_v3 = vpop.f32.mrf.mxu0  ;;  %v18993_v23 = vld [vmem:[#allocation60_spill] sm:$0xff] }
 0x502   : > { %v4648_v44 = vadd.f32 %v4647_v3, %v4557_v18  ;;  %v18994_v18 = vld [vmem:[#allocation53_spill] sm:$0xff]  ;;  %v18995_v3 = vld [vmem:[#allocation27_spill] sm:$0xff] }
 0x505   : > { %v13291_v61 = vpop.f32.mrf.mxu1 }
 0x506   : > { %v4735_v42 = vadd.f32 %v13291_v61, %v4654_v31 }
 0x507   : > { %v4728_v15 = vpop.f32.mrf.mxu1 }
 0x508   : > { %v16945_v29 = vand.u32 4294901760, %v4735_v42  ;;  %v4729_v37 = vadd.f32 %v4728_v15, %v4648_v44  ;;  %v4203_v44 = vld [vmem:[#allocation6 + $0x590] sm:$0xff] }
 0x509   : > { %v17092_v15 = vand.u32 4294901760, %v4203_v44 }
 0x50a   : > { %v16948_v35 = vsub.f32 %v4735_v42, %v16945_v29  ;;  %v16950_v14 = vand.u32 4294901760, %v4729_v37 }
 0x50c   : > { %v4831_v48 = vand.u32 4294901760, %v16948_v35  ;;  %v4820_v4 = vsub.f32 %v4729_v37, %v16950_v14  ;;  %13359 = vmatprep.mubr.f32.mxu1 %v16950_v14  ;;  %v4202_v37 = vld [vmem:[#allocation6 + $0x580] sm:$0xff] }
 0x50d   : > { %13360 = vmatmul.mubr.f32.vlgmr.msra.gmra.mxu1 %v16945_v29 }
 0x50e   : > { %13398 = vmatpush3.msra.mxu1 %v18948_v11  ;;  %v4821_v22 = vand.u32 4294901760, %v4820_v4  ;;  %v4832_v55 = vsub.f32 %v16948_v35, %v4831_v48 }
 0x50f   : > { %13399 = vmatprep.subr.mxu1 %v18949_v32 }
 0x510   : > { %13400 = vmatpush3.msra.mxu1 %v18949_v32  ;;  %13429 = vmatprep.mubr.f32.mxu1 %v4821_v22  ;;  %v4822_v58 = vsub.f32 %v4820_v4, %v4821_v22  ;;  %v4833_v13 = vand.u32 4294901760, %v4832_v55 }
 0x511   : > { %13401 = vmatprep.subr.mxu1 %v18950_v46 }
 0x512   : > { %13402 = vmatpush3.msra.mxu1 %v18950_v46  ;;  %v4823_v21 = vand.u32 4294901760, %v4822_v58 }
 0x513   : > { %13403 = vmatprep.subr.mxu1 %v18951_v24 }
 0x514   : > { %13404 = vmatpush3.msra.mxu1 %v18951_v24  ;;  %13324 = vmatprep.mubr.f32.mxu0 %v4823_v21 }
 0x515   : > { %13405 = vmatprep.subr.mxu1 %v18952_v56  ;;  %13325 = vmatmul.mubr.f32.vlgmr.msra.gmra.mxu0 %v4833_v13 }
 0x516   : > { %13363 = vmatpush3.msra.mxu0 %v18953_v36  ;;  %13406 = vmatpush3.msra.mxu1 %v18952_v56 }
 0x517   : > { %13364 = vmatprep.subr.mxu0 %v18954_v8  ;;  %13394 = vmatprep.mubr.f32.mxu0 %v4820_v4  ;;  %v4201_v4 = vld [vmem:[#allocation6 + $0x570] sm:$0xff] }
 0x518   : > { %13407 = vmatprep.subr.mxu1 %v18955_v60  ;;  %13365 = vmatpush3.msra.mxu0 %v18954_v8  ;;  %v17107_v55 = vand.u32 4294901760, %v4201_v4 }
 0x519   : > { %13408 = vmatpush3.msra.mxu1 %v18955_v60  ;;  %13366 = vmatprep.subr.mxu0 %v18956_v25 }
 0x51a   : > { %13409 = vmatprep.subr.mxu1 %v18957_v43  ;;  %13367 = vmatpush3.msra.mxu0 %v18956_v25  ;;  %v17117_v13 = vsub.f32 %v4201_v4, %v17107_v55 }
 0x51b   : > { %13410 = vmatpush3.msra.mxu1 %v18957_v43  ;;  %13368 = vmatprep.subr.mxu0 %v18958_v41 }
 0x51c   : > { %13411 = vmatprep.subr.mxu1 %v18959_v7  ;;  %13369 = vmatpush3.msra.mxu0 %v18958_v41  ;;  %v17126_v25 = vand.u32 4294901760, %v17117_v13 }
 0x51d   : > { %13412 = vmatpush3.msra.mxu1 %v18959_v7  ;;  %13370 = vmatprep.subr.mxu0 %v18960_v62 }
 0x51e   : > { %13413 = vmatprep.subr.mxu1 %v18961_v28  ;;  %13371 = vmatpush3.msra.mxu0 %v18960_v62 }
 0x51f   : > { %13414 = vmatpush3.msra.mxu1 %v18961_v28  ;;  %13372 = vmatprep.subr.mxu0 %v18962_v33 }
 0x520   : > { %13415 = vmatprep.subr.mxu1 %v18963_v2  ;;  %13373 = vmatpush3.msra.mxu0 %v18962_v33 }
 0x521   : > { %13416 = vmatpush3.msra.mxu1 %v18963_v2  ;;  %13374 = vmatprep.subr.mxu0 %v18964_v39 }
 0x522   : > { %13417 = vmatprep.subr.mxu1 %v18965_v6  ;;  %13375 = vmatpush3.msra.mxu0 %v18964_v39 }
 0x523   : > { %13418 = vmatpush3.msra.mxu1 %v18965_v6  ;;  %13376 = vmatprep.subr.mxu0 %v18966_v0 }
 0x524   : > { %13419 = vmatprep.subr.mxu1 %v18967_v12  ;;  %13377 = vmatpush3.msra.mxu0 %v18966_v0 }
 0x525   : > { %13420 = vmatpush3.msra.mxu1 %v18967_v12  ;;  %13378 = vmatprep.subr.mxu0 %v18968_v19 }
 0x526   : > { %13421 = vmatprep.subr.mxu1 %v18969_v63  ;;  %13379 = vmatpush3.msra.mxu0 %v18968_v19 }
 0x527   : > { %13422 = vmatpush3.msra.mxu1 %v18969_v63  ;;  %13380 = vmatprep.subr.mxu0 %v18970_v38 }
 0x528   : > { %13423 = vmatprep.subr.mxu1 %v18971_v57  ;;  %13381 = vmatpush3.msra.mxu0 %v18970_v38 }
 0x529   : > { %13424 = vmatpush3.msra.mxu1 %v18971_v57  ;;  %13382 = vmatprep.subr.mxu0 %v18972_v45 }
 0x52a   : > { %13425 = vmatprep.subr.mxu1 %v18973_v52  ;;  %13383 = vmatpush3.msra.mxu0 %v18972_v45 }
 0x52b   : > { %13426 = vmatpush3.msra.mxu1 %v18973_v52  ;;  %13384 = vmatprep.subr.mxu0 %v18974_v51 }
 0x52c   : > { %13427 = vmatprep.subr.mxu1 %v18975_v26  ;;  %13385 = vmatpush3.msra.mxu0 %v18974_v51 }
 0x52d   : > { %13428 = vmatpush3.msra.mxu1 %v18975_v26  ;;  %13386 = vmatprep.subr.mxu0 %v18976_v1 }
 0x52e   : > { %13430 = vmatmul.mubr.f32.vlgmr.msra.gmra.mxu1 %v4831_v48  ;;  %13467 = vmatprep.subr.mxu1 %v18948_v11  ;;  %v17097_v48 = vand.u32 4294901760, %v4202_v37 }
 0x52f   : > { %13387 = vmatpush3.msra.mxu0 %v18976_v1  ;;  %13468 = vmatpush3.msra.mxu1 %v18948_v11 }
 0x530   : > { %13499 = vmatprep.mubr.f32.mxu1 %v16950_v14  ;;  %13388 = vmatprep.subr.mxu0 %v18977_v16  ;;  %v17105_v22 = vsub.f32 %v4202_v37, %v17097_v48 }
 0x531   : > { %13469 = vmatprep.subr.mxu1 %v18949_v32  ;;  %13389 = vmatpush3.msra.mxu0 %v18977_v16 }
 0x532   : > { %13470 = vmatpush3.msra.mxu1 %v18949_v32  ;;  %13390 = vmatprep.subr.mxu0 %v18978_v20  ;;  %v4200_v32 = vld [vmem:[#allocation6 + $0x560] sm:$0xff]  ;;  %v17114_v21 = vand.u32 4294901760, %v17105_v22 }
 0x533   : > { %13471 = vmatprep.subr.mxu1 %v18950_v46  ;;  %13391 = vmatpush3.msra.mxu0 %v18978_v20 }
 0x534   : > { %13472 = vmatpush3.msra.mxu1 %v18950_v46  ;;  %13392 = vmatprep.subr.mxu0 %v18979_v34 }
 0x535   : > { %13473 = vmatprep.subr.mxu1 %v18951_v24  ;;  %13393 = vmatpush3.msra.mxu0 %v18979_v34 }
 0x536   : > { %13474 = vmatpush3.msra.mxu1 %v18951_v24  ;;  %13395 = vmatmul.mubr.f32.vlgmr.msra.gmra.mxu0 %v16948_v35  ;;  %v17120_v24 = vand.u32 4294901760, %v4200_v32 }
 0x537   : > { %13432 = vmatprep.subr.mxu0 %v18980_v53  ;;  %13475 = vmatprep.subr.mxu1 %v18952_v56 }
 0x538   : > { %13433 = vmatpush3.msra.mxu0 %v18980_v53  ;;  %13464 = vmatprep.mubr.f32.mxu0 %v16950_v14  ;;  %v17095_v14 = vsub.f32 %v4203_v44, %v17092_v15 }
 0x539   : > { %13476 = vmatpush3.msra.mxu1 %v18952_v56  ;;  %13434 = vmatprep.subr.mxu0 %v18981_v47  ;;  %v4199_v56 = vld [vmem:[#allocation6 + $0x550] sm:$0xff] }
 0x53a   : > { %13477 = vmatprep.subr.mxu1 %v18955_v60  ;;  %13435 = vmatpush3.msra.mxu0 %v18981_v47  ;;  %v17131_v41 = vand.u32 4294901760, %v4199_v56 }
 0x53b   : > { %13478 = vmatpush3.msra.mxu1 %v18955_v60  ;;  %13436 = vmatprep.subr.mxu0 %v18982_v59  ;;  %v5548_v60 = vsub.f32 %v17105_v22, %v17114_v21 }
 0x53c   : > { %13479 = vmatprep.subr.mxu1 %v18957_v43  ;;  %13437 = vmatpush3.msra.mxu0 %v18982_v59  ;;  %v17143_v39 = vsub.f32 %v4199_v56, %v17131_v41 }
 0x53d   : > { %13480 = vmatpush3.msra.mxu1 %v18957_v43  ;;  %13438 = vmatprep.subr.mxu0 %v18983_v49  ;;  %v17129_v43 = vsub.f32 %v4200_v32, %v17120_v24  ;;  %v5549_v62 = vand.u32 4294901760, %v5548_v60 }
 0x53e   : > { %13481 = vmatprep.subr.mxu1 %v18959_v7  ;;  %13439 = vmatpush3.msra.mxu0 %v18983_v49  ;;  %v17155_v38 = vand.u32 4294901760, %v17143_v39 }
 0x53f   : > { %13482 = vmatpush3.msra.mxu1 %v18959_v7  ;;  %13440 = vmatprep.subr.mxu0 %v18984_v50  ;;  %v4198_v7 = vld [vmem:[#allocation6 + $0x540] sm:$0xff] }
 0x540   : > { %13483 = vmatprep.subr.mxu1 %v18961_v28  ;;  %13441 = vmatpush3.msra.mxu0 %v18984_v50  ;;  %v17136_v33 = vand.u32 4294901760, %v4198_v7  ;;  %v5569_v1 = vsub.f32 %v17143_v39, %v17155_v38 }
 0x541   : > { %13484 = vmatpush3.msra.mxu1 %v18961_v28  ;;  %13442 = vmatprep.subr.mxu0 %v18985_v27  ;;  %v5555_v28 = vsub.f32 %v17117_v13, %v17126_v25 }
 0x542   : > { %13485 = vmatprep.subr.mxu1 %v18963_v2  ;;  %13443 = vmatpush3.msra.mxu0 %v18985_v27  ;;  %v5570_v53 = vand.u32 4294901760, %v5569_v1 }
 0x543   : > { %13486 = vmatpush3.msra.mxu1 %v18963_v2  ;;  %13444 = vmatprep.subr.mxu0 %v18986_v54  ;;  %v17140_v2 = vand.u32 4294901760, %v17129_v43  ;;  %v5556_v0 = vand.u32 4294901760, %v5555_v28 }
 0x544   : > { %13487 = vmatprep.subr.mxu1 %v18965_v6  ;;  %13445 = vmatpush3.msra.mxu0 %v18986_v54 }
 0x545   : > { %13488 = vmatpush3.msra.mxu1 %v18965_v6  ;;  %13446 = vmatprep.subr.mxu0 %v18987_v40  ;;  %v4197_v6 = vld [vmem:[#allocation6 + $0x530] sm:$0xff] }
 0x546   : > { %13489 = vmatprep.subr.mxu1 %v18967_v12  ;;  %13447 = vmatpush3.msra.mxu0 %v18987_v40  ;;  %v17149_v19 = vand.u32 4294901760, %v4197_v6 }
 0x547   : > { %13490 = vmatpush3.msra.mxu1 %v18967_v12  ;;  %13448 = vmatprep.subr.mxu0 %v18988_v5  ;;  %v17147_v12 = vsub.f32 %v4198_v7, %v17136_v33 }
 0x548   : > { %13491 = vmatprep.subr.mxu1 %v18969_v63  ;;  %13449 = vmatpush3.msra.mxu0 %v18988_v5 }
 0x549   : > { %13492 = vmatpush3.msra.mxu1 %v18969_v63  ;;  %13450 = vmatprep.subr.mxu0 %v18989_v30  ;;  %v5562_v63 = vsub.f32 %v17129_v43, %v17140_v2  ;;  %v17159_v45 = vand.u32 4294901760, %v17147_v12 }
 0x54a   : > { %13493 = vmatprep.subr.mxu1 %v18971_v57  ;;  %13451 = vmatpush3.msra.mxu0 %v18989_v30 }
 0x54b   : > { %13494 = vmatpush3.msra.mxu1 %v18971_v57  ;;  %13452 = vmatprep.subr.mxu0 %v18990_v10  ;;  %v4196_v57 = vld [vmem:[#allocation6 + $0x520] sm:$0xff]  ;;  %v5576_v16 = vsub.f32 %v17147_v12, %v17159_v45 }
 0x54c   : > { %13495 = vmatprep.subr.mxu1 %v18973_v52  ;;  %13453 = vmatpush3.msra.mxu0 %v18990_v10  ;;  %v17164_v51 = vand.u32 4294901760, %v4196_v57 }
 0x54d   : > { %13496 = vmatpush3.msra.mxu1 %v18973_v52  ;;  %13454 = vmatprep.subr.mxu0 %v18991_v9  ;;  %v17162_v52 = vsub.f32 %v4197_v6, %v17149_v19  ;;  %v5577_v47 = vand.u32 4294901760, %v5576_v16 }
 0x54e   : > { %13497 = vmatprep.subr.mxu1 %v18975_v26  ;;  %13455 = vmatpush3.msra.mxu0 %v18991_v9  ;;  %v17176_v34 = vsub.f32 %v4196_v57, %v17164_v51 }
 0x54f   : > { %13498 = vmatpush3.msra.mxu1 %v18975_v26  ;;  %13456 = vmatprep.subr.mxu0 %v18992_v17  ;;  %v5563_v26 = vand.u32 4294901760, %v5562_v63  ;;  %v17173_v20 = vand.u32 4294901760, %v17162_v52 }
 0x550   : > { %13500 = vmatmul.mubr.f32.vlgmr.msra.gmra.mxu1 %v16945_v29  ;;  %13457 = vmatpush3.msra.mxu0 %v18992_v17  ;;  %v17183_v49 = vand.u32 4294901760, %v17176_v34 }
 0x551   : > { %13458 = vmatprep.subr.mxu0 %v18993_v23  ;;  %v5583_v59 = vsub.f32 %v17162_v52, %v17173_v20 }
 0x552   : > { %13459 = vmatpush3.msra.mxu0 %v18993_v23  ;;  %v5590_v27 = vsub.f32 %v17176_v34, %v17183_v49 }
 0x553   : > { %13460 = vmatprep.subr.mxu0 %v18994_v18  ;;  %v5584_v50 = vand.u32 4294901760, %v5583_v59 }
 0x554   : > { %13461 = vmatpush3.msra.mxu0 %v18994_v18  ;;  %v5591_v54 = vand.u32 4294901760, %v5590_v27 }
 0x555   : > { %13462 = vmatprep.subr.mxu0 %v18995_v3 }
 0x556   : > { %13463 = vmatpush3.msra.mxu0 %v18995_v3 }
 0x557   : > { %13465 = vmatmul.mubr.f32.vlgmr.msra.gmra.mxu0 %v16945_v29  ;;  %13502 = vmatprep.subr.mxu0 %v17092_v15  ;;  %v17102_v29 = vand.u32 4294901760, %v17095_v14 }
 0x558   : > { %13503 = vmatpush3.msra.mxu0 %v17092_v15 }
 0x559   : > { %13504 = vmatprep.subr.mxu0 %v17097_v48  ;;  %v5541_v46 = vsub.f32 %v17095_v14, %v17102_v29 }
 0x55a   : > { %13505 = vmatpush3.msra.mxu0 %v17097_v48 }
 0x55b   : > { %13506 = vmatprep.subr.mxu0 %v17107_v55  ;;  %v5542_v8 = vand.u32 4294901760, %v5541_v46 }
 0x55c   : > { %13507 = vmatpush3.msra.mxu0 %v17107_v55 }
 0x55d   : > { %13508 = vmatprep.subr.mxu0 %v17120_v24  ;;  %13521 = vmatprep.subr.mxu1 %v5542_v8 }
 0x55e   : > { %13509 = vmatpush3.msra.mxu0 %v17120_v24  ;;  %13522 = vmatpush3.msra.mxu1 %v5542_v8 }
 0x55f   : > { %13510 = vmatprep.subr.mxu0 %v17131_v41  ;;  %13523 = vmatprep.subr.mxu1 %v5549_v62 }
 0x560   : > { %13511 = vmatpush3.msra.mxu0 %v17131_v41  ;;  %13524 = vmatpush3.msra.mxu1 %v5549_v62 }
 0x561   : > { %13512 = vmatprep.subr.mxu0 %v17136_v33  ;;  %13525 = vmatprep.subr.mxu1 %v5556_v0 }
 0x562   : > { %13513 = vmatpush3.msra.mxu0 %v17136_v33  ;;  %13526 = vmatpush3.msra.mxu1 %v5556_v0 }
 0x563   : > { %13514 = vmatprep.subr.mxu0 %v17149_v19  ;;  %13527 = vmatprep.subr.mxu1 %v5563_v26 }
 0x564   : > { %13515 = vmatpush3.msra.mxu0 %v17149_v19  ;;  %13528 = vmatpush3.msra.mxu1 %v5563_v26 }
 0x565   : > { %13516 = vmatprep.subr.mxu0 %v17164_v51  ;;  %13529 = vmatprep.subr.mxu1 %v5570_v53 }
 0x566   : > { %13517 = vmatpush3.msra.mxu0 %v17164_v51  ;;  %13530 = vmatpush3.msra.mxu1 %v5570_v53 }
 0x567   : > { %13540 = vmatprep.subr.mxu0 %v17095_v14  ;;  %13531 = vmatprep.subr.mxu1 %v5577_v47 }
 0x568   : > { %13532 = vmatpush3.msra.mxu1 %v5577_v47 }
 0x569   : > { %13533 = vmatprep.subr.mxu1 %v5584_v50 }
 0x56a   : > { %13534 = vmatpush3.msra.mxu1 %v5584_v50 }
 0x56b   : > { %13535 = vmatprep.subr.mxu1 %v5591_v54 }
 0x56c   : > { %13536 = vmatpush3.msra.mxu1 %v5591_v54 }
 0x56d   : > { %13559 = vmatprep.subr.mxu1 %v17092_v15 }
 0x585   : > { %v4163_v31 = vpop.xlane.xlu0 %4162 }
 0x586   : > { %v4164_v61 = vrot.slane %v4163_v31, 4 }
 0x588   : > { %v4165_v42 = vadd.f32 %v4164_v61, %v4163_v31 }
 0x58a   : > { %v4166_v35 = vrot.slane %v4165_v42, 2 }
 0x58c   : > { %v4167_v11 = vadd.f32 %v4166_v35, %v4165_v42 }
 0x58e   : > { %v4168_v58 = vrot.slane %v4167_v11, 1 }
 0x590   : > { %v4169_v36 = vadd.f32 %v4168_v58, %v4167_v11 }
 0x592   : > { %14228 = vpush %v4169_v36 }
 0x5c3   : > { %s14229_s17 = spop %14228 }
 0x5c4   : > { %s4171_s24 = smul.f32 3.0517578e-05, %s14229_s17 }
 0x5cd   : > { %v13361_v5 = vpop.f32.mrf.mxu1 }
 0x5cf   : > { %v4986_v9 = vpop.f32.mrf.mxu1 }
 0x5d5   : > { %v13326_v40 = vpop.f32.mrf.mxu0 }
 0x5d6   : > { %v4993_v17 = vadd.f32 %v13361_v5, %v13326_v40 }
 0x5d7   : > { %v4825_v30 = vpop.f32.mrf.mxu0 }
 0x5d8   : > { %v4987_v3 = vadd.f32 %v4986_v9, %v4825_v30 }
 0x5ee   : > { %v13431_v23 = vpop.f32.mrf.mxu1 }
 0x5f0   : > { %v5192_v44 = vpop.f32.mrf.mxu1 }
 0x5f6   : > { %v13396_v10 = vpop.f32.mrf.mxu0 }
 0x5f7   : > { %v5104_v31 = vadd.f32 %v13396_v10, %v4993_v17 }
 0x5f8   : > { %v5096_v18 = vpop.f32.mrf.mxu0 }
 0x5f9   : > { %v5097_v61 = vadd.f32 %v5096_v18, %v4987_v3  ;;  %v5201_v42 = vadd.f32 %v13431_v23, %v5104_v31 }
 0x5fb   : > { %v5193_v11 = vadd.f32 %v5192_v44, %v5097_v61 }
 0x610   : > { %v13501_v37 = vpop.f32.mrf.mxu1 }
 0x612   : > { %v5412_v56 = vpop.f32.mrf.mxu1 }
 0x617   : > { %v13466_v35 = vpop.f32.mrf.mxu0 }
 0x618   : > { %v5326_v4 = vadd.f32 %v13466_v35, %v5201_v42 }
 0x619   : > { %v5319_v32 = vpop.f32.mrf.mxu0 }
 0x61a   : > { %v17190_v58 = vadd.f32 %v13501_v37, %v5326_v4  ;;  %v5320_v46 = vadd.f32 %v5319_v32, %v5193_v11 }
 0x61c   : > { %v5426_v36 = vsel %vm365_vm0, %v17190_v58, 0  ;;  %v17194_v8 = vadd.f32 %v5412_v56, %v5320_v46 }
 0x61d   : > { %v17196_v60 = vand.u32 4294901760, %v5426_v36 }
 0x61e   : > { %v5423_v7 = vsel %vm365_vm0, %v17194_v8, 0 }
 0x61f   : > { %v5512_v62 = vsub.f32 %v5426_v36, %v17196_v60  ;;  %v5501_v28 = vand.u32 4294901760, %v5423_v7 }
 0x621   : > { %13537 = vmatprep.mubr.f32.mxu1 %v5501_v28  ;;  %v5502_v6 = vsub.f32 %v5423_v7, %v5501_v28  ;;  %v5513_v0 = vand.u32 4294901760, %v5512_v62 }
 0x622   : > { %13538 = vmatmul.mubr.f32.vlgmr.msra.gmra.mxu1 %v17196_v60 }
 0x623   : > { %13560 = vmatpush3.msra.mxu1 %v17092_v15  ;;  %v5503_v63 = vand.u32 4294901760, %v5502_v6  ;;  %v5514_v57 = vsub.f32 %v5512_v62, %v5513_v0 }
 0x624   : > { %13561 = vmatprep.subr.mxu1 %v17097_v48 }
 0x625   : > { %13562 = vmatpush3.msra.mxu1 %v17097_v48  ;;  %13575 = vmatprep.mubr.f32.mxu1 %v5503_v63  ;;  %v5504_v26 = vsub.f32 %v5502_v6, %v5503_v63  ;;  %v5515_v16 = vand.u32 4294901760, %v5514_v57  ;;  %v6632_v63 = vld [vmem:[#allocation6 + $0x5a0] sm:$0xff] }
 0x626   : > { %13563 = vmatprep.subr.mxu1 %v17107_v55 }
 0x627   : > { %13564 = vmatpush3.msra.mxu1 %v17107_v55  ;;  %v5505_v1 = vand.u32 4294901760, %v5504_v26 }
 0x628   : > { %13565 = vmatprep.subr.mxu1 %v17120_v24 }
 0x629   : > { %13566 = vmatpush3.msra.mxu1 %v17120_v24  ;;  %13518 = vmatprep.mubr.f32.mxu0 %v5505_v1 }
 0x62a   : > { %13567 = vmatprep.subr.mxu1 %v17131_v41  ;;  %13519 = vmatmul.mubr.f32.vlgmr.msra.gmra.mxu0 %v5515_v16  ;;  %v6648_v16 = vsel %vm6008_vm2, %v6632_v63, 0 }
 0x62b   : > { %13541 = vmatpush3.msra.mxu0 %v17095_v14  ;;  %13568 = vmatpush3.msra.mxu1 %v17131_v41 }
 0x62c   : > { %13542 = vmatprep.subr.mxu0 %v17105_v22  ;;  %13556 = vmatprep.mubr.f32.mxu0 %v5502_v6 }
 0x62d   : > { %13569 = vmatprep.subr.mxu1 %v17136_v33  ;;  %13543 = vmatpush3.msra.mxu0 %v17105_v22 }
 0x62e   : > { %13570 = vmatpush3.msra.mxu1 %v17136_v33  ;;  %13544 = vmatprep.subr.mxu0 %v17117_v13 }
 0x62f   : > { %13571 = vmatprep.subr.mxu1 %v17149_v19  ;;  %13545 = vmatpush3.msra.mxu0 %v17117_v13 }
 0x630   : > { %13572 = vmatpush3.msra.mxu1 %v17149_v19  ;;  %13546 = vmatprep.subr.mxu0 %v17129_v43 }
 0x631   : > { %13573 = vmatprep.subr.mxu1 %v17164_v51  ;;  %13547 = vmatpush3.msra.mxu0 %v17129_v43 }
 0x632   : > { %13574 = vmatpush3.msra.mxu1 %v17164_v51  ;;  %13548 = vmatprep.subr.mxu0 %v17143_v39 }
 0x633   : > { %13576 = vmatmul.mubr.f32.vlgmr.msra.gmra.mxu1 %v5513_v0  ;;  %13597 = vmatprep.subr.mxu1 %v17092_v15 }
 0x634   : > { %13549 = vmatpush3.msra.mxu0 %v17143_v39  ;;  %13598 = vmatpush3.msra.mxu1 %v17092_v15  ;;  %v4192_v15 = vld [vmem:[#allocation6 + $0x4e0] sm:$0xff]  ;;  %v4195_v39 = vld [vmem:[#allocation6 + $0x510] sm:$0xff] }
 0x635   : > { %13613 = vmatprep.mubr.f32.mxu1 %v5501_v28  ;;  %13550 = vmatprep.subr.mxu0 %v17147_v12  ;;  %v6010_v14 = vsel %vm6008_vm2, %v4192_v15, 0  ;;  %v17314_v15 = vand.u32 4294901760, %v6648_v16 }
 0x636   : > { %13599 = vmatprep.subr.mxu1 %v17097_v48  ;;  %13551 = vmatpush3.msra.mxu0 %v17147_v12 }
 0x637   : > { %13600 = vmatpush3.msra.mxu1 %v17097_v48  ;;  %13552 = vmatprep.subr.mxu0 %v17162_v52  ;;  %v17267_v48 = vand.u32 4294901760, %v6010_v14 }
 0x638   : > { %13601 = vmatprep.subr.mxu1 %v17107_v55  ;;  %13553 = vmatpush3.msra.mxu0 %v17162_v52  ;;  %v6019_v52 = vsel %vm6008_vm2, %v4195_v39, 0 }
 0x639   : > { %13602 = vmatpush3.msra.mxu1 %v17107_v55  ;;  %13554 = vmatprep.subr.mxu0 %v17176_v34 }
 0x63a   : > { %13603 = vmatprep.subr.mxu1 %v17120_v24  ;;  %13555 = vmatpush3.msra.mxu0 %v17176_v34 }
 0x63b   : > { %13604 = vmatpush3.msra.mxu1 %v17120_v24  ;;  %13557 = vmatmul.mubr.f32.vlgmr.msra.gmra.mxu0 %v5512_v62  ;;  %v4193_v24 = vld [vmem:[#allocation6 + $0x4f0] sm:$0xff] }
 0x63c   : > { %13578 = vmatprep.subr.mxu0 %v17102_v29  ;;  %13605 = vmatprep.subr.mxu1 %v17131_v41 }
 0x63d   : > { %13579 = vmatpush3.msra.mxu0 %v17102_v29  ;;  %13594 = vmatprep.mubr.f32.mxu0 %v5501_v28  ;;  %v17270_v29 = vsub.f32 %v6010_v14, %v17267_v48  ;;  %v17319_v14 = vand.u32 4294901760, %v17190_v58 }
 0x63e   : > { %13606 = vmatpush3.msra.mxu1 %v17131_v41  ;;  %13580 = vmatprep.subr.mxu0 %v17114_v21 }
 0x63f   : > { %13607 = vmatprep.subr.mxu1 %v17136_v33  ;;  %13581 = vmatpush3.msra.mxu0 %v17114_v21  ;;  %v6090_v22 = vand.u32 4294901760, %v17270_v29 }
 0x640   : > { %13608 = vmatpush3.msra.mxu1 %v17136_v33  ;;  %13582 = vmatprep.subr.mxu0 %v17126_v25  ;;  %v6013_v33 = vsel %vm6008_vm2, %v4193_v24, 0 }
 0x641   : > { %13609 = vmatprep.subr.mxu1 %v17149_v19  ;;  %13583 = vmatpush3.msra.mxu0 %v17126_v25  ;;  %v6091_v55 = vsub.f32 %v17270_v29, %v6090_v22  ;;  %v4194_v25 = vld [vmem:[#allocation6 + $0x500] sm:$0xff] }
 0x642   : > { %13610 = vmatpush3.msra.mxu1 %v17149_v19  ;;  %13584 = vmatprep.subr.mxu0 %v17140_v2  ;;  %v17279_v19 = vand.u32 4294901760, %v6013_v33 }
 0x643   : > { %13611 = vmatprep.subr.mxu1 %v17164_v51  ;;  %13585 = vmatpush3.msra.mxu0 %v17140_v2  ;;  %v6092_v21 = vand.u32 4294901760, %v6091_v55  ;;  %v6016_v2 = vsel %vm6008_vm2, %v4194_v25, 0  ;;  %v17323_v55 = vand.u32 4294901760, %v17194_v8 }
 0x644   : > { %13612 = vmatpush3.msra.mxu1 %v17164_v51  ;;  %13586 = vmatprep.subr.mxu0 %v17155_v38  ;;  %v17285_v59 = vsub.f32 %v6013_v33, %v17279_v19 }
 0x645   : > { %13614 = vmatmul.mubr.f32.vlgmr.msra.gmra.mxu1 %v17196_v60  ;;  %13587 = vmatpush3.msra.mxu0 %v17155_v38  ;;  %v6764_v25 = vsub.f32 %v17194_v8, %v17323_v55 }
 0x646   : > { %13588 = vmatprep.subr.mxu0 %v17159_v45  ;;  %13630 = vmatprep.mubr.f32.mxu1 %v17267_v48  ;;  %v6100_v5 = vand.u32 4294901760, %v17285_v59 }
 0x647   : > { %13589 = vmatpush3.msra.mxu0 %v17159_v45  ;;  %v17281_v45 = vand.u32 4294901760, %v6016_v2 }
 0x648   : > { %13590 = vmatprep.subr.mxu0 %v17173_v20  ;;  %v6101_v44 = vsub.f32 %v17285_v59, %v6100_v5 }
 0x649   : > { %13591 = vmatpush3.msra.mxu0 %v17173_v20  ;;  %v17290_v50 = vsub.f32 %v6016_v2, %v17281_v45 }
 0x64a   : > { %13592 = vmatprep.subr.mxu0 %v17183_v49  ;;  %v6102_v56 = vand.u32 4294901760, %v6101_v44 }
 0x64b   : > { %13593 = vmatpush3.msra.mxu0 %v17183_v49  ;;  %v17287_v49 = vand.u32 4294901760, %v6019_v52  ;;  %v6110_v17 = vand.u32 4294901760, %v17290_v50 }
 0x64c   : > { %13595 = vmatmul.mubr.f32.vlgmr.msra.gmra.mxu0 %v17196_v60 }
 0x64d   : > { %13620 = vmatprep.mubr.f32.mxu0 %v6092_v21  ;;  %v17294_v30 = vsub.f32 %v6019_v52, %v17287_v49  ;;  %v6111_v35 = vsub.f32 %v17290_v50, %v6110_v17  ;;  %v17326_v21 = vsub.f32 %v6648_v16, %v17314_v15 }
 0x64f   : > { %v6120_v42 = vand.u32 4294901760, %v17294_v30  ;;  %v6112_v60 = vand.u32 4294901760, %v6111_v35  ;;  %v6719_v24 = vand.u32 4294901760, %v17326_v21 }
 0x651   : > { %v6121_v36 = vsub.f32 %v17294_v30, %v6120_v42 }
 0x653   : > { %v6122_v28 = vand.u32 4294901760, %v6121_v36 }
 0x6e2   : > { %v13539_v43 = vpop.f32.mrf.mxu1 }
 0x6e4   : > { %v5628_v38 = vpop.f32.mrf.mxu1 }
 0x6ea   : > { %v13520_v13 = vpop.f32.mrf.mxu0 }
 0x6eb   : > { %v5635_v51 = vadd.f32 %v13539_v43, %v13520_v13  ;;  %v6757_v13 = vsub.f32 %v17190_v58, %v17319_v14  ;;  %v18996_v43 = vmov 0.0  }
 0x6ec   : > { %v5507_v41 = vpop.f32.mrf.mxu0 }
 0x6ed   : > { %v5629_v53 = vadd.f32 %v5628_v38, %v5507_v41  ;;  %v6758_v41 = vand.u32 4294901760, %v6757_v13 }
 0x6ef   : > { %v6759_v33 = vsub.f32 %v6757_v13, %v6758_v41 }
 0x6f3   : > { %v13577_v20 = vpop.f32.mrf.mxu1 }
 0x6f5   : > { %v5810_v54 = vpop.f32.mrf.mxu1 }
 0x6fb   : > { %v13558_v12 = vpop.f32.mrf.mxu0 }
 0x6fc   : > { %v5730_v47 = vadd.f32 %v13558_v12, %v5635_v51  ;;  %v6760_v12 = vand.u32 4294901760, %v6759_v33 }
 0x6fd   : > { %v5722_v34 = vpop.f32.mrf.mxu0 }
 0x6fe   : > { %v5723_v27 = vadd.f32 %v5722_v34, %v5629_v53  ;;  %v5819_v40 = vadd.f32 %v13577_v20, %v5730_v47  ;;  %v6638_v20 = vld [vmem:[#allocation6 + $0x600] sm:$0xff] }
 0x6ff   : > { %v17410_v47 = vand.u32 4294901760, %v6638_v20 }
 0x700   : > { %v5811_v18 = vadd.f32 %v5810_v54, %v5723_v27 }
 0x701   : > { %v17419_v27 = vsub.f32 %v6638_v20, %v17410_v47 }
 0x705   : > { %v13615_v10 = vpop.f32.mrf.mxu1 }
 0x707   : > { %v5998_v37 = vpop.f32.mrf.mxu1 }
 0x70c   : > { %v13596_v9 = vpop.f32.mrf.mxu0 }
 0x70d   : > { %v5920_v23 = vadd.f32 %v13596_v9, %v5819_v40  ;;  %v6636_v40 = vld [vmem:[#allocation6 + $0x5e0] sm:$0xff] }
 0x70e   : > { %v5913_v3 = vpop.f32.mrf.mxu0 }
 0x70f   : > { %v6005_v31 = vadd.f32 %v13615_v10, %v5920_v23  ;;  %v5914_v61 = vadd.f32 %v5913_v3, %v5811_v18  ;;  %v7228_v10 = vand.u32 4294901760, %v17419_v27  ;;  %v6635_v23 = vld [vmem:[#allocation6 + $0x5d0] sm:$0xff] }
 0x711   : > { %v6050_v4 = vand.u32 4294901760, %v6005_v31  ;;  %v5999_v11 = vadd.f32 %v5998_v37, %v5914_v61  ;;  %v7229_v3 = vsub.f32 %v17419_v27, %v7228_v10  ;;  %v17440_v61 = vand.u32 4294901760, %v6635_v23 }
 0x713   : > { %v6158_v32 = vsub.f32 %v6005_v31, %v6050_v4  ;;  %v17304_v46 = vand.u32 4294901760, %v5999_v11  ;;  %13616 = vmatprep.subr.mxu0 %v6050_v4  ;;  %v7230_v37 = vand.u32 4294901760, %v7229_v3 }
 0x714   : > { %13617 = vmatpush3.msra.mxu0 %v6050_v4 }
 0x715   : > { %v6165_v7 = vsub.f32 %v5999_v11, %v17304_v46  ;;  %13618 = vmatprep.subr.mxu0 %v17304_v46  ;;  %v6159_v62 = vand.u32 4294901760, %v6158_v32 }
 0x716   : > { %13619 = vmatpush3.msra.mxu0 %v17304_v46 }
 0x717   : > { %13621 = vmatmul.mubr.f32.vlgmr.msra.gmra.mxu0 %v6102_v56  ;;  %13636 = vmatprep.subr.mxu0 %v6158_v32  ;;  %v6160_v6 = vsub.f32 %v6158_v32, %v6159_v62  ;;  %v6166_v0 = vand.u32 4294901760, %v6165_v7 }
 0x718   : > { %13637 = vmatpush3.msra.mxu0 %v6158_v32  ;;  %13623 = vmatprep.mubr.f32.mxu0 %v6112_v60 }
 0x719   : > { %13638 = vmatprep.subr.mxu0 %v6165_v7  ;;  %v6161_v57 = vand.u32 4294901760, %v6160_v6  ;;  %v6167_v26 = vsub.f32 %v6165_v7, %v6166_v0 }
 0x71a   : > { %13639 = vmatpush3.msra.mxu0 %v6165_v7 }
 0x71b   : > { %13624 = vmatmul.mubr.f32.gmra.mxu0 %v6122_v28  ;;  %13626 = vmatprep.subr.mxu1 %v6161_v57  ;;  %v6168_v1 = vand.u32 4294901760, %v6167_v26 }
 0x71c   : > { %13656 = vmatprep.subr.mxu0 %v6159_v62  ;;  %13627 = vmatpush3.msra.mxu1 %v6161_v57 }
 0x71d   : > { %13628 = vmatprep.subr.mxu1 %v6168_v1  ;;  %13640 = vmatprep.mubr.f32.mxu0 %v17270_v29  ;;  %v6720_v29 = vsub.f32 %v17326_v21, %v6719_v24 }
 0x71e   : > { %13629 = vmatpush3.msra.mxu1 %v6168_v1 }
 0x71f   : > { %13631 = vmatmul.mubr.f32.vlgmr.msra.gmra.mxu1 %v17279_v19  ;;  %13641 = vmatmul.mubr.f32.vlgmr.msra.gmra.mxu0 %v17285_v59  ;;  %v6721_v2 = vand.u32 4294901760, %v6720_v29  ;;  %v6637_v59 = vld [vmem:[#allocation6 + $0x5f0] sm:$0xff] }
 0x720   : > { %13646 = vmatprep.subr.mxu1 %v6050_v4  ;;  %13657 = vmatpush3.msra.mxu0 %v6159_v62  ;;  %v17421_v54 = vand.u32 4294901760, %v6637_v59 }
 0x721   : > { %13647 = vmatpush3.msra.mxu1 %v6050_v4  ;;  %13658 = vmatprep.subr.mxu0 %v6166_v0 }
 0x722   : > { %13648 = vmatprep.subr.mxu1 %v17304_v46  ;;  %13659 = vmatpush3.msra.mxu0 %v6166_v0  ;;  %v17430_v9 = vsub.f32 %v6637_v59, %v17421_v54 }
 0x723   : > { %13633 = vmatprep.mubr.f32.mxu1 %v17281_v45  ;;  %13643 = vmatprep.mubr.f32.mxu0 %v17290_v50 }
 0x724   : > { %13649 = vmatpush3.msra.mxu1 %v17304_v46  ;;  %13644 = vmatmul.mubr.f32.gmra.mxu0 %v17294_v30  ;;  %v7235_v31 = vand.u32 4294901760, %v17430_v9 }
 0x725   : > { %13634 = vmatmul.mubr.f32.gmra.mxu1 %v17287_v49  ;;  %13666 = vmatprep.subr.mxu1 %v6050_v4 }
 0x726   : > { %13650 = vmatprep.mubr.f32.mxu1 %v6090_v22  ;;  %13660 = vmatprep.mubr.f32.mxu0 %v17267_v48  ;;  %v6765_v22 = vand.u32 4294901760, %v6764_v25  ;;  %v7236_v35 = vsub.f32 %v17430_v9, %v7235_v31 }
 0x727   : > { %13676 = vmatprep.subr.mxu0 %v18996_v43 }
 0x728   : > { %13661 = vmatmul.mubr.f32.vlgmr.msra.gmra.mxu0 %v17279_v19  ;;  %v6766_v39 = vsub.f32 %v6764_v25, %v6765_v22  ;;  %v7237_v56 = vand.u32 4294901760, %v7236_v35 }
 0x729   : > { %13651 = vmatmul.mubr.f32.vlgmr.msra.gmra.mxu1 %v6100_v5  ;;  %13677 = vmatpush3.msra.mxu0 %v17319_v14 }
 0x72a   : > { %13667 = vmatpush3.msra.mxu1 %v6050_v4  ;;  %13678 = vmatprep.subr.mxu0 %v18996_v43  ;;  %v6767_v38 = vand.u32 4294901760, %v6766_v39  ;;  %v17451_v4 = vsub.f32 %v6635_v23, %v17440_v61 }
 0x72b   : > { %13668 = vmatprep.subr.mxu1 %v17304_v46  ;;  %13679 = vmatpush3.msra.mxu0 %v17323_v55 }
 0x72c   : > { %13669 = vmatpush3.msra.mxu1 %v17304_v46  ;;  %13653 = vmatprep.mubr.f32.mxu1 %v6110_v17  ;;  %v17433_v17 = vand.u32 4294901760, %v6636_v40  ;;  %v6633_v46 = vld [vmem:[#allocation6 + $0x5b0] sm:$0xff]  ;;  %v7249_v36 = vand.u32 4294901760, %v17451_v4 }
 0x72d   : > { %13663 = vmatprep.mubr.f32.mxu0 %v17281_v45  ;;  %13654 = vmatmul.mubr.f32.gmra.mxu1 %v6120_v42  ;;  %v6634_v42 = vld [vmem:[#allocation6 + $0x5c0] sm:$0xff]  ;;  %v17463_v7 = vand.u32 4294901760, %v6633_v46 }
 0x72e   : > { %13664 = vmatmul.mubr.f32.gmra.mxu0 %v17287_v49  ;;  %13670 = vmatprep.mubr.f32.mxu1 %v17267_v48  ;;  %v6640_v48 = vld [vmem:[#allocation6 + $0x620] sm:$0xff]  ;;  %v17444_v44 = vsub.f32 %v6636_v40, %v17433_v17  ;;  %v17453_v11 = vand.u32 4294901760, %v6634_v42  ;;  %v7250_v28 = vsub.f32 %v17451_v4, %v7249_v36 }
 0x72f   : > { %13680 = vmatprep.mubr.msk.f32.mxu0 %vm14429_vm3, %v18996_v43  ;;  %13683 = vmatprep.subr.mxu1 %v18996_v43  ;;  %v17476_v0 = vsub.f32 %v6633_v46, %v17463_v7 }
 0x730   : > { %13690 = vmatprep.subr.mxu0 %v18996_v43  ;;  %v7242_v32 = vand.u32 4294901760, %v17444_v44  ;;  %v17461_v60 = vsub.f32 %v6634_v42, %v17453_v11  ;;  %v7251_v57 = vand.u32 4294901760, %v7250_v28 }
 0x731   : > { %13671 = vmatmul.mubr.f32.vlgmr.msra.gmra.mxu1 %v17279_v19  ;;  %v17397_v19 = vand.u32 4294901760, %v6640_v48  ;;  %v7263_v1 = vand.u32 4294901760, %v17476_v0 }
 0x732   : > { %13681 = vmatmul.mubr.f32.vlgmr.msra.gmra.mxu0 %v6721_v2  ;;  %13684 = vmatpush3.msra.mxu1 %v6760_v12  ;;  %v7243_v62 = vsub.f32 %v17444_v44, %v7242_v32  ;;  %v7256_v6 = vand.u32 4294901760, %v17461_v60 }
 0x733   : > { %13691 = vmatpush3.msra.mxu0 %v6757_v13  ;;  %13685 = vmatprep.subr.mxu1 %v18996_v43  ;;  %v17400_v52 = vsub.f32 %v6640_v48, %v17397_v19 }
 0x734   : > { %13692 = vmatprep.subr.mxu0 %v18996_v43  ;;  %13686 = vmatpush3.msra.mxu1 %v6767_v38  ;;  %v7244_v63 = vand.u32 4294901760, %v7243_v62  ;;  %v7257_v26 = vsub.f32 %v17461_v60, %v7256_v6 }
 0x735   : > { %13693 = vmatpush3.msra.mxu0 %v6764_v25  ;;  %13673 = vmatprep.mubr.f32.mxu1 %v17281_v45  ;;  %v6639_v45 = vld [vmem:[#allocation6 + $0x610] sm:$0xff]  ;;  %v7214_v34 = vand.u32 4294901760, %v17400_v52 }
 0x736   : > { %13694 = vmatprep.mubr.msk.f32.mxu0 %vm14429_vm3, %v18996_v43  ;;  %13704 = vmatprep.subr.mxu0 %v18996_v43  ;;  %v17402_v51 = vand.u32 4294901760, %v6639_v45  ;;  %v7258_v16 = vand.u32 4294901760, %v7257_v26 }
 0x737   : > { %13674 = vmatmul.mubr.f32.gmra.mxu1 %v17287_v49  ;;  %13695 = vmatmul.mubr.f32.vlgmr.msra.gmra.mxu0 %v17326_v21  ;;  %v7215_v49 = vsub.f32 %v17400_v52, %v7214_v34 }
 0x738   : > { %13705 = vmatpush3.msra.mxu0 %v6758_v41  ;;  %13687 = vmatprep.mubr.msk.f32.mxu1 %vm14429_vm3, %v18996_v43  ;;  %v17408_v53 = vsub.f32 %v6639_v45, %v17402_v51 }
 0x739   : > { %13706 = vmatprep.subr.mxu0 %v18996_v43  ;;  %13697 = vmatprep.subr.mxu1 %v18996_v43  ;;  %v7216_v5 = vand.u32 4294901760, %v7215_v49 }
 0x73a   : > { %13707 = vmatpush3.msra.mxu0 %v6765_v22  ;;  %13708 = vmatprep.mubr.msk.f32.mxu0 %vm14429_vm3, %v18996_v43  ;;  %v7221_v50 = vand.u32 4294901760, %v17408_v53 }
 0x73b   : > { %13688 = vmatmul.mubr.f32.vlgmr.msra.gmra.mxu1 %v17314_v15  ;;  %13709 = vmatmul.mubr.f32.vlgmr.msra.gmra.mxu0 %v17314_v15 }
 0x73c   : > { %13698 = vmatpush3.msra.mxu1 %v17319_v14  ;;  %13701 = vmatprep.mubr.msk.f32.mxu1 %vm14429_vm3, %v18996_v43  ;;  %v7222_v30 = vsub.f32 %v17408_v53, %v7221_v50 }
 0x73d   : > { %13699 = vmatprep.subr.mxu1 %v18996_v43  ;;  %13718 = vmatprep.subr.mxu0 %v18996_v43 }
 0x73e   : > { %13700 = vmatpush3.msra.mxu1 %v17323_v55  ;;  %13734 = vmatprep.mubr.msk.f32.mxu0 %vm14429_vm3, %v18996_v43  ;;  %v7223_v18 = vand.u32 4294901760, %v7222_v30 }
 0x73f   : > { %13711 = vmatprep.subr.mxu1 %v18996_v43  ;;  %13702 = vmatmul.mubr.f32.vlgmr.msra.gmra.mxu1 %v6719_v24 }
 0x740   : > { %13712 = vmatpush3.msra.mxu1 %v17319_v14  ;;  %13715 = vmatprep.mubr.msk.f32.mxu1 %vm14429_vm3, %v18996_v43 }
 0x741   : > { %13713 = vmatprep.subr.mxu1 %v18996_v43  ;;  %13719 = vmatpush3.msra.mxu0 %v17397_v19 }
 0x742   : > { %13714 = vmatpush3.msra.mxu1 %v17323_v55  ;;  %13720 = vmatprep.subr.mxu0 %v18996_v43 }
 0x743   : > { %13716 = vmatmul.mubr.f32.vlgmr.msra.gmra.mxu1 %v17314_v15  ;;  %13737 = vmatprep.subr.mxu1 %v18996_v43  ;;  %v7264_v15 = vsub.f32 %v17476_v0, %v7263_v1 }
 0x744   : > { %13753 = vmatprep.mubr.msk.f32.mxu1 %vm14429_vm3, %v18996_v43  ;;  %13721 = vmatpush3.msra.mxu0 %v17402_v51 }
 0x745   : > { %13722 = vmatprep.subr.mxu0 %v18996_v43  ;;  %13738 = vmatpush3.msra.mxu1 %v7216_v5  ;;  %v7265_v14 = vand.u32 4294901760, %v7264_v15 }
 0x746   : > { %13723 = vmatpush3.msra.mxu0 %v17410_v47  ;;  %13739 = vmatprep.subr.mxu1 %v18996_v43 }
 0x747   : > { %13724 = vmatprep.subr.mxu0 %v18996_v43  ;;  %13740 = vmatpush3.msra.mxu1 %v7223_v18 }
 0x748   : > { %13725 = vmatpush3.msra.mxu0 %v17421_v54  ;;  %13741 = vmatprep.subr.mxu1 %v18996_v43 }
 0x749   : > { %13726 = vmatprep.subr.mxu0 %v18996_v43  ;;  %13742 = vmatpush3.msra.mxu1 %v7230_v37 }
 0x74a   : > { %13727 = vmatpush3.msra.mxu0 %v17433_v17  ;;  %13743 = vmatprep.subr.mxu1 %v18996_v43 }
 0x74b   : > { %13728 = vmatprep.subr.mxu0 %v18996_v43  ;;  %13744 = vmatpush3.msra.mxu1 %v7237_v56 }
 0x74c   : > { %13729 = vmatpush3.msra.mxu0 %v17440_v61  ;;  %13745 = vmatprep.subr.mxu1 %v18996_v43 }
 0x74d   : > { %13730 = vmatprep.subr.mxu0 %v18996_v43  ;;  %13746 = vmatpush3.msra.mxu1 %v7244_v63 }
 0x74e   : > { %13731 = vmatpush3.msra.mxu0 %v17453_v11  ;;  %13747 = vmatprep.subr.mxu1 %v18996_v43 }
 0x74f   : > { %13732 = vmatprep.subr.mxu0 %v18996_v43  ;;  %13748 = vmatpush3.msra.mxu1 %v7251_v57 }
 0x750   : > { %13733 = vmatpush3.msra.mxu0 %v17463_v7  ;;  %13749 = vmatprep.subr.mxu1 %v18996_v43 }
 0x751   : > { %13756 = vmatprep.subr.mxu0 %v18996_v43  ;;  %13750 = vmatpush3.msra.mxu1 %v7258_v16 }
 0x752   : > { %13751 = vmatprep.subr.mxu1 %v18996_v43 }
 0x753   : > { %13752 = vmatpush3.msra.mxu1 %v7265_v14 }
 0x754   : > { %13775 = vmatprep.subr.mxu1 %v18996_v43 }
 0x7d7   : > { %v13622_v55 = vpop.f32.mrf.mxu0 }
 0x7d9   : > { %v6094_v21 = vpop.f32.mrf.mxu0 }
 0x7db   : > { %v13625_v13 = vpop.f32.mrf.mxu0 }
 0x7dd   : > { %v6114_v24 = vpop.f32.mrf.mxu0 }
 0x7df   : > { %v13632_v25 = vpop.f32.mrf.mxu1  ;;  %v13642_v41 = vpop.f32.mrf.mxu0 }
 0x7e0   : > { %v6212_v38 = vadd.f32 %v13632_v25, %v13622_v55 }
 0x7e1   : > { %v6205_v29 = vpop.f32.mrf.mxu1  ;;  %v6299_v22 = vpop.f32.mrf.mxu0 }
 0x7e2   : > { %v6206_v48 = vadd.f32 %v6205_v29, %v6094_v21  ;;  %v6307_v40 = vadd.f32 %v13642_v41, %v6212_v38  ;;  %v18997_v41 = vld [vmem:[#allocation78_spill] sm:$0xff] }
 0x7e4   : > { %v13645_v33 = vpop.f32.mrf.mxu0  ;;  %v6300_v30 = vadd.f32 %v6299_v22, %v6206_v48 }
 0x7e5   : > { %v13635_v2 = vpop.f32.mrf.mxu1 }
 0x7e6   : > { %v6313_v39 = vpop.f32.mrf.mxu0  ;;  %v6224_v5 = vadd.f32 %v13635_v2, %v13625_v13 }
 0x7e7   : > { %v6217_v12 = vpop.f32.mrf.mxu1 }
 0x7e8   : > { %v13662_v45 = vpop.f32.mrf.mxu0  ;;  %v6218_v18 = vadd.f32 %v6217_v12, %v6114_v24  ;;  %v6321_v46 = vadd.f32 %v13645_v33, %v6224_v5  ;;  %v18998_v12 = vld [vmem:[#allocation80_spill] sm:$0xff] }
 0x7e9   : > { %v13652_v20 = vpop.f32.mrf.mxu1  ;;  %v18999_v5 = vld [vmem:[#allocation88_spill] sm:$0xff] }
 0x7ea   : > { %v6496_v59 = vpop.f32.mrf.mxu0  ;;  %v6404_v3 = vadd.f32 %v13652_v20, %v6307_v40  ;;  %v6314_v28 = vadd.f32 %v6313_v39, %v6218_v18 }
 0x7eb   : > { %v6395_v49 = vpop.f32.mrf.mxu1 }
 0x7ec   : > { %v6396_v42 = vadd.f32 %v6395_v49, %v6300_v30  ;;  %v6503_v63 = vadd.f32 %v13662_v45, %v6404_v3 }
 0x7ed   : > { %v13655_v23 = vpop.f32.mrf.mxu1 }
 0x7ee   : > { %v13665_v37 = vpop.f32.mrf.mxu0  ;;  %v6420_v57 = vadd.f32 %v13655_v23, %v6321_v46  ;;  %v6497_v26 = vadd.f32 %v6496_v59, %v6396_v42  ;;  %v19000_v23 = vld [vmem:[#allocation84_spill] sm:$0xff] }
 0x7ef   : > { %v6411_v35 = vpop.f32.mrf.mxu1 }
 0x7f0   : > { %v6508_v56 = vpop.f32.mrf.mxu0  ;;  %v6412_v14 = vadd.f32 %v6411_v35, %v6314_v28  ;;  %v6515_v25 = vadd.f32 %v13665_v37, %v6420_v57 }
 0x7f1   : > { %v13672_v62 = vpop.f32.mrf.mxu1 }
 0x7f2   : > { %v6723_v16 = vpop.f32.mrf.mxu0  ;;  %v6594_v55 = vadd.f32 %v13672_v62, %v6503_v63  ;;  %v6509_v2 = vadd.f32 %v6508_v56, %v6412_v14 }
 0x7f3   : > { %v6587_v15 = vpop.f32.mrf.mxu1 }
 0x7f4   : > { %v6588_v21 = vadd.f32 %v6587_v15, %v6497_v26  ;;  %v13682_v13 = vpop.f32.mrf.mxu0  ;;  %v6610_v33 = vsub.f32 %v18998_v12, %v6594_v55 }
 0x7f6   : > { %v6609_v24 = vsub.f32 %v18997_v41, %v6588_v21  ;;  %v6614_v40 = vand.u32 2147483647, %v6610_v33 }
 0x7f7   : > { %v13675_v29 = vpop.f32.mrf.mxu1  ;;  %v6880_v22 = vpop.f32.mrf.mxu0 }
 0x7f8   : > { %v6606_v38 = vadd.f32 %v13675_v29, %v6515_v25  ;;  %v6613_v45 = vand.u32 2147483647, %v6609_v24 }
 0x7f9   : > { %v6599_v48 = vpop.f32.mrf.mxu1  ;;  %v13696_v39 = vpop.f32.mrf.mxu0 }
 0x7fa   : > { %v6600_v20 = vadd.f32 %v6599_v48, %v6509_v2  ;;  %v6612_v30 = vsub.f32 %v18999_v5, %v6606_v38  ;;  %v6617_v35 = vadd.f32 %v6614_v40, %v6613_v45 }
 0x7fb   : > { %v6804_v59 = vpop.f32.mrf.mxu1  ;;  %v7032_v49 = vpop.f32.mrf.mxu0 }
 0x7fc   : > { %v6611_v18 = vsub.f32 %v19000_v23, %v6600_v20  ;;  %v6805_v3 = vadd.f32 %v6804_v59, %v6723_v16  ;;  %v6616_v28 = vand.u32 2147483647, %v6612_v30 }
 0x7fd   : > { %v13689_v42 = vpop.f32.mrf.mxu1  ;;  %v13710_v37 = vpop.f32.mrf.mxu0 }
 0x7fe   : > { %v6615_v46 = vand.u32 2147483647, %v6611_v18  ;;  %v6881_v56 = vadd.f32 %v6880_v22, %v6805_v3 }
 0x7ff   : > { %v6955_v62 = vpop.f32.mrf.mxu1 }
 0x800   : > { %v6956_v63 = vadd.f32 %v6955_v62, %v6881_v56  ;;  %v6618_v57 = vadd.f32 %v6617_v35, %v6615_v46 }
 0x801   : > { %v13703_v26 = vpop.f32.mrf.mxu1 }
 0x802   : > { %v7033_v15 = vadd.f32 %v7032_v49, %v6956_v63  ;;  %v6619_v14 = vadd.f32 %v6618_v57, %v6616_v28 }
 0x803   : > { %v7105_v55 = vpop.f32.mrf.mxu1 }
 0x804   : > { %v7106_v21 = vadd.f32 %v7105_v55, %v7033_v15  ;;  %6620 = vadd.xlane.f32.xlu0 %v6619_v14 }
 0x805   : > { %v13717_v13 = vpop.f32.mrf.mxu1 }
 0x806   : > { %v7110_v25 = vsel %vm365_vm0, %v7106_v21, 0  ;;  %v6641_v13 = vld [vmem:[#allocation6 + $0x630] sm:$0xff] }
 0x807   : > { %v17498_v41 = vand.u32 4294901760, %v7110_v25 }
 0x809   : > { %v7186_v16 = vsub.f32 %v7110_v25, %v17498_v41  ;;  %13754 = vmatmul.mubr.f32.vlgmr.msra.gmra.mxu1 %v17498_v41  ;;  %v8139_v25 = vsel %vm8137_vm4, %v6641_v13, 0 }
 0x80a   : > { %13776 = vmatpush3.msra.mxu1 %v17397_v19  ;;  %13791 = vmatprep.mubr.msk.f32.mxu1 %vm14429_vm3, %v18996_v43 }
 0x80b   : > { %v7187_v24 = vand.u32 4294901760, %v7186_v16  ;;  %13777 = vmatprep.subr.mxu1 %v18996_v43 }
 0x80c   : > { %13778 = vmatpush3.msra.mxu1 %v17402_v51 }
 0x80d   : > { %v7188_v29 = vsub.f32 %v7186_v16, %v7187_v24  ;;  %13779 = vmatprep.subr.mxu1 %v18996_v43 }
 0x80e   : > { %13780 = vmatpush3.msra.mxu1 %v17410_v47 }
 0x80f   : > { %v7189_v22 = vand.u32 4294901760, %v7188_v29  ;;  %13781 = vmatprep.subr.mxu1 %v18996_v43 }
 0x810   : > { %13782 = vmatpush3.msra.mxu1 %v17421_v54 }
 0x811   : > { %13783 = vmatprep.subr.mxu1 %v18996_v43  ;;  %13735 = vmatmul.mubr.f32.vlgmr.msra.gmra.mxu0 %v7189_v22 }
 0x812   : > { %13757 = vmatpush3.msra.mxu0 %v17400_v52  ;;  %13784 = vmatpush3.msra.mxu1 %v17433_v17 }
 0x813   : > { %13758 = vmatprep.subr.mxu0 %v18996_v43  ;;  %13785 = vmatprep.subr.mxu1 %v18996_v43 }
 0x814   : > { %13759 = vmatpush3.msra.mxu0 %v17408_v53  ;;  %13786 = vmatpush3.msra.mxu1 %v17440_v61 }
 0x815   : > { %13760 = vmatprep.subr.mxu0 %v18996_v43  ;;  %13787 = vmatprep.subr.mxu1 %v18996_v43 }
 0x816   : > { %13761 = vmatpush3.msra.mxu0 %v17419_v27  ;;  %13788 = vmatpush3.msra.mxu1 %v17453_v11 }
 0x817   : > { %13762 = vmatprep.subr.mxu0 %v18996_v43  ;;  %13789 = vmatprep.subr.mxu1 %v18996_v43 }
 0x818   : > { %13763 = vmatpush3.msra.mxu0 %v17430_v9  ;;  %13790 = vmatpush3.msra.mxu1 %v17463_v7 }
 0x819   : > { %13764 = vmatprep.subr.mxu0 %v18996_v43  ;;  %13792 = vmatmul.mubr.f32.vlgmr.msra.gmra.mxu1 %v7187_v24 }
 0x81a   : > { %13813 = vmatprep.subr.mxu1 %v18996_v43  ;;  %13765 = vmatpush3.msra.mxu0 %v17444_v44 }
 0x81b   : > { %13814 = vmatpush3.msra.mxu1 %v17397_v19  ;;  %13766 = vmatprep.subr.mxu0 %v18996_v43  ;;  %v6646_v19 = vld [vmem:[#allocation6 + $0x680] sm:$0xff] }
 0x81c   : > { %13815 = vmatprep.subr.mxu1 %v18996_v43  ;;  %13767 = vmatpush3.msra.mxu0 %v17451_v4  ;;  %v17588_v52 = vand.u32 4294901760, %v6646_v19 }
 0x81d   : > { %13816 = vmatpush3.msra.mxu1 %v17402_v51  ;;  %13768 = vmatprep.subr.mxu0 %v18996_v43  ;;  %v6645_v51 = vld [vmem:[#allocation6 + $0x670] sm:$0xff] }
 0x81e   : > { %13817 = vmatprep.subr.mxu1 %v18996_v43  ;;  %13769 = vmatpush3.msra.mxu0 %v17461_v60  ;;  %v17593_v53 = vand.u32 4294901760, %v6645_v51 }
 0x81f   : > { %13818 = vmatpush3.msra.mxu1 %v17410_v47  ;;  %13770 = vmatprep.subr.mxu0 %v18996_v43  ;;  %v6644_v47 = vld [vmem:[#allocation6 + $0x660] sm:$0xff] }
 0x820   : > { %13819 = vmatprep.subr.mxu1 %v18996_v43  ;;  %13771 = vmatpush3.msra.mxu0 %v17476_v0  ;;  %v17599_v27 = vsub.f32 %v6645_v51, %v17593_v53 }
 0x821   : > { %13772 = vmatprep.mubr.msk.f32.mxu0 %vm14429_vm3, %v18996_v43  ;;  %13820 = vmatpush3.msra.mxu1 %v17421_v54  ;;  %v17601_v54 = vand.u32 4294901760, %v6644_v47 }
 0x822   : > { %13773 = vmatmul.mubr.f32.vlgmr.msra.gmra.mxu0 %v7186_v16  ;;  %13794 = vmatprep.subr.mxu0 %v18996_v43 }
 0x823   : > { %13821 = vmatprep.subr.mxu1 %v18996_v43  ;;  %13795 = vmatpush3.msra.mxu0 %v7214_v34  ;;  %v17591_v34 = vsub.f32 %v6646_v19, %v17588_v52 }
 0x824   : > { %13822 = vmatpush3.msra.mxu1 %v17433_v17  ;;  %13796 = vmatprep.subr.mxu0 %v18996_v43  ;;  %v7765_v17 = vand.u32 4294901760, %v17599_v27 }
 0x825   : > { %13823 = vmatprep.subr.mxu1 %v18996_v43  ;;  %13797 = vmatpush3.msra.mxu0 %v7221_v50  ;;  %v7758_v50 = vand.u32 4294901760, %v17591_v34 }
 0x826   : > { %13824 = vmatpush3.msra.mxu1 %v17440_v61  ;;  %13798 = vmatprep.subr.mxu0 %v18996_v43  ;;  %v7766_v4 = vsub.f32 %v17599_v27, %v7765_v17 }
 0x827   : > { %13825 = vmatprep.subr.mxu1 %v18996_v43  ;;  %13799 = vmatpush3.msra.mxu0 %v7228_v10  ;;  %v6643_v10 = vld [vmem:[#allocation6 + $0x650] sm:$0xff]  ;;  %v7759_v9 = vsub.f32 %v17591_v34, %v7758_v50 }
 0x828   : > { %13826 = vmatpush3.msra.mxu1 %v17453_v11  ;;  %13800 = vmatprep.subr.mxu0 %v18996_v43  ;;  %v17612_v61 = vand.u32 4294901760, %v6643_v10 }
 0x829   : > { %13827 = vmatprep.subr.mxu1 %v18996_v43  ;;  %13801 = vmatpush3.msra.mxu0 %v7235_v31  ;;  %v17610_v31 = vsub.f32 %v6644_v47, %v17601_v54  ;;  %v7760_v44 = vand.u32 4294901760, %v7759_v9 }
 0x82a   : > { %13828 = vmatpush3.msra.mxu1 %v17463_v7  ;;  %13829 = vmatprep.mubr.msk.f32.mxu1 %vm14429_vm3, %v18996_v43 }
 0x82b   : > { %13802 = vmatprep.subr.mxu0 %v18996_v43  ;;  %13830 = vmatmul.mubr.f32.vlgmr.msra.gmra.mxu1 %v17498_v41  ;;  %v7772_v11 = vand.u32 4294901760, %v17610_v31 }
 0x82c   : > { %13803 = vmatpush3.msra.mxu0 %v7242_v32  ;;  %13810 = vmatprep.mubr.msk.f32.mxu0 %vm14429_vm3, %v18996_v43  ;;  %v17621_v32 = vsub.f32 %v6643_v10, %v17612_v61 }
 0x82d   : > { %13804 = vmatprep.subr.mxu0 %v18996_v43  ;;  %13843 = vmatprep.subr.mxu1 %v18996_v43  ;;  %v7773_v60 = vsub.f32 %v17610_v31, %v7772_v11 }
 0x82e   : > { %13805 = vmatpush3.msra.mxu0 %v7249_v36  ;;  %13851 = vmatprep.mubr.msk.f32.mxu1 %vm14429_vm3, %v18996_v43  ;;  %v7767_v36 = vand.u32 4294901760, %v7766_v4  ;;  %v7779_v7 = vand.u32 4294901760, %v17621_v32 }
 0x82f   : > { %13806 = vmatprep.subr.mxu0 %v18996_v43  ;;  %13844 = vmatpush3.msra.mxu1 %v7760_v44 }
 0x830   : > { %13807 = vmatpush3.msra.mxu0 %v7256_v6  ;;  %13845 = vmatprep.subr.mxu1 %v18996_v43  ;;  %v7774_v6 = vand.u32 4294901760, %v7773_v60  ;;  %v7780_v0 = vsub.f32 %v17621_v32, %v7779_v7 }
 0x831   : > { %13808 = vmatprep.subr.mxu0 %v18996_v43  ;;  %13846 = vmatpush3.msra.mxu1 %v7767_v36 }
 0x832   : > { %13809 = vmatpush3.msra.mxu0 %v7263_v1  ;;  %13847 = vmatprep.subr.mxu1 %v18996_v43  ;;  %v7781_v1 = vand.u32 4294901760, %v7780_v0 }
 0x833   : > { %13811 = vmatmul.mubr.f32.vlgmr.msra.gmra.mxu0 %v17498_v41  ;;  %13832 = vmatprep.subr.mxu0 %v18996_v43  ;;  %v17683_v41 = vand.u32 4294901760, %v8139_v25 }
 0x834   : > { %13840 = vmatprep.mubr.msk.f32.mxu0 %vm14429_vm3, %v18996_v43  ;;  %13833 = vmatpush3.msra.mxu0 %v17588_v52 }
 0x835   : > { %13834 = vmatprep.subr.mxu0 %v18996_v43  ;;  %13848 = vmatpush3.msra.mxu1 %v7774_v6  ;;  %v17686_v16 = vsub.f32 %v8139_v25, %v17683_v41 }
 0x836   : > { %13835 = vmatpush3.msra.mxu0 %v17593_v53  ;;  %13849 = vmatprep.subr.mxu1 %v18996_v43 }
 0x837   : > { %13836 = vmatprep.subr.mxu0 %v18996_v43  ;;  %13850 = vmatpush3.msra.mxu1 %v7781_v1  ;;  %v8212_v24 = vand.u32 4294901760, %v17686_v16 }
 0x838   : > { %13837 = vmatpush3.msra.mxu0 %v17601_v54  ;;  %13865 = vmatprep.subr.mxu1 %v18996_v43 }
 0x839   : > { %13838 = vmatprep.subr.mxu0 %v18996_v43  ;;  %v8213_v29 = vsub.f32 %v17686_v16, %v8212_v24 }
 0x83a   : > { %13839 = vmatpush3.msra.mxu0 %v17612_v61 }
 0x83b   : > { %13854 = vmatprep.subr.mxu0 %v18996_v43  ;;  %v8214_v22 = vand.u32 4294901760, %v8213_v29 }
 0x88d   : > { %v6621_v2 = vpop.xlane.xlu0 %6620 }
 0x88e   : > { %v6622_v12 = vrot.slane %v6621_v2, 4 }
 0x890   : > { %v6623_v33 = vadd.f32 %v6622_v12, %v6621_v2 }
 0x892   : > { %v6624_v38 = vrot.slane %v6623_v33, 2 }
 0x894   : > { %v6625_v48 = vadd.f32 %v6624_v38, %v6623_v33 }
 0x896   : > { %v6626_v39 = vrot.slane %v6625_v48, 1 }
 0x898   : > { %v6627_v45 = vadd.f32 %v6626_v39, %v6625_v48 }
 0x89a   : > { %14230 = vpush %v6627_v45 }
 0x8c9   : > { %v7302_v20 = vpop.f32.mrf.mxu1 }
 0x8cb   : > { %v13755_v59 = vpop.f32.mrf.mxu1  ;;  %s14231_s18 = spop %14230 }
 0x8cc   : > { %s6629_s21 = smul.f32 0.00012207031, %s14231_s18 }
 0x8d1   : > { %v7191_v49 = vpop.f32.mrf.mxu0 }
 0x8d2   : > { %v7303_v42 = vadd.f32 %v7302_v20, %v7191_v49 }
 0x8d3   : > { %v13736_v40 = vpop.f32.mrf.mxu0 }
 0x8d9   : > { %v7471_v5 = vpop.f32.mrf.mxu1 }
 0x8db   : > { %v13793_v30 = vpop.f32.mrf.mxu1 }
 0x8e2   : > { %v7390_v23 = vpop.f32.mrf.mxu0 }
 0x8e3   : > { %v7391_v35 = vadd.f32 %v7390_v23, %v7303_v42 }
 0x8e4   : > { %v13774_v18 = vpop.f32.mrf.mxu0 }
 0x8e5   : > { %v7472_v46 = vadd.f32 %v7471_v5, %v7391_v35 }
 0x8eb   : > { %v7645_v3 = vpop.f32.mrf.mxu1 }
 0x8ed   : > { %v13831_v37 = vpop.f32.mrf.mxu1 }
 0x8ee   : > { %v8656_v37 = vld [vmem:[#allocation6 + $0x6d0] sm:$0xff] }
 0x8ef   : > { %v17728_v35 = vand.u32 4294901760, %v8656_v37 }
 0x8f3   : > { %v7566_v56 = vpop.f32.mrf.mxu0 }
 0x8f4   : > { %v7567_v62 = vadd.f32 %v7566_v56, %v7472_v46  ;;  %v8655_v46 = vld [vmem:[#allocation6 + $0x6c0] sm:$0xff]  ;;  %v17731_v56 = vsub.f32 %v8656_v37, %v17728_v35 }
 0x8f5   : > { %v13812_v28 = vpop.f32.mrf.mxu0 }
 0x8f6   : > { %v17636_v63 = vadd.f32 %v7645_v3, %v7567_v62  ;;  %v17733_v62 = vand.u32 4294901760, %v8655_v46  ;;  %v8654_v28 = vld [vmem:[#allocation6 + $0x6b0] sm:$0xff] }
 0x8f8   : > { %v7650_v57 = vsel %vm3204_vm1, %v17636_v63, 0  ;;  %v8694_v45 = vand.u32 4294901760, %v17636_v63 }
 0x8f9   : > { %v7721_v26 = vand.u32 4294901760, %v7650_v57 }
 0x8fa   : > { %v8771_v40 = vsub.f32 %v17636_v63, %v8694_v45 }
 0x8fb   : > { %v7722_v15 = vsub.f32 %v7650_v57, %v7721_v26  ;;  %13852 = vmatmul.mubr.f32.vlgmr.msra.gmra.mxu1 %v7721_v26  ;;  %v9218_v57 = vand.u32 4294901760, %v17731_v56 }
 0x8fc   : > { %13866 = vmatpush3.msra.mxu1 %v17588_v52  ;;  %13873 = vmatprep.mubr.msk.f32.mxu1 %vm14429_vm3, %v18996_v43  ;;  %v8772_v23 = vand.u32 4294901760, %v8771_v40 }
 0x8fd   : > { %13867 = vmatprep.subr.mxu1 %v18996_v43  ;;  %v7723_v14 = vand.u32 4294901760, %v7722_v15 }
 0x8fe   : > { %13868 = vmatpush3.msra.mxu1 %v17593_v53  ;;  %v8773_v3 = vsub.f32 %v8771_v40, %v8772_v23 }
 0x8ff   : > { %13869 = vmatprep.subr.mxu1 %v18996_v43  ;;  %v7724_v55 = vsub.f32 %v7722_v15, %v7723_v14 }
 0x900   : > { %13870 = vmatpush3.msra.mxu1 %v17601_v54  ;;  %v8774_v42 = vand.u32 4294901760, %v8773_v3 }
 0x901   : > { %13871 = vmatprep.subr.mxu1 %v18996_v43  ;;  %v7725_v21 = vand.u32 4294901760, %v7724_v55  ;;  %v9219_v55 = vsub.f32 %v17731_v56, %v9218_v57 }
 0x902   : > { %13872 = vmatpush3.msra.mxu1 %v17612_v61 }
 0x903   : > { %13874 = vmatmul.mubr.f32.vlgmr.msra.gmra.mxu1 %v7723_v14  ;;  %13887 = vmatprep.subr.mxu1 %v18996_v43  ;;  %v8653_v14 = vld [vmem:[#allocation6 + $0x6a0] sm:$0xff] }
 0x904   : > { %13841 = vmatmul.mubr.f32.vlgmr.msra.gmra.mxu0 %v7725_v21  ;;  %13888 = vmatpush3.msra.mxu1 %v17588_v52  ;;  %v17752_v25 = vand.u32 4294901760, %v8653_v14 }
 0x905   : > { %13855 = vmatpush3.msra.mxu0 %v17591_v34  ;;  %13889 = vmatprep.subr.mxu1 %v18996_v43 }
 0x906   : > { %13856 = vmatprep.subr.mxu0 %v18996_v43  ;;  %13890 = vmatpush3.msra.mxu1 %v17593_v53  ;;  %v6642_v53 = vld [vmem:[#allocation6 + $0x640] sm:$0xff]  ;;  %v17761_v29 = vsub.f32 %v8653_v14, %v17752_v25 }
 0x907   : > { %13857 = vmatpush3.msra.mxu0 %v17599_v27  ;;  %13891 = vmatprep.subr.mxu1 %v18996_v43  ;;  %v8142_v27 = vsel %vm8137_vm4, %v6642_v53, 0 }
 0x908   : > { %13858 = vmatprep.subr.mxu0 %v18996_v43  ;;  %13892 = vmatpush3.msra.mxu1 %v17601_v54  ;;  %v8220_v54 = vand.u32 4294901760, %v8142_v27 }
 0x909   : > { %13859 = vmatpush3.msra.mxu0 %v17610_v31  ;;  %13893 = vmatprep.subr.mxu1 %v18996_v43 }
 0x90a   : > { %13860 = vmatprep.subr.mxu0 %v18996_v43  ;;  %13862 = vmatprep.mubr.msk.f32.mxu0 %vm14429_vm3, %v18996_v43 }
 0x90b   : > { %13861 = vmatpush3.msra.mxu0 %v17621_v32  ;;  %13894 = vmatpush3.msra.mxu1 %v17612_v61  ;;  %v8221_v61 = vsub.f32 %v8142_v27, %v8220_v54 }
 0x90c   : > { %13895 = vmatprep.mubr.msk.f32.mxu1 %vm14429_vm3, %v18996_v43  ;;  %13863 = vmatmul.mubr.f32.vlgmr.msra.gmra.mxu0 %v7722_v15  ;;  %v17741_v15 = vand.u32 4294901760, %v8654_v28 }
 0x90d   : > { %13876 = vmatprep.subr.mxu0 %v18996_v43  ;;  %13896 = vmatmul.mubr.f32.vlgmr.msra.gmra.mxu1 %v7721_v26  ;;  %v8222_v32 = vand.u32 4294901760, %v8221_v61 }
 0x90e   : > { %13877 = vmatpush3.msra.mxu0 %v7758_v50  ;;  %13884 = vmatprep.mubr.msk.f32.mxu0 %vm14429_vm3, %v18996_v43  ;;  %v17750_v13 = vsub.f32 %v8654_v28, %v17741_v15 }
 0x90f   : > { %13878 = vmatprep.subr.mxu0 %v18996_v43  ;;  %13905 = vmatprep.mubr.f32.mxu1 %v17683_v41  ;;  %v8223_v0 = vsub.f32 %v8221_v61, %v8222_v32 }
 0x910   : > { %13879 = vmatpush3.msra.mxu0 %v7765_v17 }
 0x911   : > { %13880 = vmatprep.subr.mxu0 %v18996_v43  ;;  %v8224_v38 = vand.u32 4294901760, %v8223_v0 }
 0x912   : > { %13881 = vmatpush3.msra.mxu0 %v7772_v11  ;;  %v8652_v11 = vld [vmem:[#allocation6 + $0x690] sm:$0xf] }
 0x913   : > { %13882 = vmatprep.subr.mxu0 %v18996_v43  ;;  %v8661_v60 = vsel %vm8137_vm4, %v8652_v11, 0 }
 0x914   : > { %13883 = vmatpush3.msra.mxu0 %v7779_v7  ;;  %v17693_v2 = vand.u32 4294901760, %v8661_v60 }
 0x915   : > { %13885 = vmatmul.mubr.f32.vlgmr.msra.gmra.mxu0 %v7721_v26  ;;  %v17739_v26 = vsub.f32 %v8655_v46, %v17733_v62 }
 0x916   : > { %13900 = vmatprep.mubr.f32.mxu0 %v8214_v22  ;;  %v8730_v48 = vsub.f32 %v8661_v60, %v17693_v2 }
 0x917   : > { %v9225_v21 = vand.u32 4294901760, %v17739_v26 }
 0x918   : > { %v8731_v59 = vand.u32 4294901760, %v8730_v48 }
 0x91a   : > { %v8732_v30 = vsub.f32 %v8730_v48, %v8731_v59 }
 0x91c   : > { %v8733_v18 = vand.u32 4294901760, %v8732_v30 }
 0x9bb   : > { %v7818_v19 = vpop.f32.mrf.mxu1 }
 0x9bd   : > { %v13853_v52 = vpop.f32.mrf.mxu1 }
 0x9be   : > { %v9239_v52 = vand.u32 4294901760, %v17761_v29 }
 0x9c3   : > { %v7975_v51 = vpop.f32.mrf.mxu1 }
 0x9c4   : > { %v7727_v34 = vpop.f32.mrf.mxu0 }
 0x9c5   : > { %v13875_v47 = vpop.f32.mrf.mxu1  ;;  %v7819_v17 = vadd.f32 %v7818_v19, %v7727_v34  ;;  %v9240_v34 = vsub.f32 %v17761_v29, %v9239_v52 }
 0x9c6   : > { %v13842_v50 = vpop.f32.mrf.mxu0 }
 0x9c7   : > { %v9241_v53 = vand.u32 4294901760, %v9240_v34 }
 0x9cc   : > { %v7898_v10 = vpop.f32.mrf.mxu0 }
 0x9cd   : > { %v8133_v9 = vpop.f32.mrf.mxu1  ;;  %v7899_v4 = vadd.f32 %v7898_v10, %v7819_v17 }
 0x9ce   : > { %v13864_v31 = vpop.f32.mrf.mxu0 }
 0x9cf   : > { %v13897_v44 = vpop.f32.mrf.mxu1  ;;  %v7976_v36 = vadd.f32 %v7975_v51, %v7899_v4 }
 0x9d5   : > { %v8058_v7 = vpop.f32.mrf.mxu0 }
 0x9d6   : > { %v8059_v6 = vadd.f32 %v8058_v7, %v7976_v36 }
 0x9d7   : > { %v13886_v1 = vpop.f32.mrf.mxu0 }
 0x9d8   : > { %v8134_v12 = vadd.f32 %v8133_v9, %v8059_v6 }
 0x9da   : > { %v8175_v33 = vand.u32 4294901760, %v8134_v12 }
 0x9dc   : > { %v8262_v39 = vsub.f32 %v8134_v12, %v8175_v33  ;;  %13898 = vmatprep.subr.mxu0 %v8175_v33 }
 0x9dd   : > { %13899 = vmatpush3.msra.mxu0 %v8175_v33 }
 0x9de   : > { %13901 = vmatmul.mubr.f32.vlgmr.msra.gmra.mxu0 %v8224_v38  ;;  %13908 = vmatprep.subr.mxu0 %v8262_v39  ;;  %v8263_v20 = vand.u32 4294901760, %v8262_v39 }
 0x9df   : > { %13909 = vmatpush3.msra.mxu0 %v8262_v39  ;;  %13910 = vmatprep.mubr.f32.mxu0 %v17686_v16  ;;  %v9226_v16 = vsub.f32 %v17739_v26, %v9225_v21 }
 0x9e0   : > { %13918 = vmatprep.subr.mxu0 %v8263_v20  ;;  %v8264_v49 = vsub.f32 %v8262_v39, %v8263_v20 }
 0x9e1   : > { %v9227_v22 = vand.u32 4294901760, %v9226_v16 }
 0x9e2   : > { %13911 = vmatmul.mubr.f32.vlgmr.msra.gmra.mxu0 %v8221_v61  ;;  %v8265_v5 = vand.u32 4294901760, %v8264_v49 }
 0x9e3   : > { %13919 = vmatpush3.msra.mxu0 %v8263_v20  ;;  %13920 = vmatprep.mubr.f32.mxu0 %v17683_v41 }
 0x9e4   : > { %13903 = vmatprep.subr.mxu1 %v8265_v5  ;;  %13928 = vmatprep.subr.mxu0 %v18996_v43 }
 0x9e5   : > { %13904 = vmatpush3.msra.mxu1 %v8265_v5 }
 0x9e6   : > { %13906 = vmatmul.mubr.f32.vlgmr.msra.gmra.mxu1 %v8220_v54  ;;  %13913 = vmatprep.subr.mxu1 %v8175_v33 }
 0x9e7   : > { %13921 = vmatmul.mubr.f32.vlgmr.msra.gmra.mxu0 %v8220_v54  ;;  %13914 = vmatpush3.msra.mxu1 %v8175_v33 }
 0x9e8   : > { %13929 = vmatpush3.msra.mxu0 %v8694_v45  ;;  %13923 = vmatprep.subr.mxu1 %v8175_v33 }
 0x9e9   : > { %13915 = vmatprep.mubr.f32.mxu1 %v8212_v24  ;;  %13930 = vmatprep.mubr.msk.f32.mxu0 %vm14429_vm3, %v18996_v43  ;;  %v9232_v24 = vand.u32 4294901760, %v17750_v13 }
 0x9ea   : > { %13938 = vmatprep.subr.mxu0 %v18996_v43  ;;  %13916 = vmatmul.mubr.f32.vlgmr.msra.gmra.mxu1 %v8222_v32 }
 0x9eb   : > { %13924 = vmatpush3.msra.mxu1 %v8175_v33  ;;  %13931 = vmatmul.mubr.f32.vlgmr.msra.gmra.mxu0 %v8733_v18  ;;  %v9233_v19 = vsub.f32 %v17750_v13, %v9232_v24 }
 0x9ec   : > { %13939 = vmatpush3.msra.mxu0 %v8771_v40  ;;  %13925 = vmatprep.mubr.f32.mxu1 %v17683_v41  ;;  %v9220_v41 = vand.u32 4294901760, %v9219_v55 }
 0x9ed   : > { %13933 = vmatprep.subr.mxu1 %v18996_v43  ;;  %13940 = vmatprep.mubr.msk.f32.mxu0 %vm14429_vm3, %v18996_v43  ;;  %v9234_v51 = vand.u32 4294901760, %v9233_v19 }
 0x9ee   : > { %13948 = vmatprep.subr.mxu0 %v18996_v43  ;;  %13926 = vmatmul.mubr.f32.vlgmr.msra.gmra.mxu1 %v8220_v54 }
 0x9ef   : > { %13934 = vmatpush3.msra.mxu1 %v8774_v42  ;;  %13941 = vmatmul.mubr.f32.vlgmr.msra.gmra.mxu0 %v8730_v48 }
 0x9f0   : > { %13949 = vmatpush3.msra.mxu0 %v8772_v23  ;;  %13935 = vmatprep.mubr.msk.f32.mxu1 %vm14429_vm3, %v18996_v43 }
 0x9f1   : > { %13943 = vmatprep.subr.mxu1 %v18996_v43  ;;  %13950 = vmatprep.mubr.msk.f32.mxu0 %vm14429_vm3, %v18996_v43 }
 0x9f2   : > { %13936 = vmatmul.mubr.f32.vlgmr.msra.gmra.mxu1 %v17693_v2  ;;  %13958 = vmatprep.subr.mxu0 %v18996_v43 }
 0x9f3   : > { %13944 = vmatpush3.msra.mxu1 %v8694_v45  ;;  %13945 = vmatprep.mubr.msk.f32.mxu1 %vm14429_vm3, %v18996_v43 }
 0x9f4   : > { %13953 = vmatprep.subr.mxu1 %v18996_v43  ;;  %13951 = vmatmul.mubr.f32.vlgmr.msra.gmra.mxu0 %v17693_v2 }
 0x9f5   : > { %13966 = vmatprep.mubr.msk.f32.mxu0 %vm14429_vm3, %v18996_v43  ;;  %13959 = vmatpush3.msra.mxu0 %v17728_v35 }
 0x9f6   : > { %13946 = vmatmul.mubr.f32.vlgmr.msra.gmra.mxu1 %v8731_v59  ;;  %13960 = vmatprep.subr.mxu0 %v18996_v43 }
 0x9f7   : > { %13954 = vmatpush3.msra.mxu1 %v8694_v45  ;;  %13955 = vmatprep.mubr.msk.f32.mxu1 %vm14429_vm3, %v18996_v43 }
 0x9f8   : > { %13969 = vmatprep.subr.mxu1 %v18996_v43  ;;  %13961 = vmatpush3.msra.mxu0 %v17733_v62 }
 0x9f9   : > { %13962 = vmatprep.subr.mxu0 %v18996_v43 }
 0x9fa   : > { %13956 = vmatmul.mubr.f32.vlgmr.msra.gmra.mxu1 %v17693_v2  ;;  %13963 = vmatpush3.msra.mxu0 %v17741_v15 }
 0x9fb   : > { %13977 = vmatprep.mubr.msk.f32.mxu1 %vm14429_vm3, %v18996_v43  ;;  %13964 = vmatprep.subr.mxu0 %v18996_v43 }
 0x9fc   : > { %13965 = vmatpush3.msra.mxu0 %v17752_v25  ;;  %13970 = vmatpush3.msra.mxu1 %v9220_v41 }
 0x9fd   : > { %13980 = vmatprep.subr.mxu0 %v18996_v43  ;;  %13971 = vmatprep.subr.mxu1 %v18996_v43 }
 0x9fe   : > { %13972 = vmatpush3.msra.mxu1 %v9227_v22 }
 0x9ff   : > { %13973 = vmatprep.subr.mxu1 %v18996_v43 }
 0xa00   : > { %13974 = vmatpush3.msra.mxu1 %v9234_v51 }
 0xa01   : > { %13975 = vmatprep.subr.mxu1 %v18996_v43 }
 0xa02   : > { %13976 = vmatpush3.msra.mxu1 %v9241_v53 }
 0xa03   : > { %13991 = vmatprep.subr.mxu1 %v18996_v43 }
 0xa9e   : > { %v13902_v47 = vpop.f32.mrf.mxu0 }
 0xaa0   : > { %v8216_v50 = vpop.f32.mrf.mxu0 }
 0xaa2   : > { %v13912_v27 = vpop.f32.mrf.mxu0 }
 0xaa4   : > { %v8382_v54 = vpop.f32.mrf.mxu0 }
 0xaa6   : > { %v13907_v10 = vpop.f32.mrf.mxu1 }
 0xaa7   : > { %v8309_v9 = vadd.f32 %v13907_v10, %v13902_v47  ;;  %v13922_v17 = vpop.f32.mrf.mxu0 }
 0xaa8   : > { %v8302_v31 = vpop.f32.mrf.mxu1 }
 0xaa9   : > { %v8303_v61 = vadd.f32 %v8302_v31, %v8216_v50  ;;  %v8390_v44 = vadd.f32 %v13912_v27, %v8309_v9  ;;  %v8545_v4 = vpop.f32.mrf.mxu0 }
 0xaaa   : > { %v13917_v11 = vpop.f32.mrf.mxu1 }
 0xaab   : > { %v8383_v32 = vadd.f32 %v8382_v54, %v8303_v61  ;;  %v8472_v36 = vadd.f32 %v13917_v11, %v8390_v44  ;;  %v8735_v60 = vpop.f32.mrf.mxu0 }
 0xaac   : > { %v8463_v7 = vpop.f32.mrf.mxu1 }
 0xaad   : > { %v8464_v6 = vadd.f32 %v8463_v7, %v8383_v32  ;;  %v8552_v0 = vadd.f32 %v13922_v17, %v8472_v36  ;;  %v13932_v1 = vpop.f32.mrf.mxu0 }
 0xaae   : > { %v13927_v2 = vpop.f32.mrf.mxu1 }
 0xaaf   : > { %v8546_v12 = vadd.f32 %v8545_v4, %v8464_v6  ;;  %v8630_v33 = vadd.f32 %v13927_v2, %v8552_v0  ;;  %v8885_v38 = vpop.f32.mrf.mxu0 }
 0xab0   : > { %v8623_v48 = vpop.f32.mrf.mxu1 }
 0xab1   : > { %v8634_v39 = vsub.f32 %v17190_v58, %v8630_v33  ;;  %v8624_v45 = vadd.f32 %v8623_v48, %v8546_v12  ;;  %v13942_v20 = vpop.f32.mrf.mxu0 }
 0xab2   : > { %v8811_v59 = vpop.f32.mrf.mxu1 }
 0xab3   : > { %v8633_v49 = vsub.f32 %v17194_v8, %v8624_v45  ;;  %v8812_v40 = vadd.f32 %v8811_v59, %v8735_v60  ;;  %v8636_v5 = vand.u32 2147483647, %v8634_v39 }
 0xab4   : > { %v13937_v30 = vpop.f32.mrf.mxu1  ;;  %v9033_v23 = vpop.f32.mrf.mxu0 }
 0xab5   : > { %v8886_v18 = vadd.f32 %v8885_v38, %v8812_v40  ;;  %v8635_v3 = vand.u32 2147483647, %v8633_v49  ;;  %v8638_v14 = vsel %vm365_vm0, %v8636_v5, 0.0 }
 0xab6   : > { %v8959_v42 = vpop.f32.mrf.mxu1  ;;  %v13952_v37 = vpop.f32.mrf.mxu0 }
 0xab7   : > { %v8960_v46 = vadd.f32 %v8959_v42, %v8886_v18  ;;  %v8637_v28 = vsel %vm365_vm0, %v8635_v3, 0.0 }
 0xab8   : > { %v13947_v55 = vpop.f32.mrf.mxu1  ;;  %v8639_v58 = vadd.f32 %v8638_v14, %v8637_v28 }
 0xab9   : > { %v9034_v41 = vadd.f32 %v9033_v23, %v8960_v46  ;;  %v8657_v23 = vld [vmem:[#allocation6 + $0x6e0] sm:$0xff] }
 0xaba   : > { %v9105_v16 = vpop.f32.mrf.mxu1  ;;  %8640 = vadd.xlane.f32.xlu1 %v8639_v58  ;;  %v10061_v42 = vsel %vm10059_vm5, %v8657_v23, 0 }
 0xabb   : > { %v9106_v22 = vadd.f32 %v9105_v16, %v9034_v41  ;;  %v17872_v46 = vand.u32 4294901760, %v10061_v42 }
 0xabc   : > { %v13957_v8 = vpop.f32.mrf.mxu1 }
 0xabd   : > { %v9110_v19 = vsel %vm3204_vm1, %v9106_v22, 0  ;;  %v10134_v58 = vsub.f32 %v10061_v42, %v17872_v46 }
 0xabe   : > { %v9181_v51 = vand.u32 4294901760, %v9110_v19 }
 0xac0   : > { %v9182_v34 = vsub.f32 %v9110_v19, %v9181_v51  ;;  %13978 = vmatmul.mubr.f32.vlgmr.msra.gmra.mxu1 %v9181_v51  ;;  %v10528_v19 = vld [vmem:[#allocation6 + $0x710] sm:$0x3] }
 0xac1   : > { %13992 = vmatpush3.msra.mxu1 %v17728_v35  ;;  %13999 = vmatprep.mubr.msk.f32.mxu1 %vm14429_vm3, %v18996_v43 }
 0xac2   : > { %v9183_v53 = vand.u32 4294901760, %v9182_v34  ;;  %13993 = vmatprep.subr.mxu1 %v18996_v43 }
 0xac3   : > { %13994 = vmatpush3.msra.mxu1 %v17733_v62 }
 0xac4   : > { %v9184_v47 = vsub.f32 %v9182_v34, %v9183_v53  ;;  %13995 = vmatprep.subr.mxu1 %v18996_v43 }
 0xac5   : > { %13996 = vmatpush3.msra.mxu1 %v17741_v15 }
 0xac6   : > { %v9185_v50 = vand.u32 4294901760, %v9184_v47  ;;  %13997 = vmatprep.subr.mxu1 %v18996_v43 }
 0xac7   : > { %13998 = vmatpush3.msra.mxu1 %v17752_v25 }
 0xac8   : > { %14000 = vmatmul.mubr.f32.vlgmr.msra.gmra.mxu1 %v9183_v53  ;;  %14013 = vmatprep.subr.mxu1 %v18996_v43 }
 0xac9   : > { %13967 = vmatmul.mubr.f32.vlgmr.msra.gmra.mxu0 %v9185_v50  ;;  %14014 = vmatpush3.msra.mxu1 %v17728_v35  ;;  %v8659_v35 = vld [vmem:[#allocation6 + $0x700] sm:$0xff]  ;;  %v10534_v50 = vsel %vm10059_vm5, %v10528_v19, 0 }
 0xaca   : > { %13981 = vmatpush3.msra.mxu0 %v17731_v56  ;;  %14015 = vmatprep.subr.mxu1 %v18996_v43  ;;  %v9629_v56 = vand.u32 4294901760, %v8659_v35 }
 0xacb   : > { %13982 = vmatprep.subr.mxu0 %v18996_v43  ;;  %14016 = vmatpush3.msra.mxu1 %v17733_v62  ;;  %v8658_v62 = vld [vmem:[#allocation6 + $0x6f0] sm:$0xff] }
 0xacc   : > { %13983 = vmatpush3.msra.mxu0 %v17739_v26  ;;  %14017 = vmatprep.subr.mxu1 %v18996_v43  ;;  %v9632_v26 = vand.u32 4294901760, %v8658_v62 }
 0xacd   : > { %13984 = vmatprep.subr.mxu0 %v18996_v43  ;;  %14018 = vmatpush3.msra.mxu1 %v17741_v15 }
 0xace   : > { %13985 = vmatpush3.msra.mxu0 %v17750_v13  ;;  %14019 = vmatprep.subr.mxu1 %v18996_v43 }
 0xacf   : > { %13986 = vmatprep.subr.mxu0 %v18996_v43  ;;  %13988 = vmatprep.mubr.msk.f32.mxu0 %vm14429_vm3, %v18996_v43 }
 0xad0   : > { %13987 = vmatpush3.msra.mxu0 %v17761_v29  ;;  %14020 = vmatpush3.msra.mxu1 %v17752_v25 }
 0xad1   : > { %14021 = vmatprep.mubr.msk.f32.mxu1 %vm14429_vm3, %v18996_v43  ;;  %13989 = vmatmul.mubr.f32.vlgmr.msra.gmra.mxu0 %v9182_v34  ;;  %v10135_v34 = vand.u32 4294901760, %v10134_v58 }
 0xad2   : > { %14002 = vmatprep.subr.mxu0 %v18996_v43  ;;  %14022 = vmatmul.mubr.f32.vlgmr.msra.gmra.mxu1 %v9181_v51 }
 0xad3   : > { %14003 = vmatpush3.msra.mxu0 %v9218_v57  ;;  %14010 = vmatprep.mubr.msk.f32.mxu0 %vm14429_vm3, %v18996_v43  ;;  %v17829_v57 = vsub.f32 %v8659_v35, %v9629_v56 }
 0xad4   : > { %14004 = vmatprep.subr.mxu0 %v18996_v43  ;;  %14031 = vmatprep.subr.mxu1 %v18996_v43 }
 0xad5   : > { %14005 = vmatpush3.msra.mxu0 %v9225_v21  ;;  %14035 = vmatprep.mubr.msk.f32.mxu1 %vm14429_vm3, %v18996_v43  ;;  %v9708_v15 = vand.u32 4294901760, %v17829_v57  ;;  %v17833_v21 = vsub.f32 %v8658_v62, %v9632_v26  ;;  %v10136_v62 = vsub.f32 %v10134_v58, %v10135_v34 }
 0xad6   : > { %14006 = vmatprep.subr.mxu0 %v18996_v43 }
 0xad7   : > { %14007 = vmatpush3.msra.mxu0 %v9232_v24  ;;  %v9709_v13 = vsub.f32 %v17829_v57, %v9708_v15  ;;  %v9715_v25 = vand.u32 4294901760, %v17833_v21 }
 0xad8   : > { %14008 = vmatprep.subr.mxu0 %v18996_v43 }
 0xad9   : > { %14009 = vmatpush3.msra.mxu0 %v9239_v52  ;;  %v9710_v24 = vand.u32 4294901760, %v9709_v13  ;;  %v9716_v29 = vsub.f32 %v17833_v21, %v9715_v25 }
 0xada   : > { %14011 = vmatmul.mubr.f32.vlgmr.msra.gmra.mxu0 %v9181_v51  ;;  %14024 = vmatprep.subr.mxu0 %v18996_v43 }
 0xadb   : > { %14028 = vmatprep.mubr.msk.f32.mxu0 %vm14429_vm3, %v18996_v43  ;;  %14025 = vmatpush3.msra.mxu0 %v9629_v56  ;;  %v9717_v52 = vand.u32 4294901760, %v9716_v29 }
 0xadc   : > { %14026 = vmatprep.subr.mxu0 %v18996_v43  ;;  %14032 = vmatpush3.msra.mxu1 %v9710_v24 }
 0xadd   : > { %14027 = vmatpush3.msra.mxu0 %v9632_v26  ;;  %14033 = vmatprep.subr.mxu1 %v18996_v43 }
 0xade   : > { %14038 = vmatprep.subr.mxu0 %v18996_v43  ;;  %14034 = vmatpush3.msra.mxu1 %v9717_v52 }
 0xadf   : > { %14045 = vmatprep.subr.mxu1 %v18996_v43 }
 0xb43   : > { %v8641_v27 = vpop.xlane.xlu1 %8640 }
 0xb44   : > { %v8642_v54 = vrot.slane %v8641_v27, 4 }
 0xb46   : > { %v8643_v10 = vadd.f32 %v8642_v54, %v8641_v27 }
 0xb48   : > { %v8644_v9 = vrot.slane %v8643_v10, 2 }
 0xb4a   : > { %v8645_v17 = vadd.f32 %v8644_v9, %v8643_v10 }
 0xb4c   : > { %v8646_v31 = vrot.slane %v8645_v17, 1 }
 0xb4e   : > { %v8647_v61 = vadd.f32 %v8646_v31, %v8645_v17 }
 0xb50   : > { %14232 = vpush %v8647_v61 }
 0xb80   : > { %v9278_v44 = vpop.f32.mrf.mxu1 }
 0xb81   : > { %s14233_s27 = spop %14232 }
 0xb82   : > { %v13979_v4 = vpop.f32.mrf.mxu1  ;;  %s8649_s7 = smul.f32 0.00048828125, %s14233_s27 }
 0xb88   : > { %v9435_v11 = vpop.f32.mrf.mxu1 }
 0xb89   : > { %v9187_v32 = vpop.f32.mrf.mxu0 }
 0xb8a   : > { %v14001_v36 = vpop.f32.mrf.mxu1  ;;  %v9279_v0 = vadd.f32 %v9278_v44, %v9187_v32 }
 0xb8b   : > { %v13968_v60 = vpop.f32.mrf.mxu0  ;;  %v10530_v36 = vld [vmem:[#allocation6 + $0x730] sm:$0xff] }
 0xb8c   : > { %v17922_v60 = vand.u32 4294901760, %v10530_v36 }
 0xb91   : > { %v9358_v7 = vpop.f32.mrf.mxu0 }
 0xb92   : > { %v9593_v6 = vpop.f32.mrf.mxu1  ;;  %v9359_v12 = vadd.f32 %v9358_v7, %v9279_v0  ;;  %v10529_v7 = vld [vmem:[#allocation6 + $0x720] sm:$0xff] }
 0xb93   : > { %v13990_v1 = vpop.f32.mrf.mxu0  ;;  %v17927_v0 = vand.u32 4294901760, %v10529_v7 }
 0xb94   : > { %v14023_v2 = vpop.f32.mrf.mxu1  ;;  %v9436_v33 = vadd.f32 %v9435_v11, %v9359_v12 }
 0xb95   : > { %v17933_v2 = vsub.f32 %v10529_v7, %v17927_v0 }
 0xb9a   : > { %v9518_v38 = vpop.f32.mrf.mxu0 }
 0xb9b   : > { %v9519_v48 = vadd.f32 %v9518_v38, %v9436_v33  ;;  %v11102_v33 = vand.u32 4294901760, %v17933_v2 }
 0xb9c   : > { %v14012_v39 = vpop.f32.mrf.mxu0 }
 0xb9d   : > { %v17843_v45 = vadd.f32 %v9593_v6, %v9519_v48  ;;  %v17925_v6 = vsub.f32 %v10530_v36, %v17922_v60  ;;  %v11103_v48 = vsub.f32 %v17933_v2, %v11102_v33 }
 0xb9f   : > { %v9598_v20 = vsel %vm6008_vm2, %v17843_v45, 0  ;;  %v10536_v13 = vsel %vm10063_vm6, %v17843_v45, 0  ;;  %v11095_v1 = vand.u32 4294901760, %v17925_v6  ;;  %v11104_v39 = vand.u32 4294901760, %v11103_v48 }
 0xba0   : > { %v9667_v59 = vand.u32 4294901760, %v9598_v20  ;;  %v10569_v27 = vand.u32 4294901760, %v10536_v13 }
 0xba1   : > { %v11096_v12 = vsub.f32 %v17925_v6, %v11095_v1 }
 0xba2   : > { %v9668_v49 = vsub.f32 %v9598_v20, %v9667_v59  ;;  %14036 = vmatmul.mubr.f32.vlgmr.msra.gmra.mxu1 %v9667_v59  ;;  %v10646_v17 = vsub.f32 %v10536_v13, %v10569_v27 }
 0xba3   : > { %14046 = vmatpush3.msra.mxu1 %v9629_v56  ;;  %14049 = vmatprep.mubr.msk.f32.mxu1 %vm14429_vm3, %v18996_v43  ;;  %v11097_v38 = vand.u32 4294901760, %v11096_v12 }
 0xba4   : > { %14047 = vmatprep.subr.mxu1 %v18996_v43  ;;  %v9669_v40 = vand.u32 4294901760, %v9668_v49  ;;  %v10647_v44 = vand.u32 4294901760, %v10646_v17 }
 0xba5   : > { %14048 = vmatpush3.msra.mxu1 %v9632_v26 }
 0xba6   : > { %14050 = vmatmul.mubr.f32.vlgmr.msra.gmra.mxu1 %v9669_v40  ;;  %14059 = vmatprep.subr.mxu1 %v18996_v43  ;;  %v9670_v5 = vsub.f32 %v9668_v49, %v9669_v40  ;;  %v10648_v11 = vsub.f32 %v10646_v17, %v10647_v44 }
 0xba7   : > { %14060 = vmatpush3.msra.mxu1 %v9629_v56  ;;  %14063 = vmatprep.mubr.msk.f32.mxu1 %vm14429_vm3, %v18996_v43 }
 0xba8   : > { %14061 = vmatprep.subr.mxu1 %v18996_v43  ;;  %v9671_v30 = vand.u32 4294901760, %v9670_v5  ;;  %v10649_v32 = vand.u32 4294901760, %v10648_v11 }
 0xba9   : > { %14062 = vmatpush3.msra.mxu1 %v9632_v26  ;;  %v17876_v26 = vand.u32 4294901760, %v10534_v50 }
 0xbaa   : > { %14029 = vmatmul.mubr.f32.vlgmr.msra.gmra.mxu0 %v9671_v30  ;;  %14064 = vmatmul.mubr.f32.vlgmr.msra.gmra.mxu1 %v9667_v59 }
 0xbab   : > { %14039 = vmatpush3.msra.mxu0 %v17829_v57  ;;  %14042 = vmatprep.mubr.msk.f32.mxu0 %vm14429_vm3, %v18996_v43  ;;  %v10605_v29 = vsub.f32 %v10534_v50, %v17876_v26 }
 0xbac   : > { %14040 = vmatprep.subr.mxu0 %v18996_v43  ;;  %14071 = vmatprep.subr.mxu1 %v18996_v43 }
 0xbad   : > { %14041 = vmatpush3.msra.mxu0 %v17833_v21  ;;  %14073 = vmatprep.mubr.msk.f32.mxu1 %vm14429_vm3, %v18996_v43  ;;  %v10606_v10 = vand.u32 4294901760, %v10605_v29 }
 0xbae   : > { %14043 = vmatmul.mubr.f32.vlgmr.msra.gmra.mxu0 %v9668_v49  ;;  %14052 = vmatprep.subr.mxu0 %v18996_v43 }
 0xbaf   : > { %14053 = vmatpush3.msra.mxu0 %v9708_v15  ;;  %14056 = vmatprep.mubr.msk.f32.mxu0 %vm14429_vm3, %v18996_v43  ;;  %v10607_v61 = vsub.f32 %v10605_v29, %v10606_v10 }
 0xbb0   : > { %14054 = vmatprep.subr.mxu0 %v18996_v43 }
 0xbb1   : > { %14055 = vmatpush3.msra.mxu0 %v9715_v25  ;;  %v10137_v25 = vand.u32 4294901760, %v10136_v62  ;;  %v10608_v4 = vand.u32 4294901760, %v10607_v61 }
 0xbb2   : > { %14057 = vmatmul.mubr.f32.vlgmr.msra.gmra.mxu0 %v9667_v59  ;;  %14066 = vmatprep.subr.mxu0 %v18996_v43 }
 0xbb3   : > { %14068 = vmatprep.mubr.msk.f32.mxu0 %vm14429_vm3, %v18996_v43 }
 0xc62   : > { %v9754_v18 = vpop.f32.mrf.mxu1 }
 0xc64   : > { %v14037_v3 = vpop.f32.mrf.mxu1 }
 0xc66   : > { %v9905_v37 = vpop.f32.mrf.mxu1 }
 0xc68   : > { %v14051_v28 = vpop.f32.mrf.mxu1 }
 0xc6a   : > { %v9673_v14 = vpop.f32.mrf.mxu0  ;;  %v10055_v55 = vpop.f32.mrf.mxu1 }
 0xc6b   : > { %v9755_v22 = vadd.f32 %v9754_v18, %v9673_v14 }
 0xc6c   : > { %v14030_v41 = vpop.f32.mrf.mxu0  ;;  %v14065_v16 = vpop.f32.mrf.mxu1 }
 0xc6e   : > { %v9830_v8 = vpop.f32.mrf.mxu0 }
 0xc6f   : > { %v9831_v51 = vadd.f32 %v9830_v8, %v9755_v22 }
 0xc70   : > { %v14044_v53 = vpop.f32.mrf.mxu0 }
 0xc71   : > { %v9906_v47 = vadd.f32 %v9905_v37, %v9831_v51 }
 0xc72   : > { %v9982_v35 = vpop.f32.mrf.mxu0 }
 0xc73   : > { %v9983_v56 = vadd.f32 %v9982_v35, %v9906_v47 }
 0xc74   : > { %v14058_v57 = vpop.f32.mrf.mxu0 }
 0xc75   : > { %v10056_v15 = vadd.f32 %v10055_v55, %v9983_v56 }
 0xc77   : > { %v10065_v21 = vsel %vm10063_vm6, %v10056_v15, 0 }
 0xc78   : > { %v10098_v24 = vand.u32 4294901760, %v10065_v21 }
 0xc7a   : > { %v10175_v52 = vsub.f32 %v10065_v21, %v10098_v24  ;;  %14067 = vmatpush3.msra.mxu0 %v10098_v24 }
 0xc7b   : > { %14069 = vmatmul.mubr.f32.vlgmr.msra.gmra.mxu0 %v10137_v25  ;;  %14076 = vmatprep.subr.mxu0 %v18996_v43 }
 0xc7c   : > { %14077 = vmatpush3.msra.mxu0 %v10175_v52  ;;  %14078 = vmatprep.mubr.msk.f32.mxu0 %vm14429_vm3, %v18996_v43  ;;  %v10176_v54 = vand.u32 4294901760, %v10175_v52 }
 0xc7d   : > { %14086 = vmatprep.subr.mxu0 %v18996_v43 }
 0xc7e   : > { %v10177_v9 = vsub.f32 %v10175_v52, %v10176_v54 }
 0xc7f   : > { %14079 = vmatmul.mubr.f32.vlgmr.msra.gmra.mxu0 %v10134_v58 }
 0xc80   : > { %14087 = vmatpush3.msra.mxu0 %v10176_v54  ;;  %v10178_v31 = vand.u32 4294901760, %v10177_v9  ;;  %14088 = vmatprep.mubr.msk.f32.mxu0 %vm14429_vm3, %v18996_v43 }
 0xc81   : > { %14096 = vmatprep.subr.mxu0 %v18996_v43 }
 0xc82   : > { %14072 = vmatpush3.msra.mxu1 %v10178_v31 }
 0xc83   : > { %14074 = vmatmul.mubr.f32.vlgmr.msra.gmra.mxu1 %v17872_v46  ;;  %14081 = vmatprep.subr.mxu1 %v18996_v43 }
 0xc84   : > { %14089 = vmatmul.mubr.f32.vlgmr.msra.gmra.mxu0 %v17872_v46  ;;  %14082 = vmatpush3.msra.mxu1 %v10098_v24 }
 0xc85   : > { %14097 = vmatpush3.msra.mxu0 %v10569_v27  ;;  %14083 = vmatprep.mubr.msk.f32.mxu1 %vm14429_vm3, %v18996_v43 }
 0xc86   : > { %14091 = vmatprep.subr.mxu1 %v18996_v43  ;;  %14098 = vmatprep.mubr.msk.f32.mxu0 %vm14429_vm3, %v18996_v43 }
 0xc87   : > { %14106 = vmatprep.subr.mxu0 %v18996_v43  ;;  %14084 = vmatmul.mubr.f32.vlgmr.msra.gmra.mxu1 %v10135_v34 }
 0xc88   : > { %14092 = vmatpush3.msra.mxu1 %v10098_v24  ;;  %14099 = vmatmul.mubr.f32.vlgmr.msra.gmra.mxu0 %v10608_v4 }
 0xc89   : > { %14107 = vmatpush3.msra.mxu0 %v10646_v17  ;;  %14093 = vmatprep.mubr.msk.f32.mxu1 %vm14429_vm3, %v18996_v43  ;;  %v10532_v17 = vld [vmem:[#allocation6 + $0x750] sm:$0xff] }
 0xc8a   : > { %14101 = vmatprep.subr.mxu1 %v18996_v43  ;;  %14108 = vmatprep.mubr.msk.f32.mxu0 %vm14429_vm3, %v18996_v43  ;;  %v11480_v31 = vand.u32 4294901760, %v10532_v17 }
 0xc8b   : > { %14116 = vmatprep.subr.mxu0 %v18996_v43  ;;  %14094 = vmatmul.mubr.f32.vlgmr.msra.gmra.mxu1 %v17872_v46 }
 0xc8c   : > { %14102 = vmatpush3.msra.mxu1 %v10649_v32  ;;  %14109 = vmatmul.mubr.f32.vlgmr.msra.gmra.mxu0 %v10605_v29  ;;  %v11557_v61 = vsub.f32 %v10532_v17, %v11480_v31 }
 0xc8d   : > { %14117 = vmatpush3.msra.mxu0 %v10647_v44  ;;  %14103 = vmatprep.mubr.msk.f32.mxu1 %vm14429_vm3, %v18996_v43 }
 0xc8e   : > { %14111 = vmatprep.subr.mxu1 %v18996_v43  ;;  %14118 = vmatprep.mubr.msk.f32.mxu0 %vm14429_vm3, %v18996_v43  ;;  %v11558_v44 = vand.u32 4294901760, %v11557_v61 }
 0xc8f   : > { %14104 = vmatmul.mubr.f32.vlgmr.msra.gmra.mxu1 %v17876_v26  ;;  %14126 = vmatprep.subr.mxu0 %v18996_v43 }
 0xc90   : > { %14112 = vmatpush3.msra.mxu1 %v10569_v27  ;;  %14113 = vmatprep.mubr.msk.f32.mxu1 %vm14429_vm3, %v18996_v43  ;;  %v11559_v4 = vsub.f32 %v11557_v61, %v11558_v44 }
 0xc91   : > { %14121 = vmatprep.subr.mxu1 %v18996_v43  ;;  %14119 = vmatmul.mubr.f32.vlgmr.msra.gmra.mxu0 %v17876_v26 }
 0xc92   : > { %14130 = vmatprep.mubr.msk.f32.mxu0 %vm14429_vm3, %v18996_v43  ;;  %14127 = vmatpush3.msra.mxu0 %v17922_v60  ;;  %v11560_v11 = vand.u32 4294901760, %v11559_v4 }
 0xc93   : > { %14114 = vmatmul.mubr.f32.vlgmr.msra.gmra.mxu1 %v10606_v10  ;;  %14128 = vmatprep.subr.mxu0 %v18996_v43 }
 0xc94   : > { %14122 = vmatpush3.msra.mxu1 %v10569_v27  ;;  %14123 = vmatprep.mubr.msk.f32.mxu1 %vm14429_vm3, %v18996_v43 }
 0xc95   : > { %14133 = vmatprep.subr.mxu1 %v18996_v43  ;;  %14129 = vmatpush3.msra.mxu0 %v17927_v0 }
 0xc96   : > { %14140 = vmatprep.subr.mxu0 %v18996_v43 }
 0xc97   : > { %14124 = vmatmul.mubr.f32.vlgmr.msra.gmra.mxu1 %v17876_v26 }
 0xc98   : > { %14137 = vmatprep.mubr.msk.f32.mxu1 %vm14429_vm3, %v18996_v43  ;;  %14134 = vmatpush3.msra.mxu1 %v11097_v38 }
 0xc99   : > { %14135 = vmatprep.subr.mxu1 %v18996_v43 }
 0xc9a   : > { %14136 = vmatpush3.msra.mxu1 %v11104_v39 }
 0xc9b   : > { %14147 = vmatprep.subr.mxu1 %v18996_v43 }
 0xd3b   : > { %v10139_v20 = vpop.f32.mrf.mxu0 }
 0xd3d   : > { %v14070_v59 = vpop.f32.mrf.mxu0 }
 0xd3f   : > { %v10289_v49 = vpop.f32.mrf.mxu0 }
 0xd41   : > { %v14080_v40 = vpop.f32.mrf.mxu0 }
 0xd43   : > { %v10215_v5 = vpop.f32.mrf.mxu1 }
 0xd44   : > { %v10216_v30 = vadd.f32 %v10215_v5, %v10139_v20  ;;  %v10437_v23 = vpop.f32.mrf.mxu0 }
 0xd45   : > { %v14075_v18 = vpop.f32.mrf.mxu1 }
 0xd46   : > { %v10290_v3 = vadd.f32 %v10289_v49, %v10216_v30  ;;  %v14090_v42 = vpop.f32.mrf.mxu0 }
 0xd47   : > { %v10363_v37 = vpop.f32.mrf.mxu1 }
 0xd48   : > { %v10364_v46 = vadd.f32 %v10363_v37, %v10290_v3  ;;  %v10610_v28 = vpop.f32.mrf.mxu0 }
 0xd49   : > { %v14085_v14 = vpop.f32.mrf.mxu1 }
 0xd4a   : > { %v10438_v55 = vadd.f32 %v10437_v23, %v10364_v46  ;;  %v14100_v58 = vpop.f32.mrf.mxu0 }
 0xd4b   : > { %v10509_v41 = vpop.f32.mrf.mxu1 }
 0xd4c   : > { %v10510_v16 = vadd.f32 %v10509_v41, %v10438_v55  ;;  %v10760_v22 = vpop.f32.mrf.mxu0 }
 0xd4d   : > { %v14095_v8 = vpop.f32.mrf.mxu1 }
 0xd4e   : > { %v10513_v19 = vsub.f32 %v17636_v63, %v10510_v16  ;;  %v14110_v51 = vpop.f32.mrf.mxu0  ;;  %v10531_v16 = vld [vmem:[#allocation6 + $0x740] sm:$0xf] }
 0xd4f   : > { %v10686_v34 = vpop.f32.mrf.mxu1 }
 0xd50   : > { %v10687_v53 = vadd.f32 %v10686_v34, %v10610_v28  ;;  %v10514_v47 = vand.u32 2147483647, %v10513_v19  ;;  %v11897_v19 = vsel %vm11895_vm7, %v10531_v16, 0 }
 0xd51   : > { %v14105_v50 = vpop.f32.mrf.mxu1  ;;  %v10908_v35 = vpop.f32.mrf.mxu0  ;;  %v11969_v34 = vand.u32 4294901760, %v11897_v19 }
 0xd52   : > { %v10761_v56 = vadd.f32 %v10760_v22, %v10687_v53  ;;  %v10515_v62 = vsel %vm3204_vm1, %v10514_v47, 0.0 }
 0xd53   : > { %v10834_v57 = vpop.f32.mrf.mxu1  ;;  %10516 = vadd.xlane.f32.xlu1 %v10515_v62  ;;  %v14120_v26 = vpop.f32.mrf.mxu0 }
 0xd54   : > { %v10835_v15 = vadd.f32 %v10834_v57, %v10761_v56 }
 0xd55   : > { %v14115_v21 = vpop.f32.mrf.mxu1 }
 0xd56   : > { %v10909_v13 = vadd.f32 %v10908_v35, %v10835_v15  ;;  %v11970_v35 = vsub.f32 %v11897_v19, %v11969_v34 }
 0xd57   : > { %v10980_v25 = vpop.f32.mrf.mxu1 }
 0xd58   : > { %v10981_v24 = vadd.f32 %v10980_v25, %v10909_v13  ;;  %v11971_v21 = vand.u32 4294901760, %v11970_v35 }
 0xd59   : > { %v14125_v29 = vpop.f32.mrf.mxu1 }
 0xd5a   : > { %v10985_v63 = vsel %vm6008_vm2, %v10981_v24, 0 }
 0xd5b   : > { %v11054_v52 = vand.u32 4294901760, %v10985_v63 }
 0xd5d   : > { %v11055_v27 = vsub.f32 %v10985_v63, %v11054_v52  ;;  %14138 = vmatmul.mubr.f32.vlgmr.msra.gmra.mxu1 %v11054_v52  ;;  %v11972_v63 = vsub.f32 %v11970_v35, %v11971_v21 }
 0xd5e   : > { %14148 = vmatpush3.msra.mxu1 %v17922_v60  ;;  %14151 = vmatprep.mubr.msk.f32.mxu1 %vm14429_vm3, %v18996_v43 }
 0xd5f   : > { %v11056_v54 = vand.u32 4294901760, %v11055_v27  ;;  %14149 = vmatprep.subr.mxu1 %v18996_v43 }
 0xd60   : > { %14150 = vmatpush3.msra.mxu1 %v17927_v0 }
 0xd61   : > { %v11057_v10 = vsub.f32 %v11055_v27, %v11056_v54  ;;  %14152 = vmatmul.mubr.f32.vlgmr.msra.gmra.mxu1 %v11056_v54  ;;  %14161 = vmatprep.subr.mxu1 %v18996_v43 }
 0xd62   : > { %14162 = vmatpush3.msra.mxu1 %v17922_v60  ;;  %14165 = vmatprep.mubr.msk.f32.mxu1 %vm14429_vm3, %v18996_v43 }
 0xd63   : > { %v11058_v9 = vand.u32 4294901760, %v11057_v10  ;;  %14163 = vmatprep.subr.mxu1 %v18996_v43  ;;  %v11973_v10 = vand.u32 4294901760, %v11972_v63 }
 0xd64   : > { %14164 = vmatpush3.msra.mxu1 %v17927_v0 }
 0xd65   : > { %14131 = vmatmul.mubr.f32.vlgmr.msra.gmra.mxu0 %v11058_v9  ;;  %14166 = vmatmul.mubr.f32.vlgmr.msra.gmra.mxu1 %v11054_v52 }
 0xd66   : > { %14141 = vmatpush3.msra.mxu0 %v17925_v6  ;;  %14144 = vmatprep.mubr.msk.f32.mxu0 %vm14429_vm3, %v18996_v43 }
 0xd67   : > { %14142 = vmatprep.subr.mxu0 %v18996_v43  ;;  %14173 = vmatprep.subr.mxu1 %v18996_v43 }
 0xd68   : > { %14143 = vmatpush3.msra.mxu0 %v17933_v2  ;;  %14175 = vmatprep.mubr.msk.f32.mxu1 %vm14429_vm3, %v18996_v43 }
 0xd69   : > { %14145 = vmatmul.mubr.f32.vlgmr.msra.gmra.mxu0 %v11055_v27  ;;  %14154 = vmatprep.subr.mxu0 %v18996_v43 }
 0xd6a   : > { %14155 = vmatpush3.msra.mxu0 %v11095_v1  ;;  %14158 = vmatprep.mubr.msk.f32.mxu0 %vm14429_vm3, %v18996_v43 }
 0xd6b   : > { %14156 = vmatprep.subr.mxu0 %v18996_v43  ;;  %14174 = vmatpush3.msra.mxu1 %v11560_v11 }
 0xd6c   : > { %14157 = vmatpush3.msra.mxu0 %v11102_v33  ;;  %14183 = vmatprep.subr.mxu1 %v18996_v43 }
 0xd6d   : > { %14159 = vmatmul.mubr.f32.vlgmr.msra.gmra.mxu0 %v11054_v52  ;;  %14168 = vmatprep.subr.mxu0 %v18996_v43 }
 0xd6e   : > { %14170 = vmatprep.mubr.msk.f32.mxu0 %vm14429_vm3, %v18996_v43  ;;  %14169 = vmatpush3.msra.mxu0 %v11480_v31 }
 0xd6f   : > { %14178 = vmatprep.subr.mxu0 %v18996_v43 }
 0xddc   : > { %v10517_v32 = vpop.xlane.xlu1 %10516 }
 0xddd   : > { %v10518_v36 = vrot.slane %v10517_v32, 4 }
 0xddf   : > { %v10519_v60 = vadd.f32 %v10518_v36, %v10517_v32 }
 0xde1   : > { %v10520_v7 = vrot.slane %v10519_v60, 2 }
 0xde3   : > { %v10521_v6 = vadd.f32 %v10520_v7, %v10519_v60 }
 0xde5   : > { %v10522_v0 = vrot.slane %v10521_v6, 1 }
 0xde7   : > { %v10523_v1 = vadd.f32 %v10522_v0, %v10521_v6 }
 0xde9   : > { %14234 = vpush %v10523_v1 }
 0xe1a   : > { %s14235_s28 = spop %14234 }
 0xe1b   : > { %s10525_s8 = smul.f32 0.001953125, %s14235_s28 }
 0xe1d   : > { %v11141_v2 = vpop.f32.mrf.mxu1 }
 0xe1f   : > { %v14139_v12 = vpop.f32.mrf.mxu1 }
 0xe21   : > { %v11292_v33 = vpop.f32.mrf.mxu1 }
 0xe23   : > { %v14153_v38 = vpop.f32.mrf.mxu1 }
 0xe25   : > { %v11060_v48 = vpop.f32.mrf.mxu0  ;;  %v11442_v39 = vpop.f32.mrf.mxu1 }
 0xe26   : > { %v11142_v49 = vadd.f32 %v11141_v2, %v11060_v48 }
 0xe27   : > { %v14132_v20 = vpop.f32.mrf.mxu0  ;;  %v14167_v59 = vpop.f32.mrf.mxu1 }
 0xe29   : > { %v11217_v40 = vpop.f32.mrf.mxu0 }
 0xe2a   : > { %v11218_v5 = vadd.f32 %v11217_v40, %v11142_v49 }
 0xe2b   : > { %v14146_v30 = vpop.f32.mrf.mxu0 }
 0xe2c   : > { %v11293_v23 = vadd.f32 %v11292_v33, %v11218_v5 }
 0xe2d   : > { %v11369_v18 = vpop.f32.mrf.mxu0 }
 0xe2e   : > { %v11370_v3 = vadd.f32 %v11369_v18, %v11293_v23 }
 0xe2f   : > { %v14160_v42 = vpop.f32.mrf.mxu0 }
 0xe30   : > { %v11443_v37 = vadd.f32 %v11442_v39, %v11370_v3 }
 0xe32   : > { %v11447_v46 = vsel %vm8137_vm4, %v11443_v37, 0 }
 0xe33   : > { %v11515_v28 = vand.u32 4294901760, %v11447_v46 }
 0xe35   : > { %v11516_v14 = vsub.f32 %v11447_v46, %v11515_v28  ;;  %14176 = vmatmul.mubr.f32.vlgmr.msra.gmra.mxu1 %v11515_v28  ;;  %v4172_v46 = vstv %s4171_s24 }
 0xe36   : > { %14184 = vmatpush3.msra.mxu1 %v11480_v31  ;;  %14185 = vmatprep.mubr.msk.f32.mxu1 %vm14429_vm3, %v18996_v43 }
 0xe37   : > { %v11517_v55 = vand.u32 4294901760, %v11516_v14  ;;  %14193 = vmatprep.subr.mxu1 %v18996_v43 }
 0xe39   : > { %v11518_v58 = vsub.f32 %v11516_v14, %v11517_v55  ;;  %14186 = vmatmul.mubr.f32.vlgmr.msra.gmra.mxu1 %v11517_v55  ;;  %v10526_v55 = vstv %s10525_s8 }
 0xe3a   : > { %14194 = vmatpush3.msra.mxu1 %v11480_v31  ;;  %14195 = vmatprep.mubr.msk.f32.mxu1 %vm14429_vm3, %v18996_v43 }
 0xe3b   : > { %v11519_v41 = vand.u32 4294901760, %v11518_v58  ;;  %14203 = vmatprep.subr.mxu1 %v18996_v43 }
 0xe3d   : > { %14171 = vmatmul.mubr.f32.vlgmr.msra.gmra.mxu0 %v11519_v41  ;;  %14196 = vmatmul.mubr.f32.vlgmr.msra.gmra.mxu1 %v11515_v28 }
 0xe3e   : > { %14179 = vmatpush3.msra.mxu0 %v11557_v61  ;;  %14180 = vmatprep.mubr.msk.f32.mxu0 %vm14429_vm3, %v18996_v43 }
 0xe3f   : > { %14188 = vmatprep.subr.mxu0 %v18996_v43  ;;  %14205 = vmatprep.mubr.msk.f32.mxu1 %vm14429_vm3, %v18996_v43 }
 0xe41   : > { %14181 = vmatmul.mubr.f32.vlgmr.msra.gmra.mxu0 %v11516_v14 }
 0xe42   : > { %14189 = vmatpush3.msra.mxu0 %v11558_v44  ;;  %14190 = vmatprep.mubr.msk.f32.mxu0 %vm14429_vm3, %v18996_v43 }
 0xe43   : > { %14198 = vmatprep.subr.mxu0 %v18996_v43 }
 0xe45   : > { %14191 = vmatmul.mubr.f32.vlgmr.msra.gmra.mxu0 %v11515_v28  ;;  %v8650_v28 = vstv %s8649_s7 }
 0xe46   : > { %14200 = vmatprep.mubr.msk.f32.mxu0 %vm14429_vm3, %v18996_v43 }
 0xef5   : > { %v11597_v22 = vpop.f32.mrf.mxu1 }
 0xef7   : > { %v14177_v8 = vpop.f32.mrf.mxu1 }
 0xef9   : > { %v11745_v51 = vpop.f32.mrf.mxu1 }
 0xefb   : > { %v14187_v53 = vpop.f32.mrf.mxu1 }
 0xefd   : > { %v11521_v47 = vpop.f32.mrf.mxu0  ;;  %v11891_v50 = vpop.f32.mrf.mxu1 }
 0xefe   : > { %v11598_v57 = vadd.f32 %v11597_v22, %v11521_v47 }
 0xeff   : > { %v14172_v56 = vpop.f32.mrf.mxu0  ;;  %v14197_v62 = vpop.f32.mrf.mxu1 }
 0xf01   : > { %v11671_v26 = vpop.f32.mrf.mxu0 }
 0xf02   : > { %v11672_v15 = vadd.f32 %v11671_v26, %v11598_v57 }
 0xf03   : > { %v14182_v13 = vpop.f32.mrf.mxu0 }
 0xf04   : > { %v11746_v25 = vadd.f32 %v11745_v51, %v11672_v15 }
 0xf05   : > { %v11819_v24 = vpop.f32.mrf.mxu0 }
 0xf06   : > { %v11820_v29 = vadd.f32 %v11819_v24, %v11746_v25 }
 0xf07   : > { %v14192_v52 = vpop.f32.mrf.mxu0 }
 0xf08   : > { %v11892_v27 = vadd.f32 %v11891_v50, %v11820_v29 }
 0xf0a   : > { %v11901_v54 = vsel %vm11899_vm8, %v11892_v27, 0 }
 0xf0b   : > { %v11934_v9 = vand.u32 4294901760, %v11901_v54 }
 0xf0d   : > { %v12011_v17 = vsub.f32 %v11901_v54, %v11934_v9  ;;  %14199 = vmatpush3.msra.mxu0 %v11934_v9 }
 0xf0e   : > { %14201 = vmatmul.mubr.f32.vlgmr.msra.gmra.mxu0 %v11973_v10  ;;  %14208 = vmatprep.subr.mxu0 %v18996_v43 }
 0xf0f   : > { %14209 = vmatpush3.msra.mxu0 %v12011_v17  ;;  %14210 = vmatprep.mubr.msk.f32.mxu0 %vm14429_vm3, %v18996_v43  ;;  %v12012_v31 = vand.u32 4294901760, %v12011_v17 }
 0xf10   : > { %14218 = vmatprep.subr.mxu0 %v18996_v43 }
 0xf11   : > { %v12013_v61 = vsub.f32 %v12011_v17, %v12012_v31 }
 0xf12   : > { %14211 = vmatmul.mubr.f32.vlgmr.msra.gmra.mxu0 %v11970_v35 }
 0xf13   : > { %14219 = vmatpush3.msra.mxu0 %v12012_v31  ;;  %v12014_v44 = vand.u32 4294901760, %v12013_v61  ;;  %14220 = vmatprep.mubr.msk.f32.mxu0 %vm14429_vm3, %v18996_v43 }
 0xf15   : > { %14204 = vmatpush3.msra.mxu1 %v12014_v44 }
 0xf16   : > { %14206 = vmatmul.mubr.f32.vlgmr.msra.gmra.mxu1 %v11969_v34  ;;  %14213 = vmatprep.subr.mxu1 %v18996_v43 }
 0xf17   : > { %14214 = vmatpush3.msra.mxu1 %v11934_v9  ;;  %14215 = vmatprep.mubr.msk.f32.mxu1 %vm14429_vm3, %v18996_v43 }
 0xf18   : > { %14223 = vmatprep.subr.mxu1 %v18996_v43  ;;  %14221 = vmatmul.mubr.f32.vlgmr.msra.gmra.mxu0 %v11969_v34 }
 0xf1a   : > { %14216 = vmatmul.mubr.f32.vlgmr.msra.gmra.mxu1 %v11971_v21 }
 0xf1b   : > { %14224 = vmatpush3.msra.mxu1 %v11934_v9  ;;  %14225 = vmatprep.mubr.msk.f32.mxu1 %vm14429_vm3, %v18996_v43 }
 0xf1e   : > { %14226 = vmatmul.mubr.f32.vlgmr.msra.gmra.mxu1 %v11969_v34 }
 0xfce   : > { %v11975_v4 = vpop.f32.mrf.mxu0 }
 0xfd0   : > { %v14202_v11 = vpop.f32.mrf.mxu0 }
 0xfd2   : > { %v12125_v32 = vpop.f32.mrf.mxu0 }
 0xfd4   : > { %v14212_v36 = vpop.f32.mrf.mxu0 }
 0xfd6   : > { %v12051_v60 = vpop.f32.mrf.mxu1 }
 0xfd7   : > { %v12052_v7 = vadd.f32 %v12051_v60, %v11975_v4 }
 0xfd8   : > { %v14207_v6 = vpop.f32.mrf.mxu1  ;;  %v12273_v0 = vpop.f32.mrf.mxu0 }
 0xfd9   : > { %v12126_v1 = vadd.f32 %v12125_v32, %v12052_v7 }
 0xfda   : > { %v12199_v2 = vpop.f32.mrf.mxu1  ;;  %v14222_v12 = vpop.f32.mrf.mxu0 }
 0xfdb   : > { %v12200_v33 = vadd.f32 %v12199_v2, %v12126_v1 }
 0xfdc   : > { %v14217_v38 = vpop.f32.mrf.mxu1 }
 0xfdd   : > { %v12274_v48 = vadd.f32 %v12273_v0, %v12200_v33 }
 0xfde   : > { %v12345_v39 = vpop.f32.mrf.mxu1 }
 0xfdf   : > { %v12346_v20 = vadd.f32 %v12345_v39, %v12274_v48 }
 0xfe0   : > { %v14227_v59 = vpop.f32.mrf.mxu1 }
 0xfe1   : > { %v12349_v43 = vsub.f32 %v17843_v45, %v12346_v20  ;;  %v6630_v45 = vstv %s6629_s21 }
 0xfe2   : > { %v6631_v14 = vadd.f32 %v6630_v45, %v4172_v46 }
 0xfe3   : > { %v12350_v49 = vand.u32 2147483647, %v12349_v43 }
 0xfe4   : > { %v8651_v58 = vadd.f32 %v8650_v28, %v6631_v14 }
 0xfe5   : > { %v12352_v40 = vsel %vm12351_vm9, %v12350_v49, 0.0 }
 0xfe6   : > { %12353 = vadd.xlane.f32.xlu0 %v12352_v40  ;;  %v10527_v41 = vadd.f32 %v10526_v55, %v8651_v58 }
0x106f   : > { %v12354_v5 = vpop.xlane.xlu0 %12353 }
0x1070   : > { %v12355_v30 = vrot.slane %v12354_v5, 4 }
0x1072   : > { %v12356_v23 = vadd.f32 %v12355_v30, %v12354_v5 }
0x1074   : > { %v12357_v18 = vrot.slane %v12356_v23, 2 }
0x1076   : > { %v12358_v3 = vadd.f32 %v12357_v18, %v12356_v23 }
0x1078   : > { %v12359_v42 = vrot.slane %v12358_v3, 1 }
0x107a   : > { %v12360_v37 = vadd.f32 %v12359_v42, %v12358_v3 }
0x107c   : > { %14236 = vpush %v12360_v37 }
0x10ad   : > { %s14237_s10 = spop %14236 }
0x10ae   : > { %s12362_s6 = smul.f32 0.0078125, %s14237_s10 }
0x10b0   : > { %v12363_v16 = vstv %s12362_s6 }
0x10b1   : > { %v12364_v22 = vadd.f32 %v12363_v16, %v10527_v41 }
0x10b3   : > { %12366 = vst.msk [vmem:[%s240_s9] sm:$0x1] %vm12365_vm10, %v12364_v22 }
0x10b4 PF: > { %p16_p6 = scmp.ge.s32.totalorder %s14494_s22, 4   ;;  %s19001_s12 = smov %s14413_s13 }
0x10b5   : > { %s19002_s13 = smov %s14417_s14  ;;  %s19003_s14 = smov %s14514_s30 }
0x10b6   : > { %s19004_s15 = smov %s14494_s22  ;;  %18 = sbr.rel (!%p16_p6) target bundleno = 5 (0x5), region = 89 }
0x10bb   :  { %12384 = vsyncpa [#allocation3], 1 }
0x10bc   :  { %12386 = vsyncpa [#allocation3 + $0x1], 1 }
0x10bd   :  { %12387 = vsyncpa [#allocation5], 1 }
0x10be   :  { %12389 = vsyncpa [#allocation5 + $0x1], 1 }

</bundles_post_ra>
